<compile_context>
chip_gen: v6e
topology: v6e:2x2x1
jax: 0.10.0
libtpu: 0.0.40
codegen_flags: <defaults>
</compile_context>

<pallas_src>
import functools

import jax
import jax.numpy as jnp
from jax.experimental import pallas as pl
from jax.experimental.pallas import tpu as pltpu


# ----------------------------------------------------------------------------
# Fused kernel: ConvT(2x2,s2)+BN+PReLU -> 3x3 conv+BN+PReLU (polyphase)
#               -> 1x1 conv+BN+PReLU -> (+ MaxUnpool(1x1-conv branch))
# One grid step = one batch element.  All intermediates stay in VMEM.
# Output columns are ordered (di, dj, c) per low-res position (i, j).
# ----------------------------------------------------------------------------
def _fused_upsample_bottleneck_kernel(
        alphas_ref,   # SMEM (3,)          PReLU alphas
        x_ref,        # (1, H*W, Cin)      input, channels-last rows
        idx_ref,      # (1, H*W, Cout)     pool indices (int32, flat in 2H*2W)
        wt_ref,       # (Cin, 4*Cm)        ConvT weight, BN1 folded, cols=(di,dj,c)
        bt_ref,       # (1, 4*Cm)
        wc_ref,       # (16, 4*Cm, Cm)     combined polyphase 3x3 weights, BN2 folded
        b3_ref,       # (1, Cm)
        w1_ref,       # (Cm, Cout)         1x1 conv, BN3 folded
        b1_ref,       # (1, Cout)
        wu_ref,       # (Cin, Cout)        unpool-branch 1x1 conv
        bu_ref,       # (1, Cout)
        o_ref,        # (1, H*W, 4*Cout)   cols = (di, dj, c)
        *, H, W, Cm, Cout):
    HW = H * W
    W2 = 2 * W
    C4 = 4 * Cm

    a1 = alphas_ref[0]
    a2 = alphas_ref[1]
    a3 = alphas_ref[2]

    x2d = x_ref[0]                      # (HW, Cin)
    idx = idx_ref[0]                    # (HW, Cout) int32

    # --- ConvTranspose2d(2x2, s2) + BN1 + PReLU: one matmul into 4 phase groups
    y4 = jnp.dot(x2d, wt_ref[...], preferred_element_type=jnp.float32) + bt_ref[...]
    y4 = jnp.where(y4 >= 0.0, y4, a1 * y4)                     # (HW, 4*Cm)

    # --- zero-pad the low-res plane by 1 (the 4 phases share the lane axis)
    y4_3d = y4.reshape(H, W, C4)
    zc = jnp.zeros((H, 1, C4), jnp.float32)
    zr = jnp.zeros((1, W + 2, C4), jnp.float32)
    tp = jnp.concatenate(
        [zr, jnp.concatenate([zc, y4_3d, zc], axis=1), zr], axis=0)  # (H+2, W+2, 4*Cm)

    # --- unpool branch: 1x1 conv (no BN / activation)
    yu = jnp.dot(x2d, wu_ref[...], preferred_element_type=jnp.float32) + bu_ref[...]

    # flat index of the (2i, 2j) corner of each 2x2 output window, per channel
    ii = jax.lax.broadcasted_iota(jnp.int32, (H, W, Cout), 0)
    jj = jax.lax.broadcasted_iota(jnp.int32, (H, W, Cout), 1)
    base = (2 * W2 * ii + 2 * jj).reshape(HW, Cout)

    parts = []
    for di in range(2):
        for dj in range(2):
            # 3x3 conv (+BN2) in the polyphase domain: 4 matmuls with K = 4*Cm
            acc = b3_ref[...]
            for ryi in range(2):
                for rxi in range(2):
                    wy = di + ryi
                    wx = dj + rxi
                    winv = tp[wy:wy + H, wx:wx + W, :].reshape(HW, C4)
                    k = ((di * 2 + dj) * 2 + ryi) * 2 + rxi
                    acc = acc + jnp.dot(winv, wc_ref[k],
                                        preferred_element_type=jnp.float32)
            z = jnp.where(acc >= 0.0, acc, a2 * acc)
            # 1x1 conv + BN3 + PReLU  (Dropout: eval-mode identity)
            c = jnp.dot(z, w1_ref[...], preferred_element_type=jnp.float32) + b1_ref[...]
            c = jnp.where(c >= 0.0, c, a3 * c)
            # MaxUnpool2d contribution at sub-position (di, dj) + residual add
            tgt = base + (di * W2 + dj)
            parts.append(c + jnp.where(idx == tgt, yu, 0.0))

    o_ref[...] = jnp.concatenate(parts, axis=-1).reshape(1, HW, 4 * Cout)


# ----------------------------------------------------------------------------
# Wrapper: fold BN into weights, build polyphase 3x3 weights, call the kernel.
# ----------------------------------------------------------------------------
@jax.jit
def upsample_bottleneck(X_nchw, pool_indices, p):
    B, Cin, H, W = X_nchw.shape
    Cm = p["bt"].shape[0]
    Cout = p["bu"].shape[0]
    H2, W2 = 2 * H, 2 * W
    HW = H * W

    # inputs in row-flattened channels-last form
    x2 = jnp.transpose(X_nchw, (0, 2, 3, 1)).reshape(B, HW, Cin).astype(jnp.float32)
    idx2 = jnp.transpose(pool_indices, (0, 2, 3, 1)).reshape(B, HW, Cout).astype(jnp.int32)

    # ---- fold eval-mode BatchNorm into the conv weights / biases ------------
    s1, t1 = p["bn1_scale"], p["bn1_shift"]
    wt = (jnp.transpose(p["wt"], (0, 2, 3, 1)) * s1).reshape(Cin, 4 * Cm)  # (ci,(di,dj,c))
    bt = jnp.tile(p["bt"] * s1 + t1, 4)[None, :]

    s2, t2 = p["bn2_scale"], p["bn2_shift"]
    w3f = jnp.transpose(p["w3"], (2, 3, 1, 0)) * s2          # (kh, kw, ci, co)
    b3 = (p["b3"] * s2 + t2)[None, :]

    s3, t3 = p["bn3_scale"], p["bn3_shift"]
    w1 = jnp.transpose(p["w1"][:, :, 0, 0]) * s3             # (Cm, Cout)
    b1 = (p["b1"] * s3 + t3)[None, :]

    wu = jnp.transpose(p["wu"][:, :, 0, 0])                  # (Cin, Cout)
    bu = p["bu"][None, :]

    # ---- combined polyphase 3x3 weights -------------------------------------
    # Output phase (di,dj) of the 3x3 'same' conv on the 2x-upsampled image is
    # sum over low-res shifts (ry,rx) in {di-1,di} x {dj-1,dj} of
    #   <shifted low-res 4-phase plane> @ Wc[di,dj,ryi,rxi],
    # where Wc scatters the original 3x3 taps onto the source-phase row groups.
    wc = jnp.zeros((2, 2, 2, 2, 4 * Cm, Cm), jnp.float32)
    for di in range(2):
        for dj in range(2):
            for dy in range(3):
                for dx in range(3):
                    e = di + dy - 1
                    ry = e // 2
                    dip = e - 2 * ry
                    f = dj + dx - 1
                    rx = f // 2
                    djp = f - 2 * rx
                    ryi, rxi = ry - di + 1, rx - dj + 1
                    kp = dip * 2 + djp
                    wc = wc.at[di, dj, ryi, rxi,
                               kp * Cm:(kp + 1) * Cm, :].add(w3f[dy, dx])
    wc = wc.reshape(16, 4 * Cm, Cm)

    alphas = jnp.stack([p["alpha1"], p["alpha2"], p["alpha3"]]).astype(jnp.float32)

    kernel = functools.partial(_fused_upsample_bottleneck_kernel,
                               H=H, W=W, Cm=Cm, Cout=Cout)
    full = lambda shape: pl.BlockSpec(shape, lambda b, _s=shape: (0,) * len(_s))

    out = pl.pallas_call(
        kernel,
        out_shape=jax.ShapeDtypeStruct((B, HW, 4 * Cout), jnp.float32),
        grid=(B,),
        in_specs=[
            pl.BlockSpec(memory_space=pltpu.MemorySpace.SMEM),   # alphas (scalars)
            pl.BlockSpec((1, HW, Cin), lambda b: (b, 0, 0)),      # x
            pl.BlockSpec((1, HW, Cout), lambda b: (b, 0, 0)),     # pool indices
            full((Cin, 4 * Cm)),                                  # wt  (BN1 folded)
            full((1, 4 * Cm)),                                    # bt
            full((16, 4 * Cm, Cm)),                               # wc  (BN2 folded)
            full((1, Cm)),                                        # b3
            full((Cm, Cout)),                                     # w1  (BN3 folded)
            full((1, Cout)),                                      # b1
            full((Cin, Cout)),                                    # wu
            full((1, Cout)),                                      # bu
        ],
        out_specs=pl.BlockSpec((1, HW, 4 * Cout), lambda b: (b, 0, 0)),
        compiler_params=pltpu.CompilerParams(
            dimension_semantics=("parallel",),
            vmem_limit_bytes=32 * 1024 * 1024),
    )(alphas, x2, idx2, wt, bt, wc, b3, w1, b1, wu, bu)

    # (b, i*W+j, (di,dj,c)) -> NCHW (B, Cout, 2H, 2W).  Reshapes are free; the
    # single transpose is the unavoidable channels-last -> NCHW output pass.
    out = (out.reshape(B, H, W, 2, 2, Cout)
              .transpose(0, 5, 1, 3, 2, 4)
              .reshape(B, Cout, H2, W2))
    return out


# ----------------------------------------------------------------------------
# Deterministic parameter construction (synthetic; shapes match the nn.Module)
# ----------------------------------------------------------------------------
def make_params(key, cin, cmid, cout):
    ks = jax.random.split(key, 11)

    def wgt(k, shape, fan_in):
        return jax.random.normal(k, shape, jnp.float32) / jnp.sqrt(float(fan_in))

    def bn(k, c):
        k1, k2, k3, k4 = jax.random.split(k, 4)
        gamma = 1.0 + 0.1 * jax.random.normal(k1, (c,), jnp.float32)
        beta = 0.1 * jax.random.normal(k2, (c,), jnp.float32)
        mean = 0.1 * jax.random.normal(k3, (c,), jnp.float32)
        var = 1.0 + 0.1 * jax.random.uniform(k4, (c,), jnp.float32)
        scale = gamma / jnp.sqrt(var + 1e-5)
        shift = beta - mean * scale
        return scale, shift

    p = {}
    p["wt"] = wgt(ks[0], (cin, cmid, 2, 2), cin * 4)     # ConvTranspose2d weight
    p["bt"] = 0.05 * jax.random.normal(ks[1], (cmid,), jnp.float32)
    p["bn1_scale"], p["bn1_shift"] = bn(ks[2], cmid)
    p["alpha1"] = 0.25
    p["w3"] = wgt(ks[3], (cmid, cmid, 3, 3), cmid * 9)   # Conv2d 3x3 weight
    p["b3"] = 0.05 * jax.random.normal(ks[4], (cmid,), jnp.float32)
    p["bn2_scale"], p["bn2_shift"] = bn(ks[5], cmid)
    p["alpha2"] = 0.25
    p["w1"] = wgt(ks[6], (cout, cmid, 1, 1), cmid)       # Conv2d 1x1 weight
    p["b1"] = 0.05 * jax.random.normal(ks[7], (cout,), jnp.float32)
    p["bn3_scale"], p["bn3_shift"] = bn(ks[8], cout)
    p["alpha3"] = 0.25
    p["wu"] = wgt(ks[9], (cout, cin, 1, 1), cin)         # unpool_conv 1x1 weight
    p["bu"] = 0.05 * jax.random.normal(ks[10], (cout,), jnp.float32)
    return p


# ----------------------------------------------------------------------------
# Pure-JAX reference for validation
# ----------------------------------------------------------------------------
def reference(X, pool_indices, p):
    B, Cin, H, W = X.shape
    Cmid = p["bt"].shape[0]
    Cout = p["bu"].shape[0]
    H2, W2 = 2 * H, 2 * W
    x = jnp.transpose(X, (0, 2, 3, 1)).astype(jnp.float32)

    bn = lambda y, s, t: y * s + t
    prelu = lambda y, a: jnp.where(y >= 0, y, a * y)

    # ConvTranspose2d(2x2, s2)
    y = jnp.einsum('nhwi,iopq->nhpwqo', x, p["wt"]).reshape(B, H2, W2, Cmid)
    y = prelu(bn(y + p["bt"], p["bn1_scale"], p["bn1_shift"]), p["alpha1"])
    # Conv2d 3x3 'same'
    xp = jnp.pad(y, ((0, 0), (1, 1), (1, 1), (0, 0)))
    w3 = jnp.transpose(p["w3"], (2, 3, 1, 0))
    acc = jnp.zeros((B, H2, W2, Cmid), jnp.float32)
    for dy in range(3):
        for dx in range(3):
            acc = acc + jnp.einsum('nhwc,co->nhwo',
                                   xp[:, dy:dy + H2, dx:dx + W2, :], w3[dy, dx])
    y = prelu(bn(acc + p["b3"], p["bn2_scale"], p["bn2_shift"]), p["alpha2"])
    # Conv2d 1x1
    y = jnp.einsum('nhwc,co->nhwo', y, jnp.transpose(p["w1"][:, :, 0, 0])) + p["b1"]
    y_conv = prelu(bn(y, p["bn3_scale"], p["bn3_shift"]), p["alpha3"])
    y_conv = jnp.transpose(y_conv, (0, 3, 1, 2))
    # unpool branch (true scatter)
    yu = jnp.einsum('nhwi,io->nhwo', x, jnp.transpose(p["wu"][:, :, 0, 0])) + p["bu"]
    yu = jnp.transpose(yu, (0, 3, 1, 2))
    flat = jnp.zeros((B, Cout, H2 * W2), jnp.float32)
    bI = jnp.arange(B)[:, None, None, None]
    cI = jnp.arange(Cout)[None, :, None, None]
    flat = flat.at[bI, cI, pool_indices].set(yu)
    y_up = flat.reshape(B, Cout, H2, W2)
    return y_conv + y_up


if __name__ == "__main__":
    key = jax.random.PRNGKey(0)
    kparam, kx, kd1, kd2 = jax.random.split(key, 4)

    B, Cin, H, W = 2, 4, 16, 16          # X: (batch, in_channels, H, W)
    Cmid, Cout = 8, 8                    # conv_1x1_channels, out_channels

    params = make_params(kparam, Cin, Cmid, Cout)
    X = jax.random.normal(kx, (B, Cin, H, W), jnp.float32)

    # pool indices consistent with MaxPool2d(2,2,return_indices=True)
    di = jax.random.randint(kd1, (B, Cout, H, W), 0, 2)
    dj = jax.random.randint(kd2, (B, Cout, H, W), 0, 2)
    ii = jnp.arange(H)[None, None, :, None]
    jj = jnp.arange(W)[None, None, None, :]
    pool_indices = ((2 * ii + di) * (2 * W) + (2 * jj + dj)).astype(jnp.int32)

    out = upsample_bottleneck(X, pool_indices, params)
    out = jax.block_until_ready(out)
    assert out.shape == (B, Cout, 2 * H, 2 * W)

    ref = reference(X, pool_indices, params)
    err = float(jnp.max(jnp.abs(out - ref)))
    assert jnp.allclose(out, ref, rtol=5e-4, atol=5e-4), err

    print("KERNEL_OK")
</pallas_src>

<mosaic_0001>
module attributes {stable_mosaic.version = 11 : i64} {
  func.func @_fused_upsample_bottleneck_kernel(%arg0: i32, %arg1: memref<3xf32, #tpu.memory_space<smem>>, %arg2: memref<1x256x4xf32, #tpu.memory_space<vmem>>, %arg3: memref<1x256x8xi32, #tpu.memory_space<vmem>>, %arg4: memref<4x32xf32, #tpu.memory_space<vmem>>, %arg5: memref<1x32xf32, #tpu.memory_space<vmem>>, %arg6: memref<16x32x8xf32, #tpu.memory_space<vmem>>, %arg7: memref<1x8xf32, #tpu.memory_space<vmem>>, %arg8: memref<8x8xf32, #tpu.memory_space<vmem>>, %arg9: memref<1x8xf32, #tpu.memory_space<vmem>>, %arg10: memref<4x8xf32, #tpu.memory_space<vmem>>, %arg11: memref<1x8xf32, #tpu.memory_space<vmem>>, %arg12: memref<1x256x32xf32, #tpu.memory_space<vmem>>) attributes {dimension_semantics = [#tpu.dimension_semantics<parallel>], iteration_bounds = array<i64: 2>, scalar_prefetch = 0 : i64, scratch_operands = 0 : i64, tpu.core_type = #tpu.core_type<tc>, window_params = [{transform_indices = @transform_0, window_bounds = array<i64: 3>}, {transform_indices = @transform_1, window_bounds = array<i64: 1, 256, 4>}, {transform_indices = @transform_2, window_bounds = array<i64: 1, 256, 8>}, {pipeline_mode = #tpu.pipeline_mode<synchronous>, transform_indices = @transform_3, window_bounds = array<i64: 4, 32>}, {pipeline_mode = #tpu.pipeline_mode<synchronous>, transform_indices = @transform_4, window_bounds = array<i64: 1, 32>}, {pipeline_mode = #tpu.pipeline_mode<synchronous>, transform_indices = @transform_5, window_bounds = array<i64: 16, 32, 8>}, {pipeline_mode = #tpu.pipeline_mode<synchronous>, transform_indices = @transform_6, window_bounds = array<i64: 1, 8>}, {pipeline_mode = #tpu.pipeline_mode<synchronous>, transform_indices = @transform_7, window_bounds = array<i64: 8, 8>}, {pipeline_mode = #tpu.pipeline_mode<synchronous>, transform_indices = @transform_8, window_bounds = array<i64: 1, 8>}, {pipeline_mode = #tpu.pipeline_mode<synchronous>, transform_indices = @transform_9, window_bounds = array<i64: 4, 8>}, {pipeline_mode = #tpu.pipeline_mode<synchronous>, transform_indices = @transform_10, window_bounds = array<i64: 1, 8>}, {transform_indices = @transform_11, window_bounds = array<i64: 1, 256, 32>}]} {
    %c0 = arith.constant 0 : index
    %0 = memref.load %arg1[%c0] : memref<3xf32, #tpu.memory_space<smem>>
    %c1 = arith.constant 1 : index
    %1 = memref.load %arg1[%c1] : memref<3xf32, #tpu.memory_space<smem>>
    %c2 = arith.constant 2 : index
    %2 = memref.load %arg1[%c2] : memref<3xf32, #tpu.memory_space<smem>>
    %c0_0 = arith.constant 0 : index
    %c0_1 = arith.constant 0 : index
    %c0_2 = arith.constant 0 : index
    %3 = vector.load %arg2[%c0_0, %c0_1, %c0_2] : memref<1x256x4xf32, #tpu.memory_space<vmem>>, vector<1x256x4xf32>
    %4 = vector.shape_cast %3 : vector<1x256x4xf32> to vector<256x4xf32>
    %c0_3 = arith.constant 0 : index
    %c0_4 = arith.constant 0 : index
    %c0_5 = arith.constant 0 : index
    %5 = vector.load %arg3[%c0_3, %c0_4, %c0_5] : memref<1x256x8xi32, #tpu.memory_space<vmem>>, vector<1x256x8xi32>
    %6 = vector.shape_cast %5 : vector<1x256x8xi32> to vector<256x8xi32>
    %c0_6 = arith.constant 0 : index
    %c0_7 = arith.constant 0 : index
    %7 = vector.load %arg4[%c0_6, %c0_7] : memref<4x32xf32, #tpu.memory_space<vmem>>, vector<4x32xf32>
    %cst = arith.constant dense<0.000000e+00> : vector<256x32xf32>
    %8 = tpu.matmul %4, %7, %cst {dimension_numbers = #tpu.dot_dimension_numbers<[1], [0], [0], [1], [0, 0, 1, 1], [], []>} : vector<256x4xf32>, vector<4x32xf32>, vector<256x32xf32> -> vector<256x32xf32>
    %c0_8 = arith.constant 0 : index
    %c0_9 = arith.constant 0 : index
    %9 = vector.load %arg5[%c0_8, %c0_9] : memref<1x32xf32, #tpu.memory_space<vmem>>, vector<1x32xf32>
    %10 = vector.broadcast %9 : vector<1x32xf32> to vector<256x32xf32>
    %11 = arith.addf %8, %10 : vector<256x32xf32>
    %cst_10 = arith.constant 0.000000e+00 : f32
    %12 = vector.broadcast %cst_10 : f32 to vector<256x32xf32>
    %13 = arith.cmpf oge, %11, %12 : vector<256x32xf32>
    %14 = vector.broadcast %0 : f32 to vector<256x32xf32>
    %15 = arith.mulf %14, %11 : vector<256x32xf32>
    %16 = arith.select %13, %11, %15 : vector<256x32xi1>, vector<256x32xf32>
    %17 = vector.shape_cast %16 : vector<256x32xf32> to vector<16x16x32xf32>
    %cst_11 = arith.constant 0.000000e+00 : f32
    %18 = vector.broadcast %cst_11 : f32 to vector<16x1x32xf32>
    %cst_12 = arith.constant 0.000000e+00 : f32
    %19 = vector.broadcast %cst_12 : f32 to vector<1x18x32xf32>
    %20 = tpu.concatenate %18, %17, %18 in 1 : vector<16x1x32xf32>, vector<16x16x32xf32>, vector<16x1x32xf32> -> vector<16x18x32xf32>
    %21 = tpu.concatenate %19, %20, %19 in 0 : vector<1x18x32xf32>, vector<16x18x32xf32>, vector<1x18x32xf32> -> vector<18x18x32xf32>
    %c0_13 = arith.constant 0 : index
    %c0_14 = arith.constant 0 : index
    %22 = vector.load %arg10[%c0_13, %c0_14] : memref<4x8xf32, #tpu.memory_space<vmem>>, vector<4x8xf32>
    %cst_15 = arith.constant dense<0.000000e+00> : vector<256x8xf32>
    %23 = tpu.matmul %4, %22, %cst_15 {dimension_numbers = #tpu.dot_dimension_numbers<[1], [0], [0], [1], [0, 0, 1, 1], [], []>} : vector<256x4xf32>, vector<4x8xf32>, vector<256x8xf32> -> vector<256x8xf32>
    %c0_16 = arith.constant 0 : index
    %c0_17 = arith.constant 0 : index
    %24 = vector.load %arg11[%c0_16, %c0_17] : memref<1x8xf32, #tpu.memory_space<vmem>>, vector<1x8xf32>
    %25 = vector.broadcast %24 : vector<1x8xf32> to vector<256x8xf32>
    %26 = arith.addf %23, %25 : vector<256x8xf32>
    %27 = tpu.iota {dimensions = array<i32: 0>} : vector<16x16x8xi32>
    %28 = tpu.iota {dimensions = array<i32: 1>} : vector<16x16x8xi32>
    %c64_i32 = arith.constant 64 : i32
    %29 = vector.broadcast %c64_i32 : i32 to vector<16x16x8xi32>
    %30 = arith.muli %29, %27 : vector<16x16x8xi32>
    %c2_i32 = arith.constant 2 : i32
    %31 = vector.broadcast %c2_i32 : i32 to vector<16x16x8xi32>
    %32 = arith.muli %31, %28 : vector<16x16x8xi32>
    %33 = arith.addi %30, %32 : vector<16x16x8xi32>
    %34 = vector.shape_cast %33 : vector<16x16x8xi32> to vector<256x8xi32>
    %c0_18 = arith.constant 0 : index
    %c0_19 = arith.constant 0 : index
    %35 = vector.load %arg7[%c0_18, %c0_19] : memref<1x8xf32, #tpu.memory_space<vmem>>, vector<1x8xf32>
    %36 = vector.extract_strided_slice %21 {offsets = [0, 0, 0], sizes = [16, 16, 32], strides = [1, 1, 1]} : vector<18x18x32xf32> to vector<16x16x32xf32>
    %37 = vector.shape_cast %36 : vector<16x16x32xf32> to vector<256x32xf32>
    %c0_20 = arith.constant 0 : index
    %c0_21 = arith.constant 0 : index
    %c0_22 = arith.constant 0 : index
    %38 = vector.load %arg6[%c0_20, %c0_21, %c0_22] : memref<16x32x8xf32, #tpu.memory_space<vmem>>, vector<1x32x8xf32>
    %39 = vector.shape_cast %38 : vector<1x32x8xf32> to vector<32x8xf32>
    %cst_23 = arith.constant dense<0.000000e+00> : vector<256x8xf32>
    %40 = tpu.matmul %37, %39, %cst_23 {dimension_numbers = #tpu.dot_dimension_numbers<[1], [0], [0], [1], [0, 0, 1, 1], [], []>} : vector<256x32xf32>, vector<32x8xf32>, vector<256x8xf32> -> vector<256x8xf32>
    %41 = vector.broadcast %35 : vector<1x8xf32> to vector<256x8xf32>
    %42 = arith.addf %41, %40 : vector<256x8xf32>
    %43 = vector.extract_strided_slice %21 {offsets = [0, 1, 0], sizes = [16, 16, 32], strides = [1, 1, 1]} : vector<18x18x32xf32> to vector<16x16x32xf32>
    %44 = vector.shape_cast %43 : vector<16x16x32xf32> to vector<256x32xf32>
    %c1_24 = arith.constant 1 : index
    %c0_25 = arith.constant 0 : index
    %c0_26 = arith.constant 0 : index
    %45 = vector.load %arg6[%c1_24, %c0_25, %c0_26] : memref<16x32x8xf32, #tpu.memory_space<vmem>>, vector<1x32x8xf32>
    %46 = vector.shape_cast %45 : vector<1x32x8xf32> to vector<32x8xf32>
    %cst_27 = arith.constant dense<0.000000e+00> : vector<256x8xf32>
    %47 = tpu.matmul %44, %46, %cst_27 {dimension_numbers = #tpu.dot_dimension_numbers<[1], [0], [0], [1], [0, 0, 1, 1], [], []>} : vector<256x32xf32>, vector<32x8xf32>, vector<256x8xf32> -> vector<256x8xf32>
    %48 = arith.addf %42, %47 : vector<256x8xf32>
    %49 = vector.extract_strided_slice %21 {offsets = [1, 0, 0], sizes = [16, 16, 32], strides = [1, 1, 1]} : vector<18x18x32xf32> to vector<16x16x32xf32>
    %50 = vector.shape_cast %49 : vector<16x16x32xf32> to vector<256x32xf32>
    %c2_28 = arith.constant 2 : index
    %c0_29 = arith.constant 0 : index
    %c0_30 = arith.constant 0 : index
    %51 = vector.load %arg6[%c2_28, %c0_29, %c0_30] : memref<16x32x8xf32, #tpu.memory_space<vmem>>, vector<1x32x8xf32>
    %52 = vector.shape_cast %51 : vector<1x32x8xf32> to vector<32x8xf32>
    %cst_31 = arith.constant dense<0.000000e+00> : vector<256x8xf32>
    %53 = tpu.matmul %50, %52, %cst_31 {dimension_numbers = #tpu.dot_dimension_numbers<[1], [0], [0], [1], [0, 0, 1, 1], [], []>} : vector<256x32xf32>, vector<32x8xf32>, vector<256x8xf32> -> vector<256x8xf32>
    %54 = arith.addf %48, %53 : vector<256x8xf32>
    %55 = vector.extract_strided_slice %21 {offsets = [1, 1, 0], sizes = [16, 16, 32], strides = [1, 1, 1]} : vector<18x18x32xf32> to vector<16x16x32xf32>
    %56 = vector.shape_cast %55 : vector<16x16x32xf32> to vector<256x32xf32>
    %c3 = arith.constant 3 : index
    %c0_32 = arith.constant 0 : index
    %c0_33 = arith.constant 0 : index
    %57 = vector.load %arg6[%c3, %c0_32, %c0_33] : memref<16x32x8xf32, #tpu.memory_space<vmem>>, vector<1x32x8xf32>
    %58 = vector.shape_cast %57 : vector<1x32x8xf32> to vector<32x8xf32>
    %cst_34 = arith.constant dense<0.000000e+00> : vector<256x8xf32>
    %59 = tpu.matmul %56, %58, %cst_34 {dimension_numbers = #tpu.dot_dimension_numbers<[1], [0], [0], [1], [0, 0, 1, 1], [], []>} : vector<256x32xf32>, vector<32x8xf32>, vector<256x8xf32> -> vector<256x8xf32>
    %60 = arith.addf %54, %59 : vector<256x8xf32>
    %cst_35 = arith.constant 0.000000e+00 : f32
    %61 = vector.broadcast %cst_35 : f32 to vector<256x8xf32>
    %62 = arith.cmpf oge, %60, %61 : vector<256x8xf32>
    %63 = vector.broadcast %1 : f32 to vector<256x8xf32>
    %64 = arith.mulf %63, %60 : vector<256x8xf32>
    %65 = arith.select %62, %60, %64 : vector<256x8xi1>, vector<256x8xf32>
    %c0_36 = arith.constant 0 : index
    %c0_37 = arith.constant 0 : index
    %66 = vector.load %arg8[%c0_36, %c0_37] : memref<8x8xf32, #tpu.memory_space<vmem>>, vector<8x8xf32>
    %cst_38 = arith.constant dense<0.000000e+00> : vector<256x8xf32>
    %67 = tpu.matmul %65, %66, %cst_38 {dimension_numbers = #tpu.dot_dimension_numbers<[1], [0], [0], [1], [0, 0, 1, 1], [], []>} : vector<256x8xf32>, vector<8x8xf32>, vector<256x8xf32> -> vector<256x8xf32>
    %c0_39 = arith.constant 0 : index
    %c0_40 = arith.constant 0 : index
    %68 = vector.load %arg9[%c0_39, %c0_40] : memref<1x8xf32, #tpu.memory_space<vmem>>, vector<1x8xf32>
    %69 = vector.broadcast %68 : vector<1x8xf32> to vector<256x8xf32>
    %70 = arith.addf %67, %69 : vector<256x8xf32>
    %cst_41 = arith.constant 0.000000e+00 : f32
    %71 = vector.broadcast %cst_41 : f32 to vector<256x8xf32>
    %72 = arith.cmpf oge, %70, %71 : vector<256x8xf32>
    %73 = vector.broadcast %2 : f32 to vector<256x8xf32>
    %74 = arith.mulf %73, %70 : vector<256x8xf32>
    %75 = arith.select %72, %70, %74 : vector<256x8xi1>, vector<256x8xf32>
    %c0_i32 = arith.constant 0 : i32
    %76 = vector.broadcast %c0_i32 : i32 to vector<256x8xi32>
    %77 = arith.addi %34, %76 : vector<256x8xi32>
    %78 = arith.cmpi eq, %6, %77 : vector<256x8xi32>
    %cst_42 = arith.constant 0.000000e+00 : f32
    %79 = vector.broadcast %cst_42 : f32 to vector<256x8xf32>
    %80 = arith.select %78, %26, %79 : vector<256x8xi1>, vector<256x8xf32>
    %81 = arith.addf %75, %80 : vector<256x8xf32>
    %c0_43 = arith.constant 0 : index
    %c0_44 = arith.constant 0 : index
    %82 = vector.load %arg7[%c0_43, %c0_44] : memref<1x8xf32, #tpu.memory_space<vmem>>, vector<1x8xf32>
    %83 = vector.extract_strided_slice %21 {offsets = [0, 1, 0], sizes = [16, 16, 32], strides = [1, 1, 1]} : vector<18x18x32xf32> to vector<16x16x32xf32>
    %84 = vector.shape_cast %83 : vector<16x16x32xf32> to vector<256x32xf32>
    %c4 = arith.constant 4 : index
    %c0_45 = arith.constant 0 : index
    %c0_46 = arith.constant 0 : index
    %85 = vector.load %arg6[%c4, %c0_45, %c0_46] : memref<16x32x8xf32, #tpu.memory_space<vmem>>, vector<1x32x8xf32>
    %86 = vector.shape_cast %85 : vector<1x32x8xf32> to vector<32x8xf32>
    %cst_47 = arith.constant dense<0.000000e+00> : vector<256x8xf32>
    %87 = tpu.matmul %84, %86, %cst_47 {dimension_numbers = #tpu.dot_dimension_numbers<[1], [0], [0], [1], [0, 0, 1, 1], [], []>} : vector<256x32xf32>, vector<32x8xf32>, vector<256x8xf32> -> vector<256x8xf32>
    %88 = vector.broadcast %82 : vector<1x8xf32> to vector<256x8xf32>
    %89 = arith.addf %88, %87 : vector<256x8xf32>
    %90 = vector.extract_strided_slice %21 {offsets = [0, 2, 0], sizes = [16, 16, 32], strides = [1, 1, 1]} : vector<18x18x32xf32> to vector<16x16x32xf32>
    %91 = vector.shape_cast %90 : vector<16x16x32xf32> to vector<256x32xf32>
    %c5 = arith.constant 5 : index
    %c0_48 = arith.constant 0 : index
    %c0_49 = arith.constant 0 : index
    %92 = vector.load %arg6[%c5, %c0_48, %c0_49] : memref<16x32x8xf32, #tpu.memory_space<vmem>>, vector<1x32x8xf32>
    %93 = vector.shape_cast %92 : vector<1x32x8xf32> to vector<32x8xf32>
    %cst_50 = arith.constant dense<0.000000e+00> : vector<256x8xf32>
    %94 = tpu.matmul %91, %93, %cst_50 {dimension_numbers = #tpu.dot_dimension_numbers<[1], [0], [0], [1], [0, 0, 1, 1], [], []>} : vector<256x32xf32>, vector<32x8xf32>, vector<256x8xf32> -> vector<256x8xf32>
    %95 = arith.addf %89, %94 : vector<256x8xf32>
    %96 = vector.extract_strided_slice %21 {offsets = [1, 1, 0], sizes = [16, 16, 32], strides = [1, 1, 1]} : vector<18x18x32xf32> to vector<16x16x32xf32>
    %97 = vector.shape_cast %96 : vector<16x16x32xf32> to vector<256x32xf32>
    %c6 = arith.constant 6 : index
    %c0_51 = arith.constant 0 : index
    %c0_52 = arith.constant 0 : index
    %98 = vector.load %arg6[%c6, %c0_51, %c0_52] : memref<16x32x8xf32, #tpu.memory_space<vmem>>, vector<1x32x8xf32>
    %99 = vector.shape_cast %98 : vector<1x32x8xf32> to vector<32x8xf32>
    %cst_53 = arith.constant dense<0.000000e+00> : vector<256x8xf32>
    %100 = tpu.matmul %97, %99, %cst_53 {dimension_numbers = #tpu.dot_dimension_numbers<[1], [0], [0], [1], [0, 0, 1, 1], [], []>} : vector<256x32xf32>, vector<32x8xf32>, vector<256x8xf32> -> vector<256x8xf32>
    %101 = arith.addf %95, %100 : vector<256x8xf32>
    %102 = vector.extract_strided_slice %21 {offsets = [1, 2, 0], sizes = [16, 16, 32], strides = [1, 1, 1]} : vector<18x18x32xf32> to vector<16x16x32xf32>
    %103 = vector.shape_cast %102 : vector<16x16x32xf32> to vector<256x32xf32>
    %c7 = arith.constant 7 : index
    %c0_54 = arith.constant 0 : index
    %c0_55 = arith.constant 0 : index
    %104 = vector.load %arg6[%c7, %c0_54, %c0_55] : memref<16x32x8xf32, #tpu.memory_space<vmem>>, vector<1x32x8xf32>
    %105 = vector.shape_cast %104 : vector<1x32x8xf32> to vector<32x8xf32>
    %cst_56 = arith.constant dense<0.000000e+00> : vector<256x8xf32>
    %106 = tpu.matmul %103, %105, %cst_56 {dimension_numbers = #tpu.dot_dimension_numbers<[1], [0], [0], [1], [0, 0, 1, 1], [], []>} : vector<256x32xf32>, vector<32x8xf32>, vector<256x8xf32> -> vector<256x8xf32>
    %107 = arith.addf %101, %106 : vector<256x8xf32>
    %cst_57 = arith.constant 0.000000e+00 : f32
    %108 = vector.broadcast %cst_57 : f32 to vector<256x8xf32>
    %109 = arith.cmpf oge, %107, %108 : vector<256x8xf32>
    %110 = vector.broadcast %1 : f32 to vector<256x8xf32>
    %111 = arith.mulf %110, %107 : vector<256x8xf32>
    %112 = arith.select %109, %107, %111 : vector<256x8xi1>, vector<256x8xf32>
    %c0_58 = arith.constant 0 : index
    %c0_59 = arith.constant 0 : index
    %113 = vector.load %arg8[%c0_58, %c0_59] : memref<8x8xf32, #tpu.memory_space<vmem>>, vector<8x8xf32>
    %cst_60 = arith.constant dense<0.000000e+00> : vector<256x8xf32>
    %114 = tpu.matmul %112, %113, %cst_60 {dimension_numbers = #tpu.dot_dimension_numbers<[1], [0], [0], [1], [0, 0, 1, 1], [], []>} : vector<256x8xf32>, vector<8x8xf32>, vector<256x8xf32> -> vector<256x8xf32>
    %c0_61 = arith.constant 0 : index
    %c0_62 = arith.constant 0 : index
    %115 = vector.load %arg9[%c0_61, %c0_62] : memref<1x8xf32, #tpu.memory_space<vmem>>, vector<1x8xf32>
    %116 = vector.broadcast %115 : vector<1x8xf32> to vector<256x8xf32>
    %117 = arith.addf %114, %116 : vector<256x8xf32>
    %cst_63 = arith.constant 0.000000e+00 : f32
    %118 = vector.broadcast %cst_63 : f32 to vector<256x8xf32>
    %119 = arith.cmpf oge, %117, %118 : vector<256x8xf32>
    %120 = vector.broadcast %2 : f32 to vector<256x8xf32>
    %121 = arith.mulf %120, %117 : vector<256x8xf32>
    %122 = arith.select %119, %117, %121 : vector<256x8xi1>, vector<256x8xf32>
    %c1_i32 = arith.constant 1 : i32
    %123 = vector.broadcast %c1_i32 : i32 to vector<256x8xi32>
    %124 = arith.addi %34, %123 : vector<256x8xi32>
    %125 = arith.cmpi eq, %6, %124 : vector<256x8xi32>
    %cst_64 = arith.constant 0.000000e+00 : f32
    %126 = vector.broadcast %cst_64 : f32 to vector<256x8xf32>
    %127 = arith.select %125, %26, %126 : vector<256x8xi1>, vector<256x8xf32>
    %128 = arith.addf %122, %127 : vector<256x8xf32>
    %c0_65 = arith.constant 0 : index
    %c0_66 = arith.constant 0 : index
    %129 = vector.load %arg7[%c0_65, %c0_66] : memref<1x8xf32, #tpu.memory_space<vmem>>, vector<1x8xf32>
    %130 = vector.extract_strided_slice %21 {offsets = [1, 0, 0], sizes = [16, 16, 32], strides = [1, 1, 1]} : vector<18x18x32xf32> to vector<16x16x32xf32>
    %131 = vector.shape_cast %130 : vector<16x16x32xf32> to vector<256x32xf32>
    %c8 = arith.constant 8 : index
    %c0_67 = arith.constant 0 : index
    %c0_68 = arith.constant 0 : index
    %132 = vector.load %arg6[%c8, %c0_67, %c0_68] : memref<16x32x8xf32, #tpu.memory_space<vmem>>, vector<1x32x8xf32>
    %133 = vector.shape_cast %132 : vector<1x32x8xf32> to vector<32x8xf32>
    %cst_69 = arith.constant dense<0.000000e+00> : vector<256x8xf32>
    %134 = tpu.matmul %131, %133, %cst_69 {dimension_numbers = #tpu.dot_dimension_numbers<[1], [0], [0], [1], [0, 0, 1, 1], [], []>} : vector<256x32xf32>, vector<32x8xf32>, vector<256x8xf32> -> vector<256x8xf32>
    %135 = vector.broadcast %129 : vector<1x8xf32> to vector<256x8xf32>
    %136 = arith.addf %135, %134 : vector<256x8xf32>
    %137 = vector.extract_strided_slice %21 {offsets = [1, 1, 0], sizes = [16, 16, 32], strides = [1, 1, 1]} : vector<18x18x32xf32> to vector<16x16x32xf32>
    %138 = vector.shape_cast %137 : vector<16x16x32xf32> to vector<256x32xf32>
    %c9 = arith.constant 9 : index
    %c0_70 = arith.constant 0 : index
    %c0_71 = arith.constant 0 : index
    %139 = vector.load %arg6[%c9, %c0_70, %c0_71] : memref<16x32x8xf32, #tpu.memory_space<vmem>>, vector<1x32x8xf32>
    %140 = vector.shape_cast %139 : vector<1x32x8xf32> to vector<32x8xf32>
    %cst_72 = arith.constant dense<0.000000e+00> : vector<256x8xf32>
    %141 = tpu.matmul %138, %140, %cst_72 {dimension_numbers = #tpu.dot_dimension_numbers<[1], [0], [0], [1], [0, 0, 1, 1], [], []>} : vector<256x32xf32>, vector<32x8xf32>, vector<256x8xf32> -> vector<256x8xf32>
    %142 = arith.addf %136, %141 : vector<256x8xf32>
    %143 = vector.extract_strided_slice %21 {offsets = [2, 0, 0], sizes = [16, 16, 32], strides = [1, 1, 1]} : vector<18x18x32xf32> to vector<16x16x32xf32>
    %144 = vector.shape_cast %143 : vector<16x16x32xf32> to vector<256x32xf32>
    %c10 = arith.constant 10 : index
    %c0_73 = arith.constant 0 : index
    %c0_74 = arith.constant 0 : index
    %145 = vector.load %arg6[%c10, %c0_73, %c0_74] : memref<16x32x8xf32, #tpu.memory_space<vmem>>, vector<1x32x8xf32>
    %146 = vector.shape_cast %145 : vector<1x32x8xf32> to vector<32x8xf32>
    %cst_75 = arith.constant dense<0.000000e+00> : vector<256x8xf32>
    %147 = tpu.matmul %144, %146, %cst_75 {dimension_numbers = #tpu.dot_dimension_numbers<[1], [0], [0], [1], [0, 0, 1, 1], [], []>} : vector<256x32xf32>, vector<32x8xf32>, vector<256x8xf32> -> vector<256x8xf32>
    %148 = arith.addf %142, %147 : vector<256x8xf32>
    %149 = vector.extract_strided_slice %21 {offsets = [2, 1, 0], sizes = [16, 16, 32], strides = [1, 1, 1]} : vector<18x18x32xf32> to vector<16x16x32xf32>
    %150 = vector.shape_cast %149 : vector<16x16x32xf32> to vector<256x32xf32>
    %c11 = arith.constant 11 : index
    %c0_76 = arith.constant 0 : index
    %c0_77 = arith.constant 0 : index
    %151 = vector.load %arg6[%c11, %c0_76, %c0_77] : memref<16x32x8xf32, #tpu.memory_space<vmem>>, vector<1x32x8xf32>
    %152 = vector.shape_cast %151 : vector<1x32x8xf32> to vector<32x8xf32>
    %cst_78 = arith.constant dense<0.000000e+00> : vector<256x8xf32>
    %153 = tpu.matmul %150, %152, %cst_78 {dimension_numbers = #tpu.dot_dimension_numbers<[1], [0], [0], [1], [0, 0, 1, 1], [], []>} : vector<256x32xf32>, vector<32x8xf32>, vector<256x8xf32> -> vector<256x8xf32>
    %154 = arith.addf %148, %153 : vector<256x8xf32>
    %cst_79 = arith.constant 0.000000e+00 : f32
    %155 = vector.broadcast %cst_79 : f32 to vector<256x8xf32>
    %156 = arith.cmpf oge, %154, %155 : vector<256x8xf32>
    %157 = vector.broadcast %1 : f32 to vector<256x8xf32>
    %158 = arith.mulf %157, %154 : vector<256x8xf32>
    %159 = arith.select %156, %154, %158 : vector<256x8xi1>, vector<256x8xf32>
    %c0_80 = arith.constant 0 : index
    %c0_81 = arith.constant 0 : index
    %160 = vector.load %arg8[%c0_80, %c0_81] : memref<8x8xf32, #tpu.memory_space<vmem>>, vector<8x8xf32>
    %cst_82 = arith.constant dense<0.000000e+00> : vector<256x8xf32>
    %161 = tpu.matmul %159, %160, %cst_82 {dimension_numbers = #tpu.dot_dimension_numbers<[1], [0], [0], [1], [0, 0, 1, 1], [], []>} : vector<256x8xf32>, vector<8x8xf32>, vector<256x8xf32> -> vector<256x8xf32>
    %c0_83 = arith.constant 0 : index
    %c0_84 = arith.constant 0 : index
    %162 = vector.load %arg9[%c0_83, %c0_84] : memref<1x8xf32, #tpu.memory_space<vmem>>, vector<1x8xf32>
    %163 = vector.broadcast %162 : vector<1x8xf32> to vector<256x8xf32>
    %164 = arith.addf %161, %163 : vector<256x8xf32>
    %cst_85 = arith.constant 0.000000e+00 : f32
    %165 = vector.broadcast %cst_85 : f32 to vector<256x8xf32>
    %166 = arith.cmpf oge, %164, %165 : vector<256x8xf32>
    %167 = vector.broadcast %2 : f32 to vector<256x8xf32>
    %168 = arith.mulf %167, %164 : vector<256x8xf32>
    %169 = arith.select %166, %164, %168 : vector<256x8xi1>, vector<256x8xf32>
    %c32_i32 = arith.constant 32 : i32
    %170 = vector.broadcast %c32_i32 : i32 to vector<256x8xi32>
    %171 = arith.addi %34, %170 : vector<256x8xi32>
    %172 = arith.cmpi eq, %6, %171 : vector<256x8xi32>
    %cst_86 = arith.constant 0.000000e+00 : f32
    %173 = vector.broadcast %cst_86 : f32 to vector<256x8xf32>
    %174 = arith.select %172, %26, %173 : vector<256x8xi1>, vector<256x8xf32>
    %175 = arith.addf %169, %174 : vector<256x8xf32>
    %c0_87 = arith.constant 0 : index
    %c0_88 = arith.constant 0 : index
    %176 = vector.load %arg7[%c0_87, %c0_88] : memref<1x8xf32, #tpu.memory_space<vmem>>, vector<1x8xf32>
    %177 = vector.extract_strided_slice %21 {offsets = [1, 1, 0], sizes = [16, 16, 32], strides = [1, 1, 1]} : vector<18x18x32xf32> to vector<16x16x32xf32>
    %178 = vector.shape_cast %177 : vector<16x16x32xf32> to vector<256x32xf32>
    %c12 = arith.constant 12 : index
    %c0_89 = arith.constant 0 : index
    %c0_90 = arith.constant 0 : index
    %179 = vector.load %arg6[%c12, %c0_89, %c0_90] : memref<16x32x8xf32, #tpu.memory_space<vmem>>, vector<1x32x8xf32>
    %180 = vector.shape_cast %179 : vector<1x32x8xf32> to vector<32x8xf32>
    %cst_91 = arith.constant dense<0.000000e+00> : vector<256x8xf32>
    %181 = tpu.matmul %178, %180, %cst_91 {dimension_numbers = #tpu.dot_dimension_numbers<[1], [0], [0], [1], [0, 0, 1, 1], [], []>} : vector<256x32xf32>, vector<32x8xf32>, vector<256x8xf32> -> vector<256x8xf32>
    %182 = vector.broadcast %176 : vector<1x8xf32> to vector<256x8xf32>
    %183 = arith.addf %182, %181 : vector<256x8xf32>
    %184 = vector.extract_strided_slice %21 {offsets = [1, 2, 0], sizes = [16, 16, 32], strides = [1, 1, 1]} : vector<18x18x32xf32> to vector<16x16x32xf32>
    %185 = vector.shape_cast %184 : vector<16x16x32xf32> to vector<256x32xf32>
    %c13 = arith.constant 13 : index
    %c0_92 = arith.constant 0 : index
    %c0_93 = arith.constant 0 : index
    %186 = vector.load %arg6[%c13, %c0_92, %c0_93] : memref<16x32x8xf32, #tpu.memory_space<vmem>>, vector<1x32x8xf32>
    %187 = vector.shape_cast %186 : vector<1x32x8xf32> to vector<32x8xf32>
    %cst_94 = arith.constant dense<0.000000e+00> : vector<256x8xf32>
    %188 = tpu.matmul %185, %187, %cst_94 {dimension_numbers = #tpu.dot_dimension_numbers<[1], [0], [0], [1], [0, 0, 1, 1], [], []>} : vector<256x32xf32>, vector<32x8xf32>, vector<256x8xf32> -> vector<256x8xf32>
    %189 = arith.addf %183, %188 : vector<256x8xf32>
    %190 = vector.extract_strided_slice %21 {offsets = [2, 1, 0], sizes = [16, 16, 32], strides = [1, 1, 1]} : vector<18x18x32xf32> to vector<16x16x32xf32>
    %191 = vector.shape_cast %190 : vector<16x16x32xf32> to vector<256x32xf32>
    %c14 = arith.constant 14 : index
    %c0_95 = arith.constant 0 : index
    %c0_96 = arith.constant 0 : index
    %192 = vector.load %arg6[%c14, %c0_95, %c0_96] : memref<16x32x8xf32, #tpu.memory_space<vmem>>, vector<1x32x8xf32>
    %193 = vector.shape_cast %192 : vector<1x32x8xf32> to vector<32x8xf32>
    %cst_97 = arith.constant dense<0.000000e+00> : vector<256x8xf32>
    %194 = tpu.matmul %191, %193, %cst_97 {dimension_numbers = #tpu.dot_dimension_numbers<[1], [0], [0], [1], [0, 0, 1, 1], [], []>} : vector<256x32xf32>, vector<32x8xf32>, vector<256x8xf32> -> vector<256x8xf32>
    %195 = arith.addf %189, %194 : vector<256x8xf32>
    %196 = vector.extract_strided_slice %21 {offsets = [2, 2, 0], sizes = [16, 16, 32], strides = [1, 1, 1]} : vector<18x18x32xf32> to vector<16x16x32xf32>
    %197 = vector.shape_cast %196 : vector<16x16x32xf32> to vector<256x32xf32>
    %c15 = arith.constant 15 : index
    %c0_98 = arith.constant 0 : index
    %c0_99 = arith.constant 0 : index
    %198 = vector.load %arg6[%c15, %c0_98, %c0_99] : memref<16x32x8xf32, #tpu.memory_space<vmem>>, vector<1x32x8xf32>
    %199 = vector.shape_cast %198 : vector<1x32x8xf32> to vector<32x8xf32>
    %cst_100 = arith.constant dense<0.000000e+00> : vector<256x8xf32>
    %200 = tpu.matmul %197, %199, %cst_100 {dimension_numbers = #tpu.dot_dimension_numbers<[1], [0], [0], [1], [0, 0, 1, 1], [], []>} : vector<256x32xf32>, vector<32x8xf32>, vector<256x8xf32> -> vector<256x8xf32>
    %201 = arith.addf %195, %200 : vector<256x8xf32>
    %cst_101 = arith.constant 0.000000e+00 : f32
    %202 = vector.broadcast %cst_101 : f32 to vector<256x8xf32>
    %203 = arith.cmpf oge, %201, %202 : vector<256x8xf32>
    %204 = vector.broadcast %1 : f32 to vector<256x8xf32>
    %205 = arith.mulf %204, %201 : vector<256x8xf32>
    %206 = arith.select %203, %201, %205 : vector<256x8xi1>, vector<256x8xf32>
    %c0_102 = arith.constant 0 : index
    %c0_103 = arith.constant 0 : index
    %207 = vector.load %arg8[%c0_102, %c0_103] : memref<8x8xf32, #tpu.memory_space<vmem>>, vector<8x8xf32>
    %cst_104 = arith.constant dense<0.000000e+00> : vector<256x8xf32>
    %208 = tpu.matmul %206, %207, %cst_104 {dimension_numbers = #tpu.dot_dimension_numbers<[1], [0], [0], [1], [0, 0, 1, 1], [], []>} : vector<256x8xf32>, vector<8x8xf32>, vector<256x8xf32> -> vector<256x8xf32>
    %c0_105 = arith.constant 0 : index
    %c0_106 = arith.constant 0 : index
    %209 = vector.load %arg9[%c0_105, %c0_106] : memref<1x8xf32, #tpu.memory_space<vmem>>, vector<1x8xf32>
    %210 = vector.broadcast %209 : vector<1x8xf32> to vector<256x8xf32>
    %211 = arith.addf %208, %210 : vector<256x8xf32>
    %cst_107 = arith.constant 0.000000e+00 : f32
    %212 = vector.broadcast %cst_107 : f32 to vector<256x8xf32>
    %213 = arith.cmpf oge, %211, %212 : vector<256x8xf32>
    %214 = vector.broadcast %2 : f32 to vector<256x8xf32>
    %215 = arith.mulf %214, %211 : vector<256x8xf32>
    %216 = arith.select %213, %211, %215 : vector<256x8xi1>, vector<256x8xf32>
    %c33_i32 = arith.constant 33 : i32
    %217 = vector.broadcast %c33_i32 : i32 to vector<256x8xi32>
    %218 = arith.addi %34, %217 : vector<256x8xi32>
    %219 = arith.cmpi eq, %6, %218 : vector<256x8xi32>
    %cst_108 = arith.constant 0.000000e+00 : f32
    %220 = vector.broadcast %cst_108 : f32 to vector<256x8xf32>
    %221 = arith.select %219, %26, %220 : vector<256x8xi1>, vector<256x8xf32>
    %222 = arith.addf %216, %221 : vector<256x8xf32>
    %223 = tpu.concatenate %81, %128, %175, %222 in 1 : vector<256x8xf32>, vector<256x8xf32>, vector<256x8xf32>, vector<256x8xf32> -> vector<256x32xf32>
    %224 = vector.shape_cast %223 : vector<256x32xf32> to vector<1x256x32xf32>
    %c0_109 = arith.constant 0 : index
    %c0_110 = arith.constant 0 : index
    %c0_111 = arith.constant 0 : index
    %225 = vector.load %arg12[%c0_109, %c0_110, %c0_111] : memref<1x256x32xf32, #tpu.memory_space<vmem>>, vector<1x256x32xf32>
    tpu.vector_store %arg12[%c0_109, %c0_110, %c0_111], %224 {strides = array<i32>} : memref<1x256x32xf32, #tpu.memory_space<vmem>>, vector<1x256x32xf32>,
    return
  }
  func.func @transform_0(%arg0: i32) -> i32 {
    %c0_i32 = arith.constant 0 : i32
    %c0_i32_0 = arith.constant 0 : i32
    return %c0_i32 : i32
  }
  func.func @transform_1(%arg0: i32) -> (i32, i32, i32) {
    %c0_i32 = arith.constant 0 : i32
    %c0_i32_0 = arith.constant 0 : i32
    %c0_i32_1 = arith.constant 0 : i32
    return %arg0, %c0_i32, %c0_i32_0 : i32, i32, i32
  }
  func.func @transform_2(%arg0: i32) -> (i32, i32, i32) {
    %c0_i32 = arith.constant 0 : i32
    %c0_i32_0 = arith.constant 0 : i32
    %c0_i32_1 = arith.constant 0 : i32
    return %arg0, %c0_i32, %c0_i32_0 : i32, i32, i32
  }
  func.func @transform_3(%arg0: i32) -> (i32, i32) {
    %c0_i32 = arith.constant 0 : i32
    %c0_i32_0 = arith.constant 0 : i32
    %c0_i32_1 = arith.constant 0 : i32
    return %c0_i32, %c0_i32_0 : i32, i32
  }
  func.func @transform_4(%arg0: i32) -> (i32, i32) {
    %c0_i32 = arith.constant 0 : i32
    %c0_i32_0 = arith.constant 0 : i32
    %c0_i32_1 = arith.constant 0 : i32
    return %c0_i32, %c0_i32_0 : i32, i32
  }
  func.func @transform_5(%arg0: i32) -> (i32, i32, i32) {
    %c0_i32 = arith.constant 0 : i32
    %c0_i32_0 = arith.constant 0 : i32
    %c0_i32_1 = arith.constant 0 : i32
    %c0_i32_2 = arith.constant 0 : i32
    return %c0_i32, %c0_i32_0, %c0_i32_1 : i32, i32, i32
  }
  func.func @transform_6(%arg0: i32) -> (i32, i32) {
    %c0_i32 = arith.constant 0 : i32
    %c0_i32_0 = arith.constant 0 : i32
    %c0_i32_1 = arith.constant 0 : i32
    return %c0_i32, %c0_i32_0 : i32, i32
  }
  func.func @transform_7(%arg0: i32) -> (i32, i32) {
    %c0_i32 = arith.constant 0 : i32
    %c0_i32_0 = arith.constant 0 : i32
    %c0_i32_1 = arith.constant 0 : i32
    return %c0_i32, %c0_i32_0 : i32, i32
  }
  func.func @transform_8(%arg0: i32) -> (i32, i32) {
    %c0_i32 = arith.constant 0 : i32
    %c0_i32_0 = arith.constant 0 : i32
    %c0_i32_1 = arith.constant 0 : i32
    return %c0_i32, %c0_i32_0 : i32, i32
  }
  func.func @transform_9(%arg0: i32) -> (i32, i32) {
    %c0_i32 = arith.constant 0 : i32
    %c0_i32_0 = arith.constant 0 : i32
    %c0_i32_1 = arith.constant 0 : i32
    return %c0_i32, %c0_i32_0 : i32, i32
  }
  func.func @transform_10(%arg0: i32) -> (i32, i32) {
    %c0_i32 = arith.constant 0 : i32
    %c0_i32_0 = arith.constant 0 : i32
    %c0_i32_1 = arith.constant 0 : i32
    return %c0_i32, %c0_i32_0 : i32, i32
  }
  func.func @transform_11(%arg0: i32) -> (i32, i32, i32) {
    %c0_i32 = arith.constant 0 : i32
    %c0_i32_0 = arith.constant 0 : i32
    %c0_i32_1 = arith.constant 0 : i32
    return %arg0, %c0_i32, %c0_i32_0 : i32, i32, i32
  }
}

</mosaic_0001>

<bundles_post_ra>
// kernel: tile.8
= control target key start
LH: loop header
LB: loop body
LE: loop exit
PB: predicated region body
PF: predicated region fallthrough
CT: control target
= control target key end

     0   :  { %s22_s0 = inlined_call_operand.vmem [shape: f32[8], index: 0, kind: input, shape index: {}]   ;;  %s23_s1 = inlined_call_operand.vmem [shape: f32[4,8], index: 1, kind: output, shape index: {}]  }
   0x1   :  { %v4_v0 = vld [vmem:[%s22_s0] ss:$0 sm:$0xff] }
   0x2   :  { %5 = vst [vmem:[%s23_s1] sm:$0xf] %v4_v0 }

// kernel: tile.9
= control target key start
LH: loop header
LB: loop body
LE: loop exit
PB: predicated region body
PF: predicated region fallthrough
CT: control target
= control target key end

     0   :  { %vm8_vm0 = vcmask 64512   ;;  %s40_s8 = smov 8   ;;  %s41_s9 = smov 16   ;;  %vm14_vm1 = vcmask 261312   ;;  %vm20_vm2 = vcmask 195712   ;;  %vm26_vm3 = vcmask 130112   ;;  %s58_s0 = inlined_call_operand.vmem [shape: f32[4,8], index: 0, kind: input, shape index: {}]   ;;  %s59_s1 = inlined_call_operand.vmem [shape: f32[1,32], index: 1, kind: output, shape index: {}]  }
   0x1   :  { %v5_v0 = vld [vmem:[%s58_s0] sm:$0xf]  ;;  %s39_s0 = smov 24  }
   0x2   :  { %6 = vst [vmem:[#allocation1] sm:$0xf] %v5_v0 }
   0x9   :  { %v11_v1 = vld [vmem:[#allocation1 + $0x3] sm:$0x1]   ;;  %v23_v2 = vld [vmem:[#allocation1 + $0x1] sm:$0x1]   ;;  %v7_v3 = vld [vmem:[#allocation1] sm:$0x1]  }
   0xa   :  { %12 = vrot.lane.b32.xlu0 %v11_v1, %s39_s0  ;;  %24 = vrot.lane.b32.xlu1 %v23_v2, %s40_s8  ;;  %v17_v4 = vld [vmem:[#allocation1 + $0x2] sm:$0x1]   ;;  %9 = vst.msk [vmem:[#allocation0] sm:$0x1] %vm8_vm0, %v7_v3  }
   0xe   :  { %18 = vrot.lane.b32.xlu0 %v17_v4, %s41_s9 }
  0x7c   :  { %v13_v5 = vpop.permute.xlu0 %12   ;;  %v25_v6 = vpop.permute.xlu1 %24  }
  0x7d   :  { %15 = vst.msk [vmem:[#allocation0] sm:$0x1] %vm14_vm1, %v13_v5  }
  0x80   :  { %v19_v7 = vpop.permute.xlu0 %18  }
  0x81   :  { %21 = vst.msk [vmem:[#allocation0] sm:$0x1] %vm20_vm2, %v19_v7  }
  0x82   :  { %27 = vst.msk [vmem:[#allocation0] sm:$0x1] %vm26_vm3, %v25_v6  }
  0x89   :  { %v32_v8 = vld [vmem:[#allocation0] sm:$0x1] }
  0x8a   :  { %35 = vst [vmem:[%s59_s1] sm:$0x1] %v32_v8 }

// kernel: upsample_bottleneck.1
= control target key start
LH: loop header
LB: loop body
LE: loop exit
PB: predicated region body
PF: predicated region fallthrough
CT: control target
= control target key end

     0   :  { %16 = vsyncpa [#allocation3], 0  ;;  %s12001_s17 = smov 0   ;;  %s17286_s0 = inlined_call_operand.vmem [shape: f32[3], index: 0, kind: input, shape index: {}]   ;;  %s17287_s1 = inlined_call_operand.vmem [shape: f32[2,256,4], index: 1, kind: input, shape index: {}]   ;;  %s17288_s2 = inlined_call_operand.vmem [shape: s32[2,256,8], index: 2, kind: input, shape index: {}]   ;;  %s17289_s3 = inlined_call_operand.vmem [shape: f32[4,32], index: 3, kind: input, shape index: {}]   ;;  %s17290_s4 = inlined_call_operand.vmem [shape: f32[1,32], index: 4, kind: input, shape index: {}]   ;;  %s17291_s5 = inlined_call_operand.vmem [shape: f32[16,32,8], index: 5, kind: input, shape index: {}]   ;;  %s17292_s6 = inlined_call_operand.vmem [shape: f32[1,8], index: 6, kind: input, shape index: {}]   ;;  %s17293_s7 = inlined_call_operand.vmem [shape: f32[8,8], index: 7, kind: input, shape index: {}]   ;;  %s17294_s8 = inlined_call_operand.vmem [shape: f32[1,8], index: 8, kind: input, shape index: {}]   ;;  %s17295_s9 = inlined_call_operand.vmem [shape: f32[4,8], index: 9, kind: input, shape index: {}]   ;;  %s17296_s10 = inlined_call_operand.vmem [shape: f32[1,8], index: 10, kind: input, shape index: {}]   ;;  %s17297_s11 = inlined_call_operand.vmem [shape: f32[2,256,32], index: 11, kind: output, shape index: {}]  }
   0x1 LB: > { %s12007_s18 = sadd.s32 4294967295, %s11934_s17   ;;  %p9069_p0 = scmp.ge.s32.totalorder %s11934_s17, 1  ;;  %s11934_s17 = sphi %s12001_s17, %s22_s17  }
   0x2   : > { %p294_p1 = scmp.lt.s32.totalorder %s11934_s17, 3  ;;  %s307_s21 = sshll.u32 %s17286_s0, 4  ;;  %s308_s21 = int_to_ptr.vmem [resolvable:$true] %s307_s21 }
   0x3   : > { %p11831_p3 = scmp.eq.s32.totalorder %s12007_s18, 0  ;;  %s11909_s23 = scalar_lea.vmem %s308_s21, 16 }
   0x4   : > { %p12014_p2 = pnand %p9069_p0, %p294_p1  ;;  %p11910_p6 = scmp.ne.s32.totalorder %s308_s21, %s11909_s23 }
   0x5   : > { %p11917_p10 = scmp.lt.s32.totalorder %s308_s21, %s308_s21  ;;  %p11918_p11 = scmp.lt.s32.totalorder %s11909_s23, %s11909_s23 }
   0x6   : > { %p11827_p4 = pneg %p12014_p2 }
   0x7   : > { %p11919_p12 = por %p11918_p11, %p11917_p10 }
   0x8   : > { %p11828_p5 = pnand %p11831_p3, %p11827_p4 }
   0xa   : > { %p11911_p7 = pneg %p11828_p5 }
   0xc   : > { %p11912_p8 = pnand %p11911_p7, %p11910_p6 }
   0xe   : > { %p11913_p9 = pneg %p11912_p8 }
  0x10   : > { %p11920_p13 = pnand %p11919_p12, %p11913_p9 }
  0x12   : > { %11923 = shalt.err (!%p11920_p13)
}
  0x13   : > { %s11936_s24 = smov [#allocation2]   ;;  %360 = sbr.rel (%p12014_p2) target bundleno = 1880 (0x758), region = 64 }
  0x14   : > { %11830 = dma.vmem_to_smem (!%p11828_p5), %s308_s21, 16, %s11936_s24, [#allocation3]  }
  0x18   : > { %11929 = dma.done.wait (%p11831_p3), [#allocation3], 16  }
  0x19   : > { %11931 = vsyncadd (%p11831_p3), [#allocation3], 4294967280 }
  0x1a   : > { %366 = sfence }
  0x1b   : > { %v488_v0 = vld [vmem:[%s17289_s3] sm:$0xf]  ;;  %vm593_vm0 = vcmask 1043456   ;;  %p406_p0 = scmp.lt.s32.totalorder %s12007_s18, 1  ;;  %v1339_v1 = vld [vmem:[%s17291_s5 + $0x18] sm:$0xff]  ;;  %vm496_vm1 = vcmask 31744  }
  0x1c   : > { %10627 = vmatprep.subr.msk.mxu0 %vm593_vm0, %v488_v0  ;;  %v1064_v2 = vld [vmem:[%s17295_s9] sm:$0xf]  ;;  %v9184_v3 = vld [vmem:[%s17291_s5 + $0x38] sm:$0xff]  ;;  %v1338_v7 = vld [vmem:[%s17291_s5 + $0x10] sm:$0xff]  ;;  %v17298_v42 = vmov 0.0   ;;  %vm1340_vm2 = vcmask 261120  }
  0x1d   : > { %10628 = vmatpush3.msk.msra.mxu0 %vm593_vm0, %v488_v0  ;;  %s18639_s18 = smov (!%p406_p0, %s12007_s18), 1  ;;  %10677 = vmatprep.subr.msk.mxu1 %vm593_vm0, %v1064_v2  ;;  %v9183_v8 = vld [vmem:[%s17291_s5 + $0x30] sm:$0xff]  ;;  %v1337_v11 = vld [vmem:[%s17291_s5 + $0x8] sm:$0xff]  ;;  %v1336_v15 = vld [vmem:[%s17291_s5] sm:$0xff]  ;;  %v12167_v43 = vrot.slane %v17298_v42, 1  ;;  %s421_s30 = sld [smem:[#allocation2]] }
  0x1e   : > { %10678 = vmatpush3.msk.msra.mxu1 %vm593_vm0, %v1064_v2  ;;  %10727 = vmatprep.subr.mxu0 %v1339_v1  ;;  %s12043_s14 = sshll.u32 %s18639_s18, 8  ;;  %v9182_v12 = vld [vmem:[%s17291_s5 + $0x28] sm:$0xff]  ;;  %v9181_v16 = vld [vmem:[%s17291_s5 + $0x20] sm:$0xff]  ;;  %v9220_v44 = vld [vmem:[%s17291_s5 + $0x58] sm:$0xff]  ;;  %vm951_vm6 = vcmask 1040384   ;;  %vm1697_vm8 = vcmask 1046528  }
  0x1f   : > { %10783 = vmatprep.subr.mxu1 %v9184_v3  ;;  %s12049_s19 = scalar_lea.vmem %s17287_s1, %s12043_s14  ;;  %17665 = vst [vmem:[#allocation5_spill] sm:$0xff] %v12167_v43  ;;  %v9256_v45 = vld [vmem:[%s17291_s5 + $0x78] sm:$0xff]  ;;  %v9219_v46 = vld [vmem:[%s17291_s5 + $0x50] sm:$0xff]  ;;  %v9218_v48 = vld [vmem:[%s17291_s5 + $0x48] sm:$0xff]  ;;  %s12919_s16 = scalar_lea.vmem %s17288_s2, %s12043_s14 }
  0x20   : > { %v424_v4 = vld [vmem:[%s12049_s19] sm:$0xff]  ;;  %v425_v5 = vld [vmem:[%s12049_s19 + $0x8] sm:$0xff]  ;;  %v426_v6 = vld [vmem:[%s12049_s19 + $0x10] sm:$0xff]  ;;  %s9080_s26 = sld [smem:[#allocation2 + $0x1]]  ;;  %s11938_s24 = smov 8  }
  0x21   : > { %10629 = vmatprep.mubr.msk.f32.mxu0 %vm496_vm1, %v424_v4  ;;  %10679 = vmatprep.mubr.msk.f32.mxu1 %vm496_vm1, %v424_v4  ;;  %v427_v9 = vld [vmem:[%s12049_s19 + $0x18] sm:$0xff]  ;;  %v428_v10 = vld [vmem:[%s12049_s19 + $0x20] sm:$0xff]  ;;  %v429_v13 = vld [vmem:[%s12049_s19 + $0x28] sm:$0xff]  ;;  %s9081_s12 = sld [smem:[#allocation2 + $0x2]]  ;;  %s11939_s18 = smov 16  }
  0x22   : > { %10630 = vmatmul.mubr.msk.f32.vlgmr.msra.gmra.mxu0 %vm496_vm1, %v425_v5  ;;  %10680 = vmatmul.mubr.msk.f32.vlgmr.msra.gmra.mxu1 %vm496_vm1, %v425_v5  ;;  %v430_v14 = vld [vmem:[%s12049_s19 + $0x30] sm:$0xff]  ;;  %v431_v17 = vld [vmem:[%s12049_s19 + $0x38] sm:$0xff]  ;;  %v432_v18 = vld [vmem:[%s12049_s19 + $0x40] sm:$0xff] }
  0x23   : > { %10632 = vmatprep.mubr.msk.f32.mxu0 %vm496_vm1, %v426_v6  ;;  %10728 = vmatpush3.msra.mxu0 %v1339_v1  ;;  %v433_v19 = vld [vmem:[%s12049_s19 + $0x48] sm:$0xff]  ;;  %v434_v20 = vld [vmem:[%s12049_s19 + $0x50] sm:$0xff]  ;;  %v435_v21 = vld [vmem:[%s12049_s19 + $0x58] sm:$0xff]  ;;  %v12203_v54 = vstv %s421_s30 }
  0x24   : > { %10784 = vmatpush3.msra.mxu1 %v9184_v3  ;;  %10682 = vmatprep.mubr.msk.f32.mxu1 %vm496_vm1, %v426_v6  ;;  %v436_v22 = vld [vmem:[%s12049_s19 + $0x60] sm:$0xff]  ;;  %v437_v23 = vld [vmem:[%s12049_s19 + $0x68] sm:$0xff]  ;;  %v438_v24 = vld [vmem:[%s12049_s19 + $0x70] sm:$0xff] }
  0x25   : > { %10729 = vmatprep.subr.mxu0 %v1338_v7  ;;  %10785 = vmatprep.subr.mxu1 %v9183_v8  ;;  %v439_v25 = vld [vmem:[%s12049_s19 + $0x78] sm:$0xff]  ;;  %v440_v26 = vld [vmem:[%s12049_s19 + $0x80] sm:$0xff]  ;;  %v441_v27 = vld [vmem:[%s12049_s19 + $0x88] sm:$0xff] }
  0x26   : > { %10633 = vmatmul.mubr.msk.f32.gmra.mxu0 %vm496_vm1, %v427_v9  ;;  %10683 = vmatmul.mubr.msk.f32.gmra.mxu1 %vm496_vm1, %v427_v9  ;;  %v442_v28 = vld [vmem:[%s12049_s19 + $0x90] sm:$0xff]  ;;  %v443_v29 = vld [vmem:[%s12049_s19 + $0x98] sm:$0xff]  ;;  %v444_v30 = vld [vmem:[%s12049_s19 + $0xa0] sm:$0xff] }
  0x27   : > { %10635 = vmatprep.mubr.msk.f32.mxu0 %vm496_vm1, %v428_v10  ;;  %10685 = vmatprep.mubr.msk.f32.mxu1 %vm496_vm1, %v428_v10  ;;  %v445_v31 = vld [vmem:[%s12049_s19 + $0xa8] sm:$0xff]  ;;  %v446_v32 = vld [vmem:[%s12049_s19 + $0xb0] sm:$0xff]  ;;  %v447_v33 = vld [vmem:[%s12049_s19 + $0xb8] sm:$0xff] }
  0x28   : > { %10730 = vmatpush3.msra.mxu0 %v1338_v7  ;;  %10786 = vmatpush3.msra.mxu1 %v9183_v8  ;;  %v448_v34 = vld [vmem:[%s12049_s19 + $0xc0] sm:$0xff]  ;;  %v449_v35 = vld [vmem:[%s12049_s19 + $0xc8] sm:$0xff]  ;;  %v450_v36 = vld [vmem:[%s12049_s19 + $0xd0] sm:$0xff] }
  0x29   : > { %10731 = vmatprep.subr.mxu0 %v1337_v11  ;;  %10787 = vmatprep.subr.mxu1 %v9182_v12  ;;  %v451_v37 = vld [vmem:[%s12049_s19 + $0xd8] sm:$0xff]  ;;  %v452_v38 = vld [vmem:[%s12049_s19 + $0xe0] sm:$0xff]  ;;  %v453_v39 = vld [vmem:[%s12049_s19 + $0xe8] sm:$0xff] }
  0x2a   : > { %10636 = vmatmul.mubr.msk.f32.gmra.mxu0 %vm496_vm1, %v429_v13  ;;  %10686 = vmatmul.mubr.msk.f32.gmra.mxu1 %vm496_vm1, %v429_v13  ;;  %v454_v40 = vld [vmem:[%s12049_s19 + $0xf0] sm:$0xff]  ;;  %v455_v41 = vld [vmem:[%s12049_s19 + $0xf8] sm:$0xff]  ;;  %v9254_v49 = vld [vmem:[%s17291_s5 + $0x68] sm:$0xff] }
  0x2b   : > { %10638 = vmatprep.mubr.msk.f32.mxu0 %vm496_vm1, %v430_v14  ;;  %10688 = vmatprep.mubr.msk.f32.mxu1 %vm496_vm1, %v430_v14  ;;  %v9255_v47 = vld [vmem:[%s17291_s5 + $0x70] sm:$0xff]  ;;  %v9217_v50 = vld [vmem:[%s17291_s5 + $0x40] sm:$0xff] }
  0x2c   : > { %10732 = vmatpush3.msra.mxu0 %v1337_v11  ;;  %10788 = vmatpush3.msra.mxu1 %v9182_v12  ;;  %v9253_v51 = vld [vmem:[%s17291_s5 + $0x60] sm:$0xff] }
  0x2d   : > { %10733 = vmatprep.subr.mxu0 %v1336_v15  ;;  %10789 = vmatprep.subr.mxu1 %v9181_v16  ;;  %v12201_v52 = vld [vmem:[%s17290_s4] ss:$0 sm:$0xff] }
  0x2e   : > { %10639 = vmatmul.mubr.msk.f32.gmra.mxu0 %vm496_vm1, %v431_v17  ;;  %10689 = vmatmul.mubr.msk.f32.gmra.mxu1 %vm496_vm1, %v431_v17 }
  0x2f   : > { %10641 = vmatprep.mubr.msk.f32.mxu0 %vm496_vm1, %v432_v18  ;;  %10691 = vmatprep.mubr.msk.f32.mxu1 %vm496_vm1, %v432_v18 }
  0x30   : > { %10734 = vmatpush3.msra.mxu0 %v1336_v15  ;;  %10790 = vmatpush3.msra.mxu1 %v9181_v16 }
  0x31   : > { %10839 = vmatprep.subr.mxu0 %v9220_v44  ;;  %10895 = vmatprep.subr.mxu1 %v9256_v45 }
  0x32   : > { %10642 = vmatmul.mubr.msk.f32.gmra.mxu0 %vm496_vm1, %v433_v19  ;;  %10692 = vmatmul.mubr.msk.f32.gmra.mxu1 %vm496_vm1, %v433_v19 }
  0x33   : > { %10644 = vmatprep.mubr.msk.f32.mxu0 %vm496_vm1, %v434_v20  ;;  %10694 = vmatprep.mubr.msk.f32.mxu1 %vm496_vm1, %v434_v20 }
  0x36   : > { %10645 = vmatmul.mubr.msk.f32.gmra.mxu0 %vm496_vm1, %v435_v21  ;;  %10695 = vmatmul.mubr.msk.f32.gmra.mxu1 %vm496_vm1, %v435_v21 }
  0x37   : > { %10647 = vmatprep.mubr.msk.f32.mxu0 %vm496_vm1, %v436_v22  ;;  %10697 = vmatprep.mubr.msk.f32.mxu1 %vm496_vm1, %v436_v22 }
  0x3a   : > { %10648 = vmatmul.mubr.msk.f32.gmra.mxu0 %vm496_vm1, %v437_v23  ;;  %10698 = vmatmul.mubr.msk.f32.gmra.mxu1 %vm496_vm1, %v437_v23 }
  0x3b   : > { %10650 = vmatprep.mubr.msk.f32.mxu0 %vm496_vm1, %v438_v24  ;;  %10700 = vmatprep.mubr.msk.f32.mxu1 %vm496_vm1, %v438_v24 }
  0x3e   : > { %10651 = vmatmul.mubr.msk.f32.gmra.mxu0 %vm496_vm1, %v439_v25  ;;  %10701 = vmatmul.mubr.msk.f32.gmra.mxu1 %vm496_vm1, %v439_v25 }
  0x3f   : > { %10653 = vmatprep.mubr.msk.f32.mxu0 %vm496_vm1, %v440_v26  ;;  %10703 = vmatprep.mubr.msk.f32.mxu1 %vm496_vm1, %v440_v26 }
  0x42   : > { %10654 = vmatmul.mubr.msk.f32.gmra.mxu0 %vm496_vm1, %v441_v27  ;;  %10704 = vmatmul.mubr.msk.f32.gmra.mxu1 %vm496_vm1, %v441_v27 }
  0x43   : > { %10656 = vmatprep.mubr.msk.f32.mxu0 %vm496_vm1, %v442_v28  ;;  %10706 = vmatprep.mubr.msk.f32.mxu1 %vm496_vm1, %v442_v28 }
  0x46   : > { %10657 = vmatmul.mubr.msk.f32.gmra.mxu0 %vm496_vm1, %v443_v29  ;;  %10707 = vmatmul.mubr.msk.f32.gmra.mxu1 %vm496_vm1, %v443_v29 }
  0x47   : > { %10659 = vmatprep.mubr.msk.f32.mxu0 %vm496_vm1, %v444_v30  ;;  %10709 = vmatprep.mubr.msk.f32.mxu1 %vm496_vm1, %v444_v30 }
  0x4a   : > { %10660 = vmatmul.mubr.msk.f32.gmra.mxu0 %vm496_vm1, %v445_v31  ;;  %10710 = vmatmul.mubr.msk.f32.gmra.mxu1 %vm496_vm1, %v445_v31 }
  0x4b   : > { %10662 = vmatprep.mubr.msk.f32.mxu0 %vm496_vm1, %v446_v32  ;;  %10712 = vmatprep.mubr.msk.f32.mxu1 %vm496_vm1, %v446_v32 }
  0x4e   : > { %10663 = vmatmul.mubr.msk.f32.gmra.mxu0 %vm496_vm1, %v447_v33  ;;  %10713 = vmatmul.mubr.msk.f32.gmra.mxu1 %vm496_vm1, %v447_v33  ;;  %v12249_v33 = vld [vmem:[%s17291_s5 + $0x98] sm:$0xff] }
  0x4f   : > { %10665 = vmatprep.mubr.msk.f32.mxu0 %vm496_vm1, %v448_v34  ;;  %10715 = vmatprep.mubr.msk.f32.mxu1 %vm496_vm1, %v448_v34 }
  0x52   : > { %10666 = vmatmul.mubr.msk.f32.gmra.mxu0 %vm496_vm1, %v449_v35  ;;  %10716 = vmatmul.mubr.msk.f32.gmra.mxu1 %vm496_vm1, %v449_v35 }
  0x53   : > { %10668 = vmatprep.mubr.msk.f32.mxu0 %vm496_vm1, %v450_v36  ;;  %10718 = vmatprep.mubr.msk.f32.mxu1 %vm496_vm1, %v450_v36 }
  0x56   : > { %10669 = vmatmul.mubr.msk.f32.gmra.mxu0 %vm496_vm1, %v451_v37  ;;  %10719 = vmatmul.mubr.msk.f32.gmra.mxu1 %vm496_vm1, %v451_v37 }
  0x57   : > { %10671 = vmatprep.mubr.msk.f32.mxu0 %vm496_vm1, %v452_v38  ;;  %10721 = vmatprep.mubr.msk.f32.mxu1 %vm496_vm1, %v452_v38 }
  0x5a   : > { %10672 = vmatmul.mubr.msk.f32.gmra.mxu0 %vm496_vm1, %v453_v39  ;;  %10722 = vmatmul.mubr.msk.f32.gmra.mxu1 %vm496_vm1, %v453_v39 }
  0x5b   : > { %10674 = vmatprep.mubr.msk.f32.mxu0 %vm496_vm1, %v454_v40  ;;  %10724 = vmatprep.mubr.msk.f32.mxu1 %vm496_vm1, %v454_v40 }
  0x5e   : > { %10675 = vmatmul.mubr.msk.f32.gmra.mxu0 %vm496_vm1, %v455_v41  ;;  %10725 = vmatmul.mubr.msk.f32.gmra.mxu1 %vm496_vm1, %v455_v41 }
  0x5f   : > { %10735 = vmatprep.mubr.f32.mxu0 %v17298_v42  ;;  %10791 = vmatprep.mubr.msk.f32.mxu1 %vm1340_vm2, %v12167_v43 }
  0x62   : > { %10736 = vmatmul.mubr.f32.vlgmr.msra.gmra.mxu0 %v17298_v42  ;;  %10792 = vmatmul.mubr.msk.f32.vlgmr.msra.gmra.mxu1 %vm1340_vm2, %v12167_v43 }
  0x63   : > { %10840 = vmatpush3.msra.mxu0 %v9220_v44  ;;  %10896 = vmatpush3.msra.mxu1 %v9256_v45 }
  0x64   : > { %10841 = vmatprep.subr.mxu0 %v9219_v46  ;;  %10897 = vmatprep.subr.mxu1 %v9255_v47 }
  0x65   : > { %10842 = vmatpush3.msra.mxu0 %v9219_v46  ;;  %10898 = vmatpush3.msra.mxu1 %v9255_v47 }
  0x66   : > { %10843 = vmatprep.subr.mxu0 %v9218_v48  ;;  %10899 = vmatprep.subr.mxu1 %v9254_v49 }
  0x67   : > { %10844 = vmatpush3.msra.mxu0 %v9218_v48  ;;  %10900 = vmatpush3.msra.mxu1 %v9254_v49 }
  0x68   : > { %10845 = vmatprep.subr.mxu0 %v9217_v50  ;;  %10901 = vmatprep.subr.mxu1 %v9253_v51 }
  0x69   : > { %10846 = vmatpush3.msra.mxu0 %v9217_v50  ;;  %10902 = vmatpush3.msra.mxu1 %v9253_v51 }
  0x6a   : > { %11001 = vmatprep.subr.mxu1 %v12249_v33 }
  0xe2   : > { %v10631_v53 = vpop.f32.mrf.mxu0  ;;  %v12276_v51 = vpop.f32.mrf.mxu1 }
  0xe3   : > { %v669_v55 = vadd.f32 %v10631_v53, %v12201_v52  ;;  %17676 = vst [vmem:[#allocation16_spill] sm:$0xff] %v12276_v51 }
  0xe4   : > { %v663_v56 = vpop.f32.mrf.mxu0 }
  0xe5   : > { %vm823_vm3 = vcmp.ge.f32.partialorder %v669_v55, 0.0  ;;  %v856_v57 = vmul.f32 %v12203_v54, %v669_v55  ;;  %v664_v58 = vadd.f32 %v12201_v52, %v663_v56 }
  0xe6   : > { %v10634_v59 = vpop.f32.mrf.mxu0 }
  0xe7   : > { %vm822_vm4 = vcmp.ge.f32.partialorder %v664_v58, 0.0  ;;  %v855_v60 = vmul.f32 %v12203_v54, %v664_v58  ;;  %v679_v61 = vadd.f32 %v10634_v59, %v12201_v52  ;;  %v888_v62 = vsel %vm823_vm3, %v669_v55, %v856_v57 }
  0xe8   : > { %v673_v63 = vpop.f32.mrf.mxu0  ;;  %v953_v5 = vrot.slane %v888_v62, 7 }
  0xe9   : > { %v887_v0 = vsel %vm822_vm4, %v664_v58, %v855_v60  ;;  %vm825_vm5 = vcmp.ge.f32.partialorder %v679_v61, 0.0  ;;  %v858_v1 = vmul.f32 %v12203_v54, %v679_v61  ;;  %v674_v2 = vadd.f32 %v12201_v52, %v673_v63 }
  0xea   : > { %v952_v3 = vrot.slane %v887_v0, 7  ;;  %v10637_v4 = vpop.f32.mrf.mxu0  ;;  %v12228_v17 = vsel %vm951_vm6, %v953_v5, 0.0 }
  0xeb   : > { %vm824_vm7 = vcmp.ge.f32.partialorder %v674_v2, 0.0  ;;  %v890_v6 = vsel %vm825_vm5, %v679_v61, %v858_v1  ;;  %v857_v7 = vmul.f32 %v12203_v54, %v674_v2  ;;  %v689_v8 = vadd.f32 %v10637_v4, %v12201_v52  ;;  %17668 = vst [vmem:[#allocation8_spill] sm:$0xff] %v12228_v17  ;;  %v12284_v61 = vpop.f32.mrf.mxu1 }
  0xec   : > { %v683_v9 = vpop.f32.mrf.mxu0  ;;  %v12215_v10 = vsel %vm951_vm6, 0.0, %v952_v3  ;;  %v12221_v12 = vsel %vm951_vm6, %v952_v3, %v953_v5  ;;  %v956_v18 = vrot.slane %v890_v6, 7  ;;  %v1703_v34 = vrot.slane %v12228_v17, 1  ;;  %17677 = vst [vmem:[#allocation17_spill] sm:$0xff] %v12284_v61 }
  0xed   : > { %17666 = vst [vmem:[#allocation6_spill] sm:$0xff] %v12215_v10  ;;  %v684_v11 = vadd.f32 %v12201_v52, %v683_v9  ;;  %10738 = vmatprep.mubr.msk.f32.mxu0 %vm1340_vm2, %v12215_v10  ;;  %17667 = vst [vmem:[#allocation7_spill] sm:$0xff] %v12221_v12  ;;  %v889_v13 = vsel %vm824_vm7, %v674_v2, %v857_v7  ;;  %vm827_vm9 = vcmp.ge.f32.partialorder %v689_v8, 0.0  ;;  %v1700_v15 = vrot.slane %v12215_v10, 1 }
  0xee   : > { %v860_v14 = vmul.f32 %v12203_v54, %v689_v8  ;;  %v10640_v16 = vpop.f32.mrf.mxu0  ;;  %10739 = vmatmul.mubr.msk.f32.gmra.mxu0 %vm1340_vm2, %v12221_v12  ;;  %v955_v19 = vrot.slane %v889_v13, 7  ;;  %v1701_v23 = vrot.slane %v12221_v12, 1  ;;  %v12258_v37 = vsel %vm951_vm6, %v956_v18, 0.0 }
  0xef   : > { %vm826_vm10 = vcmp.ge.f32.partialorder %v684_v11, 0.0  ;;  %v859_v21 = vmul.f32 %v12203_v54, %v684_v11  ;;  %v699_v22 = vadd.f32 %v10640_v16, %v12201_v52  ;;  %17672 = vst [vmem:[#allocation12_spill] sm:$0xff] %v12258_v37  ;;  %v1708_v53 = vrot.slane %v12258_v37, 1 }
  0xf0   : > { %v892_v20 = vsel %vm827_vm9, %v689_v8, %v860_v14  ;;  %v693_v24 = vpop.f32.mrf.mxu0  ;;  %v12235_v27 = vsel %vm951_vm6, 0.0, %v955_v19  ;;  %v12238_v28 = vsel %vm951_vm6, %v955_v19, %v956_v18  ;;  %v12242_v31 = vsel %vm1697_vm8, %v1700_v15, %v1701_v23 }
  0xf1   : > { %v959_v25 = vrot.slane %v892_v20, 7  ;;  %v694_v26 = vadd.f32 %v12201_v52, %v693_v24  ;;  %17669 = vst [vmem:[#allocation9_spill] sm:$0xff] %v12235_v27  ;;  %17670 = vst [vmem:[#allocation10_spill] sm:$0xff] %v12238_v28  ;;  %v891_v29 = vsel %vm826_vm10, %v684_v11, %v859_v21  ;;  %vm829_vm11 = vcmp.ge.f32.partialorder %v699_v22, 0.0  ;;  %10741 = vmatprep.mubr.msk.f32.mxu0 %vm1340_vm2, %v12235_v27  ;;  %v12309_v11 = vpop.f32.mrf.mxu1 }
  0xf2   : > { %v862_v30 = vmul.f32 %v12203_v54, %v699_v22  ;;  %17671 = vst [vmem:[#allocation11_spill] sm:$0xff] %v12242_v31  ;;  %v10643_v32 = vpop.f32.mrf.mxu0  ;;  %v958_v35 = vrot.slane %v891_v29, 7  ;;  %10794 = vmatprep.mubr.msk.f32.mxu1 %vm1340_vm2, %v12242_v31  ;;  %10742 = vmatmul.mubr.msk.f32.gmra.mxu0 %vm1340_vm2, %v12238_v28  ;;  %v1705_v44 = vrot.slane %v12235_v27, 1  ;;  %v12266_v45 = vsel %vm1697_vm8, %v1701_v23, %v1703_v34 }
  0xf3   : > { %vm828_vm12 = vcmp.ge.f32.partialorder %v694_v26, 0.0  ;;  %v861_v36 = vmul.f32 %v12203_v54, %v694_v26  ;;  %v12261_v38 = vsel %vm951_vm6, %v959_v25, 0.0  ;;  %17674 = vst [vmem:[#allocation14_spill] sm:$0xff] %v12266_v45  ;;  %v709_v46 = vadd.f32 %v10643_v32, %v12201_v52  ;;  %10795 = vmatmul.mubr.msk.f32.gmra.mxu1 %vm1340_vm2, %v12266_v45  ;;  %17682 = vst [vmem:[#allocation22_spill] sm:$0xff] %v12309_v11  ;;  %v12322_v21 = vpop.f32.mrf.mxu1 }
  0xf4   : > { %17673 = vst [vmem:[#allocation13_spill] sm:$0xff] %v12261_v38  ;;  %v894_v39 = vsel %vm829_vm11, %v699_v22, %v862_v30  ;;  %v703_v40 = vpop.f32.mrf.mxu0  ;;  %v1706_v47 = vrot.slane %v12238_v28, 1  ;;  %v12274_v49 = vsel %vm951_vm6, 0.0, %v958_v35  ;;  %v1713_v57 = vrot.slane %v12261_v38, 1  ;;  %17685 = vst [vmem:[#allocation25_spill] sm:$0xff] %v12322_v21 }
  0xf5   : > { %v893_v41 = vsel %vm828_vm12, %v694_v26, %v861_v36  ;;  %v704_v48 = vadd.f32 %v12201_v52, %v703_v40  ;;  %17675 = vst [vmem:[#allocation15_spill] sm:$0xff] %v12274_v49  ;;  %v962_v55 = vrot.slane %v894_v39, 7  ;;  %vm831_vm13 = vcmp.ge.f32.partialorder %v709_v46, 0.0  ;;  %10744 = vmatprep.mubr.msk.f32.mxu0 %vm1340_vm2, %v12274_v49  ;;  %v12340_v34 = vpop.f32.mrf.mxu1 }
  0xf6   : > { %v10646_v50 = vpop.f32.mrf.mxu0  ;;  %v864_v56 = vmul.f32 %v12203_v54, %v709_v46  ;;  %v961_v58 = vrot.slane %v893_v41, 7  ;;  %v12287_v62 = vsel %vm1697_vm8, %v1705_v44, %v1706_v47  ;;  %v1710_v63 = vrot.slane %v12274_v49, 1  ;;  %17688 = vst [vmem:[#allocation28_spill] sm:$0xff] %v12340_v34 }
  0xf7   : > { %vm830_vm14 = vcmp.ge.f32.partialorder %v704_v48, 0.0  ;;  %v863_v59 = vmul.f32 %v12203_v54, %v704_v48  ;;  %17678 = vst [vmem:[#allocation18_spill] sm:$0xff] %v12287_v62  ;;  %v12291_v0 = vsel %vm1697_vm8, %v1706_v47, %v1708_v53  ;;  %v719_v1 = vadd.f32 %v10646_v50, %v12201_v52  ;;  %10797 = vmatprep.mubr.msk.f32.mxu1 %vm1340_vm2, %v12287_v62 }
  0xf8   : > { %v713_v60 = vpop.f32.mrf.mxu0  ;;  %17679 = vst [vmem:[#allocation19_spill] sm:$0xff] %v12291_v0  ;;  %v896_v2 = vsel %vm831_vm13, %v709_v46, %v864_v56  ;;  %v12297_v4 = vsel %vm951_vm6, %v958_v35, %v959_v25  ;;  %v12301_v7 = vsel %vm951_vm6, %v962_v55, 0.0  ;;  %10798 = vmatmul.mubr.msk.f32.gmra.mxu1 %vm1340_vm2, %v12291_v0  ;;  %v12313_v15 = vsel %vm951_vm6, 0.0, %v961_v58 }
  0xf9   : > { %v895_v3 = vsel %vm830_vm14, %v704_v48, %v863_v59  ;;  %17680 = vst [vmem:[#allocation20_spill] sm:$0xff] %v12297_v4  ;;  %v714_v5 = vadd.f32 %v12201_v52, %v713_v60  ;;  %17681 = vst [vmem:[#allocation21_spill] sm:$0xff] %v12301_v7  ;;  %vm833_vm15 = vcmp.ge.f32.partialorder %v719_v1, 0.0  ;;  %v866_v8 = vmul.f32 %v12203_v54, %v719_v1  ;;  %v12357_v48 = vpop.f32.mrf.mxu1 }
  0xfa   : > { %v10649_v6 = vpop.f32.mrf.mxu0  ;;  %10745 = vmatmul.mubr.msk.f32.gmra.mxu0 %vm1340_vm2, %v12297_v4  ;;  %v1711_v9 = vrot.slane %v12297_v4, 1  ;;  %v964_v13 = vrot.slane %v895_v3, 7  ;;  %17683 = vst [vmem:[#allocation23_spill] sm:$0xff] %v12313_v15  ;;  %v965_v18 = vrot.slane %v896_v2, 7  ;;  %v1715_v23 = vrot.slane %v12313_v15, 1  ;;  %17691 = vst [vmem:[#allocation31_spill] sm:$0xff] %v12357_v48 }
  0xfb   : > { %vm832_vm0 = vcmp.ge.f32.partialorder %v714_v5, 0.0  ;;  %v865_v14 = vmul.f32 %v12203_v54, %v714_v5  ;;  %v12315_v19 = vsel %vm833_vm15, %v719_v1, %v866_v8  ;;  %10747 = vmatprep.mubr.msk.f32.mxu0 %vm1340_vm2, %v12313_v15  ;;  %v1718_v26 = vrot.slane %v12301_v7, 1  ;;  %v12370_v60 = vpop.f32.mrf.mxu1 }
  0xfc   : > { %v723_v16 = vpop.f32.mrf.mxu0  ;;  %v12318_v20 = vsel %vm1697_vm8, %v1710_v63, %v1711_v9  ;;  %v12330_v24 = vsel %vm1697_vm8, %v1711_v9, %v1713_v57  ;;  %v729_v29 = vadd.f32 %v10649_v6, %v12201_v52  ;;  %v12337_v30 = vsel %vm951_vm6, %v961_v58, %v962_v55  ;;  %17694 = vst [vmem:[#allocation34_spill] sm:$0xff] %v12370_v60 }
  0xfd   : > { %17684 = vst [vmem:[#allocation24_spill] sm:$0xff] %v12318_v20  ;;  %v12324_v22 = vsel %vm832_vm0, %v714_v5, %v865_v14  ;;  %10800 = vmatprep.mubr.msk.f32.mxu1 %vm1340_vm2, %v12318_v20  ;;  %17686 = vst [vmem:[#allocation26_spill] sm:$0xff] %v12330_v24  ;;  %v724_v32 = vadd.f32 %v12201_v52, %v723_v16  ;;  %v968_v35 = vrot.slane %v12315_v19, 7  ;;  %v1716_v36 = vrot.slane %v12337_v30, 1  ;;  %v12387_v14 = vpop.f32.mrf.mxu1 }
  0xfe   : > { %v10652_v25 = vpop.f32.mrf.mxu0  ;;  %10801 = vmatmul.mubr.msk.f32.gmra.mxu1 %vm1340_vm2, %v12330_v24  ;;  %17687 = vst [vmem:[#allocation27_spill] sm:$0xff] %v12337_v30  ;;  %10748 = vmatmul.mubr.msk.f32.gmra.mxu0 %vm1340_vm2, %v12337_v30  ;;  %v12347_v39 = vsel %vm951_vm6, 0.0, %v964_v13  ;;  %v12351_v44 = vsel %vm951_vm6, %v965_v18, 0.0  ;;  %v967_v46 = vrot.slane %v12324_v22, 7  ;;  %vm835_vm1 = vcmp.ge.f32.partialorder %v729_v29, 0.0  ;;  %17698 = vst [vmem:[#allocation38_spill] sm:$0xff] %v12387_v14 }
  0xff   : > { %17689 = vst [vmem:[#allocation29_spill] sm:$0xff] %v12347_v39  ;;  %v739_v40 = vadd.f32 %v10652_v25, %v12201_v52  ;;  %17690 = vst [vmem:[#allocation30_spill] sm:$0xff] %v12351_v44  ;;  %v868_v47 = vmul.f32 %v12203_v54, %v729_v29  ;;  %10750 = vmatprep.mubr.msk.f32.mxu0 %vm1340_vm2, %v12347_v39  ;;  %vm834_vm3 = vcmp.ge.f32.partialorder %v724_v32, 0.0  ;;  %v1720_v55 = vrot.slane %v12347_v39, 1 }
 0x100   : > { %v733_v41 = vpop.f32.mrf.mxu0  ;;  %v867_v50 = vmul.f32 %v12203_v54, %v724_v32  ;;  %v12361_v53 = vsel %vm1697_vm8, %v1715_v23, %v1716_v36  ;;  %v12367_v58 = vsel %vm1697_vm8, %v1716_v36, %v1718_v26  ;;  %v12373_v63 = vsel %vm951_vm6, %v968_v35, 0.0  ;;  %v12399_v26 = vpop.f32.mrf.mxu1 }
 0x101   : > { %17692 = vst [vmem:[#allocation32_spill] sm:$0xff] %v12361_v53  ;;  %v900_v57 = vsel %vm835_vm1, %v729_v29, %v868_v47  ;;  %10803 = vmatprep.mubr.msk.f32.mxu1 %vm1340_vm2, %v12361_v53  ;;  %17693 = vst [vmem:[#allocation33_spill] sm:$0xff] %v12367_v58  ;;  %vm837_vm4 = vcmp.ge.f32.partialorder %v739_v40, 0.0  ;;  %v870_v59 = vmul.f32 %v12203_v54, %v739_v40  ;;  %v12385_v9 = vsel %vm951_vm6, 0.0, %v967_v46 }
 0x102   : > { %v10655_v56 = vpop.f32.mrf.mxu0  ;;  %17695 = vst [vmem:[#allocation35_spill] sm:$0xff] %v12373_v63  ;;  %v899_v1 = vsel %vm834_vm3, %v724_v32, %v867_v50  ;;  %10804 = vmatmul.mubr.msk.f32.gmra.mxu1 %vm1340_vm2, %v12367_v58  ;;  %v12378_v2 = vsel %vm951_vm6, %v964_v13, %v965_v18  ;;  %v734_v3 = vadd.f32 %v12201_v52, %v733_v41  ;;  %v971_v6 = vrot.slane %v900_v57, 7 }
 0x103   : > { %17696 = vst [vmem:[#allocation36_spill] sm:$0xff] %v12378_v2  ;;  %10751 = vmatmul.mubr.msk.f32.gmra.mxu0 %vm1340_vm2, %v12378_v2  ;;  %v1721_v8 = vrot.slane %v12378_v2, 1  ;;  %17697 = vst [vmem:[#allocation37_spill] sm:$0xff] %v12385_v9  ;;  %v1723_v16 = vrot.slane %v12351_v44, 1  ;;  %v12390_v19 = vsel %vm837_vm4, %v739_v40, %v870_v59  ;;  %v1728_v22 = vrot.slane %v12373_v63, 1  ;;  %v12417_v59 = vpop.f32.mrf.mxu1 }
 0x104   : > { %v743_v5 = vpop.f32.mrf.mxu0  ;;  %vm836_vm5 = vcmp.ge.f32.partialorder %v734_v3, 0.0  ;;  %v869_v13 = vmul.f32 %v12203_v54, %v734_v3  ;;  %10753 = vmatprep.mubr.msk.f32.mxu0 %vm1340_vm2, %v12385_v9  ;;  %v970_v23 = vrot.slane %v899_v1, 7  ;;  %17700 = vst [vmem:[#allocation40_spill] sm:$0xff] %v12399_v26  ;;  %v1725_v32 = vrot.slane %v12385_v9, 1  ;;  %17704 = vst [vmem:[#allocation44_spill] sm:$0xff] %v12417_v59 }
 0x105   : > { %v12397_v25 = vsel %vm1697_vm8, %v1720_v55, %v1721_v8  ;;  %v12405_v36 = vsel %vm1697_vm8, %v1721_v8, %v1723_v16  ;;  %v749_v40 = vadd.f32 %v10655_v56, %v12201_v52  ;;  %v12409_v47 = vsel %vm951_vm6, %v971_v6, 0.0 }
 0x106   : > { %v10658_v18 = vpop.f32.mrf.mxu0  ;;  %17699 = vst [vmem:[#allocation39_spill] sm:$0xff] %v12397_v25  ;;  %v901_v29 = vsel %vm836_vm5, %v734_v3, %v869_v13  ;;  %10806 = vmatprep.mubr.msk.f32.mxu1 %vm1340_vm2, %v12397_v25  ;;  %17701 = vst [vmem:[#allocation41_spill] sm:$0xff] %v12405_v36  ;;  %v974_v50 = vrot.slane %v12390_v19, 7  ;;  %v12415_v57 = vsel %vm951_vm6, %v967_v46, %v968_v35  ;;  %v12425_v16 = vsel %vm951_vm6, 0.0, %v970_v23  ;;  %v12432_v13 = vpop.f32.mrf.mxu1 }
 0x107   : > { %17702 = vst [vmem:[#allocation42_spill] sm:$0xff] %v12409_v47  ;;  %v973_v55 = vrot.slane %v901_v29, 7  ;;  %10807 = vmatmul.mubr.msk.f32.gmra.mxu1 %vm1340_vm2, %v12405_v36  ;;  %17703 = vst [vmem:[#allocation43_spill] sm:$0xff] %v12415_v57  ;;  %vm839_vm7 = vcmp.ge.f32.partialorder %v749_v40, 0.0  ;;  %v872_v1 = vmul.f32 %v12203_v54, %v749_v40  ;;  %10754 = vmatmul.mubr.msk.f32.gmra.mxu0 %vm1340_vm2, %v12415_v57  ;;  %v1726_v56 = vrot.slane %v12415_v57, 1 }
 0x108   : > { %v753_v41 = vpop.f32.mrf.mxu0  ;;  %v744_v3 = vadd.f32 %v12201_v52, %v743_v5  ;;  %17705 = vst [vmem:[#allocation45_spill] sm:$0xff] %v12425_v16  ;;  %v759_v19 = vadd.f32 %v10658_v18, %v12201_v52  ;;  %v12429_v35 = vsel %vm951_vm6, %v970_v23, %v971_v6  ;;  %17707 = vst [vmem:[#allocation47_spill] sm:$0xff] %v12432_v13  ;;  %v1733_v29 = vrot.slane %v12409_v47, 1 }
 0x109   : > { %17706 = vst [vmem:[#allocation46_spill] sm:$0xff] %v12429_v35  ;;  %v754_v46 = vadd.f32 %v12201_v52, %v753_v41  ;;  %v12437_v5 = vsel %vm1697_vm8, %v1725_v32, %v1726_v56  ;;  %10756 = vmatprep.mubr.msk.f32.mxu0 %vm1340_vm2, %v12425_v16  ;;  %v904_v18 = vsel %vm839_vm7, %v749_v40, %v872_v1  ;;  %v1730_v6 = vrot.slane %v12425_v16, 1  ;;  %v12448_v41 = vpop.f32.mrf.mxu1 }
 0x10a   : > { %v10661_v8 = vpop.f32.mrf.mxu0  ;;  %vm838_vm9 = vcmp.ge.f32.partialorder %v744_v3, 0.0  ;;  %v871_v42 = vmul.f32 %v12203_v54, %v744_v3  ;;  %17708 = vst [vmem:[#allocation48_spill] sm:$0xff] %v12437_v5  ;;  %10809 = vmatprep.mubr.msk.f32.mxu1 %vm1340_vm2, %v12437_v5  ;;  %v12446_v23 = vsel %vm1697_vm8, %v1726_v56, %v1728_v22  ;;  %vm841_vm10 = vcmp.ge.f32.partialorder %v759_v19, 0.0  ;;  %17710 = vst [vmem:[#allocation50_spill] sm:$0xff] %v12448_v41 }
 0x10b   : > { %17709 = vst [vmem:[#allocation49_spill] sm:$0xff] %v12446_v23  ;;  %10810 = vmatmul.mubr.msk.f32.gmra.mxu1 %vm1340_vm2, %v12446_v23  ;;  %v874_v32 = vmul.f32 %v12203_v54, %v759_v19  ;;  %10757 = vmatmul.mubr.msk.f32.gmra.mxu0 %vm1340_vm2, %v12429_v35  ;;  %v1731_v40 = vrot.slane %v12429_v35, 1  ;;  %vm840_vm11 = vcmp.ge.f32.partialorder %v754_v46, 0.0  ;;  %v12457_v26 = vsel %vm951_vm6, %v974_v50, 0.0 }
 0x10c   : > { %v763_v59 = vpop.f32.mrf.mxu0  ;;  %v903_v13 = vsel %vm838_vm9, %v744_v3, %v871_v42  ;;  %17711 = vst [vmem:[#allocation51_spill] sm:$0xff] %v12457_v26  ;;  %v873_v56 = vmul.f32 %v12203_v54, %v754_v46  ;;  %v12461_v42 = vsel %vm951_vm6, 0.0, %v973_v55  ;;  %v12463_v3 = vpop.f32.mrf.mxu1  ;;  %v977_v41 = vrot.slane %v904_v18, 7 }
 0x10d   : > { %v976_v22 = vrot.slane %v903_v13, 7  ;;  %17712 = vst [vmem:[#allocation52_spill] sm:$0xff] %v12461_v42  ;;  %17713 = vst [vmem:[#allocation53_spill] sm:$0xff] %v12463_v3  ;;  %v12465_v14 = vsel %vm841_vm10, %v759_v19, %v874_v32  ;;  %v12468_v60 = vsel %vm1697_vm8, %v1730_v6, %v1731_v40  ;;  %10759 = vmatprep.mubr.msk.f32.mxu0 %vm1340_vm2, %v12461_v42  ;;  %v1735_v13 = vrot.slane %v12461_v42, 1 }
 0x10e   : > { %v10664_v1 = vpop.f32.mrf.mxu0  ;;  %17714 = vst [vmem:[#allocation54_spill] sm:$0xff] %v12468_v60  ;;  %v12472_v34 = vsel %vm840_vm11, %v754_v46, %v873_v56  ;;  %10812 = vmatprep.mubr.msk.f32.mxu1 %vm1340_vm2, %v12468_v60  ;;  %v12478_v21 = vsel %vm1697_vm8, %v1731_v40, %v1733_v29  ;;  %v12480_v18 = vpop.f32.mrf.mxu1  ;;  %v1738_v19 = vrot.slane %v12457_v26, 1  ;;  %v769_v6 = vadd.f32 %v10661_v8, %v12201_v52 }
 0x10f   : > { %17715 = vst [vmem:[#allocation55_spill] sm:$0xff] %v12478_v21  ;;  %17716 = vst [vmem:[#allocation56_spill] sm:$0xff] %v12480_v18  ;;  %10813 = vmatmul.mubr.msk.f32.gmra.mxu1 %vm1340_vm2, %v12478_v21  ;;  %v12487_v46 = vsel %vm951_vm6, %v973_v55, %v974_v50  ;;  %v764_v32 = vadd.f32 %v12201_v52, %v763_v59  ;;  %v980_v3 = vrot.slane %v12465_v14, 7  ;;  %v12495_v40 = vsel %vm951_vm6, 0.0, %v976_v22 }
 0x110   : > { %v773_v48 = vpop.f32.mrf.mxu0  ;;  %17717 = vst [vmem:[#allocation57_spill] sm:$0xff] %v12487_v46  ;;  %10760 = vmatmul.mubr.msk.f32.gmra.mxu0 %vm1340_vm2, %v12487_v46  ;;  %v1736_v29 = vrot.slane %v12487_v46, 1  ;;  %17718 = vst [vmem:[#allocation58_spill] sm:$0xff] %v12495_v40  ;;  %v779_v11 = vadd.f32 %v10664_v1, %v12201_v52  ;;  %v12498_v61 = vpop.f32.mrf.mxu1  ;;  %v12501_v50 = vsel %vm951_vm6, %v977_v41, 0.0  ;;  %v979_v55 = vrot.slane %v12472_v34, 7 }
 0x111   : > { %17719 = vst [vmem:[#allocation59_spill] sm:$0xff] %v12498_v61  ;;  %17720 = vst [vmem:[#allocation60_spill] sm:$0xff] %v12501_v50  ;;  %vm843_vm12 = vcmp.ge.f32.partialorder %v769_v6, 0.0  ;;  %v876_v14 = vmul.f32 %v12203_v54, %v769_v6  ;;  %10762 = vmatprep.mubr.msk.f32.mxu0 %vm1340_vm2, %v12495_v40  ;;  %vm842_vm13 = vcmp.ge.f32.partialorder %v764_v32, 0.0  ;;  %v875_v8 = vmul.f32 %v12203_v54, %v764_v32 }
 0x112   : > { %v10667_v56 = vpop.f32.mrf.mxu0  ;;  %v12509_v51 = vsel %vm1697_vm8, %v1735_v13, %v1736_v29  ;;  %v1740_v1 = vrot.slane %v12495_v40, 1  ;;  %v12512_v61 = vpop.f32.mrf.mxu1  ;;  %v12517_v34 = vsel %vm1697_vm8, %v1736_v29, %v1738_v19  ;;  %vm845_vm14 = vcmp.ge.f32.partialorder %v779_v11, 0.0 }
 0x113   : > { %17721 = vst [vmem:[#allocation61_spill] sm:$0xff] %v12509_v51  ;;  %17722 = vst [vmem:[#allocation62_spill] sm:$0xff] %v12512_v61  ;;  %v908_v26 = vsel %vm843_vm12, %v769_v6, %v876_v14  ;;  %10815 = vmatprep.mubr.msk.f32.mxu1 %vm1340_vm2, %v12509_v51  ;;  %v878_v47 = vmul.f32 %v12203_v54, %v779_v11  ;;  %v12521_v44 = vsel %vm951_vm6, %v980_v3, 0.0  ;;  %v12535_v38 = vsel %vm951_vm6, 0.0, %v979_v55 }
 0x114   : > { %v783_v59 = vpop.f32.mrf.mxu0  ;;  %17723 = vst [vmem:[#allocation63_spill] sm:$0xff] %v12517_v34  ;;  %17724 = vst [vmem:[#allocation64_spill] sm:$0xff] %v12521_v44  ;;  %v907_v13 = vsel %vm842_vm13, %v764_v32, %v875_v8  ;;  %10816 = vmatmul.mubr.msk.f32.gmra.mxu1 %vm1340_vm2, %v12517_v34  ;;  %v12526_v7 = vsel %vm951_vm6, %v976_v22, %v977_v41  ;;  %v774_v6 = vadd.f32 %v12201_v52, %v773_v48  ;;  %v12529_v14 = vpop.f32.mrf.mxu1  ;;  %vm3520_vm11 = vcmask 1045504  }
 0x115   : > { %17725 = vst [vmem:[#allocation65_spill] sm:$0xff] %v12526_v7  ;;  %17726 = vst [vmem:[#allocation66_spill] sm:$0xff] %v12529_v14  ;;  %v983_v19 = vrot.slane %v908_v26, 7  ;;  %10763 = vmatmul.mubr.msk.f32.gmra.mxu0 %vm1340_vm2, %v12526_v7  ;;  %v1741_v29 = vrot.slane %v12526_v7, 1  ;;  %v1743_v32 = vrot.slane %v12501_v50, 1  ;;  %v12538_v8 = vsel %vm845_vm14, %v779_v11, %v878_v47 }
 0x116   : > { %v10670_v63 = vpop.f32.mrf.mxu0  ;;  %17727 = vst [vmem:[#allocation67_spill] sm:$0xff] %v12535_v38  ;;  %vm844_vm15 = vcmp.ge.f32.partialorder %v774_v6, 0.0  ;;  %v877_v41 = vmul.f32 %v12203_v54, %v774_v6  ;;  %10765 = vmatprep.mubr.msk.f32.mxu0 %vm1340_vm2, %v12535_v38  ;;  %v12543_v48 = vpop.f32.mrf.mxu1  ;;  %v1748_v26 = vrot.slane %v12521_v44, 1  ;;  %v982_v22 = vrot.slane %v907_v13, 7 }
 0x117   : > { %17728 = vst [vmem:[#allocation68_spill] sm:$0xff] %v12543_v48  ;;  %v12547_v14 = vsel %vm1697_vm8, %v1740_v1, %v1741_v29  ;;  %v1745_v11 = vrot.slane %v12535_v38, 1  ;;  %v12553_v47 = vsel %vm1697_vm8, %v1741_v29, %v1743_v32  ;;  %v789_v50 = vadd.f32 %v10667_v56, %v12201_v52 }
 0x118   : > { %17729 = vst [vmem:[#allocation69_spill] sm:$0xff] %v12547_v14  ;;  %v793_v37 = vpop.f32.mrf.mxu0  ;;  %v909_v17 = vsel %vm844_vm15, %v774_v6, %v877_v41  ;;  %10818 = vmatprep.mubr.msk.f32.mxu1 %vm1340_vm2, %v12547_v14  ;;  %17730 = vst [vmem:[#allocation70_spill] sm:$0xff] %v12553_v47  ;;  %v12556_v43 = vpop.f32.mrf.mxu1  ;;  %v12559_v44 = vsel %vm951_vm6, %v983_v19, 0.0  ;;  %v986_v1 = vrot.slane %v12538_v8, 7  ;;  %v12565_v6 = vsel %vm951_vm6, %v979_v55, %v980_v3 }
 0x119   : > { %17731 = vst [vmem:[#allocation71_spill] sm:$0xff] %v12556_v43  ;;  %17732 = vst [vmem:[#allocation72_spill] sm:$0xff] %v12559_v44  ;;  %v985_v13 = vrot.slane %v909_v17, 7  ;;  %10819 = vmatmul.mubr.msk.f32.gmra.mxu1 %vm1340_vm2, %v12553_v47  ;;  %vm847_vm0 = vcmp.ge.f32.partialorder %v789_v50, 0.0  ;;  %v880_v29 = vmul.f32 %v12203_v54, %v789_v50  ;;  %10766 = vmatmul.mubr.msk.f32.gmra.mxu0 %vm1340_vm2, %v12565_v6  ;;  %v1746_v56 = vrot.slane %v12565_v6, 1 }
 0x11a   : > { %17733 = vst [vmem:[#allocation73_spill] sm:$0xff] %v12565_v6  ;;  %v784_v32 = vadd.f32 %v12201_v52, %v783_v59  ;;  %v12572_v41 = vpop.f32.mrf.mxu1  ;;  %v12575_v17 = vsel %vm951_vm6, 0.0, %v982_v22  ;;  %v799_v8 = vadd.f32 %v10670_v63, %v12201_v52  ;;  %v12579_v3 = vsel %vm951_vm6, %v982_v22, %v983_v19  ;;  %v10673_v43 = vpop.f32.mrf.mxu0 }
 0x11b   : > { %17734 = vst [vmem:[#allocation74_spill] sm:$0xff] %v12572_v41  ;;  %17735 = vst [vmem:[#allocation75_spill] sm:$0xff] %v12575_v17  ;;  %v794_v55 = vadd.f32 %v12201_v52, %v793_v37  ;;  %v912_v48 = vsel %vm847_vm0, %v789_v50, %v880_v29  ;;  %v12584_v18 = vsel %vm1697_vm8, %v1745_v11, %v1746_v56  ;;  %10768 = vmatprep.mubr.msk.f32.mxu0 %vm1340_vm2, %v12575_v17 }
 0x11c   : > { %17736 = vst [vmem:[#allocation76_spill] sm:$0xff] %v12579_v3  ;;  %vm846_vm1 = vcmp.ge.f32.partialorder %v784_v32, 0.0  ;;  %v879_v61 = vmul.f32 %v12203_v54, %v784_v32  ;;  %17737 = vst [vmem:[#allocation77_spill] sm:$0xff] %v12584_v18  ;;  %v12588_v59 = vpop.f32.mrf.mxu1  ;;  %v989_v41 = vrot.slane %v912_v48, 7  ;;  %10821 = vmatprep.mubr.msk.f32.mxu1 %vm1340_vm2, %v12584_v18  ;;  %v1750_v63 = vrot.slane %v12575_v17, 1 }
 0x11d   : > { %17738 = vst [vmem:[#allocation78_spill] sm:$0xff] %v12588_v59  ;;  %v12594_v37 = vsel %vm1697_vm8, %v1746_v56, %v1748_v26  ;;  %vm849_vm3 = vcmp.ge.f32.partialorder %v799_v8, 0.0  ;;  %v882_v19 = vmul.f32 %v12203_v54, %v799_v8  ;;  %10769 = vmatmul.mubr.msk.f32.gmra.mxu0 %vm1340_vm2, %v12579_v3  ;;  %v1751_v48 = vrot.slane %v12579_v3, 1  ;;  %v803_v56 = vpop.f32.mrf.mxu0 }
 0x11e   : > { %17739 = vst [vmem:[#allocation79_spill] sm:$0xff] %v12594_v37  ;;  %v911_v50 = vsel %vm846_vm1, %v784_v32, %v879_v61  ;;  %10822 = vmatmul.mubr.msk.f32.gmra.mxu1 %vm1340_vm2, %v12594_v37  ;;  %vm848_vm4 = vcmp.ge.f32.partialorder %v794_v55, 0.0  ;;  %v12602_v22 = vpop.f32.mrf.mxu1  ;;  %v1753_v11 = vrot.slane %v12559_v44, 1  ;;  %v881_v26 = vmul.f32 %v12203_v54, %v794_v55 }
 0x11f   : > { %17740 = vst [vmem:[#allocation80_spill] sm:$0xff] %v12602_v22  ;;  %v988_v29 = vrot.slane %v911_v50, 7  ;;  %v12607_v61 = vsel %vm951_vm6, 0.0, %v985_v13  ;;  %v12610_v32 = vsel %vm951_vm6, %v986_v1, 0.0  ;;  %v12613_v59 = vsel %vm951_vm6, %v989_v41, 0.0 }
 0x120   : > { %17741 = vst [vmem:[#allocation81_spill] sm:$0xff] %v12607_v61  ;;  %17742 = vst [vmem:[#allocation82_spill] sm:$0xff] %v12610_v32  ;;  %v914_v37 = vsel %vm849_vm3, %v799_v8, %v882_v19  ;;  %v12616_v3 = vsel %vm1697_vm8, %v1750_v63, %v1751_v48  ;;  %10771 = vmatprep.mubr.msk.f32.mxu0 %vm1340_vm2, %v12607_v61  ;;  %v12620_v50 = vpop.f32.mrf.mxu1  ;;  %v913_v22 = vsel %vm848_vm4, %v794_v55, %v881_v26 }
 0x121   : > { %17743 = vst [vmem:[#allocation83_spill] sm:$0xff] %v12613_v59  ;;  %17744 = vst [vmem:[#allocation84_spill] sm:$0xff] %v12616_v3  ;;  %v992_v44 = vrot.slane %v914_v37, 7  ;;  %10824 = vmatprep.mubr.msk.f32.mxu1 %vm1340_vm2, %v12616_v3  ;;  %v1755_v17 = vrot.slane %v12607_v61, 1  ;;  %v12626_v18 = vsel %vm1697_vm8, %v1751_v48, %v1753_v11  ;;  %v991_v6 = vrot.slane %v913_v22, 7 }
 0x122   : > { %17745 = vst [vmem:[#allocation85_spill] sm:$0xff] %v12620_v50  ;;  %17746 = vst [vmem:[#allocation86_spill] sm:$0xff] %v12626_v18  ;;  %10825 = vmatmul.mubr.msk.f32.gmra.mxu1 %vm1340_vm2, %v12626_v18  ;;  %v809_v8 = vadd.f32 %v10673_v43, %v12201_v52  ;;  %v12632_v63 = vsel %vm951_vm6, %v985_v13, %v986_v1  ;;  %v804_v37 = vadd.f32 %v12201_v52, %v803_v56  ;;  %v12635_v55 = vpop.f32.mrf.mxu1 }
 0x123   : > { %17747 = vst [vmem:[#allocation87_spill] sm:$0xff] %v12632_v63  ;;  %17748 = vst [vmem:[#allocation88_spill] sm:$0xff] %v12635_v55  ;;  %v1758_v19 = vrot.slane %v12610_v32, 1  ;;  %10772 = vmatmul.mubr.msk.f32.gmra.mxu0 %vm1340_vm2, %v12632_v63  ;;  %v1756_v48 = vrot.slane %v12632_v63, 1  ;;  %v12642_v22 = vsel %vm951_vm6, 0.0, %v988_v29  ;;  %v12645_v11 = vsel %vm951_vm6, %v988_v29, %v989_v41 }
 0x124   : > { %17749 = vst [vmem:[#allocation89_spill] sm:$0xff] %v12642_v22  ;;  %17750 = vst [vmem:[#allocation90_spill] sm:$0xff] %v12645_v11  ;;  %v1763_v43 = vrot.slane %v12613_v59, 1  ;;  %v12649_v1 = vsel %vm951_vm6, %v992_v44, 0.0  ;;  %vm851_vm5 = vcmp.ge.f32.partialorder %v809_v8, 0.0  ;;  %v884_v13 = vmul.f32 %v12203_v54, %v809_v8  ;;  %10774 = vmatprep.mubr.msk.f32.mxu0 %vm1340_vm2, %v12642_v22  ;;  %v12654_v26 = vpop.f32.mrf.mxu1 }
 0x125   : > { %17751 = vst [vmem:[#allocation91_spill] sm:$0xff] %v12649_v1  ;;  %17752 = vst [vmem:[#allocation92_spill] sm:$0xff] %v12654_v26  ;;  %vm850_vm7 = vcmp.ge.f32.partialorder %v804_v37, 0.0  ;;  %v883_v56 = vmul.f32 %v12203_v54, %v804_v37  ;;  %v12658_v50 = vsel %vm1697_vm8, %v1755_v17, %v1756_v48  ;;  %v1760_v41 = vrot.slane %v12642_v22, 1 }
 0x126   : > { %17753 = vst [vmem:[#allocation93_spill] sm:$0xff] %v12658_v50  ;;  %v916_v29 = vsel %vm851_vm5, %v809_v8, %v884_v13  ;;  %10827 = vmatprep.mubr.msk.f32.mxu1 %vm1340_vm2, %v12658_v50  ;;  %v12664_v59 = vsel %vm1697_vm8, %v1756_v48, %v1758_v19  ;;  %v1761_v32 = vrot.slane %v12645_v11, 1  ;;  %v12668_v55 = vsel %vm951_vm6, 0.0, %v991_v6  ;;  %v12670_v26 = vpop.f32.mrf.mxu1 }
 0x127   : > { %17754 = vst [vmem:[#allocation94_spill] sm:$0xff] %v12664_v59  ;;  %17755 = vst [vmem:[#allocation95_spill] sm:$0xff] %v12668_v55  ;;  %v995_v63 = vrot.slane %v916_v29, 7  ;;  %v915_v18 = vsel %vm850_vm7, %v804_v37, %v883_v56  ;;  %10828 = vmatmul.mubr.msk.f32.gmra.mxu1 %vm1340_vm2, %v12664_v59  ;;  %10775 = vmatmul.mubr.msk.f32.gmra.mxu0 %vm1340_vm2, %v12645_v11  ;;  %v1765_v17 = vrot.slane %v12668_v55, 1 }
 0x128   : > { %17756 = vst [vmem:[#allocation96_spill] sm:$0xff] %v12670_v26  ;;  %v12678_v8 = vsel %vm951_vm6, %v991_v6, %v992_v44  ;;  %v994_v19 = vrot.slane %v915_v18, 7  ;;  %v12681_v48 = vsel %vm1697_vm8, %v1760_v41, %v1761_v32  ;;  %10777 = vmatprep.mubr.msk.f32.mxu0 %vm1340_vm2, %v12668_v55  ;;  %v12686_v37 = vsel %vm1697_vm8, %v1761_v32, %v1763_v43  ;;  %v12689_v56 = vpop.f32.mrf.mxu1 }
 0x129   : > { %17757 = vst [vmem:[#allocation97_spill] sm:$0xff] %v12678_v8  ;;  %17758 = vst [vmem:[#allocation98_spill] sm:$0xff] %v12681_v48  ;;  %v1766_v13 = vrot.slane %v12678_v8, 1  ;;  %10830 = vmatprep.mubr.msk.f32.mxu1 %vm1340_vm2, %v12681_v48  ;;  %v1768_v44 = vrot.slane %v12649_v1, 1  ;;  %v12703_v32 = vsel %vm951_vm6, %v995_v63, 0.0 }
 0x12a   : > { %17759 = vst [vmem:[#allocation99_spill] sm:$0xff] %v12686_v37  ;;  %17760 = vst [vmem:[#allocation100_spill] sm:$0xff] %v12689_v56  ;;  %v12698_v6 = vsel %vm951_vm6, 0.0, %v994_v19  ;;  %v12700_v41 = vpop.f32.mrf.mxu1  ;;  %v12711_v29 = vsel %vm951_vm6, %v994_v19, %v995_v63  ;;  %v1773_v26 = vrot.slane %v12703_v32, 1  ;;  %v10676_v63 = vpop.f32.mrf.mxu0 }
 0x12b   : > { %v12695_v18 = vsel %vm1697_vm8, %v1765_v17, %v1766_v13  ;;  %17762 = vst [vmem:[#allocation102_spill] sm:$0xff] %v12698_v6  ;;  %17763 = vst [vmem:[#allocation103_spill] sm:$0xff] %v12700_v41  ;;  %10831 = vmatmul.mubr.msk.f32.gmra.mxu1 %vm1340_vm2, %v12686_v37  ;;  %10778 = vmatmul.mubr.msk.f32.gmra.mxu0 %vm1340_vm2, %v12678_v8  ;;  %v1770_v43 = vrot.slane %v12698_v6, 1  ;;  %v12718_v17 = vsel %vm1697_vm8, %v1766_v13, %v1768_v44 }
 0x12c   : > { %17761 = vst [vmem:[#allocation101_spill] sm:$0xff] %v12695_v18  ;;  %17764 = vst [vmem:[#allocation104_spill] sm:$0xff] %v12703_v32  ;;  %10833 = vmatprep.mubr.msk.f32.mxu1 %vm1340_vm2, %v12695_v18  ;;  %10780 = vmatprep.mubr.msk.f32.mxu0 %vm1340_vm2, %v12698_v6  ;;  %v1771_v1 = vrot.slane %v12711_v29, 1  ;;  %v12721_v41 = vpop.f32.mrf.mxu1  ;;  %v813_v44 = vpop.f32.mrf.mxu0  ;;  %v819_v32 = vadd.f32 %v10676_v63, %v12201_v52 }
 0x12d   : > { %17765 = vst [vmem:[#allocation105_spill] sm:$0xff] %v12711_v29  ;;  %17766 = vst [vmem:[#allocation106_spill] sm:$0xff] %v12718_v17 }
 0x12e   : > { %v12725_v56 = vsel %vm1697_vm8, %v1770_v43, %v1771_v1  ;;  %v12727_v19 = vpop.f32.mrf.mxu1  ;;  %v12738_v13 = vsel %vm1697_vm8, %v1771_v1, %v1773_v26  ;;  %v12755_v26 = vld [vmem:[%s17292_s6] ss:$0 sm:$0xff]  ;;  %v886_v63 = vmul.f32 %v12203_v54, %v819_v32  ;;  %vm853_vm9 = vcmp.ge.f32.partialorder %v819_v32, 0.0 }
 0x12f   : > { %17767 = vst [vmem:[#allocation107_spill] sm:$0xff] %v12725_v56  ;;  %10834 = vmatmul.mubr.msk.f32.gmra.mxu1 %vm1340_vm2, %v12718_v17  ;;  %10781 = vmatmul.mubr.msk.f32.gmra.mxu0 %vm1340_vm2, %v12711_v29  ;;  %17768 = vst [vmem:[#allocation108_spill] sm:$0xff] %v12738_v13 }
 0x130   : > { %10847 = vmatprep.mubr.msk.f32.mxu0 %vm1340_vm2, %v12215_v10  ;;  %10836 = vmatprep.mubr.msk.f32.mxu1 %vm1340_vm2, %v12725_v56  ;;  %v10726_v43 = vpop.f32.mrf.mxu1  ;;  %v814_v10 = vadd.f32 %v12201_v52, %v813_v44  ;;  %17769 = vst [vmem:[#allocation109_spill] sm:$0xff] %v12755_v26  ;;  %v12772_v52 = vld [vmem:[%s17296_s10] ss:$0 sm:$0xff]  ;;  %v10737_v44 = vpop.f32.mrf.mxu0 }
 0x132   : > { %v12750_v1 = vpop.f32.mrf.mxu1  ;;  %vm852_vm10 = vcmp.ge.f32.partialorder %v814_v10, 0.0 }
 0x133   : > { %10837 = vmatmul.mubr.msk.f32.gmra.mxu1 %vm1340_vm2, %v12738_v13  ;;  %10848 = vmatmul.mubr.msk.f32.vlgmr.msra.gmra.mxu0 %vm1340_vm2, %v12221_v12  ;;  %v12777_v12 = vadd.f32 %v10726_v43, %v12772_v52  ;;  %v12796_v43 = vld [vmem:[%s17293_s7] sm:$0xff] }
 0x134   : > { %10903 = vmatprep.mubr.msk.f32.mxu1 %vm1340_vm2, %v12242_v31  ;;  %10850 = vmatprep.mubr.msk.f32.mxu0 %vm1340_vm2, %v12235_v27  ;;  %v9324_v27 = vld [vmem:[%s17291_s5 + $0x90] sm:$0xff] }
 0x135   : > { %10951 = vmatprep.subr.mxu0 %v12796_v43 }
 0x136   : > { %10952 = vmatpush3.msra.mxu0 %v12796_v43 }
 0x137   : > { %10904 = vmatmul.mubr.msk.f32.vlgmr.msra.gmra.mxu1 %vm1340_vm2, %v12266_v45  ;;  %10851 = vmatmul.mubr.msk.f32.gmra.mxu0 %vm1340_vm2, %v12238_v28  ;;  %v885_v28 = vmul.f32 %v12203_v54, %v814_v10  ;;  %v1651_v45 = vadd.f32 %v10737_v44, %v12755_v26  ;;  %v9323_v54 = vld [vmem:[%s17291_s5 + $0x88] sm:$0xff]  ;;  %v13078_v26 = vld [vmem:[%s12919_s16 + $0x90] sm:$0xff] }
 0x138   : > { %10906 = vmatprep.mubr.msk.f32.mxu1 %vm1340_vm2, %v12287_v62  ;;  %10853 = vmatprep.mubr.msk.f32.mxu0 %vm1340_vm2, %v12274_v49  ;;  %v10793_v62 = vpop.f32.mrf.mxu1  ;;  %v918_v49 = vsel %vm853_vm9, %v819_v32, %v886_v63 }
 0x139   : > { %11002 = vmatpush3.msra.mxu1 %v12249_v33  ;;  %v12787_v33 = vadd.f32 %v10793_v62, %v1651_v45  ;;  %v12798_v44 = vsel %vm852_vm10, %v814_v10, %v885_v28  ;;  %v998_v32 = vrot.slane %v918_v49, 7  ;;  %v9322_v45 = vld [vmem:[%s17291_s5 + $0x80] sm:$0xff]  ;;  %v12824_v28 = vld [vmem:[%s17291_s5 + $0xd8] sm:$0xff] }
 0x13a   : > { %11003 = vmatprep.subr.mxu1 %v9324_v27  ;;  %v997_v10 = vrot.slane %v12798_v44, 7  ;;  %v17773_v44 = vld [vmem:[#allocation73_spill] sm:$0xff] }
 0x13b   : > { %10907 = vmatmul.mubr.msk.f32.gmra.mxu1 %vm1340_vm2, %v12291_v0  ;;  %10854 = vmatmul.mubr.msk.f32.gmra.mxu0 %vm1340_vm2, %v12297_v4  ;;  %17770 = vst [vmem:[#allocation110_spill] sm:$0xff] %v12787_v33  ;;  %v13043_v4 = vld [vmem:[%s12919_s16 + $0xf8] sm:$0xff] }
 0x13c   : > { %10909 = vmatprep.mubr.msk.f32.mxu1 %vm1340_vm2, %v12318_v20  ;;  %10856 = vmatprep.mubr.msk.f32.mxu0 %vm1340_vm2, %v12313_v15  ;;  %v12831_v49 = vsel %vm951_vm6, %v997_v10, %v998_v32  ;;  %v17811_v15 = vld [vmem:[#allocation103_spill] sm:$0xff] }
 0x13d   : > { %11004 = vmatpush3.msra.mxu1 %v9324_v27  ;;  %v12815_v27 = vsel %vm951_vm6, %v998_v32, 0.0  ;;  %17771 = vst [vmem:[#allocation111_spill] sm:$0xff] %v12831_v49  ;;  %v17345_v63 = vrot.slane %v12831_v49, 2  ;;  %v17774_v32 = vld [vmem:[#allocation77_spill] sm:$0xff] }
 0x13e   : > { %11005 = vmatprep.subr.mxu1 %v9323_v54  ;;  %v4187_v62 = vrot.slane %v12815_v27, 2 }
 0x13f   : > { %10910 = vmatmul.mubr.msk.f32.gmra.mxu1 %vm1340_vm2, %v12330_v24  ;;  %10857 = vmatmul.mubr.msk.f32.gmra.mxu0 %vm1340_vm2, %v12337_v30  ;;  %v17809_v30 = vld [vmem:[#allocation96_spill] sm:$0xff] }
 0x140   : > { %10912 = vmatprep.mubr.msk.f32.mxu1 %vm1340_vm2, %v12361_v53  ;;  %10859 = vmatprep.mubr.msk.f32.mxu0 %vm1340_vm2, %v12347_v39 }
 0x141   : > { %11006 = vmatpush3.msra.mxu1 %v9323_v54  ;;  %v12847_v54 = vsel %vm3520_vm11, %v17345_v63, %v4187_v62  ;;  %v1300_v62 = vlaneseq  ;;  %v17776_v63 = vld [vmem:[#allocation79_spill] sm:$0xff] }
 0x142   : > { %11007 = vmatprep.subr.mxu1 %v9322_v45  ;;  %17772 = vst [vmem:[#allocation112_spill] sm:$0xff] %v12847_v54  ;;  %v17777_v54 = vld [vmem:[#allocation76_spill] sm:$0xff] }
 0x143   : > { %10913 = vmatmul.mubr.msk.f32.gmra.mxu1 %vm1340_vm2, %v12367_v58  ;;  %10860 = vmatmul.mubr.msk.f32.gmra.mxu0 %vm1340_vm2, %v12378_v2  ;;  %v17807_v2 = vld [vmem:[#allocation88_spill] sm:$0xff] }
 0x144   : > { %10915 = vmatprep.mubr.msk.f32.mxu1 %vm1340_vm2, %v12397_v25  ;;  %10862 = vmatprep.mubr.msk.f32.mxu0 %vm1340_vm2, %v12385_v9  ;;  %v13023_v39 = vadd.f32 %v12772_v52, %v17807_v2  ;;  %v13040_v2 = vadd.f32 %v12772_v52, %v12750_v1  ;;  %v13063_v1 = vld [vmem:[%s12919_s16 + $0x80] sm:$0xff] }
 0x145   : > { %11008 = vmatpush3.msra.mxu1 %v9322_v45  ;;  %v17775_v45 = vld [vmem:[#allocation75_spill] sm:$0xff] }
 0x146   : > { %11113 = vmatprep.subr.mxu1 %v12824_v28  ;;  %17808 = vst [vmem:[#allocation88_spill] sm:$0xff] %v13023_v39  ;;  %17814 = vst [vmem:[#allocation126_spill] sm:$0xff] %v13040_v2 }
 0x147   : > { %10916 = vmatmul.mubr.msk.f32.gmra.mxu1 %vm1340_vm2, %v12405_v36  ;;  %10863 = vmatmul.mubr.msk.f32.gmra.mxu0 %vm1340_vm2, %v12415_v57 }
 0x148   : > { %10918 = vmatprep.mubr.msk.f32.mxu1 %vm1340_vm2, %v12437_v5  ;;  %10865 = vmatprep.mubr.msk.f32.mxu0 %vm1340_vm2, %v12425_v16 }
 0x14b   : > { %10919 = vmatmul.mubr.msk.f32.gmra.mxu1 %vm1340_vm2, %v12446_v23  ;;  %10866 = vmatmul.mubr.msk.f32.gmra.mxu0 %vm1340_vm2, %v12429_v35 }
 0x14c   : > { %10921 = vmatprep.mubr.msk.f32.mxu1 %vm1340_vm2, %v12468_v60  ;;  %10868 = vmatprep.mubr.msk.f32.mxu0 %vm1340_vm2, %v12461_v42  ;;  %v12989_v42 = vld [vmem:[%s12919_s16 + $0xe8] sm:$0xff] }
 0x14f   : > { %10922 = vmatmul.mubr.msk.f32.gmra.mxu1 %vm1340_vm2, %v12478_v21  ;;  %10869 = vmatmul.mubr.msk.f32.gmra.mxu0 %vm1340_vm2, %v12487_v46 }
 0x150   : > { %10924 = vmatprep.mubr.msk.f32.mxu1 %vm1340_vm2, %v12509_v51  ;;  %10871 = vmatprep.mubr.msk.f32.mxu0 %vm1340_vm2, %v12495_v40  ;;  %v12958_v40 = vld [vmem:[%s12919_s16 + $0xd8] sm:$0xff] }
 0x153   : > { %10925 = vmatmul.mubr.msk.f32.gmra.mxu1 %vm1340_vm2, %v12517_v34  ;;  %10872 = vmatmul.mubr.msk.f32.gmra.mxu0 %vm1340_vm2, %v12526_v7  ;;  %v17779_v7 = vld [vmem:[#allocation87_spill] sm:$0xff] }
 0x154   : > { %10927 = vmatprep.mubr.msk.f32.mxu1 %vm1340_vm2, %v12547_v14  ;;  %10874 = vmatprep.mubr.msk.f32.mxu0 %vm1340_vm2, %v12535_v38  ;;  %v17778_v38 = vld [vmem:[#allocation86_spill] sm:$0xff] }
 0x157   : > { %10928 = vmatmul.mubr.msk.f32.gmra.mxu1 %vm1340_vm2, %v12553_v47  ;;  %10875 = vmatmul.mubr.msk.f32.gmra.mxu0 %vm1340_vm2, %v17773_v44  ;;  %v1301_v44 = vshrl.u32 %v1300_v62, 7 }
 0x158   : > { %10930 = vmatprep.mubr.msk.f32.mxu1 %vm1340_vm2, %v17774_v32  ;;  %10877 = vmatprep.mubr.msk.f32.mxu0 %vm1340_vm2, %v17775_v45  ;;  %v2370_v45 = vrot.slane %v12815_v27, 1 }
 0x159   : > { %v13017_v9 = vmul.u32 2, %v1301_v44 }
 0x15b   : > { %10931 = vmatmul.mubr.msk.f32.gmra.mxu1 %vm1340_vm2, %v17776_v63  ;;  %10878 = vmatmul.mubr.msk.f32.gmra.mxu0 %vm1340_vm2, %v17777_v54  ;;  %v1302_v54 = vadd.s32 8, %v1301_v44  ;;  %17805 = vst [vmem:[#allocation124_spill] sm:$0xff] %v13017_v9  ;;  %v13036_v44 = vadd.f32 %v12772_v52, %v12727_v19  ;;  %v13049_v33 = vadd.s32 384, %v13017_v9  ;;  %v9396_v19 = vld [vmem:[%s17291_s5 + $0xd0] sm:$0xff]  ;;  %v13138_v32 = vadd.s32 960, %v13017_v9 }
 0x15c   : > { %10933 = vmatprep.mubr.msk.f32.mxu1 %vm1340_vm2, %v12616_v3  ;;  %10880 = vmatprep.mubr.msk.f32.mxu0 %vm1340_vm2, %v12607_v61  ;;  %v9394_v3 = vld [vmem:[%s17291_s5 + $0xc0] sm:$0xff]  ;;  %v13135_v63 = vld [vmem:[%s12919_s16 + $0xf0] sm:$0xff] }
 0x15d   : > { %v12905_v62 = vmul.u32 2, %v1302_v54  ;;  %v12926_v54 = vsel %vm951_vm6, 0.0, %v997_v10  ;;  %v17785_v10 = vld [vmem:[#allocation100_spill] sm:$0xff]  ;;  %17813 = vst [vmem:[#allocation125_spill] sm:$0xff] %v13036_v44  ;;  %17815 = vst [vmem:[#allocation127_spill] sm:$0xff] %v13049_v33 }
 0x15e   : > { %17783 = vst [vmem:[#allocation114_spill] sm:$0xff] %v12926_v54  ;;  %17828 = vst [vmem:[#allocation140_spill] sm:$0xff] %v13138_v32 }
 0x15f   : > { %10934 = vmatmul.mubr.msk.f32.gmra.mxu1 %vm1340_vm2, %v17778_v38  ;;  %10881 = vmatmul.mubr.msk.f32.gmra.mxu0 %vm1340_vm2, %v17779_v7  ;;  %17780 = vst [vmem:[#allocation113_spill] sm:$0xff] %v12905_v62 }
 0x160   : > { %10936 = vmatprep.mubr.msk.f32.mxu1 %vm1340_vm2, %v12658_v50  ;;  %10883 = vmatprep.mubr.msk.f32.mxu0 %vm1340_vm2, %v12642_v22  ;;  %v17781_v22 = vld [vmem:[#allocation92_spill] sm:$0xff] }
 0x161   : > { %v12913_v7 = vadd.f32 %v17781_v22, %v12772_v52  ;;  %v12932_v22 = vld [vmem:[%s12919_s16 + $0xc8] sm:$0xff] }
 0x163   : > { %10937 = vmatmul.mubr.msk.f32.gmra.mxu1 %vm1340_vm2, %v12664_v59  ;;  %10884 = vmatmul.mubr.msk.f32.gmra.mxu0 %vm1340_vm2, %v12645_v11  ;;  %17782 = vst [vmem:[#allocation92_spill] sm:$0xff] %v12913_v7  ;;  %v12944_v11 = vadd.f32 %v17785_v10, %v12772_v52  ;;  %v13108_v59 = vadd.s32 832, %v13017_v9 }
 0x164   : > { %10939 = vmatprep.mubr.msk.f32.mxu1 %vm1340_vm2, %v12681_v48  ;;  %10886 = vmatprep.mubr.msk.f32.mxu0 %vm1340_vm2, %v12668_v55  ;;  %v2367_v55 = vrot.slane %v12926_v54, 1  ;;  %v13105_v48 = vadd.s32 768, %v13017_v9 }
 0x165   : > { %17786 = vst [vmem:[#allocation100_spill] sm:$0xff] %v12944_v11  ;;  %17824 = vst [vmem:[#allocation136_spill] sm:$0xff] %v13108_v59 }
 0x166   : > { %17823 = vst [vmem:[#allocation135_spill] sm:$0xff] %v13105_v48 }
 0x167   : > { %10940 = vmatmul.mubr.msk.f32.gmra.mxu1 %vm1340_vm2, %v12686_v37  ;;  %10887 = vmatmul.mubr.msk.f32.gmra.mxu0 %vm1340_vm2, %v12678_v8  ;;  %v12929_v8 = vadd.s32 768, %v12905_v62  ;;  %v13102_v37 = vld [vmem:[%s12919_s16 + $0xc0] sm:$0xff] }
 0x168   : > { %10942 = vmatprep.mubr.msk.f32.mxu1 %vm1340_vm2, %v12695_v18  ;;  %10889 = vmatprep.mubr.msk.f32.mxu0 %vm1340_vm2, %v12698_v6  ;;  %v2368_v6 = vrot.slane %v12831_v49, 1  ;;  %v13087_v18 = vadd.s32 704, %v13017_v9  ;;  %vm3186_vm7 = vcmp.eq.s32.totalorder %v13102_v37, %v13105_v48 }
 0x169   : > { %17784 = vst [vmem:[#allocation115_spill] sm:$0xff] %v12929_v8  ;;  %vm3187_vm12 = vcmp.eq.s32.totalorder %v12932_v22, %v12929_v8 }
 0x16a   : > { %v12947_v61 = vsel %vm3187_vm12, %v12913_v7, 0.0  ;;  %v12967_v10 = vsel %vm1697_vm8, %v2367_v55, %v2368_v6  ;;  %v12982_v46 = vsel %vm1697_vm8, %v2368_v6, %v2370_v45  ;;  %v13002_v6 = vadd.s32 960, %v12905_v62  ;;  %17821 = vst [vmem:[#allocation133_spill] sm:$0xff] %v13087_v18 }
 0x16b   : > { %10943 = vmatmul.mubr.msk.f32.gmra.mxu1 %vm1340_vm2, %v12718_v17  ;;  %10890 = vmatmul.mubr.msk.f32.gmra.mxu0 %vm1340_vm2, %v12711_v29  ;;  %17787 = vst [vmem:[#allocation116_spill] sm:$0xff] %v12947_v61  ;;  %v12954_v29 = vadd.s32 832, %v12905_v62  ;;  %17789 = vst [vmem:[#allocation118_spill] sm:$0xff] %v12967_v10  ;;  %v12971_v61 = vadd.f32 %v12721_v41, %v12772_v52  ;;  %v17796_v41 = vld [vmem:[#allocation62_spill] sm:$0xff]  ;;  %v13084_v17 = vadd.s32 640, %v13017_v9 }
 0x16c   : > { %10945 = vmatprep.mubr.msk.f32.mxu1 %vm1340_vm2, %v12725_v56  ;;  %10892 = vmatprep.mubr.msk.f32.mxu0 %vm1340_vm2, %v12926_v54  ;;  %v12979_v54 = vadd.s32 896, %v12905_v62  ;;  %17793 = vst [vmem:[#allocation122_spill] sm:$0xff] %v12982_v46  ;;  %v12993_v35 = vadd.f32 %v12772_v52, %v17796_v41  ;;  %v17802_v41 = vld [vmem:[#allocation80_spill] sm:$0xff]  ;;  %v17806_v62 = vld [vmem:[#allocation5_spill] sm:$0xff]  ;;  %vm3193_vm13 = vcmp.eq.s32.totalorder %v13043_v4, %v13002_v6 }
 0x16d   : > { %17788 = vst [vmem:[#allocation117_spill] sm:$0xff] %v12954_v29  ;;  %vm3189_vm6 = vcmp.eq.s32.totalorder %v12958_v40, %v12954_v29  ;;  %17790 = vst [vmem:[#allocation119_spill] sm:$0xff] %v12971_v61  ;;  %v13012_v57 = vadd.f32 %v12772_v52, %v17802_v41  ;;  %v13031_v41 = vadd.f32 %v12772_v52, %v17811_v15  ;;  %v13052_v15 = vld [vmem:[%s12919_s16 + $0x70] sm:$0xff]  ;;  %v13081_v56 = vld [vmem:[%s12919_s16 + $0xa0] sm:$0xff] }
 0x16e   : > { %v12974_v27 = vsel %vm3189_vm6, %v12944_v11, 0.0  ;;  %17792 = vst [vmem:[#allocation121_spill] sm:$0xff] %v12979_v54  ;;  %17797 = vst [vmem:[#allocation62_spill] sm:$0xff] %v12993_v35  ;;  %vm3191_vm8 = vcmp.eq.s32.totalorder %v12989_v42, %v12979_v54  ;;  %vm3182_vm4 = vcmp.eq.s32.totalorder %v13081_v56, %v13084_v17  ;;  %vm3192_vm12 = vcmp.eq.s32.totalorder %v13135_v63, %v13138_v32 }
 0x16f   : > { %10946 = vmatmul.mubr.msk.f32.gmra.mxu1 %vm1340_vm2, %v12738_v13  ;;  %10893 = vmatmul.mubr.msk.f32.gmra.mxu0 %vm1340_vm2, %v12831_v49  ;;  %17791 = vst [vmem:[#allocation120_spill] sm:$0xff] %v12974_v27  ;;  %v17794_v49 = vld [vmem:[#allocation56_spill] sm:$0xff]  ;;  %17803 = vst [vmem:[#allocation80_spill] sm:$0xff] %v13012_v57  ;;  %v13075_v13 = vsel %vm3193_vm13, %v12777_v12, 0.0 }
 0x170   : > { %10948 = vmatprep.mubr.msk.f32.mxu1 %vm1340_vm2, %v12967_v10  ;;  %v12986_v55 = vadd.f32 %v12772_v52, %v17794_v49  ;;  %v17798_v27 = vld [vmem:[#allocation68_spill] sm:$0xff]  ;;  %v17800_v49 = vld [vmem:[#allocation74_spill] sm:$0xff]  ;;  %17812 = vst [vmem:[#allocation103_spill] sm:$0xff] %v13031_v41  ;;  %v13069_v10 = vadd.s32 576, %v13017_v9  ;;  %17819 = vst [vmem:[#allocation131_spill] sm:$0xff] %v13075_v13 }
 0x171   : > { %v12997_v16 = vadd.f32 %v12772_v52, %v17798_v27  ;;  %v13008_v45 = vadd.f32 %v12772_v52, %v17800_v49  ;;  %v13015_v27 = vsel %vm3191_vm8, %v12971_v61, 0.0  ;;  %v13027_v49 = vadd.f32 %v12772_v52, %v17809_v30  ;;  %v13046_v30 = vld [vmem:[%s12919_s16 + $0x60] sm:$0xff]  ;;  %17820 = vst [vmem:[#allocation132_spill] sm:$0xff] %v13084_v17  ;;  %v13099_v13 = vld [vmem:[%s12919_s16 + $0xb0] sm:$0xff] }
 0x172   : > { %17795 = vst [vmem:[#allocation56_spill] sm:$0xff] %v12986_v55  ;;  %17804 = vst [vmem:[#allocation123_spill] sm:$0xff] %v13015_v27  ;;  %v4999_v27 = vadd.s32 1, %v13002_v6  ;;  %v13066_v52 = vadd.s32 512, %v13017_v9  ;;  %vm3174_vm15 = vcmp.eq.s32.totalorder %v13046_v30, %v13049_v33  ;;  %vm3180_vm3 = vcmp.eq.s32.totalorder %v13078_v26, %v13069_v10 }
 0x173   : > { %17799 = vst [vmem:[#allocation68_spill] sm:$0xff] %v12997_v16  ;;  %10949 = vmatmul.mubr.msk.f32.gmra.mxu1 %vm1340_vm2, %v12982_v46  ;;  %17801 = vst [vmem:[#allocation74_spill] sm:$0xff] %v13008_v45  ;;  %v13055_v46 = vadd.s32 448, %v13017_v9  ;;  %v13124_v50 = vsel %vm3174_vm15, %v12986_v55, 0.0  ;;  %vm3184_vm5 = vcmp.eq.s32.totalorder %v13099_v13, %v13087_v18 }
 0x174   : > { %11009 = vmatprep.mubr.msk.f32.mxu1 %vm1340_vm2, %v17806_v62  ;;  %17810 = vst [vmem:[#allocation96_spill] sm:$0xff] %v13027_v49  ;;  %17817 = vst [vmem:[#allocation129_spill] sm:$0xff] %v13066_v52  ;;  %vm5031_vm14 = vcmp.eq.s32.totalorder %v13043_v4, %v4999_v27  ;;  %vm3178_vm1 = vcmp.eq.s32.totalorder %v13063_v1, %v13066_v52 }
 0x175   : > { %17816 = vst [vmem:[#allocation128_spill] sm:$0xff] %v13055_v46  ;;  %17818 = vst [vmem:[#allocation130_spill] sm:$0xff] %v13069_v10  ;;  %v13090_v27 = vsel %vm5031_vm14, %v12777_v12, 0.0  ;;  %vm3176_vm0 = vcmp.eq.s32.totalorder %v13052_v15, %v13055_v46  ;;  %v13141_v47 = vsel %vm3178_vm1, %v12997_v16, 0.0 }
 0x176   : > { %17822 = vst [vmem:[#allocation134_spill] sm:$0xff] %v13090_v27  ;;  %v13118_v27 = vld [vmem:[%s12919_s16 + $0xe0] sm:$0xff]  ;;  %17826 = vst [vmem:[#allocation138_spill] sm:$0xff] %v13124_v50  ;;  %v13127_v38 = vsel %vm3176_vm0, %v12993_v35, 0.0  ;;  %v13153_v50 = vsel %vm3182_vm4, %v13012_v57, 0.0 }
 0x177   : > { %11010 = vmatmul.mubr.msk.f32.vlgmr.msra.gmra.mxu1 %vm1340_vm2, %v17806_v62  ;;  %v9395_v62 = vld [vmem:[%s17291_s5 + $0xc8] sm:$0xff]  ;;  %17827 = vst [vmem:[#allocation139_spill] sm:$0xff] %v13127_v38  ;;  %17829 = vst [vmem:[#allocation141_spill] sm:$0xff] %v13141_v47  ;;  %v13162_v47 = vsel %vm3184_vm5, %v13023_v39, 0.0 }
 0x178   : > { %11012 = vmatprep.mubr.msk.f32.mxu1 %vm1340_vm2, %v12242_v31  ;;  %11114 = vmatpush3.msra.mxu1 %v12824_v28  ;;  %v13115_v28 = vld [vmem:[%s12919_s16 + $0xd0] sm:$0xff]  ;;  %v13121_v31 = vadd.s32 896, %v13017_v9  ;;  %v17830_v38 = vld [vmem:[#allocation14_spill] sm:$0xff]  ;;  %17832 = vst [vmem:[#allocation143_spill] sm:$0xff] %v13153_v50  ;;  %17834 = vst [vmem:[#allocation144_spill] sm:$0xff] %v13162_v47 }
 0x179   : > { %11115 = vmatprep.subr.mxu1 %v9396_v19  ;;  %v17833_v9 = vld [vmem:[#allocation18_spill] sm:$0xff]  ;;  %vm3188_vm9 = vcmp.eq.s32.totalorder %v13115_v28, %v13108_v59 }
 0x17a   : > { %17825 = vst [vmem:[#allocation137_spill] sm:$0xff] %v13121_v31  ;;  %11116 = vmatpush3.msra.mxu1 %v9396_v19  ;;  %v13150_v19 = vsel %vm3180_vm3, %v13008_v45, 0.0  ;;  %vm3190_vm10 = vcmp.eq.s32.totalorder %v13118_v27, %v13121_v31  ;;  %v13172_v50 = vsel %vm3188_vm9, %v13031_v41, 0.0 }
 0x17b   : > { %11013 = vmatmul.mubr.msk.f32.gmra.mxu1 %vm1340_vm2, %v17830_v38  ;;  %11117 = vmatprep.subr.mxu1 %v9395_v62  ;;  %17831 = vst [vmem:[#allocation142_spill] sm:$0xff] %v13150_v19  ;;  %v13165_v38 = vsel %vm3186_vm7, %v13027_v49, 0.0  ;;  %17836 = vst [vmem:[#allocation146_spill] sm:$0xff] %v13172_v50  ;;  %v13175_v19 = vsel %vm3190_vm10, %v13036_v44, 0.0  ;;  %v13190_v50 = vld [vmem:[%s17291_s5 + $0xb8] sm:$0xff] }
 0x17c   : > { %11015 = vmatprep.mubr.msk.f32.mxu1 %vm1340_vm2, %v17833_v9  ;;  %11118 = vmatpush3.msra.mxu1 %v9395_v62  ;;  %17835 = vst [vmem:[#allocation145_spill] sm:$0xff] %v13165_v38  ;;  %17837 = vst [vmem:[#allocation147_spill] sm:$0xff] %v13175_v19  ;;  %v13180_v62 = vsel %vm3192_vm12, %v13040_v2, 0.0  ;;  %v6673_v19 = vadd.s32 32, %v13066_v52  ;;  %v6675_v38 = vadd.s32 32, %v13069_v10 }
 0x17d   : > { %11119 = vmatprep.subr.mxu1 %v9394_v3  ;;  %17838 = vst [vmem:[#allocation148_spill] sm:$0xff] %v13180_v62  ;;  %17839 = vst [vmem:[#allocation149_spill] sm:$0xff] %v13190_v50  ;;  %11057 = vmatprep.subr.mxu0 %v13190_v50  ;;  %v6671_v62 = vadd.s32 32, %v13055_v46 }
 0x17e   : > { %11120 = vmatpush3.msra.mxu1 %v9394_v3  ;;  %v6669_v3 = vadd.s32 32, %v13049_v33  ;;  %vm6705_vm13 = vcmp.eq.s32.totalorder %v13063_v1, %v6673_v19  ;;  %vm6707_vm14 = vcmp.eq.s32.totalorder %v13078_v26, %v6675_v38  ;;  %v6684_v19 = vadd.s32 32, %v12954_v29 }
 0x17f   : > { %11016 = vmatmul.mubr.msk.f32.gmra.mxu1 %vm1340_vm2, %v12291_v0  ;;  %11225 = vmatprep.subr.mxu1 %v12796_v43  ;;  %vm6703_vm8 = vcmp.eq.s32.totalorder %v13052_v15, %v6671_v62  ;;  %v6677_v62 = vadd.s32 32, %v13084_v17 }
 0x180   : > { %11018 = vmatprep.mubr.msk.f32.mxu1 %vm1340_vm2, %v12318_v20  ;;  %vm6701_vm6 = vcmp.eq.s32.totalorder %v13046_v30, %v6669_v3  ;;  %v13213_v50 = vsel %vm6703_vm8, %v12993_v35, 0.0  ;;  %v13219_v3 = vsel %vm6705_vm13, %v12997_v16, 0.0  ;;  %vm6716_vm4 = vcmp.eq.s32.totalorder %v12958_v40, %v6684_v19 }
 0x181   : > { %v13207_v47 = vsel %vm6701_vm6, %v12986_v55, 0.0  ;;  %17841 = vst [vmem:[#allocation151_spill] sm:$0xff] %v13213_v50  ;;  %17842 = vst [vmem:[#allocation152_spill] sm:$0xff] %v13219_v3  ;;  %v6681_v50 = vadd.s32 32, %v13105_v48  ;;  %vm6709_vm15 = vcmp.eq.s32.totalorder %v13081_v56, %v6677_v62 }
 0x182   : > { %17840 = vst [vmem:[#allocation150_spill] sm:$0xff] %v13207_v47  ;;  %v13223_v47 = vsel %vm6707_vm14, %v13008_v45, 0.0  ;;  %v13236_v38 = vsel %vm6709_vm15, %v13012_v57, 0.0 }
 0x183   : > { %11019 = vmatmul.mubr.msk.f32.gmra.mxu1 %vm1340_vm2, %v12330_v24  ;;  %17843 = vst [vmem:[#allocation153_spill] sm:$0xff] %v13223_v47  ;;  %17844 = vst [vmem:[#allocation154_spill] sm:$0xff] %v13236_v38  ;;  %vm6713_vm3 = vcmp.eq.s32.totalorder %v13102_v37, %v6681_v50  ;;  %v6687_v50 = vadd.s32 32, %v13138_v32 }
 0x184   : > { %11021 = vmatprep.mubr.msk.f32.mxu1 %vm1340_vm2, %v12361_v53  ;;  %v13249_v62 = vsel %vm6713_vm3, %v13027_v49, 0.0 }
 0x185   : > { %17847 = vst [vmem:[#allocation157_spill] sm:$0xff] %v13249_v62  ;;  %vm6719_vm12 = vcmp.eq.s32.totalorder %v13135_v63, %v6687_v50  ;;  %v8358_v50 = vadd.s32 33, %v13049_v33 }
 0x187   : > { %11022 = vmatmul.mubr.msk.f32.gmra.mxu1 %vm1340_vm2, %v12367_v58  ;;  %vm8390_vm6 = vcmp.eq.s32.totalorder %v13046_v30, %v8358_v50  ;;  %v8364_v30 = vadd.s32 33, %v13069_v10  ;;  %v8366_v50 = vadd.s32 33, %v13084_v17  ;;  %v17865_v17 = vld [vmem:[#allocation98_spill] sm:$0xff] }
 0x188   : > { %11024 = vmatprep.mubr.msk.f32.mxu1 %vm1340_vm2, %v12397_v25  ;;  %v6682_v25 = vadd.s32 32, %v12929_v8 }
 0x189   : > { %vm8396_vm14 = vcmp.eq.s32.totalorder %v13078_v26, %v8364_v30  ;;  %vm8398_vm15 = vcmp.eq.s32.totalorder %v13081_v56, %v8366_v50 }
 0x18a   : > { %vm6714_vm1 = vcmp.eq.s32.totalorder %v12932_v22, %v6682_v25  ;;  %v6686_v25 = vadd.s32 32, %v12979_v54 }
 0x18b   : > { %11025 = vmatmul.mubr.msk.f32.gmra.mxu1 %vm1340_vm2, %v12405_v36  ;;  %v6679_v36 = vadd.s32 32, %v13087_v18  ;;  %v13244_v3 = vsel %vm6714_vm1, %v12913_v7, 0.0 }
 0x18c   : > { %11027 = vmatprep.mubr.msk.f32.mxu1 %vm1340_vm2, %v12437_v5  ;;  %17846 = vst [vmem:[#allocation156_spill] sm:$0xff] %v13244_v3  ;;  %v6688_v3 = vadd.s32 32, %v13002_v6  ;;  %vm6718_vm7 = vcmp.eq.s32.totalorder %v12989_v42, %v6686_v25  ;;  %v17856_v25 = vld [vmem:[#allocation79_spill] sm:$0xff] }
 0x18d   : > { %vm6711_vm0 = vcmp.eq.s32.totalorder %v13099_v13, %v6679_v36  ;;  %v6683_v36 = vadd.s32 32, %v13108_v59 }
 0x18e   : > { %v13241_v47 = vsel %vm6711_vm0, %v13023_v39, 0.0  ;;  %vm6720_vm10 = vcmp.eq.s32.totalorder %v13043_v4, %v6688_v3  ;;  %v17855_v3 = vld [vmem:[#allocation77_spill] sm:$0xff] }
 0x18f   : > { %11028 = vmatmul.mubr.msk.f32.gmra.mxu1 %vm1340_vm2, %v12446_v23  ;;  %17845 = vst [vmem:[#allocation155_spill] sm:$0xff] %v13241_v47  ;;  %v6685_v47 = vadd.s32 32, %v13121_v31  ;;  %vm6715_vm5 = vcmp.eq.s32.totalorder %v13115_v28, %v6683_v36  ;;  %v13277_v38 = vsel %vm6720_vm10, %v12777_v12, 0.0  ;;  %v13283_v36 = vsel %vm6719_vm12, %v13040_v2, 0.0 }
 0x190   : > { %11030 = vmatprep.mubr.msk.f32.mxu1 %vm1340_vm2, %v12468_v60  ;;  %v13252_v60 = vsel %vm6716_vm4, %v12944_v11, 0.0  ;;  %v13266_v19 = vsel %vm6715_vm5, %v13031_v41, 0.0  ;;  %17852 = vst [vmem:[#allocation162_spill] sm:$0xff] %v13277_v38  ;;  %17853 = vst [vmem:[#allocation163_spill] sm:$0xff] %v13283_v36  ;;  %v8360_v38 = vadd.s32 33, %v13055_v46  ;;  %v8362_v36 = vadd.s32 33, %v13066_v52 }
 0x191   : > { %17848 = vst [vmem:[#allocation158_spill] sm:$0xff] %v13252_v60  ;;  %17849 = vst [vmem:[#allocation159_spill] sm:$0xff] %v13266_v19  ;;  %v13269_v60 = vsel %vm6718_vm7, %v12971_v61, 0.0  ;;  %vm6717_vm9 = vcmp.eq.s32.totalorder %v13118_v27, %v6685_v47  ;;  %v17854_v47 = vld [vmem:[#allocation70_spill] sm:$0xff]  ;;  %v17861_v46 = vld [vmem:[#allocation93_spill] sm:$0xff] }
 0x192   : > { %17850 = vst [vmem:[#allocation160_spill] sm:$0xff] %v13269_v60  ;;  %v13274_v62 = vsel %vm6717_vm9, %v13036_v44, 0.0  ;;  %v13300_v60 = vsel %vm8390_vm6, %v12986_v55, 0.0  ;;  %vm8392_vm8 = vcmp.eq.s32.totalorder %v13052_v15, %v8360_v38  ;;  %v17859_v19 = vld [vmem:[#allocation86_spill] sm:$0xff]  ;;  %vm8394_vm13 = vcmp.eq.s32.totalorder %v13063_v1, %v8362_v36 }
 0x193   : > { %11031 = vmatmul.mubr.msk.f32.gmra.mxu1 %vm1340_vm2, %v12478_v21  ;;  %17851 = vst [vmem:[#allocation161_spill] sm:$0xff] %v13274_v62  ;;  %v17857_v62 = vld [vmem:[#allocation84_spill] sm:$0xff]  ;;  %17858 = vst [vmem:[#allocation164_spill] sm:$0xff] %v13300_v60  ;;  %v13312_v52 = vsel %vm8394_vm13, %v12997_v16, 0.0  ;;  %v8368_v15 = vadd.s32 33, %v13087_v18  ;;  %v8371_v38 = vadd.s32 33, %v12929_v8  ;;  %v13323_v60 = vpop.f32.mrf.mxu0 }
 0x194   : > { %11033 = vmatprep.mubr.msk.f32.mxu1 %vm1340_vm2, %v12509_v51  ;;  %17862 = vst [vmem:[#allocation166_spill] sm:$0xff] %v13312_v52  ;;  %v8373_v1 = vadd.s32 33, %v12954_v29  ;;  %v17863_v36 = vld [vmem:[#allocation94_spill] sm:$0xff]  ;;  %v13326_v52 = vsel %vm8396_vm14, %v13008_v45, 0.0  ;;  %v13332_v8 = vsel %vm8398_vm15, %v13012_v57, 0.0  ;;  %vm2743_vm13 = vcmask 64512  }
 0x195   : > { %17864 = vst [vmem:[#allocation167_spill] sm:$0xff] %v13326_v52  ;;  %17866 = vst [vmem:[#allocation168_spill] sm:$0xff] %v13332_v8  ;;  %vm8400_vm0 = vcmp.eq.s32.totalorder %v13099_v13, %v8368_v15  ;;  %vm8403_vm1 = vcmp.eq.s32.totalorder %v12932_v22, %v8371_v38  ;;  %v8372_v13 = vadd.s32 33, %v13108_v59  ;;  %v8375_v22 = vadd.s32 33, %v12979_v54  ;;  %v17871_v15 = vld [vmem:[#allocation99_spill] sm:$0xff]  ;;  %v17886_v59 = vld [vmem:[#allocation54_spill] sm:$0xff] }
 0x196   : > { %v13337_v26 = vsel %vm8400_vm0, %v13023_v39, 0.0  ;;  %v13340_v30 = vsel %vm8403_vm1, %v12913_v7, 0.0  ;;  %vm8405_vm4 = vcmp.eq.s32.totalorder %v12958_v40, %v8373_v1  ;;  %v8376_v40 = vadd.s32 33, %v13138_v32 }
 0x197   : > { %11034 = vmatmul.mubr.msk.f32.gmra.mxu1 %vm1340_vm2, %v12517_v34  ;;  %17867 = vst [vmem:[#allocation169_spill] sm:$0xff] %v13337_v26  ;;  %17868 = vst [vmem:[#allocation170_spill] sm:$0xff] %v13340_v30  ;;  %v13348_v50 = vsel %vm8405_vm4, %v12944_v11, 0.0  ;;  %v8374_v30 = vadd.s32 33, %v13121_v31  ;;  %vm8404_vm5 = vcmp.eq.s32.totalorder %v13115_v28, %v8372_v13  ;;  %vm8407_vm7 = vcmp.eq.s32.totalorder %v12989_v42, %v8375_v22  ;;  %v17877_v42 = vld [vmem:[#allocation106_spill] sm:$0xff]  ;;  %v17879_v13 = vld [vmem:[#allocation107_spill] sm:$0xff]  ;;  %v13386_v22 = vpop.f32.mrf.mxu1 }
 0x198   : > { %11036 = vmatprep.mubr.msk.f32.mxu1 %vm1340_vm2, %v12547_v14  ;;  %17870 = vst [vmem:[#allocation172_spill] sm:$0xff] %v13348_v50  ;;  %v13364_v50 = vsel %vm8404_vm5, %v13031_v41, 0.0  ;;  %vm8408_vm12 = vcmp.eq.s32.totalorder %v13135_v63, %v8376_v40  ;;  %v17885_v41 = vld [vmem:[#allocation41_spill] sm:$0xff] }
 0x199   : > { %17873 = vst [vmem:[#allocation173_spill] sm:$0xff] %v13364_v50  ;;  %vm8406_vm9 = vcmp.eq.s32.totalorder %v13118_v27, %v8374_v30  ;;  %v13381_v28 = vsel %vm8408_vm12, %v13040_v2, 0.0  ;;  %v17880_v27 = vld [vmem:[#allocation109_spill] sm:$0xff] }
 0x19a   : > { %17878 = vst [vmem:[#allocation177_spill] sm:$0xff] %v13381_v28 }
 0x19b   : > { %11037 = vmatmul.mubr.msk.f32.gmra.mxu1 %vm1340_vm2, %v17854_v47 }
 0x19c   : > { %11039 = vmatprep.mubr.msk.f32.mxu1 %vm1340_vm2, %v17855_v3 }
 0x19f   : > { %11040 = vmatmul.mubr.msk.f32.gmra.mxu1 %vm1340_vm2, %v17856_v25  ;;  %v13306_v25 = vsel %vm8392_vm8, %v12993_v35, 0.0 }
 0x1a0   : > { %11042 = vmatprep.mubr.msk.f32.mxu1 %vm1340_vm2, %v17857_v62  ;;  %17860 = vst [vmem:[#allocation165_spill] sm:$0xff] %v13306_v25  ;;  %v8370_v25 = vadd.s32 33, %v13105_v48 }
 0x1a2   : > { %vm8402_vm3 = vcmp.eq.s32.totalorder %v13102_v37, %v8370_v25  ;;  %v8377_v37 = vadd.s32 33, %v13002_v6  ;;  %v17872_v25 = vld [vmem:[#allocation101_spill] sm:$0xff]  ;;  %v13372_v6 = vsel %vm8406_vm9, %v13036_v44, 0.0 }
 0x1a3   : > { %11043 = vmatmul.mubr.msk.f32.gmra.mxu1 %vm1340_vm2, %v17859_v19  ;;  %v13345_v56 = vsel %vm8402_vm3, %v13027_v49, 0.0  ;;  %17875 = vst [vmem:[#allocation175_spill] sm:$0xff] %v13372_v6 }
 0x1a4   : > { %11045 = vmatprep.mubr.msk.f32.mxu1 %vm1340_vm2, %v17861_v46  ;;  %17869 = vst [vmem:[#allocation171_spill] sm:$0xff] %v13345_v56  ;;  %v13367_v56 = vsel %vm8407_vm7, %v12971_v61, 0.0  ;;  %vm8409_vm10 = vcmp.eq.s32.totalorder %v13043_v4, %v8377_v37  ;;  %v17881_v37 = vld [vmem:[#allocation108_spill] sm:$0xff] }
 0x1a5   : > { %17874 = vst [vmem:[#allocation174_spill] sm:$0xff] %v13367_v56  ;;  %v13375_v26 = vsel %vm8409_vm10, %v12777_v12, 0.0  ;;  %v17883_v56 = vld [vmem:[#allocation14_spill] sm:$0xff] }
 0x1a6   : > { %17876 = vst [vmem:[#allocation176_spill] sm:$0xff] %v13375_v26  ;;  %v17882_v26 = vld [vmem:[#allocation11_spill] sm:$0xff] }
 0x1a7   : > { %11046 = vmatmul.mubr.msk.f32.gmra.mxu1 %vm1340_vm2, %v17863_v36 }
 0x1a8   : > { %11048 = vmatprep.mubr.msk.f32.mxu1 %vm1340_vm2, %v17865_v17 }
 0x1ab   : > { %11049 = vmatmul.mubr.msk.f32.gmra.mxu1 %vm1340_vm2, %v17871_v15 }
 0x1ac   : > { %11051 = vmatprep.mubr.msk.f32.mxu1 %vm1340_vm2, %v17872_v25 }
 0x1ae   : > { %v10740_v38 = vpop.f32.mrf.mxu0 }
 0x1af   : > { %11052 = vmatmul.mubr.msk.f32.gmra.mxu1 %vm1340_vm2, %v17877_v42  ;;  %v1653_v30 = vadd.f32 %v10740_v38, %v17880_v27 }
 0x1b0   : > { %v13361_v1 = vpop.f32.mrf.mxu0  ;;  %11054 = vmatprep.mubr.msk.f32.mxu1 %vm1340_vm2, %v17879_v13 }
 0x1b2   : > { %v10743_v4 = vpop.f32.mrf.mxu0 }
 0x1b3   : > { %11055 = vmatmul.mubr.msk.f32.gmra.mxu1 %vm1340_vm2, %v17881_v37  ;;  %v10796_v12 = vpop.f32.mrf.mxu1  ;;  %v1655_v28 = vadd.f32 %v10743_v4, %v17880_v27 }
 0x1b4   : > { %11121 = vmatprep.mubr.msk.f32.mxu1 %vm1340_vm2, %v17882_v26  ;;  %v13392_v63 = vadd.f32 %v10796_v12, %v1653_v30  ;;  %v13394_v40 = vpop.f32.mrf.mxu0  ;;  %v17960_v26 = vld [vmem:[#allocation83_spill] sm:$0xff] }
 0x1b5   : > { %v13397_v6 = vpop.f32.mrf.mxu1 }
 0x1b7   : > { %11122 = vmatmul.mubr.msk.f32.vlgmr.msra.gmra.mxu1 %vm1340_vm2, %v17883_v56 }
 0x1b8   : > { %11124 = vmatprep.mubr.msk.f32.mxu1 %vm1340_vm2, %v17833_v9  ;;  %v10799_v38 = vpop.f32.mrf.mxu1  ;;  %11226 = vmatpush3.msra.mxu1 %v12796_v43 }
 0x1b9   : > { %v13404_v8 = vadd.f32 %v10799_v38, %v1655_v28 }
 0x1ba   : > { %v10746_v50 = vpop.f32.mrf.mxu0  ;;  %v13407_v12 = vpop.f32.mrf.mxu1 }
 0x1bb   : > { %v1657_v30 = vadd.f32 %v10746_v50, %v17880_v27  ;;  %11125 = vmatmul.mubr.msk.f32.gmra.mxu1 %vm1340_vm2, %v12291_v0 }
 0x1bc   : > { %v13409_v52 = vpop.f32.mrf.mxu0  ;;  %11127 = vmatprep.mubr.msk.f32.mxu1 %vm1340_vm2, %v12318_v20 }
 0x1be   : > { %v10802_v4 = vpop.f32.mrf.mxu1  ;;  %v10749_v61 = vpop.f32.mrf.mxu0 }
 0x1bf   : > { %v13415_v2 = vadd.f32 %v10802_v4, %v1657_v30  ;;  %v1659_v43 = vadd.f32 %v10749_v61, %v17880_v27  ;;  %11128 = vmatmul.mubr.msk.f32.gmra.mxu1 %vm1340_vm2, %v12330_v24  ;;  %v17884_v4 = vld [vmem:[#allocation39_spill] sm:$0xff]  ;;  %v1654_v24 = vadd.f32 %v17880_v27, %v13394_v40 }
 0x1c0   : > { %v13418_v28 = vpop.f32.mrf.mxu1  ;;  %v13422_v50 = vpop.f32.mrf.mxu0  ;;  %11130 = vmatprep.mubr.msk.f32.mxu1 %vm1340_vm2, %v12361_v53 }
 0x1c2   : > { %v10805_v38 = vpop.f32.mrf.mxu1 }
 0x1c3   : > { %v13426_v44 = vadd.f32 %v10805_v38, %v1659_v43  ;;  %v10752_v11 = vpop.f32.mrf.mxu0  ;;  %11131 = vmatmul.mubr.msk.f32.gmra.mxu1 %vm1340_vm2, %v12367_v58 }
 0x1c4   : > { %v1661_v30 = vadd.f32 %v10752_v11, %v17880_v27  ;;  %v13431_v61 = vpop.f32.mrf.mxu1  ;;  %11133 = vmatprep.mubr.msk.f32.mxu1 %vm1340_vm2, %v17884_v4 }
 0x1c5   : > { %v13435_v32 = vpop.f32.mrf.mxu0 }
 0x1c7   : > { %v10808_v54 = vpop.f32.mrf.mxu1  ;;  %11134 = vmatmul.mubr.msk.f32.gmra.mxu1 %vm1340_vm2, %v17885_v41  ;;  %v10755_v43 = vpop.f32.mrf.mxu0  ;;  %v17889_v41 = vld [vmem:[#allocation122_spill] sm:$0xff] }
 0x1c8   : > { %v13439_v7 = vadd.f32 %v10808_v54, %v1661_v30  ;;  %11136 = vmatprep.mubr.msk.f32.mxu1 %vm1340_vm2, %v12437_v5  ;;  %v1663_v38 = vadd.f32 %v10755_v43, %v17880_v27 }
 0x1c9   : > { %v13444_v11 = vpop.f32.mrf.mxu1  ;;  %v13446_v31 = vpop.f32.mrf.mxu0 }
 0x1cb   : > { %11137 = vmatmul.mubr.msk.f32.gmra.mxu1 %vm1340_vm2, %v12446_v23  ;;  %v10811_v49 = vpop.f32.mrf.mxu1  ;;  %v10758_v29 = vpop.f32.mrf.mxu0 }
 0x1cc   : > { %11139 = vmatprep.mubr.msk.f32.mxu1 %vm1340_vm2, %v17886_v59  ;;  %v13452_v54 = vadd.f32 %v10811_v49, %v1663_v38  ;;  %v1665_v30 = vadd.f32 %v10758_v29, %v17880_v27 }
 0x1cd   : > { %v13455_v39 = vpop.f32.mrf.mxu1  ;;  %v13457_v48 = vpop.f32.mrf.mxu0 }
 0x1cf   : > { %11140 = vmatmul.mubr.msk.f32.gmra.mxu1 %vm1340_vm2, %v12478_v21  ;;  %v10814_v43 = vpop.f32.mrf.mxu1 }
 0x1d0   : > { %11142 = vmatprep.mubr.msk.f32.mxu1 %vm1340_vm2, %v12509_v51  ;;  %v13463_v57 = vadd.f32 %v10814_v43, %v1665_v30  ;;  %v10761_v18 = vpop.f32.mrf.mxu0 }
 0x1d1   : > { %v1667_v45 = vadd.f32 %v10761_v18, %v17880_v27  ;;  %v13466_v49 = vpop.f32.mrf.mxu1 }
 0x1d2   : > { %v13468_v38 = vpop.f32.mrf.mxu0 }
 0x1d3   : > { %11143 = vmatmul.mubr.msk.f32.gmra.mxu1 %vm1340_vm2, %v12517_v34 }
 0x1d4   : > { %11145 = vmatprep.mubr.msk.f32.mxu1 %vm1340_vm2, %v12547_v14  ;;  %v10817_v29 = vpop.f32.mrf.mxu1  ;;  %v17887_v14 = vld [vmem:[#allocation79_spill] sm:$0xff] }
 0x1d5   : > { %v13474_v16 = vadd.f32 %v10817_v29, %v1667_v45  ;;  %v10764_v10 = vpop.f32.mrf.mxu0 }
 0x1d6   : > { %v1669_v30 = vadd.f32 %v10764_v10, %v17880_v27  ;;  %v13477_v43 = vpop.f32.mrf.mxu1 }
 0x1d7   : > { %11146 = vmatmul.mubr.msk.f32.gmra.mxu1 %vm1340_vm2, %v17854_v47  ;;  %v13481_v18 = vpop.f32.mrf.mxu0 }
 0x1d8   : > { %11148 = vmatprep.mubr.msk.f32.mxu1 %vm1340_vm2, %v17855_v3 }
 0x1d9   : > { %v10820_v35 = vpop.f32.mrf.mxu1  ;;  %v10767_v33 = vpop.f32.mrf.mxu0 }
 0x1da   : > { %v13485_v55 = vadd.f32 %v10820_v35, %v1669_v30  ;;  %v1671_v45 = vadd.f32 %v10767_v33, %v17880_v27 }
 0x1db   : > { %11149 = vmatmul.mubr.msk.f32.gmra.mxu1 %vm1340_vm2, %v17887_v14  ;;  %v13490_v10 = vpop.f32.mrf.mxu1  ;;  %v13494_v29 = vpop.f32.mrf.mxu0 }
 0x1dc   : > { %11151 = vmatprep.mubr.msk.f32.mxu1 %vm1340_vm2, %v17857_v62 }
 0x1dd   : > { %v10770_v34 = vpop.f32.mrf.mxu0 }
 0x1de   : > { %v10823_v47 = vpop.f32.mrf.mxu1  ;;  %v1673_v35 = vadd.f32 %v10770_v34, %v17880_v27 }
 0x1df   : > { %v13496_v51 = vadd.f32 %v10823_v47, %v1671_v45  ;;  %11152 = vmatmul.mubr.msk.f32.gmra.mxu1 %vm1340_vm2, %v17859_v19  ;;  %v13505_v30 = vpop.f32.mrf.mxu0 }
 0x1e0   : > { %11154 = vmatprep.mubr.msk.f32.mxu1 %vm1340_vm2, %v17861_v46  ;;  %v13503_v33 = vpop.f32.mrf.mxu1 }
 0x1e2   : > { %v10826_v14 = vpop.f32.mrf.mxu1 }
 0x1e3   : > { %v13507_v62 = vadd.f32 %v10826_v14, %v1673_v35  ;;  %11155 = vmatmul.mubr.msk.f32.gmra.mxu1 %vm1340_vm2, %v17863_v36  ;;  %v10773_v47 = vpop.f32.mrf.mxu0 }
 0x1e4   : > { %v1675_v45 = vadd.f32 %v10773_v47, %v17880_v27  ;;  %11157 = vmatprep.mubr.msk.f32.mxu1 %vm1340_vm2, %v17865_v17  ;;  %v13514_v34 = vpop.f32.mrf.mxu1 }
 0x1e5   : > { %v13516_v19 = vpop.f32.mrf.mxu0 }
 0x1e7   : > { %v10829_v46 = vpop.f32.mrf.mxu1  ;;  %11158 = vmatmul.mubr.msk.f32.gmra.mxu1 %vm1340_vm2, %v17871_v15  ;;  %v10776_v3 = vpop.f32.mrf.mxu0 }
 0x1e8   : > { %v13520_v14 = vadd.f32 %v10829_v46, %v1675_v45  ;;  %v1677_v35 = vadd.f32 %v10776_v3, %v17880_v27  ;;  %11160 = vmatprep.mubr.msk.f32.mxu1 %vm1340_vm2, %v17872_v25 }
 0x1e9   : > { %v13525_v47 = vpop.f32.mrf.mxu1  ;;  %v13527_v36 = vpop.f32.mrf.mxu0 }
 0x1eb   : > { %v10832_v17 = vpop.f32.mrf.mxu1  ;;  %11161 = vmatmul.mubr.msk.f32.gmra.mxu1 %vm1340_vm2, %v17877_v42  ;;  %v10779_v21 = vpop.f32.mrf.mxu0  ;;  %v1650_v42 = vadd.f32 %v17880_v27, %v13323_v60  ;;  %v1652_v60 = vadd.f32 %v17880_v27, %v13361_v1 }
 0x1ec   : > { %v13531_v59 = vadd.f32 %v10832_v17, %v1677_v35  ;;  %v1679_v15 = vadd.f32 %v10779_v21, %v17880_v27  ;;  %11163 = vmatprep.mubr.msk.f32.mxu1 %vm1340_vm2, %v17879_v13  ;;  %v17888_v21 = vld [vmem:[#allocation118_spill] sm:$0xff] }
 0x1ed   : > { %v13536_v46 = vpop.f32.mrf.mxu1  ;;  %v13538_v3 = vpop.f32.mrf.mxu0  ;;  %v2067_v4 = vadd.f32 %v13386_v22, %v1650_v42  ;;  %v13566_v42 = vstv %s9080_s26  ;;  %s17085_s26 = scalar_lea.vmem %s17297_s11, %s12043_s14 }
 0x1ee   : > { %17891 = vst [vmem:[#allocation109_spill] sm:$0xff] %v13566_v42 }
 0x1ef   : > { %v10835_v45 = vpop.f32.mrf.mxu1  ;;  %11164 = vmatmul.mubr.msk.f32.gmra.mxu1 %vm1340_vm2, %v17881_v37  ;;  %v10782_v25 = vpop.f32.mrf.mxu0 }
 0x1f0   : > { %v13544_v23 = vadd.f32 %v10835_v45, %v1679_v15  ;;  %v1681_v17 = vadd.f32 %v10782_v25, %v17880_v27  ;;  %11166 = vmatprep.mubr.msk.f32.mxu1 %vm1340_vm2, %v17888_v21  ;;  %v17890_v25 = vld [vmem:[#allocation110_spill] sm:$0xff] }
 0x1f1   : > { %v13549_v35 = vpop.f32.mrf.mxu1  ;;  %v13551_v13 = vpop.f32.mrf.mxu0 }
 0x1f3   : > { %v10838_v5 = vpop.f32.mrf.mxu1  ;;  %11167 = vmatmul.mubr.msk.f32.gmra.mxu1 %vm1340_vm2, %v17889_v41  ;;  %v10849_v37 = vpop.f32.mrf.mxu0  ;;  %v2069_v41 = vadd.f32 %v13397_v6, %v1652_v60 }
 0x1f4   : > { %v13558_v15 = vadd.f32 %v10838_v5, %v1681_v17  ;;  %v2335_v45 = vadd.f32 %v10849_v37, %v17890_v25  ;;  %v1656_v37 = vadd.f32 %v17880_v27, %v13409_v52 }
 0x1f5   : > { %v13561_v21 = vpop.f32.mrf.mxu1  ;;  %v2175_v58 = vpop.f32.mrf.mxu0 }
 0x1f6   : > { %v2334_v53 = vadd.f32 %v2175_v58, %v2067_v4  ;;  %v2071_v58 = vadd.f32 %v13407_v12, %v1654_v24  ;;  %v2073_v52 = vadd.f32 %v13418_v28, %v1656_v37  ;;  %v9360_v28 = vld [vmem:[%s17291_s5 + $0xb0] sm:$0xff] }
 0x1f7   : > { %v10905_v20 = vpop.f32.mrf.mxu1  ;;  %v10852_v0 = vpop.f32.mrf.mxu0 }
 0x1f8   : > { %v2607_v9 = vadd.f32 %v10905_v20, %v2335_v45  ;;  %v2337_v1 = vadd.f32 %v10852_v0, %v13392_v63 }
 0x1f9   : > { %v2447_v5 = vpop.f32.mrf.mxu1  ;;  %v2185_v22 = vpop.f32.mrf.mxu0 }
 0x1fa   : > { %v2606_v17 = vadd.f32 %v2447_v5, %v2334_v53  ;;  %v2336_v25 = vadd.f32 %v2185_v22, %v2069_v41  ;;  %v2672_v40 = vmul.f32 %v13566_v42, %v2607_v9  ;;  %vm2639_vm6 = vcmp.ge.f32.partialorder %v2607_v9, 0.0 }
 0x1fb   : > { %v10908_v4 = vpop.f32.mrf.mxu1  ;;  %v10855_v56 = vpop.f32.mrf.mxu0  ;;  %v1658_v53 = vadd.f32 %v17880_v27, %v13422_v50 }
 0x1fc   : > { %v2671_v20 = vmul.f32 %v13566_v42, %v2606_v17  ;;  %v2609_v6 = vadd.f32 %v10908_v4, %v2337_v1  ;;  %v2339_v60 = vadd.f32 %v10855_v56, %v13404_v8  ;;  %vm2638_vm8 = vcmp.ge.f32.partialorder %v2606_v17, 0.0 }
 0x1fd   : > { %v2457_v0 = vpop.f32.mrf.mxu1  ;;  %v2195_v63 = vpop.f32.mrf.mxu0  ;;  %v2704_v12 = vsel %vm2639_vm6, %v2607_v9, %v2672_v40  ;;  %v2075_v37 = vadd.f32 %v13431_v61, %v1658_v53  ;;  %v9358_v53 = vld [vmem:[%s17291_s5 + $0xa0] sm:$0xff] }
 0x1fe   : > { %v2608_v24 = vadd.f32 %v2457_v0, %v2336_v25  ;;  %v2338_v41 = vadd.f32 %v2195_v63, %v2071_v58  ;;  %vm2641_vm14 = vcmp.ge.f32.partialorder %v2609_v6, 0.0  ;;  %v2674_v45 = vmul.f32 %v13566_v42, %v2609_v6  ;;  %v17892_v25 = vld [vmem:[#allocation149_spill] sm:$0xff] }
 0x1ff   : > { %v10911_v5 = vpop.f32.mrf.mxu1  ;;  %v2703_v22 = vsel %vm2638_vm8, %v2606_v17, %v2671_v20  ;;  %v10858_v1 = vpop.f32.mrf.mxu0  ;;  %v1660_v17 = vadd.f32 %v17880_v27, %v13435_v32 }
 0x200   : > { %v2673_v8 = vmul.f32 %v13566_v42, %v2608_v24  ;;  %v2611_v56 = vadd.f32 %v10911_v5, %v2339_v60  ;;  %10953 = vmatprep.mubr.msk.f32.mxu0 %vm2743_vm13, %v2703_v22  ;;  %v2341_v4 = vadd.f32 %v10858_v1, %v13415_v2  ;;  %vm2640_vm15 = vcmp.ge.f32.partialorder %v2608_v24, 0.0  ;;  %v9359_v2 = vld [vmem:[%s17291_s5 + $0xa8] sm:$0xff] }
 0x201   : > { %10954 = vmatmul.mubr.msk.f32.vlgmr.msra.gmra.mxu0 %vm2743_vm13, %v2704_v12  ;;  %v2467_v9 = vpop.f32.mrf.mxu1  ;;  %v2205_v50 = vpop.f32.mrf.mxu0  ;;  %v2706_v12 = vsel %vm2641_vm14, %v2609_v6, %v2674_v45  ;;  %v2077_v6 = vadd.f32 %v13444_v11, %v1660_v17  ;;  %v1662_v45 = vadd.f32 %v17880_v27, %v13446_v31 }
 0x202   : > { %11058 = vmatpush3.msra.mxu0 %v17892_v25  ;;  %v2610_v58 = vadd.f32 %v2467_v9, %v2338_v41  ;;  %v2340_v40 = vadd.f32 %v2205_v50, %v2073_v52  ;;  %vm2643_vm0 = vcmp.ge.f32.partialorder %v2611_v56, 0.0  ;;  %v2676_v20 = vmul.f32 %v13566_v42, %v2611_v56 }
 0x203   : > { %v10914_v60 = vpop.f32.mrf.mxu1  ;;  %v2705_v0 = vsel %vm2640_vm15, %v2608_v24, %v2673_v8  ;;  %v10861_v63 = vpop.f32.mrf.mxu0  ;;  %11059 = vmatprep.subr.mxu0 %v9360_v28  ;;  %v2079_v17 = vadd.f32 %v13455_v39, %v1662_v45 }
 0x204   : > { %v2675_v61 = vmul.f32 %v13566_v42, %v2610_v58  ;;  %v2613_v32 = vadd.f32 %v10914_v60, %v2341_v4  ;;  %10956 = vmatprep.mubr.msk.f32.mxu0 %vm2743_vm13, %v2705_v0  ;;  %v2343_v52 = vadd.f32 %v10861_v63, %v13426_v44  ;;  %vm2642_vm1 = vcmp.ge.f32.partialorder %v2610_v58, 0.0  ;;  %11060 = vmatpush3.msra.mxu0 %v9360_v28  ;;  %v13608_v44 = vld [vmem:[%s17291_s5 + $0xf8] sm:$0xff] }
 0x205   : > { %10957 = vmatmul.mubr.msk.f32.gmra.mxu0 %vm2743_vm13, %v2706_v12  ;;  %v2477_v24 = vpop.f32.mrf.mxu1  ;;  %v2215_v41 = vpop.f32.mrf.mxu0  ;;  %11061 = vmatprep.subr.mxu0 %v9359_v2  ;;  %v2708_v11 = vsel %vm2643_vm0, %v2611_v56, %v2676_v20  ;;  %v13622_v56 = vld [vmem:[%s17292_s6] ss:$0 sm:$0xff] }
 0x206   : > { %v2612_v5 = vadd.f32 %v2477_v24, %v2340_v40  ;;  %v2342_v22 = vadd.f32 %v2215_v41, %v2075_v37  ;;  %11062 = vmatpush3.msra.mxu0 %v9359_v2  ;;  %vm2645_vm3 = vcmp.ge.f32.partialorder %v2613_v32, 0.0  ;;  %v2678_v1 = vmul.f32 %v13566_v42, %v2613_v32 }
 0x207   : > { %v10917_v8 = vpop.f32.mrf.mxu1  ;;  %v2707_v4 = vsel %vm2642_vm1, %v2610_v58, %v2675_v61  ;;  %v10864_v28 = vpop.f32.mrf.mxu0  ;;  %11063 = vmatprep.subr.mxu0 %v9358_v53  ;;  %v1664_v25 = vadd.f32 %v13622_v56, %v13457_v48 }
 0x208   : > { %v2677_v31 = vmul.f32 %v13566_v42, %v2612_v5  ;;  %v2615_v27 = vadd.f32 %v10917_v8, %v2343_v52  ;;  %10959 = vmatprep.mubr.msk.f32.mxu0 %vm2743_vm13, %v2707_v4  ;;  %v2345_v9 = vadd.f32 %v10864_v28, %v13439_v7  ;;  %vm2644_vm4 = vcmp.ge.f32.partialorder %v2612_v5, 0.0  ;;  %11064 = vmatpush3.msra.mxu0 %v9358_v53 }
 0x209   : > { %10960 = vmatmul.mubr.msk.f32.gmra.mxu0 %vm2743_vm13, %v2708_v11  ;;  %v2487_v50 = vpop.f32.mrf.mxu1  ;;  %v2225_v37 = vpop.f32.mrf.mxu0  ;;  %11169 = vmatprep.subr.mxu0 %v13608_v44  ;;  %v2710_v0 = vsel %vm2645_vm3, %v2613_v32, %v2678_v1  ;;  %v2081_v52 = vadd.f32 %v13466_v49, %v1664_v25  ;;  %v1666_v53 = vadd.f32 %v13622_v56, %v13468_v38 }
 0x20a   : > { %v2614_v58 = vadd.f32 %v2487_v50, %v2342_v22  ;;  %v2344_v7 = vadd.f32 %v2225_v37, %v2077_v6  ;;  %vm2647_vm5 = vcmp.ge.f32.partialorder %v2615_v27, 0.0  ;;  %v2680_v40 = vmul.f32 %v13566_v42, %v2615_v27 }
 0x20b   : > { %v10920_v2 = vpop.f32.mrf.mxu1  ;;  %v2709_v20 = vsel %vm2644_vm4, %v2612_v5, %v2677_v31  ;;  %v10867_v60 = vpop.f32.mrf.mxu0  ;;  %v2083_v4 = vadd.f32 %v13477_v43, %v1666_v53  ;;  %v1668_v28 = vadd.f32 %v13622_v56, %v13481_v18 }
 0x20c   : > { %v2679_v39 = vmul.f32 %v13566_v42, %v2614_v58  ;;  %v2617_v63 = vadd.f32 %v10920_v2, %v2345_v9  ;;  %10962 = vmatprep.mubr.msk.f32.mxu0 %vm2743_vm13, %v2709_v20  ;;  %v2347_v12 = vadd.f32 %v10867_v60, %v13452_v54  ;;  %vm2646_vm7 = vcmp.ge.f32.partialorder %v2614_v58, 0.0 }
 0x20d   : > { %10963 = vmatmul.mubr.msk.f32.gmra.mxu0 %vm2743_vm13, %v2710_v0  ;;  %v2497_v48 = vpop.f32.mrf.mxu1  ;;  %v2235_v61 = vpop.f32.mrf.mxu0  ;;  %v2712_v54 = vsel %vm2647_vm5, %v2615_v27, %v2680_v40  ;;  %v1670_v40 = vadd.f32 %v13622_v56, %v13494_v29 }
 0x20e   : > { %v2616_v24 = vadd.f32 %v2497_v48, %v2344_v7  ;;  %v2346_v41 = vadd.f32 %v2235_v61, %v2079_v17  ;;  %vm2649_vm9 = vcmp.ge.f32.partialorder %v2617_v63, 0.0  ;;  %v2682_v32 = vmul.f32 %v13566_v42, %v2617_v63 }
 0x20f   : > { %v10923_v6 = vpop.f32.mrf.mxu1  ;;  %v2711_v45 = vsel %vm2646_vm7, %v2614_v58, %v2679_v39  ;;  %v10870_v5 = vpop.f32.mrf.mxu0  ;;  %v2085_v7 = vadd.f32 %v13490_v10, %v1668_v28 }
 0x210   : > { %v2681_v22 = vmul.f32 %v13566_v42, %v2616_v24  ;;  %v2619_v1 = vadd.f32 %v10923_v6, %v2347_v12  ;;  %10965 = vmatprep.mubr.msk.f32.mxu0 %vm2743_vm13, %v2711_v45  ;;  %v2349_v49 = vadd.f32 %v10870_v5, %v13463_v57  ;;  %vm2648_vm10 = vcmp.ge.f32.partialorder %v2616_v24, 0.0 }
 0x211   : > { %10966 = vmatmul.mubr.msk.f32.gmra.mxu0 %vm2743_vm13, %v2712_v54  ;;  %v2507_v38 = vpop.f32.mrf.mxu1  ;;  %v2245_v8 = vpop.f32.mrf.mxu0  ;;  %v2714_v57 = vsel %vm2649_vm9, %v2617_v63, %v2682_v32 }
 0x212   : > { %v2618_v11 = vadd.f32 %v2507_v38, %v2346_v41  ;;  %v2348_v31 = vadd.f32 %v2245_v8, %v2081_v52  ;;  %vm2651_vm12 = vcmp.ge.f32.partialorder %v2619_v1, 0.0  ;;  %v2684_v27 = vmul.f32 %v13566_v42, %v2619_v1 }
 0x213   : > { %v10926_v9 = vpop.f32.mrf.mxu1  ;;  %v2713_v50 = vsel %vm2648_vm10, %v2616_v24, %v2681_v22  ;;  %v10873_v37 = vpop.f32.mrf.mxu0  ;;  %v2087_v52 = vadd.f32 %v13503_v33, %v1670_v40  ;;  %v1672_v41 = vadd.f32 %v13622_v56, %v13505_v30  ;;  %v1674_v30 = vadd.f32 %v13622_v56, %v13516_v19 }
 0x214   : > { %v2683_v17 = vmul.f32 %v13566_v42, %v2618_v11  ;;  %v2621_v25 = vadd.f32 %v10926_v9, %v2349_v49  ;;  %10968 = vmatprep.mubr.msk.f32.mxu0 %vm2743_vm13, %v2713_v50  ;;  %v2351_v43 = vadd.f32 %v10873_v37, %v13474_v16  ;;  %vm2650_vm6 = vcmp.ge.f32.partialorder %v2618_v11, 0.0 }
 0x215   : > { %10969 = vmatmul.mubr.msk.f32.gmra.mxu0 %vm2743_vm13, %v2714_v57  ;;  %v2517_v18 = vpop.f32.mrf.mxu1  ;;  %v2255_v58 = vpop.f32.mrf.mxu0  ;;  %v2716_v16 = vsel %vm2651_vm12, %v2619_v1, %v2684_v27 }
 0x216   : > { %v2620_v2 = vadd.f32 %v2517_v18, %v2348_v31  ;;  %v2350_v20 = vadd.f32 %v2255_v58, %v2083_v4  ;;  %vm2653_vm8 = vcmp.ge.f32.partialorder %v2621_v25, 0.0  ;;  %v2686_v60 = vmul.f32 %v13566_v42, %v2621_v25 }
 0x217   : > { %v10929_v0 = vpop.f32.mrf.mxu1  ;;  %v2715_v39 = vsel %vm2650_vm6, %v2618_v11, %v2683_v17  ;;  %v10876_v63 = vpop.f32.mrf.mxu0  ;;  %v2089_v4 = vadd.f32 %v13514_v34, %v1672_v41  ;;  %v2091_v34 = vadd.f32 %v13525_v47, %v1674_v30 }
 0x218   : > { %v2685_v12 = vmul.f32 %v13566_v42, %v2620_v2  ;;  %v2623_v48 = vadd.f32 %v10929_v0, %v2351_v43  ;;  %10971 = vmatprep.mubr.msk.f32.mxu0 %vm2743_vm13, %v2715_v39  ;;  %v2353_v10 = vadd.f32 %v10876_v63, %v13485_v55  ;;  %vm2652_vm14 = vcmp.ge.f32.partialorder %v2620_v2, 0.0 }
 0x219   : > { %10972 = vmatmul.mubr.msk.f32.gmra.mxu0 %vm2743_vm13, %v2716_v16  ;;  %v2527_v29 = vpop.f32.mrf.mxu1  ;;  %v2265_v61 = vpop.f32.mrf.mxu0  ;;  %v2718_v54 = vsel %vm2653_vm8, %v2621_v25, %v2686_v60  ;;  %v1676_v43 = vadd.f32 %v13622_v56, %v13527_v36  ;;  %v1678_v36 = vadd.f32 %v13622_v56, %v13538_v3 }
 0x21a   : > { %v2622_v53 = vadd.f32 %v2527_v29, %v2350_v20  ;;  %v2352_v24 = vadd.f32 %v2265_v61, %v2085_v7  ;;  %v2688_v32 = vmul.f32 %v13566_v42, %v2623_v48  ;;  %v2717_v45 = vsel %vm2652_vm14, %v2620_v2, %v2685_v12 }
 0x21b   : > { %v10932_v6 = vpop.f32.mrf.mxu1  ;;  %v10879_v5 = vpop.f32.mrf.mxu0  ;;  %vm2655_vm15 = vcmp.ge.f32.partialorder %v2623_v48, 0.0  ;;  %10974 = vmatprep.mubr.msk.f32.mxu0 %vm2743_vm13, %v2717_v45  ;;  %v2093_v16 = vadd.f32 %v13536_v46, %v1676_v43  ;;  %v2095_v46 = vadd.f32 %v13549_v35, %v1678_v36  ;;  %v17896_v36 = vld [vmem:[#allocation7_spill] sm:$0xff] }
 0x21c   : > { %v2687_v55 = vmul.f32 %v13566_v42, %v2622_v53  ;;  %v2625_v22 = vadd.f32 %v10932_v6, %v2353_v10  ;;  %v2355_v33 = vadd.f32 %v10879_v5, %v13496_v51  ;;  %vm2654_vm0 = vcmp.ge.f32.partialorder %v2622_v53, 0.0 }
 0x21d   : > { %10975 = vmatmul.mubr.msk.f32.gmra.mxu0 %vm2743_vm13, %v2718_v54  ;;  %v2537_v1 = vpop.f32.mrf.mxu1  ;;  %v2275_v49 = vpop.f32.mrf.mxu0  ;;  %v2720_v28 = vsel %vm2655_vm15, %v2623_v48, %v2688_v32  ;;  %v1680_v6 = vadd.f32 %v13622_v56, %v13551_v13 }
 0x21e   : > { %v2624_v38 = vadd.f32 %v2537_v1, %v2352_v24  ;;  %v2354_v8 = vadd.f32 %v2275_v49, %v2087_v52  ;;  %v2690_v11 = vmul.f32 %v13566_v42, %v2625_v22  ;;  %v2719_v27 = vsel %vm2654_vm0, %v2622_v53, %v2687_v55 }
 0x21f   : > { %v10935_v31 = vpop.f32.mrf.mxu1  ;;  %v10882_v9 = vpop.f32.mrf.mxu0  ;;  %vm2657_vm1 = vcmp.ge.f32.partialorder %v2625_v22, 0.0  ;;  %10977 = vmatprep.mubr.msk.f32.mxu0 %vm2743_vm13, %v2719_v27  ;;  %v2097_v30 = vadd.f32 %v13561_v21, %v1680_v6  ;;  %v17905_v6 = vld [vmem:[#allocation12_spill] sm:$0xff] }
 0x220   : > { %v2689_v51 = vmul.f32 %v13566_v42, %v2624_v38  ;;  %v2627_v50 = vadd.f32 %v10935_v31, %v2355_v33  ;;  %v2357_v37 = vadd.f32 %v10882_v9, %v13507_v62  ;;  %vm2656_vm3 = vcmp.ge.f32.partialorder %v2624_v38, 0.0 }
 0x221   : > { %10978 = vmatmul.mubr.msk.f32.gmra.mxu0 %vm2743_vm13, %v2720_v28  ;;  %v2547_v19 = vpop.f32.mrf.mxu1  ;;  %v2285_v57 = vpop.f32.mrf.mxu0  ;;  %v2722_v18 = vsel %vm2657_vm1, %v2625_v22, %v2690_v11 }
 0x222   : > { %v2626_v17 = vadd.f32 %v2547_v19, %v2354_v8  ;;  %v2356_v25 = vadd.f32 %v2285_v57, %v2089_v4  ;;  %v2692_v58 = vmul.f32 %v13566_v42, %v2627_v50  ;;  %v2721_v40 = vsel %vm2656_vm3, %v2624_v38, %v2689_v51 }
 0x223   : > { %v10938_v7 = vpop.f32.mrf.mxu1  ;;  %v10885_v2 = vpop.f32.mrf.mxu0  ;;  %vm2659_vm4 = vcmp.ge.f32.partialorder %v2627_v50, 0.0  ;;  %10980 = vmatprep.mubr.msk.f32.mxu0 %vm2743_vm13, %v2721_v40 }
 0x224   : > { %v2691_v62 = vmul.f32 %v13566_v42, %v2626_v17  ;;  %v2629_v20 = vadd.f32 %v10938_v7, %v2357_v37  ;;  %v2359_v60 = vadd.f32 %v10885_v2, %v13520_v14  ;;  %vm2658_vm5 = vcmp.ge.f32.partialorder %v2626_v17, 0.0 }
 0x225   : > { %10981 = vmatmul.mubr.msk.f32.gmra.mxu0 %vm2743_vm13, %v2722_v18  ;;  %v2557_v47 = vpop.f32.mrf.mxu1  ;;  %v2295_v0 = vpop.f32.mrf.mxu0  ;;  %v2724_v12 = vsel %vm2659_vm4, %v2627_v50, %v2692_v58 }
 0x226   : > { %v2628_v39 = vadd.f32 %v2557_v47, %v2356_v25  ;;  %v2358_v63 = vadd.f32 %v2295_v0, %v2091_v34  ;;  %v2694_v48 = vmul.f32 %v13566_v42, %v2629_v20  ;;  %v2723_v29 = vsel %vm2658_vm5, %v2626_v17, %v2691_v62  ;;  %v17895_v47 = vld [vmem:[#allocation6_spill] sm:$0xff] }
 0x227   : > { %v10941_v10 = vpop.f32.mrf.mxu1  ;;  %v10888_v61 = vpop.f32.mrf.mxu0  ;;  %vm2661_vm7 = vcmp.ge.f32.partialorder %v2629_v20, 0.0  ;;  %10983 = vmatprep.mubr.msk.f32.mxu0 %vm2743_vm13, %v2723_v29  ;;  %v17893_v62 = vmov 0.0   ;;  %v3523_v0 = vrot.slane %v17895_v47, 2 }
 0x228   : > { %v2693_v14 = vmul.f32 %v13566_v42, %v2628_v39  ;;  %v2631_v52 = vadd.f32 %v10941_v10, %v2359_v60  ;;  %v2361_v53 = vadd.f32 %v10888_v61, %v13531_v59  ;;  %vm2660_vm9 = vcmp.ge.f32.partialorder %v2628_v39, 0.0  ;;  %v17899_v10 = vld [vmem:[#allocation10_spill] sm:$0xff]  ;;  %v17900_v61 = vld [vmem:[#allocation8_spill] sm:$0xff] }
 0x229   : > { %10984 = vmatmul.mubr.msk.f32.gmra.mxu0 %vm2743_vm13, %v2724_v12  ;;  %v2567_v3 = vpop.f32.mrf.mxu1  ;;  %v2305_v24 = vpop.f32.mrf.mxu0  ;;  %v2726_v45 = vsel %vm2661_vm7, %v2629_v20, %v2694_v48  ;;  %v13715_v20 = vrot.slane %v17893_v62, 2  ;;  %v17898_v12 = vld [vmem:[#allocation9_spill] sm:$0xff]  ;;  %v3529_v29 = vrot.slane %v17899_v10, 2 }
 0x22a   : > { %v2630_v41 = vadd.f32 %v2567_v3, %v2358_v63  ;;  %v2360_v32 = vadd.f32 %v2305_v24, %v2093_v16  ;;  %v2696_v5 = vmul.f32 %v13566_v42, %v2631_v52  ;;  %v2725_v55 = vsel %vm2660_vm9, %v2628_v39, %v2693_v14  ;;  %v9432_v63 = vld [vmem:[%s17291_s5 + $0xf0] sm:$0xff]  ;;  %v9430_v3 = vld [vmem:[%s17291_s5 + $0xe0] sm:$0xff] }
 0x22b   : > { %v10944_v54 = vpop.f32.mrf.mxu1  ;;  %v10891_v22 = vpop.f32.mrf.mxu0  ;;  %vm2663_vm10 = vcmp.ge.f32.partialorder %v2631_v52, 0.0  ;;  %10986 = vmatprep.mubr.msk.f32.mxu0 %vm2743_vm13, %v2725_v55  ;;  %17894 = vst [vmem:[#allocation110_spill] sm:$0xff] %v13715_v20  ;;  %v3524_v39 = vrot.slane %v17896_v36, 2  ;;  %v3528_v48 = vrot.slane %v17898_v12, 2  ;;  %v3526_v14 = vrot.slane %v17900_v61, 2  ;;  %v17903_v24 = vld [vmem:[#allocation15_spill] sm:$0xff] }
 0x22c   : > { %v2695_v59 = vmul.f32 %v13566_v42, %v2630_v41  ;;  %v2633_v33 = vadd.f32 %v10944_v54, %v2361_v53  ;;  %v2363_v1 = vadd.f32 %v10891_v22, %v13544_v23  ;;  %vm2662_vm12 = vcmp.ge.f32.partialorder %v2630_v41, 0.0  ;;  %v17908_v22 = vld [vmem:[#allocation23_spill] sm:$0xff]  ;;  %v17933_v61 = vld [vmem:[#allocation58_spill] sm:$0xff]  ;;  %v17964_v62 = vld [vmem:[#allocation105_spill] sm:$0xff] }
 0x22d   : > { %10987 = vmatmul.mubr.msk.f32.gmra.mxu0 %vm2743_vm13, %v2726_v45  ;;  %v2577_v35 = vpop.f32.mrf.mxu1  ;;  %v2315_v49 = vpop.f32.mrf.mxu0  ;;  %v2728_v38 = vsel %vm2663_vm10, %v2631_v52, %v2696_v5  ;;  %v13729_v16 = vsel %vm3520_vm11, %v3523_v0, %v3524_v39  ;;  %v9431_v52 = vld [vmem:[%s17291_s5 + $0xe8] sm:$0xff]  ;;  %v13741_v53 = vsel %vm3520_vm11, %v3524_v39, %v3526_v14  ;;  %v3531_v45 = vrot.slane %v17905_v6, 2  ;;  %v13759_v5 = vld [vmem:[%s17291_s5 + $0x118] sm:$0xff] }
 0x22e   : > { %v2632_v13 = vadd.f32 %v2577_v35, %v2360_v32  ;;  %v2362_v56 = vadd.f32 %v2315_v49, %v2095_v46  ;;  %v2698_v8 = vmul.f32 %v13566_v42, %v2633_v33  ;;  %v2727_v28 = vsel %vm2662_vm12, %v2630_v41, %v2695_v59  ;;  %17897 = vst [vmem:[#allocation149_spill] sm:$0xff] %v13729_v16  ;;  %v17904_v41 = vld [vmem:[#allocation20_spill] sm:$0xff]  ;;  %v17910_v35 = vld [vmem:[#allocation13_spill] sm:$0xff]  ;;  %v17930_v39 = vld [vmem:[#allocation42_spill] sm:$0xff] }
 0x22f   : > { %v10947_v4 = vpop.f32.mrf.mxu1  ;;  %v10894_v11 = vpop.f32.mrf.mxu0  ;;  %vm2665_vm6 = vcmp.ge.f32.partialorder %v2633_v33, 0.0  ;;  %10989 = vmatprep.mubr.msk.f32.mxu0 %vm2743_vm13, %v2727_v28  ;;  %17901 = vst [vmem:[#allocation6_spill] sm:$0xff] %v13741_v53  ;;  %v3533_v46 = vrot.slane %v17903_v24, 2  ;;  %v3534_v32 = vrot.slane %v17904_v41, 2  ;;  %v13762_v54 = vsel %vm3520_vm11, %v3529_v29, %v3531_v45  ;;  %v17915_v28 = vld [vmem:[#allocation21_spill] sm:$0xff] }
 0x230   : > { %v2697_v31 = vmul.f32 %v13566_v42, %v2632_v13  ;;  %v2635_v27 = vadd.f32 %v10947_v4, %v2363_v1  ;;  %v2365_v23 = vadd.f32 %v10894_v11, %v13558_v15  ;;  %vm2664_vm8 = vcmp.ge.f32.partialorder %v2632_v13, 0.0  ;;  %17906 = vst [vmem:[#allocation9_spill] sm:$0xff] %v13762_v54 }
 0x231   : > { %10990 = vmatmul.mubr.msk.f32.gmra.mxu0 %vm2743_vm13, %v2728_v38  ;;  %v2587_v9 = vpop.f32.mrf.mxu1  ;;  %v2325_v51 = vpop.f32.mrf.mxu0  ;;  %v2730_v37 = vsel %vm2665_vm6, %v2633_v33, %v2698_v8  ;;  %v13767_v55 = vsel %vm3520_vm11, %v3533_v46, %v3534_v32  ;;  %v3538_v59 = vrot.slane %v17908_v22, 2  ;;  %v17909_v33 = vld [vmem:[#allocation27_spill] sm:$0xff]  ;;  %v3536_v49 = vrot.slane %v17910_v35, 2  ;;  %v17914_v8 = vld [vmem:[#allocation36_spill] sm:$0xff]  ;;  %v17939_v35 = vld [vmem:[#allocation73_spill] sm:$0xff] }
 0x232   : > { %v2634_v21 = vadd.f32 %v2587_v9, %v2362_v56  ;;  %v2364_v50 = vadd.f32 %v2325_v51, %v2097_v30  ;;  %v2729_v57 = vsel %vm2664_vm8, %v2632_v13, %v2697_v31  ;;  %v2700_v34 = vmul.f32 %v13566_v42, %v2635_v27  ;;  %17907 = vst [vmem:[#allocation10_spill] sm:$0xff] %v13767_v55  ;;  %v17913_v30 = vld [vmem:[#allocation29_spill] sm:$0xff]  ;;  %v17919_v51 = vld [vmem:[#allocation43_spill] sm:$0xff] }
 0x233   : > { %v10950_v19 = vpop.f32.mrf.mxu1  ;;  %10992 = vmatprep.mubr.msk.f32.mxu0 %vm2743_vm13, %v2729_v57  ;;  %vm2667_vm15 = vcmp.ge.f32.partialorder %v2635_v27, 0.0  ;;  %v3539_v1 = vrot.slane %v17909_v33, 2  ;;  %v13776_v13 = vsel %vm3520_vm11, %v3534_v32, %v3536_v49  ;;  %v3543_v38 = vrot.slane %v17913_v30, 2  ;;  %v17935_v46 = vld [vmem:[#allocation51_spill] sm:$0xff] }
 0x234   : > { %v2699_v17 = vmul.f32 %v13566_v42, %v2634_v21  ;;  %v2637_v25 = vadd.f32 %v10950_v19, %v2365_v23  ;;  %vm2666_vm14 = vcmp.ge.f32.partialorder %v2634_v21, 0.0  ;;  %v2732_v58 = vsel %vm2667_vm15, %v2635_v27, %v2700_v34  ;;  %17911 = vst [vmem:[#allocation8_spill] sm:$0xff] %v13776_v13  ;;  %v17918_v23 = vld [vmem:[#allocation37_spill] sm:$0xff] }
 0x235   : > { %10993 = vmatmul.mubr.msk.f32.gmra.mxu0 %vm2743_vm13, %v2730_v37  ;;  %v2597_v15 = vpop.f32.mrf.mxu1  ;;  %v13781_v56 = vsel %vm3520_vm11, %v3538_v59, %v3539_v1  ;;  %v3544_v4 = vrot.slane %v17914_v8, 2  ;;  %v3541_v11 = vrot.slane %v17915_v28, 2  ;;  %v3548_v9 = vrot.slane %v17918_v23, 2  ;;  %v17923_v34 = vld [vmem:[#allocation45_spill] sm:$0xff]  ;;  %v17938_v59 = vld [vmem:[#allocation67_spill] sm:$0xff] }
 0x236   : > { %v2636_v43 = vadd.f32 %v2597_v15, %v2364_v50  ;;  %v2731_v18 = vsel %vm2666_vm14, %v2634_v21, %v2699_v17  ;;  %v2702_v7 = vmul.f32 %v13566_v42, %v2637_v25  ;;  %vm2669_vm1 = vcmp.ge.f32.partialorder %v2637_v25, 0.0  ;;  %17912 = vst [vmem:[#allocation15_spill] sm:$0xff] %v13781_v56  ;;  %v17920_v50 = vld [vmem:[#allocation30_spill] sm:$0xff] }
 0x237   : > { %10995 = vmatprep.mubr.msk.f32.mxu0 %vm2743_vm13, %v2731_v18  ;;  %v13789_v31 = vsel %vm3520_vm11, %v3539_v1, %v3541_v11  ;;  %v13794_v27 = vsel %vm3520_vm11, %v3543_v38, %v3544_v4  ;;  %v3549_v21 = vrot.slane %v17919_v51, 2  ;;  %v3546_v37 = vrot.slane %v17920_v50, 2  ;;  %v17940_v38 = vld [vmem:[#allocation60_spill] sm:$0xff] }
 0x238   : > { %v2701_v40 = vmul.f32 %v13566_v42, %v2636_v43  ;;  %vm2668_vm0 = vcmp.ge.f32.partialorder %v2636_v43, 0.0  ;;  %v2734_v60 = vsel %vm2669_vm1, %v2637_v25, %v2702_v7  ;;  %17916 = vst [vmem:[#allocation20_spill] sm:$0xff] %v13789_v31  ;;  %17917 = vst [vmem:[#allocation12_spill] sm:$0xff] %v13794_v27  ;;  %v3553_v17 = vrot.slane %v17923_v34, 2  ;;  %v17924_v25 = vld [vmem:[#allocation46_spill] sm:$0xff]  ;;  %v17944_v50 = vld [vmem:[#allocation76_spill] sm:$0xff] }
 0x239   : > { %10996 = vmatmul.mubr.msk.f32.gmra.mxu0 %vm2743_vm13, %v2732_v58  ;;  %v13802_v19 = vsel %vm3520_vm11, %v3544_v4, %v3546_v37  ;;  %v13807_v57 = vsel %vm3520_vm11, %v3548_v9, %v3549_v21  ;;  %v3554_v15 = vrot.slane %v17924_v25, 2  ;;  %v3563_v14 = vrot.slane %v17933_v61, 2  ;;  %v17943_v9 = vld [vmem:[#allocation75_spill] sm:$0xff] }
 0x23a   : > { %v2733_v2 = vsel %vm2668_vm0, %v2636_v43, %v2701_v40  ;;  %17921 = vst [vmem:[#allocation23_spill] sm:$0xff] %v13802_v19  ;;  %17922 = vst [vmem:[#allocation27_spill] sm:$0xff] %v13807_v57  ;;  %v17925_v43 = vld [vmem:[#allocation35_spill] sm:$0xff]  ;;  %v17928_v40 = vld [vmem:[#allocation52_spill] sm:$0xff]  ;;  %v3561_v32 = vrot.slane %v17935_v46, 2  ;;  %v3568_v1 = vrot.slane %v17938_v59, 2 }
 0x23b   : > { %10998 = vmatprep.mubr.msk.f32.mxu0 %vm2743_vm13, %v2733_v2  ;;  %v3551_v18 = vrot.slane %v17925_v43, 2  ;;  %v13820_v7 = vsel %vm3520_vm11, %v3553_v17, %v3554_v15  ;;  %v3558_v2 = vrot.slane %v17928_v40, 2  ;;  %v3569_v49 = vrot.slane %v17939_v35, 2  ;;  %v17945_v17 = vld [vmem:[#allocation64_spill] sm:$0xff] }
 0x23c   : > { %17927 = vst [vmem:[#allocation29_spill] sm:$0xff] %v13820_v7  ;;  %v3566_v4 = vrot.slane %v17940_v38, 2  ;;  %v3574_v37 = vrot.slane %v17944_v50, 2  ;;  %v17954_v38 = vld [vmem:[#allocation90_spill] sm:$0xff]  ;;  %v3586_v42 = vrot.slane %v17960_v26, 2 }
 0x23d   : > { %10999 = vmatmul.mubr.msk.f32.gmra.mxu0 %vm2743_vm13, %v2734_v60  ;;  %v13815_v58 = vsel %vm3520_vm11, %v3549_v21, %v3551_v18  ;;  %v17929_v60 = vld [vmem:[#allocation57_spill] sm:$0xff]  ;;  %v13859_v11 = vsel %vm3520_vm11, %v3568_v1, %v3569_v49  ;;  %v3573_v21 = vrot.slane %v17943_v9, 2 }
 0x23e   : > { %11065 = vmatprep.mubr.msk.f32.mxu0 %vm1340_vm2, %v13715_v20  ;;  %17926 = vst [vmem:[#allocation13_spill] sm:$0xff] %v13815_v58  ;;  %v3559_v0 = vrot.slane %v17929_v60, 2  ;;  %17942 = vst [vmem:[#allocation45_spill] sm:$0xff] %v13859_v11  ;;  %v17953_v1 = vld [vmem:[#allocation89_spill] sm:$0xff] }
 0x23f   : > { %v13872_v18 = vsel %vm3520_vm11, %v3573_v21, %v3574_v37  ;;  %v17955_v21 = vld [vmem:[#allocation82_spill] sm:$0xff] }
 0x240   : > { %v13841_v6 = vsel %vm3520_vm11, %v3559_v0, %v3561_v32  ;;  %17947 = vst [vmem:[#allocation35_spill] sm:$0xff] %v13872_v18 }
 0x241   : > { %11066 = vmatmul.mubr.msk.f32.vlgmr.msra.gmra.mxu0 %vm1340_vm2, %v13715_v20  ;;  %17936 = vst [vmem:[#allocation37_spill] sm:$0xff] %v13841_v6 }
 0x242   : > { %11170 = vmatpush3.msra.mxu0 %v13608_v44  ;;  %11068 = vmatprep.mubr.msk.f32.mxu0 %vm1340_vm2, %v13729_v16  ;;  %v13749_v44 = vsel %vm3520_vm11, %v3528_v48, %v3529_v29  ;;  %v13833_v29 = vsel %vm3520_vm11, %v3558_v2, %v3559_v0  ;;  %v17948_v2 = vld [vmem:[#allocation81_spill] sm:$0xff] }
 0x243   : > { %11171 = vmatprep.subr.mxu0 %v9432_v63  ;;  %17902 = vst [vmem:[#allocation7_spill] sm:$0xff] %v13749_v44  ;;  %17932 = vst [vmem:[#allocation21_spill] sm:$0xff] %v13833_v29  ;;  %v3578_v0 = vrot.slane %v17948_v2, 2 }
 0x244   : > { %11172 = vmatpush3.msra.mxu0 %v9432_v63  ;;  %v3556_v63 = vrot.slane %v17930_v39, 2  ;;  %v17949_v39 = vld [vmem:[#allocation87_spill] sm:$0xff] }
 0x245   : > { %11069 = vmatmul.mubr.msk.f32.gmra.mxu0 %vm1340_vm2, %v13741_v53  ;;  %11173 = vmatprep.subr.mxu0 %v9431_v52 }
 0x246   : > { %11071 = vmatprep.mubr.msk.f32.mxu0 %vm1340_vm2, %v13749_v44  ;;  %11174 = vmatpush3.msra.mxu0 %v9431_v52  ;;  %v13828_v48 = vsel %vm3520_vm11, %v3554_v15, %v3556_v63  ;;  %v17934_v52 = vld [vmem:[#allocation65_spill] sm:$0xff]  ;;  %v3571_v15 = vrot.slane %v17945_v17, 2  ;;  %v3579_v63 = vrot.slane %v17949_v39, 2  ;;  %v3581_v17 = vrot.slane %v17955_v21, 2 }
 0x247   : > { %11175 = vmatprep.subr.mxu0 %v9430_v3  ;;  %17931 = vst [vmem:[#allocation36_spill] sm:$0xff] %v13828_v48 }
 0x248   : > { %11176 = vmatpush3.msra.mxu0 %v9430_v3  ;;  %v3564_v3 = vrot.slane %v17934_v52, 2  ;;  %v13867_v43 = vsel %vm3520_vm11, %v3569_v49, %v3571_v15  ;;  %v13885_v32 = vsel %vm3520_vm11, %v3578_v0, %v3579_v63  ;;  %v3583_v49 = vrot.slane %v17953_v1, 2  ;;  %v17958_v0 = vld [vmem:[#allocation95_spill] sm:$0xff] }
 0x249   : > { %11072 = vmatmul.mubr.msk.f32.gmra.mxu0 %vm1340_vm2, %v13762_v54  ;;  %11275 = vmatprep.subr.mxu0 %v13759_v5  ;;  %17946 = vst [vmem:[#allocation46_spill] sm:$0xff] %v13867_v43  ;;  %17952 = vst [vmem:[#allocation57_spill] sm:$0xff] %v13885_v32  ;;  %v13893_v15 = vsel %vm3520_vm11, %v3579_v63, %v3581_v17 }
 0x24a   : > { %11074 = vmatprep.mubr.msk.f32.mxu0 %vm1340_vm2, %v13767_v55  ;;  %v13846_v45 = vsel %vm3520_vm11, %v3563_v14, %v3564_v3  ;;  %v13854_v28 = vsel %vm3520_vm11, %v3564_v3, %v3566_v4  ;;  %v17950_v14 = vld [vmem:[#allocation72_spill] sm:$0xff]  ;;  %v3584_v4 = vrot.slane %v17954_v38, 2  ;;  %17956 = vst [vmem:[#allocation42_spill] sm:$0xff] %v13893_v15  ;;  %v17965_v38 = vld [vmem:[#allocation91_spill] sm:$0xff] }
 0x24b   : > { %17937 = vst [vmem:[#allocation43_spill] sm:$0xff] %v13846_v45  ;;  %17941 = vst [vmem:[#allocation30_spill] sm:$0xff] %v13854_v28  ;;  %v3576_v3 = vrot.slane %v17950_v14, 2  ;;  %v3588_v14 = vrot.slane %v17958_v0, 2  ;;  %v3594_v0 = vrot.slane %v17964_v62, 2 }
 0x24c   : > { %v13906_v21 = vsel %vm3520_vm11, %v3584_v4, %v3586_v42 }
 0x24d   : > { %11075 = vmatmul.mubr.msk.f32.gmra.mxu0 %vm1340_vm2, %v13776_v13  ;;  %v13880_v46 = vsel %vm3520_vm11, %v3574_v37, %v3576_v3  ;;  %v13898_v37 = vsel %vm3520_vm11, %v3583_v49, %v3584_v4  ;;  %v17959_v3 = vld [vmem:[#allocation97_spill] sm:$0xff]  ;;  %17961 = vst [vmem:[#allocation65_spill] sm:$0xff] %v13906_v21  ;;  %v17963_v49 = vld [vmem:[#allocation102_spill] sm:$0xff]  ;;  %v17968_v4 = vld [vmem:[#allocation104_spill] sm:$0xff] }
 0x24e   : > { %11077 = vmatprep.mubr.msk.f32.mxu0 %vm1340_vm2, %v13781_v56  ;;  %17951 = vst [vmem:[#allocation52_spill] sm:$0xff] %v13880_v46  ;;  %17957 = vst [vmem:[#allocation58_spill] sm:$0xff] %v13898_v37  ;;  %v3589_v20 = vrot.slane %v17959_v3, 2  ;;  %v3593_v17 = vrot.slane %v17963_v49, 2  ;;  %v3591_v3 = vrot.slane %v17965_v38, 2  ;;  %v9500_v38 = vld [vmem:[%s17291_s5 + $0x110] sm:$0xff] }
 0x250   : > { %v13911_v63 = vsel %vm3520_vm11, %v3588_v14, %v3589_v20  ;;  %v13919_v26 = vsel %vm3520_vm11, %v3589_v20, %v3591_v3  ;;  %v13924_v42 = vsel %vm3520_vm11, %v3593_v17, %v3594_v0  ;;  %v3596_v14 = vrot.slane %v17968_v4, 2  ;;  %v13936_v20 = vpop.f32.mrf.mxu1  ;;  %v9498_v17 = vld [vmem:[%s17291_s5 + $0x100] sm:$0xff] }
 0x251   : > { %11078 = vmatmul.mubr.msk.f32.gmra.mxu0 %vm1340_vm2, %v13789_v31  ;;  %17962 = vst [vmem:[#allocation51_spill] sm:$0xff] %v13911_v63  ;;  %17966 = vst [vmem:[#allocation67_spill] sm:$0xff] %v13919_v26 }
 0x252   : > { %11080 = vmatprep.mubr.msk.f32.mxu0 %vm1340_vm2, %v13794_v27  ;;  %17967 = vst [vmem:[#allocation73_spill] sm:$0xff] %v13924_v42  ;;  %v13930_v62 = vsel %vm3520_vm11, %v3594_v0, %v3596_v14  ;;  %v9499_v0 = vld [vmem:[%s17291_s5 + $0x108] sm:$0xff]  ;;  %v13949_v3 = vpop.f32.mrf.mxu1 }
 0x253   : > { %17969 = vst [vmem:[#allocation60_spill] sm:$0xff] %v13930_v62 }
 0x254   : > { %v13961_v4 = vpop.f32.mrf.mxu1 }
 0x255   : > { %11081 = vmatmul.mubr.msk.f32.gmra.mxu0 %vm1340_vm2, %v13802_v19 }
 0x256   : > { %11083 = vmatprep.mubr.msk.f32.mxu0 %vm1340_vm2, %v13807_v57  ;;  %v13967_v14 = vpop.f32.mrf.mxu1 }
 0x259   : > { %11084 = vmatmul.mubr.msk.f32.gmra.mxu0 %vm1340_vm2, %v13815_v58 }
 0x25a   : > { %11086 = vmatprep.mubr.msk.f32.mxu0 %vm1340_vm2, %v13820_v7 }
 0x25d   : > { %11087 = vmatmul.mubr.msk.f32.gmra.mxu0 %vm1340_vm2, %v13828_v48 }
 0x25e   : > { %11089 = vmatprep.mubr.msk.f32.mxu0 %vm1340_vm2, %v13833_v29 }
 0x261   : > { %11090 = vmatmul.mubr.msk.f32.gmra.mxu0 %vm1340_vm2, %v13841_v6 }
 0x262   : > { %11092 = vmatprep.mubr.msk.f32.mxu0 %vm1340_vm2, %v13846_v45 }
 0x265   : > { %11093 = vmatmul.mubr.msk.f32.gmra.mxu0 %vm1340_vm2, %v13854_v28 }
 0x266   : > { %11095 = vmatprep.mubr.msk.f32.mxu0 %vm1340_vm2, %v13859_v11 }
 0x269   : > { %11096 = vmatmul.mubr.msk.f32.gmra.mxu0 %vm1340_vm2, %v13867_v43 }
 0x26a   : > { %11098 = vmatprep.mubr.msk.f32.mxu0 %vm1340_vm2, %v13872_v18 }
 0x26d   : > { %11099 = vmatmul.mubr.msk.f32.gmra.mxu0 %vm1340_vm2, %v13880_v46 }
 0x26e   : > { %11101 = vmatprep.mubr.msk.f32.mxu0 %vm1340_vm2, %v13885_v32 }
 0x271   : > { %11102 = vmatmul.mubr.msk.f32.gmra.mxu0 %vm1340_vm2, %v13893_v15 }
 0x272   : > { %11104 = vmatprep.mubr.msk.f32.mxu0 %vm1340_vm2, %v13898_v37 }
 0x275   : > { %11105 = vmatmul.mubr.msk.f32.gmra.mxu0 %vm1340_vm2, %v13906_v21 }
 0x276   : > { %11107 = vmatprep.mubr.msk.f32.mxu0 %vm1340_vm2, %v13911_v63 }
 0x279   : > { %11108 = vmatmul.mubr.msk.f32.gmra.mxu0 %vm1340_vm2, %v13919_v26 }
 0x27a   : > { %11110 = vmatprep.mubr.msk.f32.mxu0 %vm1340_vm2, %v13924_v42 }
 0x27d   : > { %11111 = vmatmul.mubr.msk.f32.gmra.mxu0 %vm1340_vm2, %v13930_v62 }
 0x27e   : > { %11177 = vmatprep.mubr.msk.f32.mxu0 %vm1340_vm2, %v13729_v16 }
 0x281   : > { %11178 = vmatmul.mubr.msk.f32.vlgmr.msra.gmra.mxu0 %vm1340_vm2, %v13741_v53 }
 0x282   : > { %11180 = vmatprep.mubr.msk.f32.mxu0 %vm1340_vm2, %v13749_v44  ;;  %11276 = vmatpush3.msra.mxu0 %v13759_v5  ;;  %v9573_v5 = vld [vmem:[%s17291_s5 + $0x158] sm:$0xff] }
 0x283   : > { %11277 = vmatprep.subr.mxu0 %v9500_v38 }
 0x284   : > { %11278 = vmatpush3.msra.mxu0 %v9500_v38  ;;  %v13973_v38 = vpop.f32.mrf.mxu1 }
 0x285   : > { %11181 = vmatmul.mubr.msk.f32.gmra.mxu0 %vm1340_vm2, %v13762_v54  ;;  %11279 = vmatprep.subr.mxu0 %v9499_v0 }
 0x286   : > { %11183 = vmatprep.mubr.msk.f32.mxu0 %vm1340_vm2, %v13767_v55  ;;  %11280 = vmatpush3.msra.mxu0 %v9499_v0  ;;  %v13979_v0 = vpop.f32.mrf.mxu1 }
 0x287   : > { %11281 = vmatprep.subr.mxu0 %v9498_v17 }
 0x288   : > { %11282 = vmatpush3.msra.mxu0 %v9498_v17  ;;  %v13985_v17 = vpop.f32.mrf.mxu1 }
 0x289   : > { %11184 = vmatmul.mubr.msk.f32.gmra.mxu0 %vm1340_vm2, %v13776_v13  ;;  %11387 = vmatprep.subr.mxu0 %v9573_v5 }
 0x28a   : > { %11186 = vmatprep.mubr.msk.f32.mxu0 %vm1340_vm2, %v13781_v56 }
 0x28d   : > { %11187 = vmatmul.mubr.msk.f32.gmra.mxu0 %vm1340_vm2, %v13789_v31 }
 0x28e   : > { %11189 = vmatprep.mubr.msk.f32.mxu0 %vm1340_vm2, %v13794_v27 }
 0x291   : > { %11190 = vmatmul.mubr.msk.f32.gmra.mxu0 %vm1340_vm2, %v13802_v19  ;;  %v13991_v19 = vpop.f32.mrf.mxu1 }
 0x292   : > { %11192 = vmatprep.mubr.msk.f32.mxu0 %vm1340_vm2, %v13807_v57  ;;  %v14107_v57 = vld [vmem:[%s17291_s5 + $0x138] sm:$0xff] }
 0x293   : > { %11331 = vmatprep.subr.mxu1 %v14107_v57 }
 0x295   : > { %11193 = vmatmul.mubr.msk.f32.gmra.mxu0 %vm1340_vm2, %v13815_v58  ;;  %v13997_v58 = vpop.f32.mrf.mxu1 }
 0x296   : > { %11195 = vmatprep.mubr.msk.f32.mxu0 %vm1340_vm2, %v13820_v7 }
 0x299   : > { %11196 = vmatmul.mubr.msk.f32.gmra.mxu0 %vm1340_vm2, %v13828_v48  ;;  %v14003_v48 = vpop.f32.mrf.mxu1 }
 0x29a   : > { %11198 = vmatprep.mubr.msk.f32.mxu0 %vm1340_vm2, %v13833_v29  ;;  %v14089_v29 = vld [vmem:[%s17293_s7] sm:$0xff] }
 0x29d   : > { %11199 = vmatmul.mubr.msk.f32.gmra.mxu0 %vm1340_vm2, %v13841_v6  ;;  %v14009_v6 = vpop.f32.mrf.mxu1 }
 0x29e   : > { %11201 = vmatprep.mubr.msk.f32.mxu0 %vm1340_vm2, %v13846_v45 }
 0x2a1   : > { %11202 = vmatmul.mubr.msk.f32.gmra.mxu0 %vm1340_vm2, %v13854_v28  ;;  %v14015_v28 = vpop.f32.mrf.mxu1 }
 0x2a2   : > { %11204 = vmatprep.mubr.msk.f32.mxu0 %vm1340_vm2, %v13859_v11 }
 0x2a5   : > { %11205 = vmatmul.mubr.msk.f32.gmra.mxu0 %vm1340_vm2, %v13867_v43  ;;  %v14021_v43 = vpop.f32.mrf.mxu1 }
 0x2a6   : > { %11207 = vmatprep.mubr.msk.f32.mxu0 %vm1340_vm2, %v13872_v18 }
 0x2a9   : > { %11208 = vmatmul.mubr.msk.f32.gmra.mxu0 %vm1340_vm2, %v13880_v46  ;;  %v14027_v46 = vpop.f32.mrf.mxu1 }
 0x2aa   : > { %11210 = vmatprep.mubr.msk.f32.mxu0 %vm1340_vm2, %v13885_v32  ;;  %v17970_v32 = vld [vmem:[#allocation114_spill] sm:$0xff] }
 0x2ab   : > { %v4184_v18 = vrot.slane %v17970_v32, 2 }
 0x2ad   : > { %11211 = vmatmul.mubr.msk.f32.gmra.mxu0 %vm1340_vm2, %v13893_v15  ;;  %v14034_v15 = vpop.f32.mrf.mxu1 }
 0x2ae   : > { %11213 = vmatprep.mubr.msk.f32.mxu0 %vm1340_vm2, %v13898_v37  ;;  %v17971_v37 = vld [vmem:[#allocation111_spill] sm:$0xff] }
 0x2b1   : > { %11214 = vmatmul.mubr.msk.f32.gmra.mxu0 %vm1340_vm2, %v13906_v21  ;;  %v17972_v21 = vrot.slane %v17971_v37, 2 }
 0x2b2   : > { %11216 = vmatprep.mubr.msk.f32.mxu0 %vm1340_vm2, %v13911_v63  ;;  %v14045_v63 = vpop.f32.mrf.mxu1 }
 0x2b3   : > { %v14041_v11 = vsel %vm3520_vm11, %v4184_v18, %v17972_v21  ;;  %17974 = vst [vmem:[#allocation76_spill] sm:$0xff] %v14045_v63  ;;  %v9571_v18 = vld [vmem:[%s17291_s5 + $0x148] sm:$0xff] }
 0x2b4   : > { %17973 = vst [vmem:[#allocation75_spill] sm:$0xff] %v14041_v11 }
 0x2b5   : > { %11217 = vmatmul.mubr.msk.f32.gmra.mxu0 %vm1340_vm2, %v13919_v26  ;;  %v17975_v26 = vld [vmem:[#allocation112_spill] sm:$0xff] }
 0x2b6   : > { %11219 = vmatprep.mubr.msk.f32.mxu0 %vm1340_vm2, %v13924_v42  ;;  %v14051_v42 = vpop.f32.mrf.mxu1 }
 0x2b7   : > { %17976 = vst [vmem:[#allocation64_spill] sm:$0xff] %v14051_v42 }
 0x2b8   : > { %v14067_v21 = vpop.f32.mrf.mxu1 }
 0x2b9   : > { %11220 = vmatmul.mubr.msk.f32.gmra.mxu0 %vm1340_vm2, %v13930_v62  ;;  %v9572_v62 = vld [vmem:[%s17291_s5 + $0x150] sm:$0xff]  ;;  %17979 = vst [vmem:[#allocation72_spill] sm:$0xff] %v14067_v21 }
 0x2ba   : > { %11222 = vmatprep.mubr.msk.f32.mxu0 %vm1340_vm2, %v14041_v11 }
 0x2bd   : > { %11223 = vmatmul.mubr.msk.f32.gmra.mxu0 %vm1340_vm2, %v17975_v26  ;;  %v9570_v26 = vld [vmem:[%s17291_s5 + $0x140] sm:$0xff] }
 0x2be   : > { %11283 = vmatprep.mubr.msk.f32.mxu0 %vm1340_vm2, %v17895_v47 }
 0x2c1   : > { %v14056_v45 = vpop.f32.mrf.mxu0  ;;  %11284 = vmatmul.mubr.msk.f32.vlgmr.msra.gmra.mxu0 %vm1340_vm2, %v17896_v36 }
 0x2c2   : > { %17977 = vst [vmem:[#allocation81_spill] sm:$0xff] %v14056_v45  ;;  %11286 = vmatprep.mubr.msk.f32.mxu0 %vm1340_vm2, %v17898_v12  ;;  %11388 = vmatpush3.msra.mxu0 %v9573_v5  ;;  %v14080_v5 = vpop.f32.mrf.mxu1 }
 0x2c3   : > { %v14065_v47 = vpop.f32.mrf.mxu0  ;;  %11389 = vmatprep.subr.mxu0 %v9572_v62  ;;  %17982 = vst [vmem:[#allocation83_spill] sm:$0xff] %v14080_v5 }
 0x2c4   : > { %17978 = vst [vmem:[#allocation87_spill] sm:$0xff] %v14065_v47  ;;  %11390 = vmatpush3.msra.mxu0 %v9572_v62  ;;  %v14096_v7 = vpop.f32.mrf.mxu1 }
 0x2c5   : > { %v14072_v11 = vpop.f32.mrf.mxu0  ;;  %11287 = vmatmul.mubr.msk.f32.gmra.mxu0 %vm1340_vm2, %v17899_v10  ;;  %11391 = vmatprep.subr.mxu0 %v9571_v18  ;;  %17985 = vst [vmem:[#allocation104_spill] sm:$0xff] %v14096_v7 }
 0x2c6   : > { %17980 = vst [vmem:[#allocation89_spill] sm:$0xff] %v14072_v11  ;;  %11289 = vmatprep.mubr.msk.f32.mxu0 %vm1340_vm2, %v17903_v24  ;;  %11392 = vmatpush3.msra.mxu0 %v9571_v18  ;;  %v14112_v31 = vpop.f32.mrf.mxu1 }
 0x2c7   : > { %v14078_v36 = vpop.f32.mrf.mxu0  ;;  %11393 = vmatprep.subr.mxu0 %v9570_v26  ;;  %17988 = vst [vmem:[#allocation178_spill] sm:$0xff] %v14112_v31  ;;  %v18016_v31 = vld [vmem:[#allocation142_spill] sm:$0xff] }
 0x2c8   : > { %17981 = vst [vmem:[#allocation82_spill] sm:$0xff] %v14078_v36  ;;  %11394 = vmatpush3.msra.mxu0 %v9570_v26  ;;  %v14122_v55 = vpop.f32.mrf.mxu1 }
 0x2c9   : > { %v14082_v62 = vpop.f32.mrf.mxu0  ;;  %11290 = vmatmul.mubr.msk.f32.gmra.mxu0 %vm1340_vm2, %v17904_v41  ;;  %11499 = vmatprep.subr.mxu0 %v14089_v29  ;;  %17991 = vst [vmem:[#allocation181_spill] sm:$0xff] %v14122_v55 }
 0x2ca   : > { %17983 = vst [vmem:[#allocation102_spill] sm:$0xff] %v14082_v62  ;;  %11292 = vmatprep.mubr.msk.f32.mxu0 %vm1340_vm2, %v17908_v22  ;;  %v14132_v53 = vpop.f32.mrf.mxu1 }
 0x2cb   : > { %v14094_v18 = vpop.f32.mrf.mxu0  ;;  %17994 = vst [vmem:[#allocation184_spill] sm:$0xff] %v14132_v53 }
 0x2cc   : > { %17984 = vst [vmem:[#allocation91_spill] sm:$0xff] %v14094_v18 }
 0x2cd   : > { %v14098_v26 = vpop.f32.mrf.mxu0  ;;  %11293 = vmatmul.mubr.msk.f32.gmra.mxu0 %vm1340_vm2, %v17909_v33 }
 0x2ce   : > { %17986 = vst [vmem:[#allocation114_spill] sm:$0xff] %v14098_v26  ;;  %11295 = vmatprep.mubr.msk.f32.mxu0 %vm1340_vm2, %v17913_v30 }
 0x2cf   : > { %v14109_v27 = vpop.f32.mrf.mxu0 }
 0x2d0   : > { %17987 = vst [vmem:[#allocation111_spill] sm:$0xff] %v14109_v27  ;;  %v14148_v27 = vstv %s9081_s12 }
 0x2d1   : > { %v14114_v56 = vpop.f32.mrf.mxu0  ;;  %11296 = vmatmul.mubr.msk.f32.gmra.mxu0 %vm1340_vm2, %v17914_v8  ;;  %17997 = vst [vmem:[#allocation187_spill] sm:$0xff] %v14148_v27 }
 0x2d2   : > { %17989 = vst [vmem:[#allocation179_spill] sm:$0xff] %v14114_v56  ;;  %11298 = vmatprep.mubr.msk.f32.mxu0 %vm1340_vm2, %v17918_v23  ;;  %v14145_v56 = vpop.f32.mrf.mxu1 }
 0x2d3   : > { %v14120_v13 = vpop.f32.mrf.mxu0  ;;  %17996 = vst [vmem:[#allocation186_spill] sm:$0xff] %v14145_v56 }
 0x2d4   : > { %17990 = vst [vmem:[#allocation180_spill] sm:$0xff] %v14120_v13  ;;  %v14157_v62 = vpop.f32.mrf.mxu1 }
 0x2d5   : > { %v14124_v54 = vpop.f32.mrf.mxu0  ;;  %11299 = vmatmul.mubr.msk.f32.gmra.mxu0 %vm1340_vm2, %v17919_v51  ;;  %17999 = vst [vmem:[#allocation189_spill] sm:$0xff] %v14157_v62  ;;  %v479_v62 = vld [vmem:[%s12919_s16 + $0xb8] sm:$0xff] }
 0x2d6   : > { %17992 = vst [vmem:[#allocation182_spill] sm:$0xff] %v14124_v54  ;;  %11301 = vmatprep.mubr.msk.f32.mxu0 %vm1340_vm2, %v17923_v34  ;;  %v14143_v54 = vld [vmem:[%s17294_s8] ss:$0 sm:$0xff]  ;;  %v14170_v53 = vpop.f32.mrf.mxu1 }
 0x2d7   : > { %v14130_v44 = vpop.f32.mrf.mxu0  ;;  %18003 = vst [vmem:[#allocation191_spill] sm:$0xff] %v14170_v53 }
 0x2d8   : > { %17993 = vst [vmem:[#allocation183_spill] sm:$0xff] %v14130_v44  ;;  %v14183_v53 = vpop.f32.mrf.mxu1 }
 0x2d9   : > { %v14134_v16 = vpop.f32.mrf.mxu0  ;;  %11302 = vmatmul.mubr.msk.f32.gmra.mxu0 %vm1340_vm2, %v17924_v25  ;;  %18007 = vst [vmem:[#allocation193_spill] sm:$0xff] %v14183_v53 }
 0x2da   : > { %17995 = vst [vmem:[#allocation185_spill] sm:$0xff] %v14134_v16  ;;  %11304 = vmatprep.mubr.msk.f32.mxu0 %vm1340_vm2, %v17928_v40  ;;  %v14197_v53 = vpop.f32.mrf.mxu1 }
 0x2db   : > { %v2966_v13 = vpop.f32.mrf.mxu0  ;;  %18011 = vst [vmem:[#allocation195_spill] sm:$0xff] %v14197_v53  ;;  %v18019_v53 = vld [vmem:[#allocation90_spill] sm:$0xff] }
 0x2dc   : > { %v2967_v44 = vadd.f32 %v14143_v54, %v2966_v13 }
 0x2dd   : > { %v14150_v26 = vpop.f32.mrf.mxu0  ;;  %11305 = vmatmul.mubr.msk.f32.gmra.mxu0 %vm1340_vm2, %v17929_v60 }
 0x2de   : > { %17998 = vst [vmem:[#allocation188_spill] sm:$0xff] %v14150_v26  ;;  %vm3077_vm11 = vcmp.ge.f32.partialorder %v2967_v44, 0.0  ;;  %v3110_v16 = vmul.f32 %v14148_v27, %v2967_v44  ;;  %11307 = vmatprep.mubr.msk.f32.mxu0 %vm1340_vm2, %v17933_v61  ;;  %v18001_v26 = vld [vmem:[#allocation138_spill] sm:$0xff] }
 0x2df   : > { %v2976_v18 = vpop.f32.mrf.mxu0 }
 0x2e0   : > { %v3142_v36 = vsel %vm3077_vm11, %v2967_v44, %v3110_v16  ;;  %v2977_v11 = vadd.f32 %v14143_v54, %v2976_v18 }
 0x2e1   : > { %v14160_v13 = vpop.f32.mrf.mxu0  ;;  %11308 = vmatmul.mubr.msk.f32.gmra.mxu0 %vm1340_vm2, %v17934_v52  ;;  %v14165_v47 = vadd.f32 %v18001_v26, %v3142_v36 }
 0x2e2   : > { %18000 = vst [vmem:[#allocation190_spill] sm:$0xff] %v14160_v13  ;;  %vm3079_vm3 = vcmp.ge.f32.partialorder %v2977_v11, 0.0  ;;  %v3112_v45 = vmul.f32 %v14148_v27, %v2977_v11  ;;  %11310 = vmatprep.mubr.msk.f32.mxu0 %vm1340_vm2, %v17938_v59  ;;  %v18005_v13 = vld [vmem:[#allocation139_spill] sm:$0xff] }
 0x2e3   : > { %18002 = vst [vmem:[#allocation138_spill] sm:$0xff] %v14165_v47  ;;  %v2986_v56 = vpop.f32.mrf.mxu0 }
 0x2e4   : > { %v3144_v16 = vsel %vm3079_vm3, %v2977_v11, %v3112_v45  ;;  %v2987_v44 = vadd.f32 %v14143_v54, %v2986_v56 }
 0x2e5   : > { %v14173_v18 = vpop.f32.mrf.mxu0  ;;  %11311 = vmatmul.mubr.msk.f32.gmra.mxu0 %vm1340_vm2, %v17939_v35  ;;  %v14178_v36 = vadd.f32 %v18005_v13, %v3144_v16 }
 0x2e6   : > { %18004 = vst [vmem:[#allocation192_spill] sm:$0xff] %v14173_v18  ;;  %vm3081_vm4 = vcmp.ge.f32.partialorder %v2987_v44, 0.0  ;;  %v3114_v26 = vmul.f32 %v14148_v27, %v2987_v44  ;;  %11313 = vmatprep.mubr.msk.f32.mxu0 %vm1340_vm2, %v17943_v9  ;;  %v18009_v18 = vld [vmem:[#allocation141_spill] sm:$0xff] }
 0x2e7   : > { %18006 = vst [vmem:[#allocation139_spill] sm:$0xff] %v14178_v36  ;;  %v2996_v47 = vpop.f32.mrf.mxu0 }
 0x2e8   : > { %v3146_v45 = vsel %vm3081_vm4, %v2987_v44, %v3114_v26  ;;  %v2997_v56 = vadd.f32 %v14143_v54, %v2996_v47  ;;  %v18012_v26 = vld [vmem:[#allocation113_spill] sm:$0xff] }
 0x2e9   : > { %v14186_v11 = vpop.f32.mrf.mxu0  ;;  %11314 = vmatmul.mubr.msk.f32.gmra.mxu0 %vm1340_vm2, %v17944_v50  ;;  %v14191_v13 = vadd.f32 %v18009_v18, %v3146_v45  ;;  %v11848_v18 = vld [vmem:[%s17296_s10] ss:$0 sm:$0xff] }
 0x2ea   : > { %18008 = vst [vmem:[#allocation194_spill] sm:$0xff] %v14186_v11  ;;  %vm3083_vm5 = vcmp.ge.f32.partialorder %v2997_v56, 0.0  ;;  %v3116_v16 = vmul.f32 %v14148_v27, %v2997_v56  ;;  %11316 = vmatprep.mubr.msk.f32.mxu0 %vm1340_vm2, %v17948_v2  ;;  %v14201_v11 = vadd.s32 704, %v18012_v26  ;;  %v18014_v45 = vld [vmem:[#allocation85_spill] sm:$0xff] }
 0x2eb   : > { %18010 = vst [vmem:[#allocation141_spill] sm:$0xff] %v14191_v13  ;;  %v3006_v36 = vpop.f32.mrf.mxu0  ;;  %v14207_v13 = vadd.f32 %v11848_v18, %v18014_v45  ;;  %v14219_v18 = vpop.f32.mrf.mxu1 }
 0x2ec   : > { %v3148_v44 = vsel %vm3083_vm5, %v2997_v56, %v3116_v16  ;;  %v3007_v47 = vadd.f32 %v14143_v54, %v3006_v36  ;;  %18013 = vst [vmem:[#allocation196_spill] sm:$0xff] %v14201_v11  ;;  %vm3185_vm9 = vcmp.eq.s32.totalorder %v479_v62, %v14201_v11  ;;  %18018 = vst [vmem:[#allocation197_spill] sm:$0xff] %v14219_v18 }
 0x2ed   : > { %18015 = vst [vmem:[#allocation85_spill] sm:$0xff] %v14207_v13  ;;  %v10988_v55 = vpop.f32.mrf.mxu0  ;;  %11317 = vmatmul.mubr.msk.f32.gmra.mxu0 %vm1340_vm2, %v17949_v39  ;;  %v14212_v7 = vadd.f32 %v18016_v31, %v3148_v44  ;;  %v3217_v44 = vsel %vm3185_vm9, %v14207_v13, 0.0  ;;  %v14235_v13 = vpop.f32.mrf.mxu1 }
 0x2ee   : > { %vm3085_vm7 = vcmp.ge.f32.partialorder %v3007_v47, 0.0  ;;  %v3118_v36 = vmul.f32 %v14148_v27, %v3007_v47  ;;  %v3022_v56 = vadd.f32 %v10988_v55, %v14143_v54  ;;  %11319 = vmatprep.mubr.msk.f32.mxu0 %vm1340_vm2, %v17953_v1  ;;  %v18020_v55 = vld [vmem:[#allocation143_spill] sm:$0xff] }
 0x2ef   : > { %18017 = vst [vmem:[#allocation142_spill] sm:$0xff] %v14212_v7  ;;  %v3016_v16 = vpop.f32.mrf.mxu0 }
 0x2f0   : > { %v3150_v45 = vsel %vm3085_vm7, %v3007_v47, %v3118_v36  ;;  %vm3088_vm10 = vcmp.ge.f32.partialorder %v3022_v56, 0.0  ;;  %v3121_v26 = vmul.f32 %v14148_v27, %v3022_v56  ;;  %v3017_v31 = vadd.f32 %v14143_v54, %v3016_v16  ;;  %v18022_v36 = vld [vmem:[#allocation95_spill] sm:$0xff] }
 0x2f1   : > { %v10991_v7 = vpop.f32.mrf.mxu0  ;;  %11320 = vmatmul.mubr.msk.f32.gmra.mxu0 %vm1340_vm2, %v18019_v53  ;;  %v14227_v62 = vadd.f32 %v18020_v55, %v3150_v45  ;;  %18024 = vst [vmem:[#allocation95_spill] sm:$0xff] %v14235_v13  ;;  %v18026_v55 = vld [vmem:[#allocation144_spill] sm:$0xff] }
 0x2f2   : > { %v3153_v11 = vsel %vm3088_vm10, %v3022_v56, %v3121_v26  ;;  %vm3087_vm12 = vcmp.ge.f32.partialorder %v3017_v31, 0.0  ;;  %v3120_v5 = vmul.f32 %v14148_v27, %v3017_v31  ;;  %v3032_v47 = vadd.f32 %v10991_v7, %v14143_v54  ;;  %11322 = vmatprep.mubr.msk.f32.mxu0 %vm1340_vm2, %v18022_v36  ;;  %v18025_v56 = vld [vmem:[#allocation97_spill] sm:$0xff] }
 0x2f3   : > { %18021 = vst [vmem:[#allocation90_spill] sm:$0xff] %v14227_v62  ;;  %v14233_v18 = vadd.f32 %v3217_v44, %v3153_v11  ;;  %v3026_v16 = vpop.f32.mrf.mxu0 }
 0x2f4   : > { %v3152_v21 = vsel %vm3087_vm12, %v3017_v31, %v3120_v5  ;;  %vm3090_vm6 = vcmp.ge.f32.partialorder %v3032_v47, 0.0  ;;  %v3123_v42 = vmul.f32 %v14148_v27, %v3032_v47  ;;  %v3027_v45 = vadd.f32 %v14143_v54, %v3026_v16  ;;  %v18028_v5 = vld [vmem:[#allocation116_spill] sm:$0xff] }
 0x2f5   : > { %18023 = vst [vmem:[#allocation143_spill] sm:$0xff] %v14233_v18  ;;  %v10994_v26 = vpop.f32.mrf.mxu0  ;;  %11323 = vmatmul.mubr.msk.f32.gmra.mxu0 %vm1340_vm2, %v18025_v56  ;;  %v14242_v7 = vadd.f32 %v18026_v55, %v3152_v21  ;;  %v14251_v18 = vpop.f32.mrf.mxu1  ;;  %v18031_v55 = vld [vmem:[#allocation105_spill] sm:$0xff] }
 0x2f6   : > { %v3155_v62 = vsel %vm3090_vm6, %v3032_v47, %v3123_v42  ;;  %vm3089_vm8 = vcmp.ge.f32.partialorder %v3027_v45, 0.0  ;;  %v3122_v11 = vmul.f32 %v14148_v27, %v3027_v45  ;;  %v3042_v44 = vadd.f32 %v10994_v26, %v14143_v54  ;;  %11325 = vmatprep.mubr.msk.f32.mxu0 %vm1340_vm2, %v17963_v49  ;;  %18030 = vst [vmem:[#allocation116_spill] sm:$0xff] %v14251_v18  ;;  %v18032_v26 = vld [vmem:[#allocation145_spill] sm:$0xff] }
 0x2f7   : > { %18027 = vst [vmem:[#allocation97_spill] sm:$0xff] %v14242_v7  ;;  %v14249_v31 = vadd.f32 %v18028_v5, %v3155_v62  ;;  %v3036_v16 = vpop.f32.mrf.mxu0 }
 0x2f8   : > { %v3154_v13 = vsel %vm3089_vm8, %v3027_v45, %v3122_v11  ;;  %vm3092_vm14 = vcmp.ge.f32.partialorder %v3042_v44, 0.0  ;;  %v3125_v21 = vmul.f32 %v14148_v27, %v3042_v44  ;;  %v3037_v42 = vadd.f32 %v14143_v54, %v3036_v16  ;;  %v18034_v45 = vld [vmem:[#allocation120_spill] sm:$0xff] }
 0x2f9   : > { %18029 = vst [vmem:[#allocation144_spill] sm:$0xff] %v14249_v31  ;;  %v10997_v47 = vpop.f32.mrf.mxu0  ;;  %11326 = vmatmul.mubr.msk.f32.gmra.mxu0 %vm1340_vm2, %v18031_v55  ;;  %v14258_v7 = vadd.f32 %v18032_v26, %v3154_v13  ;;  %v14267_v31 = vpop.f32.mrf.mxu1 }
 0x2fa   : > { %v3157_v63 = vsel %vm3092_vm14, %v3042_v44, %v3125_v21  ;;  %vm3091_vm15 = vcmp.ge.f32.partialorder %v3037_v42, 0.0  ;;  %v3124_v62 = vmul.f32 %v14148_v27, %v3037_v42  ;;  %v3052_v5 = vadd.f32 %v10997_v47, %v14143_v54  ;;  %11328 = vmatprep.mubr.msk.f32.mxu0 %vm1340_vm2, %v17970_v32  ;;  %18036 = vst [vmem:[#allocation120_spill] sm:$0xff] %v14267_v31  ;;  %v18037_v47 = vld [vmem:[#allocation146_spill] sm:$0xff] }
 0x2fb   : > { %18033 = vst [vmem:[#allocation105_spill] sm:$0xff] %v14258_v7  ;;  %v14265_v11 = vadd.f32 %v18034_v45, %v3157_v63  ;;  %v3046_v16 = vpop.f32.mrf.mxu0 }
 0x2fc   : > { %v3156_v18 = vsel %vm3091_vm15, %v3037_v42, %v3124_v62  ;;  %vm3094_vm0 = vcmp.ge.f32.partialorder %v3052_v5, 0.0  ;;  %v3127_v13 = vmul.f32 %v14148_v27, %v3052_v5  ;;  %v3047_v44 = vadd.f32 %v14143_v54, %v3046_v16  ;;  %v18039_v42 = vld [vmem:[#allocation123_spill] sm:$0xff] }
 0x2fd   : > { %18035 = vst [vmem:[#allocation145_spill] sm:$0xff] %v14265_v11  ;;  %v11000_v21 = vpop.f32.mrf.mxu0  ;;  %11329 = vmatmul.mubr.msk.f32.gmra.mxu0 %vm1340_vm2, %v17971_v37  ;;  %v14274_v26 = vadd.f32 %v18037_v47, %v3156_v18  ;;  %v14283_v11 = vpop.f32.mrf.mxu1 }
 0x2fe   : > { %v3159_v7 = vsel %vm3094_vm0, %v3052_v5, %v3127_v13  ;;  %vm3093_vm1 = vcmp.ge.f32.partialorder %v3047_v44, 0.0  ;;  %v3126_v63 = vmul.f32 %v14148_v27, %v3047_v44  ;;  %v3062_v45 = vadd.f32 %v11000_v21, %v14143_v54  ;;  %11395 = vmatprep.mubr.msk.f32.mxu0 %vm1340_vm2, %v17898_v12  ;;  %v18041_v21 = vld [vmem:[#allocation147_spill] sm:$0xff] }
 0x2ff   : > { %18038 = vst [vmem:[#allocation146_spill] sm:$0xff] %v14274_v26  ;;  %v14281_v62 = vadd.f32 %v18039_v42, %v3159_v7  ;;  %v3056_v16 = vpop.f32.mrf.mxu0  ;;  %v14303_v42 = vpop.f32.mrf.mxu1 }
 0x300   : > { %v3158_v31 = vsel %vm3093_vm1, %v3047_v44, %v3126_v63  ;;  %vm3096_vm11 = vcmp.ge.f32.partialorder %v3062_v45, 0.0  ;;  %v3129_v18 = vmul.f32 %v14148_v27, %v3062_v45  ;;  %v3057_v5 = vadd.f32 %v14143_v54, %v3056_v16  ;;  %v18043_v44 = vld [vmem:[#allocation131_spill] sm:$0xff] }
 0x301   : > { %18040 = vst [vmem:[#allocation123_spill] sm:$0xff] %v14281_v62  ;;  %v14287_v13 = vpop.f32.mrf.mxu0  ;;  %11396 = vmatmul.mubr.msk.f32.vlgmr.msra.gmra.mxu0 %vm1340_vm2, %v17899_v10  ;;  %v14292_v47 = vadd.f32 %v18041_v21, %v3158_v31  ;;  %v18045_v31 = vld [vmem:[#allocation148_spill] sm:$0xff] }
 0x302   : > { %v3161_v12 = vsel %vm3096_vm11, %v3062_v45, %v3129_v18  ;;  %vm3095_vm3 = vcmp.ge.f32.partialorder %v3057_v5, 0.0  ;;  %v3128_v7 = vmul.f32 %v14148_v27, %v3057_v5  ;;  %11398 = vmatprep.mubr.msk.f32.mxu0 %vm1340_vm2, %v17903_v24  ;;  %11500 = vmatpush3.msra.mxu0 %v14089_v29  ;;  %v14316_v29 = vpop.f32.mrf.mxu1 }
 0x303   : > { %18042 = vst [vmem:[#allocation147_spill] sm:$0xff] %v14292_v47  ;;  %v14299_v63 = vadd.f32 %v18043_v44, %v3161_v12  ;;  %v14301_v54 = vpop.f32.mrf.mxu0 }
 0x304   : > { %v3160_v10 = vsel %vm3095_vm3, %v3057_v5, %v3128_v7 }
 0x305   : > { %18044 = vst [vmem:[#allocation131_spill] sm:$0xff] %v14299_v63  ;;  %v14305_v16 = vpop.f32.mrf.mxu0  ;;  %11399 = vmatmul.mubr.msk.f32.gmra.mxu0 %vm1340_vm2, %v17904_v41  ;;  %v14310_v45 = vadd.f32 %v18045_v31, %v3160_v10  ;;  %v14326_v41 = vpop.f32.mrf.mxu1 }
 0x306   : > { %11401 = vmatprep.mubr.msk.f32.mxu0 %vm1340_vm2, %v17908_v22 }
 0x307   : > { %18046 = vst [vmem:[#allocation148_spill] sm:$0xff] %v14310_v45  ;;  %v14314_v24 = vpop.f32.mrf.mxu0  ;;  %v14336_v12 = vpop.f32.mrf.mxu1 }
 0x309   : > { %v14318_v18 = vpop.f32.mrf.mxu0  ;;  %11402 = vmatmul.mubr.msk.f32.gmra.mxu0 %vm1340_vm2, %v17909_v33  ;;  %v14346_v7 = vpop.f32.mrf.mxu1 }
 0x30a   : > { %11404 = vmatprep.mubr.msk.f32.mxu0 %vm1340_vm2, %v17913_v30 }
 0x30b   : > { %v14324_v5 = vpop.f32.mrf.mxu0  ;;  %v14356_v44 = vpop.f32.mrf.mxu1 }
 0x30d   : > { %v14328_v21 = vpop.f32.mrf.mxu0  ;;  %11405 = vmatmul.mubr.msk.f32.gmra.mxu0 %vm1340_vm2, %v17914_v8  ;;  %v14366_v10 = vpop.f32.mrf.mxu1 }
 0x30e   : > { %11407 = vmatprep.mubr.msk.f32.mxu0 %vm1340_vm2, %v17918_v23 }
 0x30f   : > { %v14334_v22 = vpop.f32.mrf.mxu0  ;;  %v14376_v31 = vpop.f32.mrf.mxu1 }
 0x311   : > { %v14338_v33 = vpop.f32.mrf.mxu0  ;;  %11408 = vmatmul.mubr.msk.f32.gmra.mxu0 %vm1340_vm2, %v17919_v51  ;;  %v14386_v45 = vpop.f32.mrf.mxu1 }
 0x312   : > { %11410 = vmatprep.mubr.msk.f32.mxu0 %vm1340_vm2, %v17923_v34 }
 0x313   : > { %v14344_v30 = vpop.f32.mrf.mxu0  ;;  %v14396_v63 = vpop.f32.mrf.mxu1 }
 0x315   : > { %v14348_v8 = vpop.f32.mrf.mxu0  ;;  %11411 = vmatmul.mubr.msk.f32.gmra.mxu0 %vm1340_vm2, %v17924_v25  ;;  %v14406_v62 = vpop.f32.mrf.mxu1 }
 0x316   : > { %11413 = vmatprep.mubr.msk.f32.mxu0 %vm1340_vm2, %v17928_v40 }
 0x317   : > { %v14354_v23 = vpop.f32.mrf.mxu0  ;;  %v14416_v47 = vpop.f32.mrf.mxu1 }
 0x319   : > { %v14358_v51 = vpop.f32.mrf.mxu0  ;;  %11414 = vmatmul.mubr.msk.f32.gmra.mxu0 %vm1340_vm2, %v17929_v60  ;;  %v14426_v26 = vpop.f32.mrf.mxu1 }
 0x31a   : > { %11416 = vmatprep.mubr.msk.f32.mxu0 %vm1340_vm2, %v17933_v61 }
 0x31b   : > { %v14364_v34 = vpop.f32.mrf.mxu0  ;;  %v14443_v27 = vpop.f32.mrf.mxu1 }
 0x31d   : > { %v14368_v25 = vpop.f32.mrf.mxu0  ;;  %11417 = vmatmul.mubr.msk.f32.gmra.mxu0 %vm1340_vm2, %v17934_v52 }
 0x31e   : > { %11419 = vmatprep.mubr.msk.f32.mxu0 %vm1340_vm2, %v17938_v59 }
 0x31f   : > { %v14374_v40 = vpop.f32.mrf.mxu0 }
 0x321   : > { %v14378_v60 = vpop.f32.mrf.mxu0  ;;  %11420 = vmatmul.mubr.msk.f32.gmra.mxu0 %vm1340_vm2, %v17939_v35 }
 0x322   : > { %11422 = vmatprep.mubr.msk.f32.mxu0 %vm1340_vm2, %v17943_v9 }
 0x323   : > { %v14384_v61 = vpop.f32.mrf.mxu0 }
 0x325   : > { %v14388_v52 = vpop.f32.mrf.mxu0  ;;  %11423 = vmatmul.mubr.msk.f32.gmra.mxu0 %vm1340_vm2, %v17944_v50 }
 0x326   : > { %11425 = vmatprep.mubr.msk.f32.mxu0 %vm1340_vm2, %v17948_v2 }
 0x327   : > { %v14394_v59 = vpop.f32.mrf.mxu0 }
 0x329   : > { %v14398_v35 = vpop.f32.mrf.mxu0  ;;  %11426 = vmatmul.mubr.msk.f32.gmra.mxu0 %vm1340_vm2, %v17949_v39 }
 0x32a   : > { %11428 = vmatprep.mubr.msk.f32.mxu0 %vm1340_vm2, %v17953_v1 }
 0x32b   : > { %v14404_v9 = vpop.f32.mrf.mxu0 }
 0x32c   : > { %18047 = vst [vmem:[#allocation198_spill] sm:$0xff] %v14404_v9 }
 0x32d   : > { %v14408_v50 = vpop.f32.mrf.mxu0  ;;  %11429 = vmatmul.mubr.msk.f32.gmra.mxu0 %vm1340_vm2, %v18019_v53 }
 0x32e   : > { %18048 = vst [vmem:[#allocation199_spill] sm:$0xff] %v14408_v50  ;;  %11431 = vmatprep.mubr.msk.f32.mxu0 %vm1340_vm2, %v18022_v36 }
 0x32f   : > { %v14414_v2 = vpop.f32.mrf.mxu0 }
 0x330   : > { %18049 = vst [vmem:[#allocation200_spill] sm:$0xff] %v14414_v2 }
 0x331   : > { %v14418_v39 = vpop.f32.mrf.mxu0  ;;  %11432 = vmatmul.mubr.msk.f32.gmra.mxu0 %vm1340_vm2, %v18025_v56  ;;  %v14439_v56 = vld [vmem:[%s17292_s6] ss:$0 sm:$0xff] }
 0x332   : > { %18050 = vst [vmem:[#allocation201_spill] sm:$0xff] %v14418_v39  ;;  %11434 = vmatprep.mubr.msk.f32.mxu0 %vm1340_vm2, %v17963_v49  ;;  %v3489_v49 = vadd.f32 %v14439_v56, %v13936_v20  ;;  %v3491_v20 = vadd.f32 %v14439_v56, %v13961_v4 }
 0x333   : > { %v14424_v1 = vpop.f32.mrf.mxu0 }
 0x334   : > { %18051 = vst [vmem:[#allocation202_spill] sm:$0xff] %v14424_v1  ;;  %v3891_v39 = vadd.f32 %v14287_v13, %v3489_v49 }
 0x335   : > { %v14428_v53 = vpop.f32.mrf.mxu0  ;;  %11435 = vmatmul.mubr.msk.f32.gmra.mxu0 %vm1340_vm2, %v18031_v55  ;;  %v18055_v55 = vmov 0.0  }
 0x336   : > { %18052 = vst [vmem:[#allocation203_spill] sm:$0xff] %v14428_v53  ;;  %11437 = vmatprep.mubr.msk.f32.mxu0 %vm1340_vm2, %v17970_v32  ;;  %v14454_v53 = vpop.f32.mrf.mxu1  ;;  %v4153_v13 = vadd.f32 %v14283_v11, %v3891_v39 }
 0x337   : > { %v14434_v36 = vpop.f32.mrf.mxu0 }
 0x338   : > { %18053 = vst [vmem:[#allocation204_spill] sm:$0xff] %v14434_v36  ;;  %v3488_v36 = vadd.f32 %v14439_v56, %v13949_v3  ;;  %v14467_v50 = vpop.f32.mrf.mxu1  ;;  %v3893_v3 = vadd.f32 %v14305_v16, %v3491_v20 }
 0x339   : > { %v14445_v1 = vpop.f32.mrf.mxu0  ;;  %11438 = vmatmul.mubr.msk.f32.gmra.mxu0 %vm1340_vm2, %v17971_v37 }
 0x33a   : > { %18054 = vst [vmem:[#allocation205_spill] sm:$0xff] %v14445_v1  ;;  %11440 = vmatprep.mubr.f32.mxu0 %v18055_v55  ;;  %v3890_v37 = vadd.f32 %v14301_v54, %v3488_v36  ;;  %v3490_v1 = vadd.f32 %v14439_v56, %v13967_v14  ;;  %v3492_v14 = vadd.f32 %v14439_v56, %v13979_v0 }
 0x33b   : > { %v14450_v32 = vpop.f32.mrf.mxu0  ;;  %v4155_v11 = vadd.f32 %v14316_v29, %v3893_v3  ;;  %v3497_v29 = vadd.f32 %v14439_v56, %v13997_v58 }
 0x33c   : > { %18056 = vst [vmem:[#allocation206_spill] sm:$0xff] %v14450_v32  ;;  %v3892_v49 = vadd.f32 %v14314_v24, %v3490_v1  ;;  %v4152_v54 = vadd.f32 %v14303_v42, %v3890_v37  ;;  %v3495_v24 = vadd.f32 %v14439_v56, %v13985_v17  ;;  %v3894_v39 = vadd.f32 %v14324_v5, %v3492_v14 }
 0x33d   : > { %v14457_v2 = vpop.f32.mrf.mxu0  ;;  %11441 = vmatmul.mubr.f32.gmra.mxu0 %v18055_v55  ;;  %v3493_v55 = vadd.f32 %v14439_v56, %v13973_v38  ;;  %v18059_v38 = vld [vmem:[#allocation109_spill] sm:$0xff]  ;;  %v3496_v17 = vadd.f32 %v14439_v56, %v14003_v48  ;;  %v9536_v48 = vld [vmem:[%s17291_s5 + $0x130] sm:$0xff] }
 0x33e   : > { %18057 = vst [vmem:[#allocation207_spill] sm:$0xff] %v14457_v2  ;;  %v4154_v42 = vadd.f32 %v14326_v41, %v3892_v49  ;;  %v3897_v3 = vadd.f32 %v14328_v21, %v3495_v24  ;;  %v4156_v58 = vadd.f32 %v14346_v7, %v3894_v39  ;;  %v9535_v7 = vld [vmem:[%s17291_s5 + $0x128] sm:$0xff] }
 0x33f   : > { %v14465_v32 = vpop.f32.mrf.mxu0  ;;  %v3895_v9 = vadd.f32 %v14318_v18, %v3493_v55  ;;  %v3494_v18 = vadd.f32 %v14439_v56, %v13991_v19 }
 0x340   : > { %18058 = vst [vmem:[#allocation208_spill] sm:$0xff] %v14465_v32  ;;  %v14477_v32 = vpop.f32.mrf.mxu1  ;;  %v4159_v24 = vadd.f32 %v14356_v44, %v3897_v3 }
 0x341   : > { %v11179_v2 = vpop.f32.mrf.mxu0  ;;  %v3896_v55 = vadd.f32 %v14334_v22, %v3494_v18  ;;  %v3499_v22 = vadd.f32 %v14439_v56, %v14009_v6  ;;  %v14534_v18 = vld [vmem:[%s17291_s5 + $0x178] sm:$0xff] }
 0x342   : > { %v4424_v4 = vadd.f32 %v11179_v2, %v4153_v13  ;;  %v14493_v37 = vpop.f32.mrf.mxu1  ;;  %v4157_v13 = vadd.f32 %v14336_v12, %v3895_v9  ;;  %v3899_v12 = vadd.f32 %v14338_v33, %v3497_v29 }
 0x343   : > { %v4264_v36 = vpop.f32.mrf.mxu0 }
 0x344   : > { %v4423_v16 = vadd.f32 %v4264_v36, %v4152_v54  ;;  %v4488_v2 = vmul.f32 %v4424_v4, %v18059_v38  ;;  %vm4456_vm4 = vcmp.ge.f32.partialorder %v4424_v4, 0.0 }
 0x345   : > { %v11182_v1 = vpop.f32.mrf.mxu0 }
 0x346   : > { %v4487_v0 = vmul.f32 %v4423_v16, %v18059_v38  ;;  %v4426_v20 = vadd.f32 %v11182_v1, %v4155_v11  ;;  %vm4455_vm5 = vcmp.ge.f32.partialorder %v4423_v16, 0.0  ;;  %v4520_v54 = vsel %vm4456_vm4, %v4424_v4, %v4488_v2  ;;  %v14513_v4 = vpop.f32.mrf.mxu1  ;;  %v9534_v1 = vld [vmem:[%s17291_s5 + $0x120] sm:$0xff] }
 0x347   : > { %v4274_v5 = vpop.f32.mrf.mxu0 }
 0x348   : > { %v4425_v41 = vadd.f32 %v4274_v5, %v4154_v42  ;;  %v4519_v49 = vsel %vm4455_vm5, %v4423_v16, %v4487_v0  ;;  %v4490_v19 = vmul.f32 %v4426_v20, %v18059_v38  ;;  %vm4458_vm7 = vcmp.ge.f32.partialorder %v4426_v20, 0.0  ;;  %v14536_v29 = vpop.f32.mrf.mxu1 }
 0x349   : > { %v11185_v14 = vpop.f32.mrf.mxu0  ;;  %11227 = vmatprep.mubr.msk.f32.mxu1 %vm2743_vm13, %v4519_v49  ;;  %v3898_v16 = vadd.f32 %v14344_v30, %v3496_v17  ;;  %v3498_v42 = vadd.f32 %v14439_v56, %v14015_v28  ;;  %v3501_v0 = vadd.f32 %v14439_v56, %v14021_v43  ;;  %v3901_v17 = vadd.f32 %v14348_v8, %v3499_v22 }
 0x34a   : > { %v4489_v21 = vmul.f32 %v4425_v41, %v18059_v38  ;;  %v4428_v36 = vadd.f32 %v11185_v14, %v4157_v13  ;;  %11228 = vmatmul.mubr.msk.f32.vlgmr.msra.gmra.mxu1 %vm2743_vm13, %v4520_v54  ;;  %vm4457_vm9 = vcmp.ge.f32.partialorder %v4425_v41, 0.0  ;;  %v4522_v6 = vsel %vm4458_vm7, %v4426_v20, %v4490_v19  ;;  %v14551_v54 = vpop.f32.mrf.mxu1 }
 0x34b   : > { %11332 = vmatpush3.msra.mxu1 %v14107_v57  ;;  %v4284_v9 = vpop.f32.mrf.mxu0  ;;  %v4158_v57 = vadd.f32 %v14366_v10, %v3896_v55  ;;  %v4161_v20 = vadd.f32 %v14376_v31, %v3899_v12  ;;  %v4160_v28 = vadd.f32 %v14386_v45, %v3898_v16  ;;  %v3900_v43 = vadd.f32 %v14354_v23, %v3498_v42 }
 0x34c   : > { %v4427_v11 = vadd.f32 %v4284_v9, %v4156_v58  ;;  %v4521_v39 = vsel %vm4457_vm9, %v4425_v41, %v4489_v21  ;;  %11333 = vmatprep.subr.mxu1 %v9536_v48  ;;  %v4492_v33 = vmul.f32 %v4428_v36, %v18059_v38  ;;  %vm4460_vm10 = vcmp.ge.f32.partialorder %v4428_v36, 0.0 }
 0x34d   : > { %v11188_v2 = vpop.f32.mrf.mxu0  ;;  %11230 = vmatprep.mubr.msk.f32.mxu1 %vm2743_vm13, %v4521_v39  ;;  %11334 = vmatpush3.msra.mxu1 %v9536_v48  ;;  %v3500_v45 = vadd.f32 %v14439_v56, %v14027_v46  ;;  %v3503_v8 = vadd.f32 %v14439_v56, %v14034_v15  ;;  %v3903_v19 = vadd.f32 %v14358_v51, %v3501_v0  ;;  %v18060_v51 = vld [vmem:[#allocation76_spill] sm:$0xff]  ;;  %v18063_v0 = vld [vmem:[#allocation83_spill] sm:$0xff] }
 0x34e   : > { %v4491_v30 = vmul.f32 %v4427_v11, %v18059_v38  ;;  %v4430_v44 = vadd.f32 %v11188_v2, %v4159_v24  ;;  %11231 = vmatmul.mubr.msk.f32.gmra.mxu1 %vm2743_vm13, %v4522_v6  ;;  %vm4459_vm12 = vcmp.ge.f32.partialorder %v4427_v11, 0.0  ;;  %11335 = vmatprep.subr.mxu1 %v9535_v7  ;;  %v4524_v41 = vsel %vm4460_vm10, %v4428_v36, %v4492_v33 }
 0x34f   : > { %v4294_v10 = vpop.f32.mrf.mxu0  ;;  %11336 = vmatpush3.msra.mxu1 %v9535_v7  ;;  %v4163_v58 = vadd.f32 %v14396_v63, %v3901_v17  ;;  %v3902_v21 = vadd.f32 %v14364_v34, %v3500_v45  ;;  %v4162_v46 = vadd.f32 %v14406_v62, %v3900_v43  ;;  %v3502_v63 = vadd.f32 %v14439_v56, %v18060_v51  ;;  %v18061_v7 = vld [vmem:[#allocation64_spill] sm:$0xff]  ;;  %v18065_v45 = vld [vmem:[#allocation178_spill] sm:$0xff] }
 0x350   : > { %v4429_v5 = vadd.f32 %v4294_v10, %v4158_v57  ;;  %v4523_v3 = vsel %vm4459_vm12, %v4427_v11, %v4491_v30  ;;  %11337 = vmatprep.subr.mxu1 %v9534_v1  ;;  %v4494_v31 = vmul.f32 %v4430_v44, %v18059_v38  ;;  %vm4462_vm6 = vcmp.ge.f32.partialorder %v4430_v44, 0.0  ;;  %v14565_v11 = vpop.f32.mrf.mxu1 }
 0x351   : > { %v11191_v13 = vpop.f32.mrf.mxu0  ;;  %11233 = vmatprep.mubr.msk.f32.mxu1 %vm2743_vm13, %v4523_v3  ;;  %11338 = vmatpush3.msra.mxu1 %v9534_v1  ;;  %v3505_v34 = vadd.f32 %v14439_v56, %v18061_v7  ;;  %v3905_v24 = vadd.f32 %v14368_v25, %v3503_v8  ;;  %v4165_v62 = vadd.f32 %v14416_v47, %v3903_v19  ;;  %v18062_v25 = vld [vmem:[#allocation72_spill] sm:$0xff] }
 0x352   : > { %v4493_v49 = vmul.f32 %v4429_v5, %v18059_v38  ;;  %v4432_v55 = vadd.f32 %v11191_v13, %v4161_v20  ;;  %11234 = vmatmul.mubr.msk.f32.gmra.mxu1 %vm2743_vm13, %v4524_v41  ;;  %vm4461_vm8 = vcmp.ge.f32.partialorder %v4429_v5, 0.0  ;;  %11443 = vmatprep.subr.mxu1 %v14534_v18  ;;  %v4526_v36 = vsel %vm4462_vm6, %v4430_v44, %v4494_v31  ;;  %v14579_v20 = vpop.f32.mrf.mxu1 }
 0x353   : > { %v4304_v23 = vpop.f32.mrf.mxu0  ;;  %v3904_v33 = vadd.f32 %v14374_v40, %v3502_v63  ;;  %v4164_v30 = vadd.f32 %v14426_v26, %v3902_v21  ;;  %v3504_v47 = vadd.f32 %v14439_v56, %v18062_v25  ;;  %v3507_v40 = vadd.f32 %v14439_v56, %v18063_v0 }
 0x354   : > { %v4431_v14 = vadd.f32 %v4304_v23, %v4160_v28  ;;  %v4525_v48 = vsel %vm4461_vm8, %v4429_v5, %v4493_v49  ;;  %v4496_v22 = vmul.f32 %v4432_v55, %v18059_v38  ;;  %vm4464_vm14 = vcmp.ge.f32.partialorder %v4432_v55, 0.0  ;;  %v14593_v23 = vpop.f32.mrf.mxu1 }
 0x355   : > { %v11194_v12 = vpop.f32.mrf.mxu0  ;;  %11236 = vmatprep.mubr.msk.f32.mxu1 %vm2743_vm13, %v4525_v48  ;;  %v3907_v17 = vadd.f32 %v14378_v60, %v3505_v34  ;;  %v4167_v26 = vadd.f32 %v14443_v27, %v3905_v24  ;;  %v3906_v28 = vadd.f32 %v14384_v61, %v3504_v47  ;;  %v4166_v13 = vadd.f32 %v14454_v53, %v3904_v33  ;;  %v18064_v60 = vld [vmem:[#allocation104_spill] sm:$0xff]  ;;  %v18068_v24 = vld [vmem:[#allocation198_spill] sm:$0xff]  ;;  %v18071_v47 = vld [vmem:[#allocation199_spill] sm:$0xff] }
 0x356   : > { %v4495_v15 = vmul.f32 %v4431_v14, %v18059_v38  ;;  %v4434_v9 = vadd.f32 %v11194_v12, %v4163_v58  ;;  %11237 = vmatmul.mubr.msk.f32.gmra.mxu1 %vm2743_vm13, %v4526_v36  ;;  %vm4463_vm15 = vcmp.ge.f32.partialorder %v4431_v14, 0.0  ;;  %v4528_v2 = vsel %vm4464_vm14, %v4432_v55, %v4496_v22  ;;  %v14607_v63 = vpop.f32.mrf.mxu1 }
 0x357   : > { %v4314_v16 = vpop.f32.mrf.mxu0  ;;  %v3506_v27 = vadd.f32 %v14439_v56, %v18064_v60  ;;  %v3509_v61 = vadd.f32 %v14439_v56, %v18065_v45  ;;  %v3909_v19 = vadd.f32 %v14388_v52, %v3507_v40  ;;  %v4169_v53 = vadd.f32 %v14467_v50, %v3907_v17  ;;  %v18066_v52 = vld [vmem:[#allocation181_spill] sm:$0xff]  ;;  %v18072_v17 = vld [vmem:[#allocation200_spill] sm:$0xff] }
 0x358   : > { %v4433_v39 = vadd.f32 %v4314_v16, %v4162_v46  ;;  %v4527_v6 = vsel %vm4463_vm15, %v4431_v14, %v4495_v15  ;;  %v4498_v57 = vmul.f32 %v4434_v9, %v18059_v38  ;;  %vm4466_vm0 = vcmp.ge.f32.partialorder %v4434_v9, 0.0  ;;  %v11162_v25 = vpop.f32.mrf.mxu1  ;;  %v18075_v45 = vld [vmem:[#allocation201_spill] sm:$0xff] }
 0x359   : > { %v11197_v1 = vpop.f32.mrf.mxu0  ;;  %11239 = vmatprep.mubr.msk.f32.mxu1 %vm2743_vm13, %v4527_v6  ;;  %v3908_v48 = vadd.f32 %v14394_v59, %v3506_v27  ;;  %v4168_v12 = vadd.f32 %v14477_v32, %v3906_v28  ;;  %v3508_v50 = vadd.f32 %v14439_v56, %v18066_v52  ;;  %v3911_v7 = vadd.f32 %v14398_v35, %v3509_v61  ;;  %v18069_v35 = vld [vmem:[#allocation186_spill] sm:$0xff] }
 0x35a   : > { %v4497_v44 = vmul.f32 %v4433_v39, %v18059_v38  ;;  %v4436_v42 = vadd.f32 %v11197_v1, %v4165_v62  ;;  %11240 = vmatmul.mubr.msk.f32.gmra.mxu1 %vm2743_vm13, %v4528_v2  ;;  %vm4465_vm1 = vcmp.ge.f32.partialorder %v4433_v39, 0.0  ;;  %v4530_v43 = vsel %vm4466_vm0, %v4434_v9, %v4498_v57  ;;  %v18067_v9 = vld [vmem:[#allocation184_spill] sm:$0xff]  ;;  %v4123_v27 = vpop.f32.mrf.mxu1 }
 0x35b   : > { %v4324_v10 = vpop.f32.mrf.mxu0  ;;  %v3511_v59 = vadd.f32 %v14439_v56, %v18067_v9  ;;  %v4171_v32 = vadd.f32 %v14493_v37, %v3909_v19  ;;  %v4170_v2 = vadd.f32 %v14513_v4, %v3908_v48  ;;  %v3510_v37 = vadd.f32 %v14439_v56, %v18069_v35 }
 0x35c   : > { %v4435_v5 = vadd.f32 %v4324_v10, %v4164_v30  ;;  %v4529_v3 = vsel %vm4465_vm1, %v4433_v39, %v4497_v44  ;;  %v4500_v41 = vmul.f32 %v4436_v42, %v18059_v38  ;;  %vm4468_vm11 = vcmp.ge.f32.partialorder %v4436_v42, 0.0  ;;  %v18070_v30 = vld [vmem:[#allocation189_spill] sm:$0xff]  ;;  %v11165_v9 = vpop.f32.mrf.mxu1 }
 0x35d   : > { %v11200_v31 = vpop.f32.mrf.mxu0  ;;  %11242 = vmatprep.mubr.msk.f32.mxu1 %vm2743_vm13, %v4529_v3  ;;  %v3910_v39 = vadd.f32 %v18068_v24, %v3508_v50  ;;  %v3513_v44 = vadd.f32 %v14439_v56, %v18070_v30  ;;  %v3913_v0 = vadd.f32 %v18071_v47, %v3511_v59  ;;  %v4173_v4 = vadd.f32 %v14536_v29, %v3911_v7  ;;  %v18079_v59 = vld [vmem:[#allocation203_spill] sm:$0xff] }
 0x35e   : > { %v4499_v49 = vmul.f32 %v4435_v5, %v18059_v38  ;;  %v4438_v55 = vadd.f32 %v11200_v31, %v4167_v26  ;;  %11243 = vmatmul.mubr.msk.f32.gmra.mxu1 %vm2743_vm13, %v4530_v43  ;;  %vm4467_vm3 = vcmp.ge.f32.partialorder %v4435_v5, 0.0  ;;  %v4532_v21 = vsel %vm4468_vm11, %v4436_v42, %v4500_v41  ;;  %v4133_v30 = vpop.f32.mrf.mxu1 }
 0x35f   : > { %v4334_v8 = vpop.f32.mrf.mxu0  ;;  %v4172_v43 = vadd.f32 %v14551_v54, %v3910_v39  ;;  %v3915_v61 = vadd.f32 %v18075_v45, %v3513_v44  ;;  %v4175_v54 = vadd.f32 %v14565_v11, %v3913_v0  ;;  %v18083_v44 = vld [vmem:[#allocation205_spill] sm:$0xff]  ;;  %v18087_v45 = vld [vmem:[#allocation208_spill] sm:$0xff] }
 0x360   : > { %v4437_v14 = vadd.f32 %v4334_v8, %v4166_v13  ;;  %v4531_v58 = vsel %vm4467_vm3, %v4435_v5, %v4499_v49  ;;  %v4502_v36 = vmul.f32 %v4438_v55, %v18059_v38  ;;  %vm4470_vm4 = vcmp.ge.f32.partialorder %v4438_v55, 0.0  ;;  %v18073_v13 = vld [vmem:[#allocation191_spill] sm:$0xff]  ;;  %v18074_v49 = vld [vmem:[#allocation193_spill] sm:$0xff] }
 0x361   : > { %v11203_v22 = vpop.f32.mrf.mxu0  ;;  %11245 = vmatprep.mubr.msk.f32.mxu1 %vm2743_vm13, %v4531_v58  ;;  %v3912_v5 = vadd.f32 %v18072_v17, %v3510_v37  ;;  %v3512_v29 = vadd.f32 %v14439_v56, %v18073_v13  ;;  %v18086_v13 = vld [vmem:[#allocation207_spill] sm:$0xff] }
 0x362   : > { %v4501_v46 = vmul.f32 %v4437_v14, %v18059_v38  ;;  %v4440_v15 = vadd.f32 %v11203_v22, %v4169_v53  ;;  %11246 = vmatmul.mubr.msk.f32.gmra.mxu1 %vm2743_vm13, %v4532_v21  ;;  %vm4469_vm5 = vcmp.ge.f32.partialorder %v4437_v14, 0.0  ;;  %v4534_v62 = vsel %vm4470_vm4, %v4438_v55, %v4502_v36 }
 0x363   : > { %v4344_v51 = vpop.f32.mrf.mxu0  ;;  %v3515_v55 = vadd.f32 %v14439_v56, %v18074_v49  ;;  %v4174_v36 = vadd.f32 %v14579_v20, %v3912_v5  ;;  %v4177_v20 = vadd.f32 %v14593_v23, %v3915_v61 }
 0x364   : > { %v4439_v34 = vadd.f32 %v4344_v51, %v4168_v12  ;;  %v4533_v16 = vsel %vm4469_vm5, %v4437_v14, %v4501_v46  ;;  %v4504_v6 = vmul.f32 %v4440_v15, %v18059_v38  ;;  %vm4472_vm7 = vcmp.ge.f32.partialorder %v4440_v15, 0.0  ;;  %v18076_v14 = vld [vmem:[#allocation202_spill] sm:$0xff]  ;;  %v18077_v46 = vld [vmem:[#allocation195_spill] sm:$0xff] }
 0x365   : > { %v11206_v33 = vpop.f32.mrf.mxu0  ;;  %11248 = vmatprep.mubr.msk.f32.mxu1 %vm2743_vm13, %v4533_v16  ;;  %v3914_v53 = vadd.f32 %v18076_v14, %v3512_v29  ;;  %v3514_v11 = vadd.f32 %v14439_v56, %v18077_v46  ;;  %v3917_v51 = vadd.f32 %v18079_v59, %v3515_v55 }
 0x366   : > { %v4503_v57 = vmul.f32 %v4439_v34, %v18059_v38  ;;  %v4442_v1 = vadd.f32 %v11206_v33, %v4171_v32  ;;  %11249 = vmatmul.mubr.msk.f32.gmra.mxu1 %vm2743_vm13, %v4534_v62  ;;  %vm4471_vm9 = vcmp.ge.f32.partialorder %v4439_v34, 0.0  ;;  %v4536_v26 = vsel %vm4472_vm7, %v4440_v15, %v4504_v6  ;;  %v18078_v15 = vld [vmem:[#allocation197_spill] sm:$0xff]  ;;  %v18080_v32 = vld [vmem:[#allocation204_spill] sm:$0xff] }
 0x367   : > { %v4354_v42 = vpop.f32.mrf.mxu0  ;;  %v3517_v52 = vadd.f32 %v14439_v56, %v18078_v15  ;;  %v3916_v16 = vadd.f32 %v18080_v32, %v3514_v11  ;;  %v4176_v6 = vadd.f32 %v14607_v63, %v3914_v53  ;;  %v4179_v0 = vadd.f32 %v11162_v25, %v3917_v51 }
 0x368   : > { %v4441_v40 = vadd.f32 %v4354_v42, %v4170_v2  ;;  %v4535_v10 = vsel %vm4471_vm9, %v4439_v34, %v4503_v57  ;;  %v4506_v3 = vmul.f32 %v4442_v1, %v18059_v38  ;;  %vm4474_vm10 = vcmp.ge.f32.partialorder %v4442_v1, 0.0  ;;  %v18081_v57 = vld [vmem:[#allocation95_spill] sm:$0xff] }
 0x369   : > { %v11209_v28 = vpop.f32.mrf.mxu0  ;;  %11251 = vmatprep.mubr.msk.f32.mxu1 %vm2743_vm13, %v4535_v10  ;;  %v3516_v23 = vadd.f32 %v14439_v56, %v18081_v57  ;;  %v3919_v42 = vadd.f32 %v18083_v44, %v3517_v52  ;;  %v18092_v57 = vld [vmem:[#allocation24_spill] sm:$0xff] }
 0x36a   : > { %v4505_v41 = vmul.f32 %v4441_v40, %v18059_v38  ;;  %v4444_v31 = vadd.f32 %v11209_v28, %v4173_v4  ;;  %11252 = vmatmul.mubr.msk.f32.gmra.mxu1 %vm2743_vm13, %v4536_v26  ;;  %vm4473_vm12 = vcmp.ge.f32.partialorder %v4441_v40, 0.0  ;;  %v4538_v58 = vsel %vm4474_vm10, %v4442_v1, %v4506_v3  ;;  %v18082_v1 = vld [vmem:[#allocation116_spill] sm:$0xff] }
 0x36b   : > { %v4364_v60 = vpop.f32.mrf.mxu0  ;;  %v3519_v35 = vadd.f32 %v14439_v56, %v18082_v1  ;;  %v4178_v26 = vadd.f32 %v4123_v27, %v3916_v16  ;;  %v4181_v55 = vadd.f32 %v11165_v9, %v3919_v42  ;;  %v18088_v16 = vld [vmem:[#allocation11_spill] sm:$0xff]  ;;  %v18094_v1 = vld [vmem:[#allocation32_spill] sm:$0xff]  ;;  %v18099_v42 = vld [vmem:[#allocation49_spill] sm:$0xff] }
 0x36c   : > { %v4443_v8 = vadd.f32 %v4364_v60, %v4172_v43  ;;  %v4537_v19 = vsel %vm4473_vm12, %v4441_v40, %v4505_v41  ;;  %v4508_v48 = vmul.f32 %v4444_v31, %v18059_v38  ;;  %vm4476_vm6 = vcmp.ge.f32.partialorder %v4444_v31, 0.0  ;;  %v18084_v40 = vld [vmem:[#allocation206_spill] sm:$0xff]  ;;  %v18085_v43 = vld [vmem:[#allocation120_spill] sm:$0xff] }
 0x36d   : > { %v11212_v21 = vpop.f32.mrf.mxu0  ;;  %11254 = vmatprep.mubr.msk.f32.mxu1 %vm2743_vm13, %v4537_v19  ;;  %v3918_v4 = vadd.f32 %v18084_v40, %v3516_v23  ;;  %v3518_v25 = vadd.f32 %v14439_v56, %v18085_v43  ;;  %v3921_v29 = vadd.f32 %v18086_v13, %v3519_v35  ;;  %v18093_v23 = vld [vmem:[#allocation26_spill] sm:$0xff]  ;;  %v18095_v35 = vld [vmem:[#allocation33_spill] sm:$0xff]  ;;  %v18098_v44 = vld [vmem:[#allocation48_spill] sm:$0xff] }
 0x36e   : > { %v4507_v22 = vmul.f32 %v4443_v8, %v18059_v38  ;;  %v4446_v12 = vadd.f32 %v11212_v21, %v4175_v54  ;;  %11255 = vmatmul.mubr.msk.f32.gmra.mxu1 %vm2743_vm13, %v4538_v58  ;;  %vm4475_vm8 = vcmp.ge.f32.partialorder %v4443_v8, 0.0  ;;  %v4540_v24 = vsel %vm4476_vm6, %v4444_v31, %v4508_v48  ;;  %v11168_v31 = vpop.f32.mrf.mxu1  ;;  %v18103_v40 = vld [vmem:[#allocation63_spill] sm:$0xff]  ;;  %v18111_v43 = vld [vmem:[#allocation94_spill] sm:$0xff] }
 0x36f   : > { %v4374_v50 = vpop.f32.mrf.mxu0  ;;  %v3920_v61 = vadd.f32 %v18087_v45, %v3518_v25  ;;  %v4180_v19 = vadd.f32 %v4133_v30, %v3918_v4  ;;  %v4183_v21 = vadd.f32 %v11168_v31, %v3921_v29  ;;  %v18097_v30 = vld [vmem:[#allocation41_spill] sm:$0xff]  ;;  %v18112_v25 = vld [vmem:[#allocation98_spill] sm:$0xff]  ;;  %v18116_v29 = vld [vmem:[#allocation107_spill] sm:$0xff] }
 0x370   : > { %v4445_v7 = vadd.f32 %v4374_v50, %v4174_v36  ;;  %v4539_v34 = vsel %vm4475_vm8, %v4443_v8, %v4507_v22  ;;  %v4510_v39 = vmul.f32 %v4446_v12, %v18059_v38  ;;  %vm4478_vm14 = vcmp.ge.f32.partialorder %v4446_v12, 0.0  ;;  %v4143_v58 = vpop.f32.mrf.mxu1  ;;  %v18104_v4 = vld [vmem:[#allocation69_spill] sm:$0xff]  ;;  %v18115_v13 = vld [vmem:[#allocation106_spill] sm:$0xff]  ;;  %v9674_v45 = vld [vmem:[%s17291_s5 + $0x190] sm:$0xff] }
 0x371   : > { %v11215_v62 = vpop.f32.mrf.mxu0  ;;  %11257 = vmatprep.mubr.msk.f32.mxu1 %vm2743_vm13, %v4539_v34  ;;  %v4182_v11 = vadd.f32 %v4143_v58, %v3920_v61  ;;  %v18114_v31 = vld [vmem:[#allocation101_spill] sm:$0xff] }
 0x372   : > { %v4509_v33 = vmul.f32 %v4445_v7, %v18059_v38  ;;  %v4448_v2 = vadd.f32 %v11215_v62, %v4177_v20  ;;  %11258 = vmatmul.mubr.msk.f32.gmra.mxu1 %vm2743_vm13, %v4540_v24  ;;  %vm4477_vm15 = vcmp.ge.f32.partialorder %v4445_v7, 0.0  ;;  %v4542_v10 = vsel %vm4478_vm14, %v4446_v12, %v4510_v39  ;;  %v9606_v24 = vld [vmem:[%s17291_s5 + $0x170] sm:$0xff]  ;;  %v18089_v39 = vld [vmem:[#allocation14_spill] sm:$0xff] }
 0x373   : > { %v4384_v37 = vpop.f32.mrf.mxu0  ;;  %v18090_v62 = vld [vmem:[#allocation18_spill] sm:$0xff] }
 0x374   : > { %v4447_v47 = vadd.f32 %v4384_v37, %v4176_v6  ;;  %v4541_v63 = vsel %vm4477_vm15, %v4445_v7, %v4509_v33  ;;  %v4512_v17 = vmul.f32 %v4448_v2, %v18059_v38  ;;  %vm4480_vm0 = vcmp.ge.f32.partialorder %v4448_v2, 0.0  ;;  %v9605_v6 = vld [vmem:[%s17291_s5 + $0x168] sm:$0xff]  ;;  %v9604_v33 = vld [vmem:[%s17291_s5 + $0x160] sm:$0xff]  ;;  %v18096_v37 = vld [vmem:[#allocation39_spill] sm:$0xff] }
 0x375   : > { %v11218_v5 = vpop.f32.mrf.mxu0  ;;  %11260 = vmatprep.mubr.msk.f32.mxu1 %vm2743_vm13, %v4541_v63  ;;  %v18102_v63 = vld [vmem:[#allocation61_spill] sm:$0xff] }
 0x376   : > { %v4511_v3 = vmul.f32 %v4447_v47, %v18059_v38  ;;  %v4450_v28 = vadd.f32 %v11218_v5, %v4179_v0  ;;  %11261 = vmatmul.mubr.msk.f32.gmra.mxu1 %vm2743_vm13, %v4542_v10  ;;  %vm4479_vm1 = vcmp.ge.f32.partialorder %v4447_v47, 0.0  ;;  %v4544_v27 = vsel %vm4480_vm0, %v4448_v2, %v4512_v17  ;;  %v18091_v2 = vld [vmem:[#allocation19_spill] sm:$0xff]  ;;  %v18105_v10 = vld [vmem:[#allocation70_spill] sm:$0xff]  ;;  %v18106_v17 = vld [vmem:[#allocation77_spill] sm:$0xff] }
 0x377   : > { %v4394_v41 = vpop.f32.mrf.mxu0  ;;  %v18101_v0 = vld [vmem:[#allocation55_spill] sm:$0xff] }
 0x378   : > { %v4449_v49 = vadd.f32 %v4394_v41, %v4178_v26  ;;  %v4543_v60 = vsel %vm4479_vm1, %v4447_v47, %v4511_v3  ;;  %v4514_v8 = vmul.f32 %v4450_v28, %v18059_v38  ;;  %vm4482_vm11 = vcmp.ge.f32.partialorder %v4450_v28, 0.0  ;;  %v18100_v47 = vld [vmem:[#allocation54_spill] sm:$0xff]  ;;  %v18107_v5 = vld [vmem:[#allocation79_spill] sm:$0xff]  ;;  %v18108_v26 = vld [vmem:[#allocation84_spill] sm:$0xff] }
 0x379   : > { %v11221_v54 = vpop.f32.mrf.mxu0  ;;  %11263 = vmatprep.mubr.msk.f32.mxu1 %vm2743_vm13, %v4543_v60  ;;  %v18109_v3 = vld [vmem:[#allocation86_spill] sm:$0xff]  ;;  %v18113_v41 = vld [vmem:[#allocation99_spill] sm:$0xff] }
 0x37a   : > { %v4513_v14 = vmul.f32 %v4449_v49, %v18059_v38  ;;  %v4452_v56 = vadd.f32 %v11221_v54, %v4181_v55  ;;  %11264 = vmatmul.mubr.msk.f32.gmra.mxu1 %vm2743_vm13, %v4544_v27  ;;  %vm4481_vm3 = vcmp.ge.f32.partialorder %v4449_v49, 0.0  ;;  %v4546_v22 = vsel %vm4482_vm11, %v4450_v28, %v4514_v8  ;;  %v18110_v28 = vld [vmem:[#allocation93_spill] sm:$0xff]  ;;  %v18118_v55 = vld [vmem:[#allocation118_spill] sm:$0xff] }
 0x37b   : > { %v4404_v53 = vpop.f32.mrf.mxu0  ;;  %v18119_v60 = vld [vmem:[#allocation122_spill] sm:$0xff]  ;;  %v9672_v8 = vld [vmem:[%s17291_s5 + $0x180] sm:$0xff] }
 0x37c   : > { %v4451_v48 = vadd.f32 %v4404_v53, %v4180_v19  ;;  %v4545_v36 = vsel %vm4481_vm3, %v4449_v49, %v4513_v14  ;;  %v4516_v12 = vmul.f32 %v4452_v56, %v18059_v38  ;;  %vm4484_vm4 = vcmp.ge.f32.partialorder %v4452_v56, 0.0  ;;  %v18117_v49 = vld [vmem:[#allocation108_spill] sm:$0xff]  ;;  %v9673_v27 = vld [vmem:[%s17291_s5 + $0x188] sm:$0xff] }
 0x37d   : > { %v11224_v46 = vpop.f32.mrf.mxu0  ;;  %11266 = vmatprep.mubr.msk.f32.mxu1 %vm2743_vm13, %v4545_v36  ;;  %v14784_v19 = vld [vmem:[%s17291_s5 + $0x1d8] sm:$0xff] }
 0x37e   : > { %v4515_v15 = vmul.f32 %v4451_v48, %v18059_v38  ;;  %v4454_v52 = vadd.f32 %v11224_v46, %v4183_v21  ;;  %11267 = vmatmul.mubr.msk.f32.gmra.mxu1 %vm2743_vm13, %v4546_v22  ;;  %vm4483_vm5 = vcmp.ge.f32.partialorder %v4451_v48, 0.0  ;;  %v4548_v51 = vsel %vm4484_vm4, %v4452_v56, %v4516_v12 }
 0x37f   : > { %v4414_v50 = vpop.f32.mrf.mxu0 }
 0x380   : > { %v4453_v9 = vadd.f32 %v4414_v50, %v4182_v11  ;;  %v4547_v59 = vsel %vm4483_vm5, %v4451_v48, %v4515_v15  ;;  %v4518_v7 = vmul.f32 %v4454_v52, %v18059_v38  ;;  %vm4486_vm7 = vcmp.ge.f32.partialorder %v4454_v52, 0.0  ;;  %v18135_v50 = vld [vmem:[#allocation5_spill] sm:$0xff] }
 0x381   : > { %11269 = vmatprep.mubr.msk.f32.mxu1 %vm2743_vm13, %v4547_v59  ;;  %v14763_v61 = vpop.f32.mrf.mxu0  ;;  %v18136_v59 = vld [vmem:[#allocation16_spill] sm:$0xff] }
 0x382   : > { %v4517_v20 = vmul.f32 %v4453_v9, %v18059_v38  ;;  %11270 = vmatmul.mubr.msk.f32.gmra.mxu1 %vm2743_vm13, %v4548_v51  ;;  %vm4485_vm9 = vcmp.ge.f32.partialorder %v4453_v9, 0.0  ;;  %v4550_v32 = vsel %vm4486_vm7, %v4454_v52, %v4518_v7  ;;  %18120 = vst [vmem:[#allocation76_spill] sm:$0xff] %v14763_v61  ;;  %v18138_v7 = vld [vmem:[#allocation17_spill] sm:$0xff] }
 0x383   : > { %v14775_v54 = vpop.f32.mrf.mxu0  ;;  %v14965_v61 = vld [vmem:[%s12919_s16] sm:$0xff] }
 0x384   : > { %v4549_v34 = vsel %vm4485_vm9, %v4453_v9, %v4517_v20  ;;  %18121 = vst [vmem:[#allocation64_spill] sm:$0xff] %v14775_v54  ;;  %v11850_v9 = vld [vmem:[%s17296_s10] ss:$0 sm:$0xff]  ;;  %18180 = vst [vmem:[#allocation63_spill] sm:$0xff] %v14965_v61 }
 0x385   : > { %11272 = vmatprep.mubr.msk.f32.mxu1 %vm2743_vm13, %v4549_v34  ;;  %v14786_v14 = vpop.f32.mrf.mxu0  ;;  %v14869_v51 = vadd.f32 %v11850_v9, %v18136_v59  ;;  %v14872_v20 = vadd.f32 %v11850_v9, %v18138_v7  ;;  %v18140_v34 = vld [vmem:[#allocation22_spill] sm:$0xff]  ;;  %v18150_v59 = vld [vmem:[#allocation113_spill] sm:$0xff] }
 0x386   : > { %11273 = vmatmul.mubr.msk.f32.gmra.mxu1 %vm2743_vm13, %v4550_v32  ;;  %18122 = vst [vmem:[#allocation72_spill] sm:$0xff] %v14786_v14  ;;  %v14875_v32 = vadd.f32 %v11850_v9, %v18140_v34  ;;  %v18153_v34 = vld [vmem:[#allocation38_spill] sm:$0xff] }
 0x387   : > { %11339 = vmatprep.mubr.msk.f32.mxu1 %vm1340_vm2, %v18088_v16  ;;  %v14793_v56 = vpop.f32.mrf.mxu0  ;;  %18137 = vst [vmem:[#allocation201_spill] sm:$0xff] %v14869_v51  ;;  %18139 = vst [vmem:[#allocation202_spill] sm:$0xff] %v14872_v20 }
 0x388   : > { %18123 = vst [vmem:[#allocation83_spill] sm:$0xff] %v14793_v56  ;;  %18141 = vst [vmem:[#allocation195_spill] sm:$0xff] %v14875_v32 }
 0x389   : > { %v14799_v53 = vpop.f32.mrf.mxu0 }
 0x38a   : > { %11340 = vmatmul.mubr.msk.f32.vlgmr.msra.gmra.mxu1 %vm1340_vm2, %v18089_v39  ;;  %18124 = vst [vmem:[#allocation104_spill] sm:$0xff] %v14799_v53 }
 0x38b   : > { %11444 = vmatpush3.msra.mxu1 %v14534_v18  ;;  %11342 = vmatprep.mubr.msk.f32.mxu1 %vm1340_vm2, %v18090_v62  ;;  %v9675_v18 = vld [vmem:[%s17291_s5 + $0x198] sm:$0xff]  ;;  %v14805_v58 = vpop.f32.mrf.mxu0 }
 0x38c   : > { %11445 = vmatprep.subr.mxu1 %v9606_v24  ;;  %18125 = vst [vmem:[#allocation178_spill] sm:$0xff] %v14805_v58 }
 0x38d   : > { %11446 = vmatpush3.msra.mxu1 %v9606_v24  ;;  %v14811_v48 = vpop.f32.mrf.mxu0  ;;  %v18142_v24 = vld [vmem:[#allocation25_spill] sm:$0xff] }
 0x38e   : > { %11343 = vmatmul.mubr.msk.f32.gmra.mxu1 %vm1340_vm2, %v18091_v2  ;;  %11447 = vmatprep.subr.mxu1 %v9605_v6  ;;  %18126 = vst [vmem:[#allocation181_spill] sm:$0xff] %v14811_v48  ;;  %v18168_v48 = vld [vmem:[#allocation66_spill] sm:$0xff] }
 0x38f   : > { %11345 = vmatprep.mubr.msk.f32.mxu1 %vm1340_vm2, %v18092_v57  ;;  %11448 = vmatpush3.msra.mxu1 %v9605_v6  ;;  %v14817_v21 = vpop.f32.mrf.mxu0  ;;  %v14878_v6 = vadd.f32 %v11850_v9, %v18142_v24  ;;  %v14897_v24 = vadd.f32 %v11850_v9, %v18153_v34  ;;  %v14924_v58 = vadd.f32 %v11850_v9, %v18168_v48 }
 0x390   : > { %11449 = vmatprep.subr.mxu1 %v9604_v33  ;;  %18127 = vst [vmem:[#allocation184_spill] sm:$0xff] %v14817_v21 }
 0x391   : > { %11450 = vmatpush3.msra.mxu1 %v9604_v33  ;;  %v14823_v36 = vpop.f32.mrf.mxu0  ;;  %18143 = vst [vmem:[#allocation197_spill] sm:$0xff] %v14878_v6  ;;  %v18144_v33 = vld [vmem:[#allocation28_spill] sm:$0xff]  ;;  %18154 = vst [vmem:[#allocation206_spill] sm:$0xff] %v14897_v24 }
 0x392   : > { %11346 = vmatmul.mubr.msk.f32.gmra.mxu1 %vm1340_vm2, %v18093_v23  ;;  %11549 = vmatprep.subr.mxu1 %v9675_v18  ;;  %18128 = vst [vmem:[#allocation198_spill] sm:$0xff] %v14823_v36  ;;  %v18163_v36 = vld [vmem:[#allocation53_spill] sm:$0xff]  ;;  %18169 = vst [vmem:[#allocation33_spill] sm:$0xff] %v14924_v58 }
 0x393   : > { %11348 = vmatprep.mubr.msk.f32.mxu1 %vm1340_vm2, %v18094_v1  ;;  %v14829_v22 = vpop.f32.mrf.mxu0  ;;  %v14915_v34 = vadd.f32 %v11850_v9, %v18163_v36  ;;  %v9746_v36 = vld [vmem:[%s17291_s5 + $0x1d0] sm:$0xff] }
 0x394   : > { %18129 = vst [vmem:[#allocation186_spill] sm:$0xff] %v14829_v22 }
 0x395   : > { %v14835_v12 = vpop.f32.mrf.mxu0  ;;  %18164 = vst [vmem:[#allocation14_spill] sm:$0xff] %v14915_v34 }
 0x396   : > { %11349 = vmatmul.mubr.msk.f32.gmra.mxu1 %vm1340_vm2, %v18095_v35  ;;  %18130 = vst [vmem:[#allocation189_spill] sm:$0xff] %v14835_v12  ;;  %v18159_v12 = vld [vmem:[#allocation47_spill] sm:$0xff] }
 0x397   : > { %11351 = vmatprep.mubr.msk.f32.mxu1 %vm1340_vm2, %v18096_v37  ;;  %v14841_v46 = vpop.f32.mrf.mxu0  ;;  %v14909_v38 = vadd.f32 %v11850_v9, %v18159_v12  ;;  %v18172_v12 = vld [vmem:[#allocation78_spill] sm:$0xff] }
 0x398   : > { %18131 = vst [vmem:[#allocation199_spill] sm:$0xff] %v14841_v46  ;;  %v18157_v46 = vld [vmem:[#allocation44_spill] sm:$0xff]  ;;  %v14930_v56 = vadd.f32 %v11850_v9, %v18172_v12 }
 0x399   : > { %v14847_v11 = vpop.f32.mrf.mxu0  ;;  %18160 = vst [vmem:[#allocation208_spill] sm:$0xff] %v14909_v38 }
 0x39a   : > { %11352 = vmatmul.mubr.msk.f32.gmra.mxu1 %vm1340_vm2, %v18097_v30  ;;  %18132 = vst [vmem:[#allocation200_spill] sm:$0xff] %v14847_v11  ;;  %v18155_v11 = vld [vmem:[#allocation40_spill] sm:$0xff]  ;;  %18173 = vst [vmem:[#allocation41_spill] sm:$0xff] %v14930_v56  ;;  %v9744_v56 = vld [vmem:[%s17291_s5 + $0x1c0] sm:$0xff] }
 0x39b   : > { %11354 = vmatprep.mubr.msk.f32.mxu1 %vm1340_vm2, %v18098_v44  ;;  %v14853_v15 = vpop.f32.mrf.mxu0 }
 0x39c   : > { %18133 = vst [vmem:[#allocation191_spill] sm:$0xff] %v14853_v15  ;;  %v14890_v15 = vadd.s32 64, %v18150_v59 }
 0x39d   : > { %v14859_v52 = vpop.f32.mrf.mxu0 }
 0x39e   : > { %11355 = vmatmul.mubr.msk.f32.gmra.mxu1 %vm1340_vm2, %v18099_v42  ;;  %18134 = vst [vmem:[#allocation193_spill] sm:$0xff] %v14859_v52  ;;  %18151 = vst [vmem:[#allocation116_spill] sm:$0xff] %v14890_v15  ;;  %v4971_v48 = vadd.s32 1, %v14890_v15 }
 0x39f   : > { %11357 = vmatprep.mubr.msk.f32.mxu1 %vm1340_vm2, %v18100_v47  ;;  %v14892_v7 = vpop.f32.mrf.mxu0 }
 0x3a0   : > { %18152 = vst [vmem:[#allocation205_spill] sm:$0xff] %v14892_v7  ;;  %v18161_v7 = vld [vmem:[#allocation50_spill] sm:$0xff] }
 0x3a1   : > { %v14912_v22 = vadd.f32 %v11850_v9, %v18161_v7  ;;  %v18174_v7 = vld [vmem:[#allocation124_spill] sm:$0xff] }
 0x3a2   : > { %11358 = vmatmul.mubr.msk.f32.gmra.mxu1 %vm1340_vm2, %v18101_v0  ;;  %v14933_v14 = vadd.s32 1, %v18174_v7  ;;  %v14950_v12 = vadd.s32 192, %v18174_v7  ;;  %v14968_v15 = vadd.s32 256, %v18174_v7 }
 0x3a3   : > { %11360 = vmatprep.mubr.msk.f32.mxu1 %vm1340_vm2, %v18102_v63  ;;  %18162 = vst [vmem:[#allocation11_spill] sm:$0xff] %v14912_v22 }
 0x3a4   : > { %18178 = vst [vmem:[#allocation55_spill] sm:$0xff] %v14950_v12  ;;  %18181 = vst [vmem:[#allocation69_spill] sm:$0xff] %v14968_v15  ;;  %vm5000_vm6 = vcmp.eq.s32.totalorder %v14965_v61, %v14933_v14 }
 0x3a6   : > { %11361 = vmatmul.mubr.msk.f32.gmra.mxu1 %vm1340_vm2, %v18103_v40 }
 0x3a7   : > { %11363 = vmatprep.mubr.msk.f32.mxu1 %vm1340_vm2, %v18104_v4 }
 0x3aa   : > { %11364 = vmatmul.mubr.msk.f32.gmra.mxu1 %vm1340_vm2, %v18105_v10 }
 0x3ab   : > { %11366 = vmatprep.mubr.msk.f32.mxu1 %vm1340_vm2, %v18106_v17 }
 0x3ae   : > { %11367 = vmatmul.mubr.msk.f32.gmra.mxu1 %vm1340_vm2, %v18107_v5 }
 0x3af   : > { %11369 = vmatprep.mubr.msk.f32.mxu1 %vm1340_vm2, %v18108_v26 }
 0x3b2   : > { %11370 = vmatmul.mubr.msk.f32.gmra.mxu1 %vm1340_vm2, %v18109_v3 }
 0x3b3   : > { %11372 = vmatprep.mubr.msk.f32.mxu1 %vm1340_vm2, %v18110_v28 }
 0x3b6   : > { %11373 = vmatmul.mubr.msk.f32.gmra.mxu1 %vm1340_vm2, %v18111_v43 }
 0x3b7   : > { %11375 = vmatprep.mubr.msk.f32.mxu1 %vm1340_vm2, %v18112_v25 }
 0x3ba   : > { %11376 = vmatmul.mubr.msk.f32.gmra.mxu1 %vm1340_vm2, %v18113_v41 }
 0x3bb   : > { %11378 = vmatprep.mubr.msk.f32.mxu1 %vm1340_vm2, %v18114_v31 }
 0x3be   : > { %11379 = vmatmul.mubr.msk.f32.gmra.mxu1 %vm1340_vm2, %v18115_v13 }
 0x3bf   : > { %11381 = vmatprep.mubr.msk.f32.mxu1 %vm1340_vm2, %v18116_v29 }
 0x3c2   : > { %11382 = vmatmul.mubr.msk.f32.gmra.mxu1 %vm1340_vm2, %v18117_v49 }
 0x3c3   : > { %11384 = vmatprep.mubr.msk.f32.mxu1 %vm1340_vm2, %v18118_v55 }
 0x3c6   : > { %11385 = vmatmul.mubr.msk.f32.gmra.mxu1 %vm1340_vm2, %v18119_v60 }
 0x3c7   : > { %11451 = vmatprep.mubr.msk.f32.mxu1 %vm1340_vm2, %v18090_v62 }
 0x3ca   : > { %11452 = vmatmul.mubr.msk.f32.vlgmr.msra.gmra.mxu1 %vm1340_vm2, %v18091_v2 }
 0x3cb   : > { %11454 = vmatprep.mubr.msk.f32.mxu1 %vm1340_vm2, %v18092_v57  ;;  %11550 = vmatpush3.msra.mxu1 %v9675_v18  ;;  %v14881_v18 = vadd.f32 %v11850_v9, %v18144_v33  ;;  %v14900_v33 = vadd.f32 %v11850_v9, %v18155_v11  ;;  %v18165_v11 = vld [vmem:[#allocation59_spill] sm:$0xff] }
 0x3cc   : > { %11551 = vmatprep.subr.mxu1 %v9674_v45  ;;  %v14918_v21 = vadd.f32 %v11850_v9, %v18165_v11  ;;  %v14938_v11 = vpop.f32.mrf.mxu0 }
 0x3cd   : > { %11552 = vmatpush3.msra.mxu1 %v9674_v45  ;;  %18145 = vst [vmem:[#allocation203_spill] sm:$0xff] %v14881_v18  ;;  %v18146_v45 = vld [vmem:[#allocation31_spill] sm:$0xff]  ;;  %18156 = vst [vmem:[#allocation120_spill] sm:$0xff] %v14900_v33 }
 0x3ce   : > { %11455 = vmatmul.mubr.msk.f32.gmra.mxu1 %vm1340_vm2, %v18093_v23  ;;  %11553 = vmatprep.subr.mxu1 %v9673_v27  ;;  %18166 = vst [vmem:[#allocation26_spill] sm:$0xff] %v14918_v21  ;;  %18175 = vst [vmem:[#allocation48_spill] sm:$0xff] %v14938_v11  ;;  %v14958_v11 = vld [vmem:[%s17294_s8] ss:$0 sm:$0xff] }
 0x3cf   : > { %11457 = vmatprep.mubr.msk.f32.mxu1 %vm1340_vm2, %v18094_v1  ;;  %11554 = vmatpush3.msra.mxu1 %v9673_v27  ;;  %v14884_v27 = vadd.f32 %v11850_v9, %v18146_v45  ;;  %v14903_v45 = vadd.f32 %v11850_v9, %v18157_v46  ;;  %v14921_v46 = vld [vmem:[%s12919_s16 + $0x8] sm:$0xff] }
 0x3d0   : > { %11555 = vmatprep.subr.mxu1 %v9672_v8  ;;  %18167 = vst [vmem:[#allocation32_spill] sm:$0xff] %v14921_v46 }
 0x3d1   : > { %11556 = vmatpush3.msra.mxu1 %v9672_v8  ;;  %18147 = vst [vmem:[#allocation204_spill] sm:$0xff] %v14884_v27  ;;  %v18148_v8 = vld [vmem:[#allocation34_spill] sm:$0xff]  ;;  %18158 = vst [vmem:[#allocation207_spill] sm:$0xff] %v14903_v45 }
 0x3d2   : > { %11458 = vmatmul.mubr.msk.f32.gmra.mxu1 %vm1340_vm2, %v18095_v35  ;;  %11661 = vmatprep.subr.mxu1 %v14784_v19  ;;  %v14887_v52 = vadd.f32 %v11850_v9, %v18148_v8  ;;  %v4969_v8 = vadd.s32 1, %v18150_v59 }
 0x3d3   : > { %11460 = vmatprep.mubr.msk.f32.mxu1 %vm1340_vm2, %v18096_v37 }
 0x3d4   : > { %18149 = vst [vmem:[#allocation95_spill] sm:$0xff] %v14887_v52  ;;  %vm5001_vm10 = vcmp.eq.s32.totalorder %v14921_v46, %v4969_v8  ;;  %v15016_v8 = vadd.s32 448, %v18150_v59 }
 0x3d6   : > { %11461 = vmatmul.mubr.msk.f32.gmra.mxu1 %vm1340_vm2, %v18097_v30  ;;  %18191 = vst [vmem:[#allocation28_spill] sm:$0xff] %v15016_v8 }
 0x3d7   : > { %11463 = vmatprep.mubr.msk.f32.mxu1 %vm1340_vm2, %v18098_v44 }
 0x3da   : > { %11464 = vmatmul.mubr.msk.f32.gmra.mxu1 %vm1340_vm2, %v18099_v42 }
 0x3db   : > { %11466 = vmatprep.mubr.msk.f32.mxu1 %vm1340_vm2, %v18100_v47 }
 0x3de   : > { %11467 = vmatmul.mubr.msk.f32.gmra.mxu1 %vm1340_vm2, %v18101_v0 }
 0x3df   : > { %11469 = vmatprep.mubr.msk.f32.mxu1 %vm1340_vm2, %v18102_v63 }
 0x3e2   : > { %11470 = vmatmul.mubr.msk.f32.gmra.mxu1 %vm1340_vm2, %v18103_v40 }
 0x3e3   : > { %11472 = vmatprep.mubr.msk.f32.mxu1 %vm1340_vm2, %v18104_v4 }
 0x3e6   : > { %11473 = vmatmul.mubr.msk.f32.gmra.mxu1 %vm1340_vm2, %v18105_v10 }
 0x3e7   : > { %11475 = vmatprep.mubr.msk.f32.mxu1 %vm1340_vm2, %v18106_v17 }
 0x3ea   : > { %11476 = vmatmul.mubr.msk.f32.gmra.mxu1 %vm1340_vm2, %v18107_v5 }
 0x3eb   : > { %11478 = vmatprep.mubr.msk.f32.mxu1 %vm1340_vm2, %v18108_v26 }
 0x3ee   : > { %11479 = vmatmul.mubr.msk.f32.gmra.mxu1 %vm1340_vm2, %v18109_v3 }
 0x3ef   : > { %11481 = vmatprep.mubr.msk.f32.mxu1 %vm1340_vm2, %v18110_v28  ;;  %v15013_v28 = vld [vmem:[%s12919_s16 + $0x10] sm:$0xff] }
 0x3f0   : > { %18190 = vst [vmem:[#allocation25_spill] sm:$0xff] %v15013_v28 }
 0x3f2   : > { %11482 = vmatmul.mubr.msk.f32.gmra.mxu1 %vm1340_vm2, %v18111_v43 }
 0x3f3   : > { %11484 = vmatprep.mubr.msk.f32.mxu1 %vm1340_vm2, %v18112_v25  ;;  %v14997_v25 = vpop.f32.mrf.mxu0 }
 0x3f4   : > { %18189 = vst [vmem:[#allocation22_spill] sm:$0xff] %v14997_v25 }
 0x3f6   : > { %11485 = vmatmul.mubr.msk.f32.gmra.mxu1 %vm1340_vm2, %v18113_v41 }
 0x3f7   : > { %11487 = vmatprep.mubr.msk.f32.mxu1 %vm1340_vm2, %v18114_v31 }
 0x3fa   : > { %11488 = vmatmul.mubr.msk.f32.gmra.mxu1 %vm1340_vm2, %v18115_v13  ;;  %v18188_v13 = vld [vmem:[#allocation187_spill] sm:$0xff] }
 0x3fb   : > { %11490 = vmatprep.mubr.msk.f32.mxu1 %vm1340_vm2, %v18116_v29  ;;  %v14987_v29 = vadd.s32 320, %v18150_v59 }
 0x3fd   : > { %18186 = vst [vmem:[#allocation16_spill] sm:$0xff] %v14987_v29 }
 0x3fe   : > { %11491 = vmatmul.mubr.msk.f32.gmra.mxu1 %vm1340_vm2, %v18117_v49  ;;  %v14984_v49 = vadd.s32 256, %v18150_v59 }
 0x3ff   : > { %11493 = vmatprep.mubr.msk.f32.mxu1 %vm1340_vm2, %v18118_v55  ;;  %v9745_v55 = vld [vmem:[%s17291_s5 + $0x1c8] sm:$0xff] }
 0x400   : > { %18185 = vst [vmem:[#allocation84_spill] sm:$0xff] %v14984_v49 }
 0x402   : > { %11494 = vmatmul.mubr.msk.f32.gmra.mxu1 %vm1340_vm2, %v18119_v60  ;;  %v14971_v60 = vadd.s32 320, %v18174_v7 }
 0x403   : > { %11496 = vmatprep.mubr.msk.f32.mxu1 %vm1340_vm2, %v18135_v50 }
 0x404   : > { %18182 = vst [vmem:[#allocation70_spill] sm:$0xff] %v14971_v60 }
 0x406   : > { %11497 = vmatmul.mubr.msk.f32.gmra.mxu1 %vm1340_vm2, %v18135_v50  ;;  %v14953_v50 = vld [vmem:[%s12919_s16 + $0x18] sm:$0xff] }
 0x407   : > { %11557 = vmatprep.mubr.msk.f32.mxu1 %vm1340_vm2, %v18088_v16  ;;  %v18170_v16 = vld [vmem:[#allocation71_spill] sm:$0xff]  ;;  %18179 = vst [vmem:[#allocation61_spill] sm:$0xff] %v14953_v50  ;;  %vm5003_vm8 = vcmp.eq.s32.totalorder %v14953_v50, %v4971_v48  ;;  %v15049_v48 = vld [vmem:[%s17293_s7] sm:$0xff] }
 0x408   : > { %v14927_v53 = vadd.f32 %v11850_v9, %v18170_v16  ;;  %v14944_v16 = vadd.s32 64, %v18174_v7  ;;  %v14947_v9 = vadd.s32 128, %v18174_v7 }
 0x40a   : > { %18171 = vst [vmem:[#allocation39_spill] sm:$0xff] %v14927_v53  ;;  %v11229_v54 = vpop.f32.mrf.mxu1  ;;  %11558 = vmatmul.mubr.msk.f32.vlgmr.msra.gmra.mxu1 %vm1340_vm2, %v18089_v39  ;;  %18176 = vst [vmem:[#allocation49_spill] sm:$0xff] %v14944_v16  ;;  %v5033_v53 = vsel %vm5001_vm10, %v14869_v51, 0.0  ;;  %v15019_v51 = vadd.s32 512, %v18150_v59  ;;  %v4972_v58 = vadd.s32 1, %v14947_v9 }
 0x40b   : > { %18177 = vst [vmem:[#allocation54_spill] sm:$0xff] %v14947_v9  ;;  %v4719_v39 = vadd.f32 %v14958_v11, %v11229_v54  ;;  %11560 = vmatprep.mubr.msk.f32.mxu1 %vm1340_vm2, %v18090_v62  ;;  %11662 = vmatpush3.msra.mxu1 %v14784_v19  ;;  %v14978_v54 = vadd.s32 128, %v18150_v59  ;;  %v14981_v62 = vadd.s32 192, %v18150_v59  ;;  %v14990_v19 = vadd.s32 384, %v18150_v59 }
 0x40c   : > { %v4713_v7 = vpop.f32.mrf.mxu1  ;;  %11663 = vmatprep.subr.mxu1 %v9746_v36  ;;  %18192 = vst [vmem:[#allocation31_spill] sm:$0xff] %v15019_v51 }
 0x40d   : > { %18183 = vst [vmem:[#allocation77_spill] sm:$0xff] %v14978_v54  ;;  %18184 = vst [vmem:[#allocation79_spill] sm:$0xff] %v14981_v62  ;;  %v4905_v31 = vmul.f32 %v4719_v39, %v18188_v13  ;;  %v4714_v41 = vadd.f32 %v14958_v11, %v4713_v7  ;;  %vm4873_vm12 = vcmp.ge.f32.partialorder %v4719_v39, 0.0  ;;  %11664 = vmatpush3.msra.mxu1 %v9746_v36  ;;  %v4970_v7 = vadd.s32 1, %v14944_v16 }
 0x40e   : > { %18187 = vst [vmem:[#allocation17_spill] sm:$0xff] %v14990_v19  ;;  %v11232_v43 = vpop.f32.mrf.mxu1  ;;  %11561 = vmatmul.mubr.msk.f32.gmra.mxu1 %vm1340_vm2, %v18091_v2  ;;  %11665 = vmatprep.subr.mxu1 %v9745_v55  ;;  %v4975_v61 = vadd.s32 1, %v14981_v62 }
 0x40f   : > { %vm4872_vm14 = vcmp.ge.f32.partialorder %v4714_v41, 0.0  ;;  %v4904_v36 = vmul.f32 %v4714_v41, %v18188_v13  ;;  %v4729_v25 = vadd.f32 %v14958_v11, %v11232_v43  ;;  %11563 = vmatprep.mubr.msk.f32.mxu1 %vm1340_vm2, %v18092_v57  ;;  %v4937_v2 = vsel %vm4873_vm12, %v4719_v39, %v4905_v31  ;;  %11666 = vmatpush3.msra.mxu1 %v9745_v55  ;;  %v15024_v55 = vpop.f32.mrf.mxu0 }
 0x410   : > { %v4723_v16 = vpop.f32.mrf.mxu1  ;;  %v5065_v46 = vadd.f32 %v5033_v53, %v4937_v2  ;;  %11667 = vmatprep.subr.mxu1 %v9744_v56  ;;  %18193 = vst [vmem:[#allocation34_spill] sm:$0xff] %v15024_v55  ;;  %v5032_v2 = vsel %vm5000_vm6, %v14872_v20, 0.0  ;;  %vm5002_vm0 = vcmp.eq.s32.totalorder %v15013_v28, %v4970_v7  ;;  %v4973_v53 = vadd.s32 1, %v14978_v54  ;;  %v15109_v28 = vld [vmem:[%s12919_s16 + $0x48] sm:$0xff] }
 0x411   : > { %v4907_v43 = vmul.f32 %v4729_v25, %v18188_v13  ;;  %v4724_v57 = vadd.f32 %v14958_v11, %v4723_v16  ;;  %v4936_v31 = vsel %vm4872_vm14, %v4714_v41, %v4904_v36  ;;  %vm4875_vm15 = vcmp.ge.f32.partialorder %v4729_v25, 0.0  ;;  %11668 = vmatpush3.msra.mxu1 %v9744_v56  ;;  %v15038_v56 = vld [vmem:[%s12919_s16 + $0x20] sm:$0xff]  ;;  %v15053_v36 = vld [vmem:[%s12919_s16 + $0x28] sm:$0xff] }
 0x412   : > { %8508 = vrot.lane.b32.xlu0 %v5065_v46, %s11938_s24  ;;  %v11235_v39 = vpop.f32.mrf.mxu1  ;;  %11564 = vmatmul.mubr.msk.f32.gmra.mxu1 %vm1340_vm2, %v18093_v23  ;;  %v5035_v41 = vsel %vm5003_vm8, %v14875_v32, 0.0  ;;  %18194 = vst [vmem:[#allocation38_spill] sm:$0xff] %v15038_v56  ;;  %v5064_v20 = vadd.f32 %v5032_v2, %v4936_v31  ;;  %vm5004_vm11 = vcmp.eq.s32.totalorder %v15038_v56, %v4972_v58  ;;  %v15068_v31 = vld [vmem:[%s12919_s16 + $0x30] sm:$0xff]  ;;  %v15070_v2 = vpop.f32.mrf.mxu0 }
 0x413   : > { %vm4874_vm1 = vcmp.ge.f32.partialorder %v4724_v57, 0.0  ;;  %v4906_v46 = vmul.f32 %v4724_v57, %v18188_v13  ;;  %v4739_v16 = vadd.f32 %v14958_v11, %v11235_v39  ;;  %11566 = vmatprep.mubr.msk.f32.mxu1 %vm1340_vm2, %v18094_v1  ;;  %v4939_v14 = vsel %vm4875_vm15, %v4729_v25, %v4907_v43  ;;  %11773 = vmatprep.subr.mxu1 %v15049_v48  ;;  %v9711_v25 = vld [vmem:[%s17291_s5 + $0x1b8] sm:$0xff] }
 0x414   : > { %v4733_v55 = vpop.f32.mrf.mxu1  ;;  %v5067_v9 = vadd.f32 %v5035_v41, %v4939_v14  ;;  %v4974_v39 = vadd.s32 1, %v14950_v12  ;;  %v15061_v43 = vld [vmem:[%s12919_s16 + $0x38] sm:$0xff]  ;;  %18195 = vst [vmem:[#allocation40_spill] sm:$0xff] %v15068_v31  ;;  %11605 = vmatprep.subr.mxu0 %v9711_v25  ;;  %18196 = vst [vmem:[#allocation44_spill] sm:$0xff] %v15070_v2  ;;  %vm5005_vm5 = vcmp.eq.s32.totalorder %v15053_v36, %v4973_v53  ;;  %v5036_v7 = vsel %vm5004_vm11, %v14884_v27, 0.0 }
 0x415   : > { %v4909_v54 = vmul.f32 %v4739_v16, %v18188_v13  ;;  %v4734_v32 = vadd.f32 %v14958_v11, %v4733_v55  ;;  %v4938_v50 = vsel %vm4874_vm1, %v4724_v57, %v4906_v46  ;;  %vm4877_vm3 = vcmp.ge.f32.partialorder %v4739_v16, 0.0 }
 0x416   : > { %8506 = vrot.lane.b32.xlu0 %v5064_v20, %s11938_s24  ;;  %8512 = vrot.lane.b32.xlu1 %v5067_v9, %s11938_s24  ;;  %v11238_v41 = vpop.f32.mrf.mxu1  ;;  %v5034_v55 = vsel %vm5002_vm0, %v14878_v6, 0.0  ;;  %v4976_v57 = vadd.s32 1, %v14968_v15  ;;  %v15079_v46 = vadd.s32 1, %v14984_v49  ;;  %vm5006_vm7 = vcmp.eq.s32.totalorder %v15068_v31, %v4974_v39 }
 0x417   : > { %vm4876_vm4 = vcmp.ge.f32.partialorder %v4734_v32, 0.0  ;;  %v4908_v14 = vmul.f32 %v4734_v32, %v18188_v13  ;;  %v4749_v25 = vadd.f32 %v14958_v11, %v11238_v41  ;;  %11567 = vmatmul.mubr.msk.f32.gmra.mxu1 %vm1340_vm2, %v18095_v35  ;;  %v5066_v9 = vadd.f32 %v5034_v55, %v4938_v50  ;;  %v15094_v41 = vld [vmem:[%s12919_s16 + $0x40] sm:$0xff]  ;;  %v15102_v55 = vpop.f32.mrf.mxu0 }
 0x418   : > { %11569 = vmatprep.mubr.msk.f32.mxu1 %vm1340_vm2, %v18096_v37  ;;  %v4743_v20 = vpop.f32.mrf.mxu1  ;;  %vm5007_vm9 = vcmp.eq.s32.totalorder %v15061_v43, %v4975_v61  ;;  %18197 = vst [vmem:[#allocation47_spill] sm:$0xff] %v15094_v41  ;;  %v4941_v6 = vsel %vm4877_vm3, %v4739_v16, %v4909_v54  ;;  %v15100_v50 = vadd.s32 576, %v18150_v59  ;;  %18199 = vst [vmem:[#allocation53_spill] sm:$0xff] %v15102_v55  ;;  %v5037_v56 = vsel %vm5005_vm5, %v14881_v18, 0.0  ;;  %v15130_v55 = vld [vmem:[%s12919_s16 + $0x50] sm:$0xff] }
 0x419   : > { %v4911_v2 = vmul.f32 %v4749_v25, %v18188_v13  ;;  %v4744_v15 = vadd.f32 %v14958_v11, %v4743_v20  ;;  %v4940_v12 = vsel %vm4876_vm4, %v4734_v32, %v4908_v14  ;;  %vm4879_vm10 = vcmp.ge.f32.partialorder %v4749_v25, 0.0  ;;  %18200 = vst [vmem:[#allocation59_spill] sm:$0xff] %v15130_v55 }
 0x41a   : > { %18198 = vst [vmem:[#allocation50_spill] sm:$0xff] %v15100_v50  ;;  %8510 = vrot.lane.b32.xlu1 %v5066_v9, %s11938_s24  ;;  %v11241_v58 = vpop.f32.mrf.mxu1  ;;  %v5068_v27 = vadd.f32 %v5036_v7, %v4940_v12  ;;  %vm5008_vm6 = vcmp.eq.s32.totalorder %v15094_v41, %v4976_v57  ;;  %v5069_v53 = vadd.f32 %v5037_v56, %v4941_v6  ;;  %v5038_v16 = vsel %vm5006_vm7, %v14897_v24, 0.0  ;;  %v15132_v6 = vpop.f32.mrf.mxu0 }
 0x41b   : > { %vm4878_vm12 = vcmp.ge.f32.partialorder %v4744_v15, 0.0  ;;  %v4910_v32 = vmul.f32 %v4744_v15, %v18188_v13  ;;  %v4759_v54 = vadd.f32 %v14958_v11, %v11241_v58  ;;  %11570 = vmatmul.mubr.msk.f32.gmra.mxu1 %vm1340_vm2, %v18097_v30  ;;  %v5039_v14 = vsel %vm5007_vm9, %v14887_v52, 0.0  ;;  %18201 = vst [vmem:[#allocation66_spill] sm:$0xff] %v15132_v6 }
 0x41c   : > { %11572 = vmatprep.mubr.msk.f32.mxu1 %vm1340_vm2, %v18098_v44  ;;  %8514 = vrot.lane.b32.xlu0 %v5068_v27, %s11938_s24  ;;  %v4753_v12 = vpop.f32.mrf.mxu1  ;;  %v4978_v20 = vadd.s32 1, %v14971_v60  ;;  %v4943_v27 = vsel %vm4879_vm10, %v4749_v25, %v4911_v2  ;;  %v5040_v39 = vsel %vm5008_vm6, %v14903_v45, 0.0  ;;  %vm5009_vm14 = vcmp.eq.s32.totalorder %v15109_v28, %v15079_v46  ;;  %v15159_v60 = vpop.f32.mrf.mxu0 }
 0x41d   : > { %v4913_v9 = vmul.f32 %v4759_v54, %v18188_v13  ;;  %v4754_v7 = vadd.f32 %v14958_v11, %v4753_v12  ;;  %v4942_v58 = vsel %vm4878_vm12, %v4744_v15, %v4910_v32  ;;  %vm4881_vm8 = vcmp.ge.f32.partialorder %v4759_v54, 0.0  ;;  %v15146_v32 = vld [vmem:[%s12919_s16 + $0x58] sm:$0xff]  ;;  %18204 = vst [vmem:[#allocation78_spill] sm:$0xff] %v15159_v60 }
 0x41e   : > { %8516 = vrot.lane.b32.xlu1 %v5069_v53, %s11938_s24  ;;  %v11244_v56 = vpop.f32.mrf.mxu1  ;;  %v5070_v61 = vadd.f32 %v5038_v16, %v4942_v58  ;;  %v4979_v25 = vadd.s32 1, %v14987_v29  ;;  %v15149_v12 = vadd.s32 640, %v18150_v59  ;;  %v5071_v53 = vadd.f32 %v5039_v14, %v4943_v27  ;;  %v18203_v16 = vld [vmem:[#allocation127_spill] sm:$0xff] }
 0x41f   : > { %vm4880_vm15 = vcmp.ge.f32.partialorder %v4754_v7, 0.0  ;;  %v4912_v15 = vmul.f32 %v4754_v7, %v18188_v13  ;;  %v4769_v2 = vadd.f32 %v14958_v11, %v11244_v56  ;;  %11573 = vmatmul.mubr.msk.f32.gmra.mxu1 %vm1340_vm2, %v18099_v42  ;;  %vm5010_vm0 = vcmp.eq.s32.totalorder %v15130_v55, %v4978_v20 }
 0x420   : > { %18202 = vst [vmem:[#allocation71_spill] sm:$0xff] %v15149_v12  ;;  %11575 = vmatprep.mubr.msk.f32.mxu1 %vm1340_vm2, %v18100_v47  ;;  %8518 = vrot.lane.b32.xlu0 %v5070_v61, %s11938_s24  ;;  %v4763_v57 = vpop.f32.mrf.mxu1  ;;  %v4980_v58 = vadd.s32 1, %v18203_v16  ;;  %v4945_v24 = vsel %vm4881_vm8, %v4759_v54, %v4913_v9  ;;  %v5041_v27 = vsel %vm5009_vm14, %v14900_v33, 0.0  ;;  %v4981_v16 = vadd.s32 1, %v14990_v19  ;;  %v15173_v9 = vld [vmem:[%s12919_s16 + $0x68] sm:$0xff] }
 0x421   : > { %v4915_v56 = vmul.f32 %v4769_v2, %v18188_v13  ;;  %v4764_v6 = vadd.f32 %v14958_v11, %v4763_v57  ;;  %v4944_v45 = vsel %vm4880_vm15, %v4754_v7, %v4912_v15  ;;  %vm4883_vm1 = vcmp.ge.f32.partialorder %v4769_v2, 0.0  ;;  %v11853_v15 = vld [vmem:[%s12919_s16 + $0x60] sm:$0xff]  ;;  %v18205_v57 = vld [vmem:[#allocation128_spill] sm:$0xff] }
 0x422   : > { %8520 = vrot.lane.b32.xlu1 %v5071_v53, %s11938_s24  ;;  %v11247_v61 = vpop.f32.mrf.mxu1  ;;  %v5072_v14 = vadd.f32 %v5040_v39, %v4944_v45  ;;  %vm5011_vm3 = vcmp.eq.s32.totalorder %v15146_v32, %v4979_v25  ;;  %v5073_v46 = vadd.f32 %v5041_v27, %v4945_v24  ;;  %v5042_v39 = vsel %vm5010_vm0, %v14912_v22, 0.0  ;;  %v15195_v22 = vld [vmem:[%s12919_s16 + $0x78] sm:$0xff] }
 0x423   : > { %vm4882_vm11 = vcmp.ge.f32.partialorder %v4764_v6, 0.0  ;;  %v4914_v7 = vmul.f32 %v4764_v6, %v18188_v13  ;;  %v4779_v54 = vadd.f32 %v14958_v11, %v11247_v61  ;;  %11576 = vmatmul.mubr.msk.f32.gmra.mxu1 %vm1340_vm2, %v18101_v0  ;;  %vm5012_vm4 = vcmp.eq.s32.totalorder %v11853_v15, %v4980_v58 }
 0x424   : > { %11578 = vmatprep.mubr.msk.f32.mxu1 %vm1340_vm2, %v18102_v63  ;;  %8522 = vrot.lane.b32.xlu0 %v5072_v14, %s11938_s24  ;;  %v4773_v45 = vpop.f32.mrf.mxu1  ;;  %v4982_v53 = vadd.s32 1, %v18205_v57  ;;  %v4947_v31 = vsel %vm4883_vm1, %v4769_v2, %v4915_v56  ;;  %v15187_v14 = vpop.f32.mrf.mxu0  ;;  %v5043_v27 = vsel %vm5011_vm3, %v14909_v38, 0.0  ;;  %v4983_v57 = vadd.s32 1, %v15016_v8  ;;  %v18207_v56 = vld [vmem:[#allocation56_spill] sm:$0xff] }
 0x425   : > { %v4917_v61 = vmul.f32 %v4779_v54, %v18188_v13  ;;  %v4774_v60 = vadd.f32 %v14958_v11, %v4773_v45  ;;  %v4946_v41 = vsel %vm4882_vm11, %v4764_v6, %v4914_v7  ;;  %18206 = vst [vmem:[#allocation127_spill] sm:$0xff] %v15187_v14  ;;  %vm4885_vm5 = vcmp.ge.f32.partialorder %v4779_v54, 0.0  ;;  %v11854_v45 = vld [vmem:[%s12919_s16 + $0x70] sm:$0xff] }
 0x426   : > { %8524 = vrot.lane.b32.xlu1 %v5073_v46, %s11938_s24  ;;  %v11250_v24 = vpop.f32.mrf.mxu1  ;;  %v5074_v20 = vadd.f32 %v5042_v39, %v4946_v41  ;;  %vm5013_vm9 = vcmp.eq.s32.totalorder %v15173_v9, %v4981_v16  ;;  %v5075_v25 = vadd.f32 %v5043_v27, %v4947_v31  ;;  %v5044_v7 = vsel %vm5012_vm4, %v18207_v56, 0.0  ;;  %v18208_v46 = vld [vmem:[#allocation129_spill] sm:$0xff]  ;;  %v15212_v33 = vpop.f32.mrf.mxu0  ;;  %v15232_v56 = vld [vmem:[%s12919_s16 + $0x88] sm:$0xff] }
 0x427   : > { %vm4884_vm7 = vcmp.ge.f32.partialorder %v4774_v60, 0.0  ;;  %v4916_v6 = vmul.f32 %v4774_v60, %v18188_v13  ;;  %v4789_v2 = vadd.f32 %v14958_v11, %v11250_v24  ;;  %11579 = vmatmul.mubr.msk.f32.gmra.mxu1 %vm1340_vm2, %v18103_v40  ;;  %vm5014_vm10 = vcmp.eq.s32.totalorder %v11854_v45, %v4982_v53  ;;  %18209 = vst [vmem:[#allocation128_spill] sm:$0xff] %v15212_v33 }
 0x428   : > { %11581 = vmatprep.mubr.msk.f32.mxu1 %vm1340_vm2, %v18104_v4  ;;  %8526 = vrot.lane.b32.xlu0 %v5074_v20, %s11938_s24  ;;  %v4783_v41 = vpop.f32.mrf.mxu1  ;;  %v4984_v39 = vadd.s32 1, %v18208_v46  ;;  %v4949_v38 = vsel %vm4885_vm5, %v4779_v54, %v4917_v61  ;;  %v5045_v15 = vsel %vm5013_vm9, %v14915_v34, 0.0  ;;  %vm5015_vm6 = vcmp.eq.s32.totalorder %v15195_v22, %v4983_v57  ;;  %v18210_v20 = vld [vmem:[#allocation62_spill] sm:$0xff]  ;;  %v15238_v33 = vpop.f32.mrf.mxu0 }
 0x429   : > { %v4919_v24 = vmul.f32 %v4789_v2, %v18188_v13  ;;  %v4784_v14 = vadd.f32 %v14958_v11, %v4783_v41  ;;  %v4948_v55 = vsel %vm4884_vm7, %v4774_v60, %v4916_v6  ;;  %vm4887_vm12 = vcmp.ge.f32.partialorder %v4789_v2, 0.0  ;;  %v11855_v6 = vld [vmem:[%s12919_s16 + $0x80] sm:$0xff]  ;;  %v18211_v41 = vld [vmem:[#allocation130_spill] sm:$0xff]  ;;  %18212 = vst [vmem:[#allocation56_spill] sm:$0xff] %v15238_v33 }
 0x42a   : > { %8528 = vrot.lane.b32.xlu1 %v5075_v25, %s11938_s24  ;;  %v11253_v31 = vpop.f32.mrf.mxu1  ;;  %v5076_v58 = vadd.f32 %v5044_v7, %v4948_v55  ;;  %v4985_v61 = vadd.s32 1, %v15019_v51  ;;  %v5077_v16 = vadd.f32 %v5045_v15, %v4949_v38  ;;  %v5046_v27 = vsel %vm5014_vm10, %v18210_v20, 0.0  ;;  %v15246_v20 = vld [vmem:[%s12919_s16 + $0x98] sm:$0xff]  ;;  %v18219_v33 = vld [vmem:[#allocation133_spill] sm:$0xff] }
 0x42b   : > { %vm4886_vm8 = vcmp.ge.f32.partialorder %v4784_v14, 0.0  ;;  %v4918_v60 = vmul.f32 %v4784_v14, %v18188_v13  ;;  %v4799_v54 = vadd.f32 %v14958_v11, %v11253_v31  ;;  %11582 = vmatmul.mubr.msk.f32.gmra.mxu1 %vm1340_vm2, %v18105_v10  ;;  %vm5016_vm14 = vcmp.eq.s32.totalorder %v11855_v6, %v4984_v39 }
 0x42c   : > { %11584 = vmatprep.mubr.msk.f32.mxu1 %vm1340_vm2, %v18106_v17  ;;  %8530 = vrot.lane.b32.xlu0 %v5076_v58, %s11938_s24  ;;  %v4793_v55 = vpop.f32.mrf.mxu1  ;;  %v4986_v25 = vadd.s32 1, %v18211_v41  ;;  %v4951_v58 = vsel %vm4887_vm12, %v4789_v2, %v4919_v24  ;;  %v5047_v45 = vsel %vm5015_vm6, %v14918_v21, 0.0  ;;  %v4987_v15 = vadd.s32 1, %v15100_v50  ;;  %v18213_v24 = vld [vmem:[#allocation68_spill] sm:$0xff] }
 0x42d   : > { %v4921_v7 = vmul.f32 %v4799_v54, %v18188_v13  ;;  %v4794_v46 = vadd.f32 %v14958_v11, %v4793_v55  ;;  %v4950_v31 = vsel %vm4886_vm8, %v4784_v14, %v4918_v60  ;;  %vm4889_vm15 = vcmp.ge.f32.partialorder %v4799_v54, 0.0 }
 0x42e   : > { %8532 = vrot.lane.b32.xlu1 %v5077_v16, %s11938_s24  ;;  %v11256_v38 = vpop.f32.mrf.mxu1  ;;  %v5078_v53 = vadd.f32 %v5046_v27, %v4950_v31  ;;  %v5048_v60 = vsel %vm5016_vm14, %v18213_v24, 0.0  ;;  %v5079_v55 = vadd.f32 %v5047_v45, %v4951_v58  ;;  %vm5017_vm1 = vcmp.eq.s32.totalorder %v15232_v56, %v4985_v61  ;;  %v11856_v16 = vld [vmem:[%s12919_s16 + $0x90] sm:$0xff]  ;;  %v18214_v27 = vld [vmem:[#allocation132_spill] sm:$0xff]  ;;  %v15263_v24 = vpop.f32.mrf.mxu0 }
 0x42f   : > { %vm4888_vm0 = vcmp.ge.f32.partialorder %v4794_v46, 0.0  ;;  %v4920_v14 = vmul.f32 %v4794_v46, %v18188_v13  ;;  %v4809_v2 = vadd.f32 %v14958_v11, %v11256_v38  ;;  %11585 = vmatmul.mubr.msk.f32.gmra.mxu1 %vm1340_vm2, %v18107_v5  ;;  %vm5018_vm11 = vcmp.eq.s32.totalorder %v11856_v16, %v4986_v25  ;;  %18215 = vst [vmem:[#allocation129_spill] sm:$0xff] %v15263_v24 }
 0x430   : > { %11587 = vmatprep.mubr.msk.f32.mxu1 %vm1340_vm2, %v18108_v26  ;;  %8534 = vrot.lane.b32.xlu0 %v5078_v53, %s11938_s24  ;;  %v4803_v57 = vpop.f32.mrf.mxu1  ;;  %v4988_v41 = vadd.s32 1, %v18214_v27  ;;  %v4953_v6 = vsel %vm4889_vm15, %v4799_v54, %v4921_v7  ;;  %vm5019_vm4 = vcmp.eq.s32.totalorder %v15246_v20, %v4987_v15  ;;  %v4989_v45 = vadd.s32 1, %v15149_v12  ;;  %v18216_v54 = vld [vmem:[#allocation33_spill] sm:$0xff] }
 0x431   : > { %v4923_v31 = vmul.f32 %v4809_v2, %v18188_v13  ;;  %v4804_v38 = vadd.f32 %v14958_v11, %v4803_v57  ;;  %v4952_v39 = vsel %vm4888_vm0, %v4794_v46, %v4920_v14  ;;  %vm4891_vm3 = vcmp.ge.f32.partialorder %v4809_v2, 0.0  ;;  %v15276_v46 = vld [vmem:[%s12919_s16 + $0xa8] sm:$0xff]  ;;  %v18217_v14 = vld [vmem:[#allocation93_spill] sm:$0xff] }
 0x432   : > { %8536 = vrot.lane.b32.xlu1 %v5079_v55, %s11938_s24  ;;  %v11259_v58 = vpop.f32.mrf.mxu1  ;;  %v5080_v53 = vadd.f32 %v5048_v60, %v4952_v39  ;;  %v5049_v7 = vsel %vm5017_vm1, %v18216_v54, 0.0  ;;  %v18218_v39 = vld [vmem:[#allocation74_spill] sm:$0xff]  ;;  %v4990_v21 = vadd.s32 1, %v18219_v33  ;;  %vm5021_vm12 = vcmp.eq.s32.totalorder %v15276_v46, %v4989_v45 }
 0x433   : > { %vm4890_vm5 = vcmp.ge.f32.partialorder %v4804_v38, 0.0  ;;  %v4922_v27 = vmul.f32 %v4804_v38, %v18188_v13  ;;  %v4819_v57 = vadd.f32 %v14958_v11, %v11259_v58  ;;  %11588 = vmatmul.mubr.msk.f32.gmra.mxu1 %vm1340_vm2, %v18109_v3  ;;  %v5081_v55 = vadd.f32 %v5049_v7, %v4953_v6  ;;  %v11857_v58 = vld [vmem:[%s12919_s16 + $0xa0] sm:$0xff]  ;;  %v18221_v6 = vld [vmem:[#allocation39_spill] sm:$0xff] }
 0x434   : > { %11590 = vmatprep.mubr.msk.f32.mxu1 %vm1340_vm2, %v18217_v14  ;;  %8538 = vrot.lane.b32.xlu0 %v5080_v53, %s11938_s24  ;;  %v4813_v60 = vpop.f32.mrf.mxu1  ;;  %v5050_v24 = vsel %vm5018_vm11, %v18218_v39, 0.0  ;;  %vm5020_vm7 = vcmp.eq.s32.totalorder %v11857_v58, %v4988_v41  ;;  %v4955_v3 = vsel %vm4891_vm3, %v4809_v2, %v4923_v31  ;;  %v15289_v14 = vpop.f32.mrf.mxu0  ;;  %v5051_v33 = vsel %vm5019_vm4, %v18221_v6, 0.0  ;;  %v18222_v53 = vld [vmem:[#allocation196_spill] sm:$0xff]  ;;  %v18223_v2 = vld [vmem:[#allocation94_spill] sm:$0xff]  ;;  %v18226_v39 = vld [vmem:[#allocation135_spill] sm:$0xff] }
 0x435   : > { %v4925_v34 = vmul.f32 %v4819_v57, %v18188_v13  ;;  %v4814_v61 = vadd.f32 %v14958_v11, %v4813_v60  ;;  %v4954_v54 = vsel %vm4890_vm5, %v4804_v38, %v4922_v27  ;;  %18220 = vst [vmem:[#allocation62_spill] sm:$0xff] %v15289_v14  ;;  %vm4893_vm9 = vcmp.ge.f32.partialorder %v4819_v57, 0.0  ;;  %v18224_v31 = vld [vmem:[#allocation98_spill] sm:$0xff]  ;;  %v18225_v27 = vld [vmem:[#allocation80_spill] sm:$0xff]  ;;  %v18228_v58 = vld [vmem:[#allocation41_spill] sm:$0xff] }
 0x436   : > { %8540 = vrot.lane.b32.xlu1 %v5081_v55, %s11938_s24  ;;  %v11262_v25 = vpop.f32.mrf.mxu1  ;;  %v5082_v16 = vadd.f32 %v5050_v24, %v4954_v54  ;;  %v4991_v7 = vadd.s32 1, %v18222_v53  ;;  %v5083_v15 = vadd.f32 %v5051_v33, %v4955_v3  ;;  %v5052_v54 = vsel %vm5020_vm7, %v18225_v27, 0.0  ;;  %v11858_v55 = vld [vmem:[%s12919_s16 + $0xb0] sm:$0xff]  ;;  %v11859_v33 = vld [vmem:[%s12919_s16 + $0xb8] sm:$0xff] }
 0x437   : > { %vm4892_vm10 = vcmp.ge.f32.partialorder %v4814_v61, 0.0  ;;  %v4924_v60 = vmul.f32 %v4814_v61, %v18188_v13  ;;  %v4829_v38 = vadd.f32 %v14958_v11, %v11262_v25  ;;  %11591 = vmatmul.mubr.msk.f32.gmra.mxu1 %vm1340_vm2, %v18223_v2  ;;  %vm5022_vm6 = vcmp.eq.s32.totalorder %v11858_v55, %v4990_v21  ;;  %v18232_v27 = vld [vmem:[#allocation88_spill] sm:$0xff]  ;;  %v18235_v55 = vld [vmem:[#allocation85_spill] sm:$0xff] }
 0x438   : > { %11593 = vmatprep.mubr.msk.f32.mxu1 %vm1340_vm2, %v18224_v31  ;;  %8542 = vrot.lane.b32.xlu0 %v5082_v16, %s11938_s24  ;;  %v4823_v24 = vpop.f32.mrf.mxu1  ;;  %v4992_v25 = vadd.s32 1, %v18226_v39  ;;  %v4957_v6 = vsel %vm4893_vm9, %v4819_v57, %v4925_v34  ;;  %v15311_v31 = vpop.f32.mrf.mxu0  ;;  %v5053_v16 = vsel %vm5021_vm12, %v18228_v58, 0.0  ;;  %vm5023_vm14 = vcmp.eq.s32.totalorder %v11859_v33, %v4991_v7  ;;  %v18229_v34 = vld [vmem:[#allocation99_spill] sm:$0xff]  ;;  %v11860_v39 = vld [vmem:[%s12919_s16 + $0xc0] sm:$0xff] }
 0x439   : > { %v4927_v53 = vmul.f32 %v4829_v38, %v18188_v13  ;;  %v4824_v14 = vadd.f32 %v14958_v11, %v4823_v24  ;;  %v4956_v2 = vsel %vm4892_vm10, %v4814_v61, %v4924_v60  ;;  %18227 = vst [vmem:[#allocation130_spill] sm:$0xff] %v15311_v31  ;;  %vm4895_vm8 = vcmp.ge.f32.partialorder %v4829_v38, 0.0  ;;  %v18230_v57 = vld [vmem:[#allocation115_spill] sm:$0xff]  ;;  %v18233_v31 = vld [vmem:[#allocation136_spill] sm:$0xff] }
 0x43a   : > { %8544 = vrot.lane.b32.xlu1 %v5083_v15, %s11938_s24  ;;  %v11265_v3 = vpop.f32.mrf.mxu1  ;;  %v5084_v41 = vadd.f32 %v5052_v54, %v4956_v2  ;;  %v4993_v60 = vadd.s32 1, %v18230_v57  ;;  %v18231_v15 = vld [vmem:[#allocation101_spill] sm:$0xff]  ;;  %v5085_v45 = vadd.f32 %v5053_v16, %v4957_v6  ;;  %v5054_v54 = vsel %vm5022_vm6, %v18232_v27, 0.0 }
 0x43b   : > { %vm4894_vm15 = vcmp.ge.f32.partialorder %v4824_v14, 0.0  ;;  %v4926_v24 = vmul.f32 %v4824_v14, %v18188_v13  ;;  %v4839_v61 = vadd.f32 %v14958_v11, %v11265_v3  ;;  %11594 = vmatmul.mubr.msk.f32.gmra.mxu1 %vm1340_vm2, %v18229_v34  ;;  %vm5024_vm0 = vcmp.eq.s32.totalorder %v11860_v39, %v4992_v25  ;;  %v11863_v39 = vld [vmem:[%s12919_s16 + $0xd8] sm:$0xff] }
 0x43c   : > { %11596 = vmatprep.mubr.msk.f32.mxu1 %vm1340_vm2, %v18231_v15  ;;  %8546 = vrot.lane.b32.xlu0 %v5084_v41, %s11938_s24  ;;  %v4833_v2 = vpop.f32.mrf.mxu1  ;;  %v4994_v58 = vadd.s32 1, %v18233_v31  ;;  %v4959_v52 = vsel %vm4895_vm8, %v4829_v38, %v4927_v53  ;;  %v15333_v15 = vpop.f32.mrf.mxu0  ;;  %v5055_v41 = vsel %vm5023_vm14, %v18235_v55, 0.0  ;;  %v18236_v31 = vld [vmem:[#allocation117_spill] sm:$0xff]  ;;  %v11861_v53 = vld [vmem:[%s12919_s16 + $0xc8] sm:$0xff]  ;;  %v18238_v38 = vld [vmem:[#allocation107_spill] sm:$0xff] }
 0x43d   : > { %v4929_v3 = vmul.f32 %v4839_v61, %v18188_v13  ;;  %v4834_v34 = vadd.f32 %v14958_v11, %v4833_v2  ;;  %v4958_v57 = vsel %vm4894_vm15, %v4824_v14, %v4926_v24  ;;  %18234 = vst [vmem:[#allocation68_spill] sm:$0xff] %v15333_v15  ;;  %vm4897_vm1 = vcmp.ge.f32.partialorder %v4839_v61, 0.0  ;;  %v18237_v24 = vld [vmem:[#allocation106_spill] sm:$0xff]  ;;  %v18239_v2 = vld [vmem:[#allocation96_spill] sm:$0xff] }
 0x43e   : > { %8548 = vrot.lane.b32.xlu1 %v5085_v45, %s11938_s24  ;;  %v11268_v21 = vpop.f32.mrf.mxu1  ;;  %v5086_v6 = vadd.f32 %v5054_v54, %v4958_v57  ;;  %v4995_v16 = vadd.s32 1, %v18236_v31  ;;  %vm5025_vm3 = vcmp.eq.s32.totalorder %v11861_v53, %v4993_v60  ;;  %v5087_v33 = vadd.f32 %v5055_v41, %v4959_v52  ;;  %v11862_v54 = vld [vmem:[%s12919_s16 + $0xd0] sm:$0xff]  ;;  %v18240_v57 = vld [vmem:[#allocation137_spill] sm:$0xff] }
 0x43f   : > { %vm4896_vm11 = vcmp.ge.f32.partialorder %v4834_v34, 0.0  ;;  %v4928_v27 = vmul.f32 %v4834_v34, %v18188_v13  ;;  %v4849_v14 = vadd.f32 %v14958_v11, %v11268_v21  ;;  %11597 = vmatmul.mubr.msk.f32.gmra.mxu1 %vm1340_vm2, %v18237_v24  ;;  %v5056_v45 = vsel %vm5024_vm0, %v18239_v2, 0.0  ;;  %v15355_v24 = vpop.f32.mrf.mxu0 }
 0x440   : > { %11599 = vmatprep.mubr.msk.f32.mxu1 %vm1340_vm2, %v18238_v38  ;;  %8550 = vrot.lane.b32.xlu0 %v5086_v6, %s11938_s24  ;;  %v4843_v7 = vpop.f32.mrf.mxu1  ;;  %vm5026_vm4 = vcmp.eq.s32.totalorder %v11862_v54, %v4994_v58  ;;  %v4996_v21 = vadd.s32 1, %v18240_v57  ;;  %v4961_v38 = vsel %vm4897_vm1, %v4839_v61, %v4929_v3  ;;  %18241 = vst [vmem:[#allocation132_spill] sm:$0xff] %v15355_v24  ;;  %v18244_v3 = vld [vmem:[#allocation118_spill] sm:$0xff]  ;;  %v18246_v57 = vld [vmem:[#allocation121_spill] sm:$0xff]  ;;  %v18248_v54 = vld [vmem:[#allocation140_spill] sm:$0xff] }
 0x441   : > { %v4931_v31 = vmul.f32 %v4849_v14, %v18188_v13  ;;  %v4844_v55 = vadd.f32 %v14958_v11, %v4843_v7  ;;  %v4960_v15 = vsel %vm4896_vm11, %v4834_v34, %v4928_v27  ;;  %vm4899_vm5 = vcmp.ge.f32.partialorder %v4849_v14, 0.0  ;;  %v18242_v7 = vld [vmem:[#allocation108_spill] sm:$0xff] }
 0x442   : > { %8552 = vrot.lane.b32.xlu1 %v5087_v33, %s11938_s24  ;;  %v11271_v52 = vpop.f32.mrf.mxu1  ;;  %v5088_v25 = vadd.f32 %v5056_v45, %v4960_v15  ;;  %vm5027_vm7 = vcmp.eq.s32.totalorder %v11863_v39, %v4995_v16  ;;  %v18243_v34 = vld [vmem:[#allocation92_spill] sm:$0xff]  ;;  %v18245_v33 = vld [vmem:[#allocation103_spill] sm:$0xff]  ;;  %v11864_v45 = vld [vmem:[%s12919_s16 + $0xe0] sm:$0xff] }
 0x443   : > { %vm4898_vm9 = vcmp.ge.f32.partialorder %v4844_v55, 0.0  ;;  %v4930_v6 = vmul.f32 %v4844_v55, %v18188_v13  ;;  %v4859_v41 = vadd.f32 %v14958_v11, %v11271_v52  ;;  %11600 = vmatmul.mubr.msk.f32.gmra.mxu1 %vm1340_vm2, %v18242_v7  ;;  %v5057_v61 = vsel %vm5025_vm3, %v18243_v34, 0.0  ;;  %v15375_v34 = vpop.f32.mrf.mxu0 }
 0x444   : > { %11602 = vmatprep.mubr.msk.f32.mxu1 %vm1340_vm2, %v18244_v3  ;;  %8554 = vrot.lane.b32.xlu0 %v5088_v25, %s11938_s24  ;;  %v4853_v27 = vpop.f32.mrf.mxu1  ;;  %v5089_v15 = vadd.f32 %v5057_v61, %v4961_v38  ;;  %v5058_v2 = vsel %vm5026_vm4, %v18245_v33, 0.0  ;;  %vm5028_vm10 = vcmp.eq.s32.totalorder %v11864_v45, %v4996_v21  ;;  %v4997_v52 = vadd.s32 1, %v18246_v57  ;;  %18247 = vst [vmem:[#allocation74_spill] sm:$0xff] %v15375_v34  ;;  %v18249_v57 = vld [vmem:[#allocation122_spill] sm:$0xff]  ;;  %v18253_v45 = vld [vmem:[#allocation19_spill] sm:$0xff] }
 0x445   : > { %v4933_v24 = vmul.f32 %v4859_v41, %v18188_v13  ;;  %v4854_v7 = vadd.f32 %v14958_v11, %v4853_v27  ;;  %v4962_v60 = vsel %vm4898_vm9, %v4844_v55, %v4930_v6  ;;  %v4963_v53 = vsel %vm4899_vm5, %v4849_v14, %v4931_v31  ;;  %v18250_v55 = vld [vmem:[#allocation100_spill] sm:$0xff]  ;;  %v18251_v31 = vld [vmem:[#allocation18_spill] sm:$0xff]  ;;  %v15394_v39 = vpop.f32.mrf.mxu0 }
 0x446   : > { %vm4901_vm12 = vcmp.ge.f32.partialorder %v4859_v41, 0.0  ;;  %8556 = vrot.lane.b32.xlu1 %v5089_v15, %s11938_s24  ;;  %v11274_v38 = vpop.f32.mrf.mxu1  ;;  %v5090_v58 = vadd.f32 %v5058_v2, %v4962_v60  ;;  %v4998_v25 = vadd.s32 1, %v18248_v54  ;;  %v5059_v14 = vsel %vm5027_vm7, %v18250_v55, 0.0  ;;  %v18252_v15 = vld [vmem:[#allocation125_spill] sm:$0xff]  ;;  %v11865_v60 = vld [vmem:[%s12919_s16 + $0xe8] sm:$0xff]  ;;  %v11866_v55 = vld [vmem:[%s12919_s16 + $0xf0] sm:$0xff] }
 0x447   : > { %vm4900_vm6 = vcmp.ge.f32.partialorder %v4854_v7, 0.0  ;;  %v4932_v61 = vmul.f32 %v4854_v7, %v18188_v13  ;;  %v4869_v33 = vadd.f32 %v14958_v11, %v11274_v38  ;;  %11603 = vmatmul.mubr.msk.f32.gmra.mxu1 %vm1340_vm2, %v18249_v57  ;;  %v5091_v27 = vadd.f32 %v5059_v14, %v4963_v53 }
 0x448   : > { %11669 = vmatprep.mubr.msk.f32.mxu1 %vm1340_vm2, %v18251_v31  ;;  %8558 = vrot.lane.b32.xlu0 %v5090_v58, %s11938_s24  ;;  %v4863_v6 = vpop.f32.mrf.mxu1  ;;  %v5060_v2 = vsel %vm5028_vm10, %v18252_v15, 0.0  ;;  %vm5029_vm8 = vcmp.eq.s32.totalorder %v11865_v60, %v4997_v52  ;;  %v4965_v16 = vsel %vm4901_vm12, %v4859_v41, %v4933_v24  ;;  %vm5030_vm15 = vcmp.eq.s32.totalorder %v11866_v55, %v4998_v25  ;;  %v18254_v52 = vld [vmem:[#allocation119_spill] sm:$0xff] }
 0x449   : > { %v4935_v38 = vmul.f32 %v4869_v33, %v18188_v13  ;;  %v4864_v54 = vadd.f32 %v14958_v11, %v4863_v6  ;;  %v4964_v34 = vsel %vm4900_vm6, %v4854_v7, %v4932_v61  ;;  %vm4903_vm14 = vcmp.ge.f32.partialorder %v4869_v33, 0.0  ;;  %v18255_v61 = vld [vmem:[#allocation24_spill] sm:$0xff]  ;;  %v15412_v6 = vpop.f32.mrf.mxu0 }
 0x44a   : > { %8560 = vrot.lane.b32.xlu1 %v5091_v27, %s11938_s24  ;;  %v15397_v58 = vpop.f32.mrf.mxu1  ;;  %v5092_v53 = vadd.f32 %v5060_v2, %v4964_v34  ;;  %v5061_v7 = vsel %vm5029_vm8, %v18254_v52, 0.0  ;;  %v18256_v34 = vld [vmem:[#allocation126_spill] sm:$0xff]  ;;  %vm3169_vm4 = vcmp.eq.s32.totalorder %v15061_v43, %v14981_v62  ;;  %vm3171_vm5 = vcmp.eq.s32.totalorder %v15109_v28, %v14984_v49  ;;  %v18287_v43 = vld [vmem:[#allocation33_spill] sm:$0xff] }
 0x44b   : > { %vm4902_vm0 = vcmp.ge.f32.partialorder %v4864_v54, 0.0  ;;  %v4934_v21 = vmul.f32 %v4864_v54, %v18188_v13  ;;  %11670 = vmatmul.mubr.msk.f32.vlgmr.msra.gmra.mxu1 %vm1340_vm2, %v18253_v45  ;;  %v5093_v41 = vadd.f32 %v5061_v7, %v4965_v16  ;;  %v5062_v31 = vsel %vm5030_vm15, %v18256_v34, 0.0  ;;  %v18269_v7 = vld [vmem:[#allocation61_spill] sm:$0xff]  ;;  %v18299_v62 = vld [vmem:[#allocation38_spill] sm:$0xff] }
 0x44c   : > { %11672 = vmatprep.mubr.msk.f32.mxu1 %vm1340_vm2, %v18255_v61  ;;  %8562 = vrot.lane.b32.xlu0 %v5092_v53, %s11938_s24  ;;  %v15407_v24 = vpop.f32.mrf.mxu1  ;;  %v4967_v25 = vsel %vm4903_vm14, %v4869_v33, %v4935_v38  ;;  %v18257_v33 = vld [vmem:[#allocation134_spill] sm:$0xff]  ;;  %vm3173_vm7 = vcmp.eq.s32.totalorder %v15146_v32, %v14987_v29  ;;  %vm3175_vm9 = vcmp.eq.s32.totalorder %v15173_v9, %v14990_v19  ;;  %v18290_v19 = vld [vmem:[#allocation39_spill] sm:$0xff]  ;;  %v18292_v29 = vld [vmem:[#allocation124_spill] sm:$0xff] }
 0x44d   : > { %v4966_v14 = vsel %vm4902_vm0, %v4864_v54, %v4934_v21  ;;  %11774 = vmatpush3.msra.mxu1 %v15049_v48  ;;  %v5095_v60 = vadd.f32 %v18257_v33, %v4967_v25  ;;  %v15425_v48 = vpop.f32.mrf.mxu0  ;;  %vm3177_vm10 = vcmp.eq.s32.totalorder %v15195_v22, %v15016_v8  ;;  %vm3179_vm12 = vcmp.eq.s32.totalorder %v15232_v56, %v15019_v51  ;;  %v18280_v22 = vld [vmem:[#allocation89_spill] sm:$0xff] }
 0x44e   : > { %8564 = vrot.lane.b32.xlu1 %v5093_v41, %s11938_s24  ;;  %v15415_v27 = vpop.f32.mrf.mxu1  ;;  %v5094_v15 = vadd.f32 %v5062_v31, %v4966_v14  ;;  %v18272_v41 = vld [vmem:[#allocation201_spill] sm:$0xff]  ;;  %vm3181_vm6 = vcmp.eq.s32.totalorder %v15246_v20, %v15100_v50  ;;  %vm3183_vm8 = vcmp.eq.s32.totalorder %v15276_v46, %v15149_v12  ;;  %v2922_v33 = vadd.f32 %v14958_v11, %v18280_v22  ;;  %v18282_v46 = vld [vmem:[#allocation120_spill] sm:$0xff]  ;;  %v18286_v12 = vld [vmem:[#allocation26_spill] sm:$0xff] }
 0x44f   : > { %11673 = vmatmul.mubr.msk.f32.gmra.mxu1 %vm1340_vm2, %v18093_v23  ;;  %v18274_v31 = vld [vmem:[#allocation77_spill] sm:$0xff]  ;;  %v15561_v50 = vsel %vm3177_vm10, %v18286_v12, 0.0  ;;  %v15564_v51 = vsel %vm3179_vm12, %v18287_v43, 0.0 }
 0x450   : > { %11675 = vmatprep.mubr.msk.f32.mxu1 %vm1340_vm2, %v18094_v1  ;;  %v15421_v2 = vpop.f32.mrf.mxu1  ;;  %8566 = vrot.lane.b32.xlu0 %v5094_v15, %s11938_s24  ;;  %v15436_v1 = vpop.f32.mrf.mxu0  ;;  %vm3167_vm3 = vcmp.eq.s32.totalorder %v15053_v36, %v18274_v31  ;;  %v18277_v15 = vld [vmem:[#allocation87_spill] sm:$0xff]  ;;  %v18285_v36 = vld [vmem:[#allocation14_spill] sm:$0xff]  ;;  %v18288_v8 = vld [vmem:[#allocation93_spill] sm:$0xff] }
 0x451   : > { %v15538_v56 = vsel %vm3167_vm3, %v14881_v18, 0.0  ;;  %v15558_v22 = vsel %vm3175_vm9, %v18285_v36, 0.0  ;;  %v18293_v36 = vld [vmem:[#allocation63_spill] sm:$0xff]  ;;  %v18295_v12 = vld [vmem:[#allocation25_spill] sm:$0xff]  ;;  %vm3068_vm3 = vcmp.ge.f32.partialorder %v2922_v33, 0.0 }
 0x452   : > { %8568 = vrot.lane.b32.xlu1 %v5095_v60, %s11938_s24  ;;  %v15428_v38 = vpop.f32.mrf.mxu1  ;;  %v15446_v53 = vpop.f32.mrf.mxu0  ;;  %v18281_v60 = vld [vmem:[#allocation95_spill] sm:$0xff]  ;;  %vm3162_vm14 = vcmp.eq.s32.totalorder %v18293_v36, %v18292_v29  ;;  %s11940_s24 = smov 24  }
 0x453   : > { %11676 = vmatmul.mubr.msk.f32.gmra.mxu1 %vm1340_vm2, %v18095_v35  ;;  %v15544_v20 = vsel %vm3169_vm4, %v18281_v60, 0.0  ;;  %v18294_v60 = vld [vmem:[#allocation49_spill] sm:$0xff]  ;;  %v18318_v29 = vld [vmem:[#allocation59_spill] sm:$0xff] }
 0x454   : > { %11678 = vmatprep.mubr.msk.f32.mxu1 %vm1340_vm2, %v18096_v37  ;;  %v15434_v23 = vpop.f32.mrf.mxu1  ;;  %v15456_v55 = vpop.f32.mrf.mxu0  ;;  %vm3164_vm15 = vcmp.eq.s32.totalorder %v18295_v12, %v18294_v60 }
 0x456   : > { %v15438_v54 = vpop.f32.mrf.mxu1  ;;  %v15466_v21 = vpop.f32.mrf.mxu0 }
 0x457   : > { %11679 = vmatmul.mubr.msk.f32.gmra.mxu1 %vm1340_vm2, %v18097_v30  ;;  %18261 = vst [vmem:[#allocation115_spill] sm:$0xff] %v15466_v21 }
 0x458   : > { %11681 = vmatprep.mubr.msk.f32.mxu1 %vm1340_vm2, %v18098_v44  ;;  %v15444_v16 = vpop.f32.mrf.mxu1  ;;  %v15476_v45 = vpop.f32.mrf.mxu0 }
 0x459   : > { %18264 = vst [vmem:[#allocation117_spill] sm:$0xff] %v15476_v45 }
 0x45a   : > { %v15448_v35 = vpop.f32.mrf.mxu1 }
 0x45b   : > { %11682 = vmatmul.mubr.msk.f32.gmra.mxu1 %vm1340_vm2, %v18099_v42 }
 0x45c   : > { %11684 = vmatprep.mubr.msk.f32.mxu1 %vm1340_vm2, %v18100_v47  ;;  %v15454_v37 = vpop.f32.mrf.mxu1 }
 0x45d   : > { %18258 = vst [vmem:[#allocation133_spill] sm:$0xff] %v15454_v37  ;;  %v18328_v37 = vld [vmem:[#allocation207_spill] sm:$0xff] }
 0x45e   : > { %v15458_v30 = vpop.f32.mrf.mxu1 }
 0x45f   : > { %18259 = vst [vmem:[#allocation80_spill] sm:$0xff] %v15458_v30  ;;  %11685 = vmatmul.mubr.msk.f32.gmra.mxu1 %vm1340_vm2, %v18101_v0 }
 0x460   : > { %11687 = vmatprep.mubr.msk.f32.mxu1 %vm1340_vm2, %v18102_v63  ;;  %v15464_v44 = vpop.f32.mrf.mxu1  ;;  %v18266_v63 = vld [vmem:[#allocation32_spill] sm:$0xff] }
 0x461   : > { %18260 = vst [vmem:[#allocation135_spill] sm:$0xff] %v15464_v44  ;;  %vm3163_vm1 = vcmp.eq.s32.totalorder %v18266_v63, %v18150_v59  ;;  %v15550_v63 = vsel %vm3171_vm5, %v18282_v46, 0.0  ;;  %v15571_v46 = vsel %vm3181_vm6, %v18290_v19, 0.0  ;;  %v18298_v19 = vld [vmem:[#allocation54_spill] sm:$0xff] }
 0x462   : > { %v15468_v42 = vpop.f32.mrf.mxu1  ;;  %v15495_v14 = vsel %vm3163_vm1, %v18272_v41, 0.0  ;;  %vm3166_vm1 = vcmp.eq.s32.totalorder %v18299_v62, %v18298_v19  ;;  %v18301_v41 = vld [vmem:[#allocation102_spill] sm:$0xff] }
 0x463   : > { %18262 = vst [vmem:[#allocation88_spill] sm:$0xff] %v15468_v42  ;;  %11688 = vmatmul.mubr.msk.f32.gmra.mxu1 %vm1340_vm2, %v18103_v40  ;;  %v18268_v40 = vld [vmem:[#allocation116_spill] sm:$0xff]  ;;  %v18302_v59 = vld [vmem:[#allocation94_spill] sm:$0xff] }
 0x464   : > { %11690 = vmatprep.mubr.msk.f32.mxu1 %vm1340_vm2, %v18104_v4  ;;  %v15474_v47 = vpop.f32.mrf.mxu1  ;;  %vm3165_vm11 = vcmp.eq.s32.totalorder %v18269_v7, %v18268_v40  ;;  %v15490_v4 = vpop.f32.mrf.mxu0  ;;  %v18283_v7 = vld [vmem:[#allocation86_spill] sm:$0xff]  ;;  %v2932_v40 = vadd.f32 %v14958_v11, %v18301_v41  ;;  %v18312_v42 = vld [vmem:[#allocation40_spill] sm:$0xff] }
 0x465   : > { %18263 = vst [vmem:[#allocation136_spill] sm:$0xff] %v15474_v47  ;;  %18270 = vst [vmem:[#allocation92_spill] sm:$0xff] %v15490_v4  ;;  %v18305_v62 = vld [vmem:[#allocation98_spill] sm:$0xff]  ;;  %v18311_v47 = vld [vmem:[#allocation55_spill] sm:$0xff] }
 0x466   : > { %v15478_v0 = vpop.f32.mrf.mxu1  ;;  %v15528_v32 = vpop.f32.mrf.mxu0  ;;  %vm3168_vm4 = vcmp.eq.s32.totalorder %v18312_v42, %v18311_v47  ;;  %vm3070_vm10 = vcmp.ge.f32.partialorder %v2932_v40, 0.0  ;;  %v18324_v44 = vld [vmem:[#allocation182_spill] sm:$0xff] }
 0x467   : > { %18265 = vst [vmem:[#allocation96_spill] sm:$0xff] %v15478_v0  ;;  %11691 = vmatmul.mubr.msk.f32.gmra.mxu1 %vm1340_vm2, %v18105_v10  ;;  %v18273_v10 = vld [vmem:[#allocation195_spill] sm:$0xff]  ;;  %18278 = vst [vmem:[#allocation121_spill] sm:$0xff] %v15528_v32  ;;  %v18310_v0 = vld [vmem:[#allocation204_spill] sm:$0xff] }
 0x468   : > { %11693 = vmatprep.mubr.msk.f32.mxu1 %vm1340_vm2, %v18106_v17  ;;  %v15486_v52 = vpop.f32.mrf.mxu1  ;;  %v15500_v34 = vsel %vm3165_vm11, %v18273_v10, 0.0  ;;  %v18300_v10 = vld [vmem:[#allocation82_spill] sm:$0xff] }
 0x469   : > { %18267 = vst [vmem:[#allocation137_spill] sm:$0xff] %v15486_v52  ;;  %v2917_v31 = vadd.f32 %v14958_v11, %v18300_v10  ;;  %v18308_v10 = vld [vmem:[#allocation111_spill] sm:$0xff]  ;;  %v18309_v52 = vld [vmem:[#allocation197_spill] sm:$0xff] }
 0x46a   : > { %v15492_v61 = vpop.f32.mrf.mxu1 }
 0x46b   : > { %18271 = vst [vmem:[#allocation118_spill] sm:$0xff] %v15492_v61  ;;  %11694 = vmatmul.mubr.msk.f32.gmra.mxu1 %vm1340_vm2, %v18107_v5  ;;  %v18276_v5 = vld [vmem:[#allocation81_spill] sm:$0xff]  ;;  %v18307_v61 = vld [vmem:[#allocation202_spill] sm:$0xff]  ;;  %vm3067_vm9 = vcmp.ge.f32.partialorder %v2917_v31, 0.0 }
 0x46c   : > { %11696 = vmatprep.mubr.msk.f32.mxu1 %vm1340_vm2, %v18108_v26  ;;  %v15510_v17 = vpop.f32.mrf.mxu1  ;;  %v2912_v25 = vadd.f32 %v14958_v11, %v18276_v5  ;;  %v2907_v26 = vadd.f32 %v14958_v11, %v18277_v15  ;;  %v18284_v5 = vld [vmem:[#allocation208_spill] sm:$0xff]  ;;  %v3194_v41 = vsel %vm3162_vm14, %v18307_v61, 0.0  ;;  %v18315_v61 = vld [vmem:[#allocation69_spill] sm:$0xff] }
 0x46d   : > { %18275 = vst [vmem:[#allocation103_spill] sm:$0xff] %v15510_v17  ;;  %v15555_v15 = vsel %vm3173_vm7, %v18284_v5, 0.0 }
 0x46e   : > { %v15530_v9 = vpop.f32.mrf.mxu1  ;;  %vm3066_vm0 = vcmp.ge.f32.partialorder %v2912_v25, 0.0  ;;  %v3099_v43 = vmul.f32 %v18188_v13, %v2912_v25  ;;  %v3098_v49 = vmul.f32 %v18188_v13, %v2907_v26  ;;  %vm3065_vm11 = vcmp.ge.f32.partialorder %v2907_v26, 0.0 }
 0x46f   : > { %18279 = vst [vmem:[#allocation140_spill] sm:$0xff] %v15530_v9  ;;  %11697 = vmatmul.mubr.msk.f32.gmra.mxu1 %vm1340_vm2, %v18283_v7  ;;  %v18291_v7 = vld [vmem:[#allocation41_spill] sm:$0xff] }
 0x470   : > { %11699 = vmatprep.mubr.msk.f32.mxu1 %vm1340_vm2, %v18288_v8  ;;  %v15568_v28 = vpop.f32.mrf.mxu1  ;;  %v15574_v5 = vsel %vm3183_vm8, %v18291_v7, 0.0  ;;  %v15582_v8 = vpop.f32.mrf.mxu0  ;;  %v3101_v7 = vmul.f32 %v18188_v13, %v2922_v33 }
 0x471   : > { %18289 = vst [vmem:[#allocation122_spill] sm:$0xff] %v15568_v28  ;;  %18296 = vst [vmem:[#allocation100_spill] sm:$0xff] %v15582_v8  ;;  %v18303_v28 = vld [vmem:[#allocation91_spill] sm:$0xff] }
 0x472   : > { %v15584_v18 = vpop.f32.mrf.mxu1  ;;  %v2927_v9 = vadd.f32 %v14958_v11, %v18303_v28  ;;  %v3196_v28 = vsel %vm3164_vm15, %v18309_v52, 0.0  ;;  %v15618_v8 = vpop.f32.mrf.mxu0  ;;  %v3133_v12 = vsel %vm3068_vm3, %v2922_v33, %v3101_v7  ;;  %v18319_v52 = vld [vmem:[#allocation99_spill] sm:$0xff]  ;;  %v11867_v7 = vld [vmem:[%s17294_s8] ss:$0 sm:$0xff] }
 0x473   : > { %18297 = vst [vmem:[#allocation18_spill] sm:$0xff] %v15584_v18  ;;  %11700 = vmatmul.mubr.msk.f32.gmra.mxu1 %vm1340_vm2, %v18302_v59  ;;  %v18304_v18 = vld [vmem:[#allocation114_spill] sm:$0xff]  ;;  %v2937_v59 = vadd.f32 %v14958_v11, %v18308_v10  ;;  %18313 = vst [vmem:[#allocation19_spill] sm:$0xff] %v15618_v8  ;;  %v18323_v8 = vld [vmem:[#allocation180_spill] sm:$0xff]  ;;  %v2962_v4 = vadd.f32 %v11867_v7, %v18324_v44 }
 0x474   : > { %v2942_v17 = vadd.f32 %v14958_v11, %v18304_v18  ;;  %11702 = vmatprep.mubr.msk.f32.mxu1 %vm1340_vm2, %v18305_v62  ;;  %v15601_v19 = vpop.f32.mrf.mxu1  ;;  %v3198_v18 = vsel %vm3166_vm1, %v18310_v0, 0.0  ;;  %v3131_v62 = vsel %vm3066_vm0, %v2912_v25, %v3099_v43  ;;  %v18316_v11 = vld [vmem:[#allocation47_spill] sm:$0xff]  ;;  %v18317_v10 = vld [vmem:[#allocation70_spill] sm:$0xff]  ;;  %v3100_v0 = vmul.f32 %v18188_v13, %v2917_v31  ;;  %v18320_v43 = vld [vmem:[#allocation101_spill] sm:$0xff]  ;;  %v15644_v30 = vpop.f32.mrf.mxu0 }
 0x475   : > { %18306 = vst [vmem:[#allocation125_spill] sm:$0xff] %v15601_v19  ;;  %v3130_v19 = vsel %vm3065_vm11, %v2907_v26, %v3098_v49  ;;  %vm3170_vm5 = vcmp.eq.s32.totalorder %v18316_v11, %v18315_v61  ;;  %vm3172_vm7 = vcmp.eq.s32.totalorder %v18318_v29, %v18317_v10  ;;  %v3103_v49 = vmul.f32 %v18188_v13, %v2932_v40  ;;  %v18329_v44 = vld [vmem:[#allocation106_spill] sm:$0xff] }
 0x476   : > { %v15620_v36 = vpop.f32.mrf.mxu1  ;;  %vm3069_vm12 = vcmp.ge.f32.partialorder %v2927_v9, 0.0  ;;  %v3102_v25 = vmul.f32 %v18188_v13, %v2927_v9  ;;  %v3105_v26 = vmul.f32 %v18188_v13, %v2942_v17  ;;  %vm3072_vm6 = vcmp.ge.f32.partialorder %v2942_v17, 0.0  ;;  %18325 = vst [vmem:[#allocation126_spill] sm:$0xff] %v15644_v30  ;;  %v18330_v30 = vld [vmem:[#allocation11_spill] sm:$0xff] }
 0x477   : > { %18314 = vst [vmem:[#allocation119_spill] sm:$0xff] %v15620_v36  ;;  %11703 = vmatmul.mubr.msk.f32.gmra.mxu1 %vm1340_vm2, %v18319_v52  ;;  %v3104_v33 = vmul.f32 %v18188_v13, %v2937_v59  ;;  %v18322_v52 = vld [vmem:[#allocation179_spill] sm:$0xff]  ;;  %v2947_v32 = vadd.f32 %v11867_v7, %v18323_v8  ;;  %vm3071_vm8 = vcmp.ge.f32.partialorder %v2937_v59, 0.0  ;;  %v15656_v21 = vsel %vm3170_vm5, %v18328_v37, 0.0 }
 0x478   : > { %11705 = vmatprep.mubr.msk.f32.mxu1 %vm1340_vm2, %v18320_v43  ;;  %v15635_v60 = vpop.f32.mrf.mxu1  ;;  %v2952_v36 = vadd.f32 %v11867_v7, %v18322_v52  ;;  %v18327_v43 = vld [vmem:[#allocation206_spill] sm:$0xff]  ;;  %v3227_v8 = vadd.f32 %v15495_v14, %v3131_v62  ;;  %v15660_v52 = vadd.f32 %v15500_v34, %v3133_v12  ;;  %v15670_v42 = vsel %vm3172_vm7, %v18330_v30, 0.0  ;;  %v18331_v62 = vld [vmem:[#allocation107_spill] sm:$0xff] }
 0x479   : > { %18321 = vst [vmem:[#allocation24_spill] sm:$0xff] %v15635_v60  ;;  %v3200_v60 = vsel %vm3168_vm4, %v18327_v43, 0.0  ;;  %v3132_v11 = vsel %vm3067_vm9, %v2917_v31, %v3100_v0  ;;  %v3135_v37 = vsel %vm3070_vm10, %v2932_v40, %v3103_v49  ;;  %v3134_v14 = vsel %vm3069_vm12, %v2927_v9, %v3102_v25  ;;  %v18332_v40 = vld [vmem:[#allocation183_spill] sm:$0xff]  ;;  %v18333_v9 = vld [vmem:[#allocation185_spill] sm:$0xff] }
 0x47a   : > { %v15646_v45 = vpop.f32.mrf.mxu1  ;;  %v3137_v34 = vsel %vm3072_vm6, %v2942_v17, %v3105_v26  ;;  %vm3074_vm14 = vcmp.ge.f32.partialorder %v2952_v36, 0.0  ;;  %v3107_v29 = vmul.f32 %v18188_v13, %v2952_v36  ;;  %vm3073_vm15 = vcmp.ge.f32.partialorder %v2947_v32, 0.0  ;;  %v15686_v17 = vpop.f32.mrf.mxu0  ;;  %v18334_v26 = vld [vmem:[#allocation188_spill] sm:$0xff] }
 0x47b   : > { %18326 = vst [vmem:[#allocation134_spill] sm:$0xff] %v15646_v45  ;;  %11706 = vmatmul.mubr.msk.f32.gmra.mxu1 %vm1340_vm2, %v18329_v44  ;;  %v15664_v45 = vadd.f32 %v3194_v41, %v3130_v19  ;;  %v3136_v19 = vsel %vm3071_vm8, %v2937_v59, %v3104_v33  ;;  %v3106_v41 = vmul.f32 %v18188_v13, %v2947_v32  ;;  %vm3076_vm0 = vcmp.ge.f32.partialorder %v2962_v4, 0.0  ;;  %v18335_v59 = vld [vmem:[#allocation190_spill] sm:$0xff] }
 0x47c   : > { %11708 = vmatprep.mubr.msk.f32.mxu1 %vm1340_vm2, %v18331_v62  ;;  %v15678_v12 = vpop.f32.mrf.mxu1  ;;  %v3109_v0 = vmul.f32 %v18188_v13, %v2962_v4  ;;  %v2957_v31 = vadd.f32 %v11867_v7, %v18332_v40  ;;  %v2972_v49 = vadd.f32 %v11867_v7, %v18333_v9  ;;  %v2982_v44 = vadd.f32 %v11867_v7, %v18334_v26  ;;  %v18336_v62 = vld [vmem:[#allocation108_spill] sm:$0xff]  ;;  %v18338_v9 = vld [vmem:[#allocation194_spill] sm:$0xff] }
 0x47d   : > { %v2992_v33 = vadd.f32 %v11867_v7, %v18335_v59  ;;  %v15694_v30 = vadd.f32 %v3196_v28, %v3132_v11  ;;  %v15697_v10 = vadd.f32 %v15538_v56, %v3135_v37  ;;  %v18337_v40 = vld [vmem:[#allocation192_spill] sm:$0xff]  ;;  %v3012_v61 = vadd.f32 %v11867_v7, %v18338_v9 }
 0x47e   : > { %v15688_v25 = vpop.f32.mrf.mxu1  ;;  %v3002_v43 = vadd.f32 %v11867_v7, %v18337_v40  ;;  %v15705_v26 = vadd.f32 %v3198_v18, %v3134_v14  ;;  %v15708_v59 = vadd.f32 %v15544_v20, %v3137_v34  ;;  %v3139_v28 = vsel %vm3074_vm14, %v2952_v36, %v3107_v29  ;;  %v18341_v14 = vld [vmem:[#allocation76_spill] sm:$0xff] }
 0x47f   : > { %11709 = vmatmul.mubr.msk.f32.gmra.mxu1 %vm1340_vm2, %v18336_v62  ;;  %v3138_v11 = vsel %vm3073_vm15, %v2947_v32, %v3106_v41  ;;  %v15712_v37 = vadd.f32 %v3200_v60, %v3136_v19  ;;  %v3141_v56 = vsel %vm3076_vm0, %v2962_v4, %v3109_v0  ;;  %vm3075_vm1 = vcmp.ge.f32.partialorder %v2957_v31, 0.0  ;;  %v15715_v62 = vpop.f32.mrf.mxu0  ;;  %v15729_v60 = vld [vmem:[%s17292_s6] ss:$0 sm:$0xff]  ;;  %v18345_v9 = vld [vmem:[#allocation64_spill] sm:$0xff] }
 0x480   : > { %11711 = vmatprep.mubr.msk.f32.mxu1 %vm1340_vm2, %v18244_v3  ;;  %v15703_v47 = vpop.f32.mrf.mxu1  ;;  %v3108_v7 = vmul.f32 %v18188_v13, %v2957_v31  ;;  %vm3078_vm11 = vcmp.ge.f32.partialorder %v2972_v49, 0.0  ;;  %v3111_v18 = vmul.f32 %v18188_v13, %v2972_v49  ;;  %vm3080_vm3 = vcmp.ge.f32.partialorder %v2982_v44, 0.0  ;;  %v18343_v41 = vld [vmem:[#allocation5_spill] sm:$0xff] }
 0x481   : > { %18339 = vst [vmem:[#allocation32_spill] sm:$0xff] %v15703_v47  ;;  %v3113_v20 = vmul.f32 %v18188_v13, %v2982_v44  ;;  %v3115_v36 = vmul.f32 %v18188_v13, %v2992_v33  ;;  %vm3082_vm4 = vcmp.ge.f32.partialorder %v2992_v33, 0.0  ;;  %v3117_v4 = vmul.f32 %v18188_v13, %v3002_v43 }
 0x482   : > { %v15717_v3 = vpop.f32.mrf.mxu1  ;;  %v3119_v32 = vmul.f32 %v18188_v13, %v3012_v61  ;;  %v5327_v34 = vadd.f32 %v15729_v60, %v18341_v14  ;;  %vm3084_vm5 = vcmp.ge.f32.partialorder %v3002_v43, 0.0  ;;  %vm3086_vm7 = vcmp.ge.f32.partialorder %v3012_v61, 0.0  ;;  %v15746_v14 = vpop.f32.mrf.mxu0 }
 0x483   : > { %18340 = vst [vmem:[#allocation61_spill] sm:$0xff] %v15717_v3  ;;  %11712 = vmatmul.mubr.msk.f32.gmra.mxu1 %vm1340_vm2, %v18249_v57  ;;  %v15738_v57 = vadd.f32 %v15550_v63, %v3139_v28  ;;  %v3140_v40 = vsel %vm3075_vm1, %v2957_v31, %v3108_v7  ;;  %v5326_v13 = vadd.f32 %v15729_v60, %v18345_v9 }
 0x484   : > { %v8509_v19 = vpop.permute.xlu0 %8508  ;;  %v15733_v29 = vpop.f32.mrf.mxu1  ;;  %11714 = vmatprep.mubr.msk.f32.mxu1 %vm1340_vm2, %v18343_v41  ;;  %v15752_v47 = vadd.f32 %v15656_v21, %v3138_v11  ;;  %v15755_v63 = vadd.f32 %v15555_v15, %v3141_v56  ;;  %v3145_v28 = vsel %vm3080_vm3, %v2982_v44, %v3113_v20  ;;  %v3147_v31 = vsel %vm3082_vm4, %v2992_v33, %v3115_v36  ;;  %v18347_v15 = vld [vmem:[#allocation83_spill] sm:$0xff] }
 0x485   : > { %18342 = vst [vmem:[#allocation81_spill] sm:$0xff] %v15733_v29  ;;  %v15741_v0 = vsel %vm2743_vm13, %v3227_v8, %v8509_v19  ;;  %v5589_v29 = vadd.f32 %v15397_v58, %v5327_v34  ;;  %v3143_v8 = vsel %vm3078_vm11, %v2972_v49, %v3111_v18  ;;  %v3149_v7 = vsel %vm3084_vm5, %v3002_v43, %v3117_v4  ;;  %v18346_v58 = vld [vmem:[#allocation72_spill] sm:$0xff]  ;;  %v15786_v33 = vpop.f32.mrf.mxu0 }
 0x486   : > { %18344 = vst [vmem:[#allocation87_spill] sm:$0xff] %v15741_v0  ;;  %v15749_v3 = vpop.f32.mrf.mxu1  ;;  %v3151_v19 = vsel %vm3086_vm7, %v3012_v61, %v3119_v32  ;;  %v5329_v34 = vadd.f32 %v15729_v60, %v18346_v58  ;;  %v5588_v21 = vadd.f32 %v15407_v24, %v5326_v13  ;;  %v5328_v56 = vadd.f32 %v15729_v60, %v18347_v15  ;;  %v18351_v32 = vld [vmem:[#allocation178_spill] sm:$0xff]  ;;  %v18357_v15 = vld [vmem:[#allocation109_spill] sm:$0xff] }
 0x487   : > { %11715 = vmatmul.mubr.msk.f32.gmra.mxu1 %vm1340_vm2, %v18343_v41  ;;  %v15778_v61 = vadd.f32 %v15670_v42, %v3140_v40  ;;  %v15781_v13 = vadd.f32 %v15558_v22, %v3143_v8  ;;  %v15784_v24 = vadd.f32 %v15561_v50, %v3145_v28  ;;  %v5851_v18 = vadd.f32 %v15394_v39, %v5589_v29  ;;  %v18350_v50 = vld [vmem:[#allocation104_spill] sm:$0xff]  ;;  %v18352_v29 = vld [vmem:[#allocation181_spill] sm:$0xff]  ;;  %v18354_v8 = vld [vmem:[#allocation198_spill] sm:$0xff]  ;;  %v15817_v58 = vpop.f32.mrf.mxu0 }
 0x488   : > { %v8507_v11 = vpop.permute.xlu0 %8506  ;;  %v8513_v9 = vpop.permute.xlu1 %8512  ;;  %v15794_v20 = vadd.f32 %v15571_v46, %v3149_v7  ;;  %v15797_v42 = vadd.f32 %v15574_v5, %v3151_v19  ;;  %v5590_v22 = vadd.f32 %v15421_v2, %v5328_v56  ;;  %v5331_v4 = vadd.f32 %v15729_v60, %v18350_v50  ;;  %v18353_v40 = vld [vmem:[#allocation184_spill] sm:$0xff]  ;;  %v18356_v7 = vld [vmem:[#allocation186_spill] sm:$0xff] }
 0x489   : > { %v15769_v49 = vsel %vm2743_vm13, %v15664_v45, %v8507_v11  ;;  %v15773_v44 = vsel %vm2743_vm13, %v15660_v52, %v8513_v9  ;;  %v15775_v43 = vpop.f32.mrf.mxu1  ;;  %v5591_v45 = vadd.f32 %v15415_v27, %v5329_v34  ;;  %v15791_v52 = vadd.f32 %v15564_v51, %v3147_v31 }
 0x48a   : > { %18348 = vst [vmem:[#allocation89_spill] sm:$0xff] %v15769_v49  ;;  %18349 = vst [vmem:[#allocation86_spill] sm:$0xff] %v15773_v44  ;;  %v5330_v27 = vadd.f32 %v15729_v60, %v18351_v32  ;;  %v5850_v51 = vadd.f32 %v15412_v6, %v5588_v21  ;;  %v5333_v46 = vadd.f32 %v15729_v60, %v18352_v29 }
 0x48b   : > { %v11453_v36 = vpop.f32.mrf.mxu1  ;;  %v5332_v5 = vadd.f32 %v15729_v60, %v18353_v40  ;;  %v5335_v2 = vadd.f32 %v15729_v60, %v18354_v8  ;;  %v5334_v19 = vadd.f32 %v15729_v60, %v18356_v7  ;;  %v5593_v6 = vadd.f32 %v15428_v38, %v5331_v4  ;;  %v18359_v4 = vld [vmem:[#allocation189_spill] sm:$0xff] }
 0x48c   : > { %v6113_v41 = vadd.f32 %v11453_v36, %v5851_v18  ;;  %v8511_v39 = vpop.permute.xlu1 %8510  ;;  %v5853_v11 = vadd.f32 %v15425_v48, %v5591_v45  ;;  %v5592_v9 = vadd.f32 %v15434_v23, %v5330_v27  ;;  %v5852_v36 = vadd.f32 %v15436_v1, %v5590_v22  ;;  %v18360_v45 = vld [vmem:[#allocation199_spill] sm:$0xff]  ;;  %v15838_v1 = vpop.f32.mrf.mxu0 }
 0x48d   : > { %v15813_v28 = vsel %vm2743_vm13, %v15694_v30, %v8511_v39  ;;  %v5953_v31 = vpop.f32.mrf.mxu1  ;;  %v5337_v48 = vadd.f32 %v15729_v60, %v18359_v4  ;;  %v5336_v23 = vadd.f32 %v15729_v60, %v18360_v45  ;;  %v5595_v27 = vadd.f32 %v15438_v54, %v5333_v46  ;;  %v18367_v45 = vld [vmem:[#allocation117_spill] sm:$0xff] }
 0x48e   : > { %18355 = vst [vmem:[#allocation93_spill] sm:$0xff] %v15813_v28  ;;  %v6112_v34 = vadd.f32 %v5953_v31, %v5850_v51  ;;  %v8515_v21 = vpop.permute.xlu0 %8514  ;;  %v6177_v56 = vmul.f32 %v6113_v41, %v18357_v15  ;;  %vm6145_vm9 = vcmp.ge.f32.partialorder %v6113_v41, 0.0  ;;  %v5594_v22 = vadd.f32 %v15444_v16, %v5332_v5  ;;  %v9710_v16 = vld [vmem:[%s17291_s5 + $0x1b0] sm:$0xff] }
 0x48f   : > { %v15825_v30 = vsel %vm2743_vm13, %v15705_v26, %v8515_v21  ;;  %v11456_v18 = vpop.f32.mrf.mxu1  ;;  %v5855_v40 = vadd.f32 %v15446_v53, %v5593_v6  ;;  %v5854_v46 = vadd.f32 %v15456_v55, %v5592_v9  ;;  %v18363_v6 = vld [vmem:[#allocation200_spill] sm:$0xff]  ;;  %v18365_v9 = vld [vmem:[#allocation115_spill] sm:$0xff] }
 0x490   : > { %18358 = vst [vmem:[#allocation63_spill] sm:$0xff] %v15825_v30  ;;  %v6176_v50 = vmul.f32 %v6112_v34, %v18357_v15  ;;  %v6115_v32 = vadd.f32 %v11456_v18, %v5853_v11  ;;  %v8517_v38 = vpop.permute.xlu1 %8516  ;;  %vm6144_vm10 = vcmp.ge.f32.partialorder %v6112_v34, 0.0  ;;  %v6209_v31 = vsel %vm6145_vm9, %v6113_v41, %v6177_v56  ;;  %v11869_v55 = vld [vmem:[%s17291_s5 + $0x1b8] sm:$0xff]  ;;  %v9709_v18 = vld [vmem:[%s17291_s5 + $0x1a8] sm:$0xff] }
 0x491   : > { %v15836_v26 = vsel %vm2743_vm13, %v15697_v10, %v8517_v38  ;;  %v5963_v39 = vpop.f32.mrf.mxu1  ;;  %v5857_v56 = vadd.f32 %v18365_v9, %v5595_v27 }
 0x492   : > { %18361 = vst [vmem:[#allocation25_spill] sm:$0xff] %v15836_v26  ;;  %v6114_v51 = vadd.f32 %v5963_v39, %v5852_v36  ;;  %v8519_v29 = vpop.permute.xlu0 %8518  ;;  %v6208_v8 = vsel %vm6144_vm10, %v6112_v34, %v6176_v50  ;;  %v6179_v7 = vmul.f32 %v6115_v32, %v18357_v15  ;;  %vm6147_vm12 = vcmp.ge.f32.partialorder %v6115_v32, 0.0  ;;  %v15869_v36 = vpop.f32.mrf.mxu0  ;;  %v18366_v50 = vld [vmem:[#allocation133_spill] sm:$0xff] }
 0x493   : > { %v15846_v54 = vsel %vm2743_vm13, %v15712_v37, %v8519_v29  ;;  %v11459_v10 = vpop.f32.mrf.mxu1  ;;  %11501 = vmatprep.mubr.msk.f32.mxu0 %vm2743_vm13, %v6208_v8  ;;  %v5339_v37 = vadd.f32 %v15729_v60, %v18363_v6  ;;  %v5597_v34 = vadd.f32 %v15448_v35, %v5335_v2  ;;  %v5596_v35 = vadd.f32 %v18366_v50, %v5334_v19  ;;  %v9708_v19 = vld [vmem:[%s17291_s5 + $0x1a0] sm:$0xff]  ;;  %v18369_v8 = vld [vmem:[#allocation191_spill] sm:$0xff] }
 0x494   : > { %18362 = vst [vmem:[#allocation38_spill] sm:$0xff] %v15846_v54  ;;  %v6178_v53 = vmul.f32 %v6114_v51, %v18357_v15  ;;  %v6117_v5 = vadd.f32 %v11459_v10, %v5855_v40  ;;  %11502 = vmatmul.mubr.msk.f32.vlgmr.msra.gmra.mxu0 %vm2743_vm13, %v6209_v31  ;;  %v8521_v41 = vpop.permute.xlu1 %8520  ;;  %vm6146_vm6 = vcmp.ge.f32.partialorder %v6114_v51, 0.0  ;;  %v5856_v39 = vadd.f32 %v18367_v45, %v5594_v22  ;;  %v18370_v31 = vld [vmem:[#allocation80_spill] sm:$0xff]  ;;  %v15898_v6 = vpop.f32.mrf.mxu0  ;;  %v18374_v50 = vld [vmem:[#allocation121_spill] sm:$0xff] }
 0x495   : > { %11606 = vmatpush3.msra.mxu0 %v11869_v55  ;;  %v15863_v21 = vsel %vm2743_vm13, %v15708_v59, %v8521_v41  ;;  %v5973_v11 = vpop.f32.mrf.mxu1  ;;  %v6211_v59 = vsel %vm6147_vm12, %v6115_v32, %v6179_v7  ;;  %v5599_v7 = vadd.f32 %v18370_v31, %v5337_v48  ;;  %v15896_v41 = vld [vmem:[%s17291_s5 + $0x1f8] sm:$0xff]  ;;  %v18373_v55 = vld [vmem:[#allocation135_spill] sm:$0xff] }
 0x496   : > { %18364 = vst [vmem:[#allocation82_spill] sm:$0xff] %v15863_v21  ;;  %v6116_v2 = vadd.f32 %v5973_v11, %v5854_v46  ;;  %v8523_v38 = vpop.permute.xlu0 %8522  ;;  %v6210_v4 = vsel %vm6146_vm6, %v6114_v51, %v6178_v53  ;;  %11607 = vmatprep.subr.mxu0 %v9710_v16  ;;  %v6181_v29 = vmul.f32 %v6117_v5, %v18357_v15  ;;  %vm6149_vm8 = vcmp.ge.f32.partialorder %v6117_v5, 0.0 }
 0x497   : > { %v15877_v27 = vsel %vm2743_vm13, %v15752_v47, %v8523_v38  ;;  %v11462_v40 = vpop.f32.mrf.mxu1  ;;  %11504 = vmatprep.mubr.msk.f32.mxu0 %vm2743_vm13, %v6210_v4  ;;  %11608 = vmatpush3.msra.mxu0 %v9710_v16  ;;  %v5338_v47 = vadd.f32 %v15729_v60, %v18369_v8  ;;  %v18372_v16 = vld [vmem:[#allocation92_spill] sm:$0xff]  ;;  %v5598_v11 = vadd.f32 %v18373_v55, %v5336_v23 }
 0x498   : > { %18368 = vst [vmem:[#allocation102_spill] sm:$0xff] %v15877_v27  ;;  %v6180_v22 = vmul.f32 %v6116_v2, %v18357_v15  ;;  %v6119_v51 = vadd.f32 %v11462_v40, %v5857_v56  ;;  %11505 = vmatmul.mubr.msk.f32.gmra.mxu0 %vm2743_vm13, %v6211_v59  ;;  %v8525_v32 = vpop.permute.xlu1 %8524  ;;  %vm6148_vm14 = vcmp.ge.f32.partialorder %v6116_v2, 0.0  ;;  %11609 = vmatprep.subr.mxu0 %v9709_v18  ;;  %v18379_v40 = vld [vmem:[#allocation100_spill] sm:$0xff] }
 0x499   : > { %v15890_v10 = vsel %vm2743_vm13, %v15738_v57, %v8525_v32  ;;  %v5983_v46 = vpop.f32.mrf.mxu1  ;;  %v5859_v53 = vadd.f32 %v18372_v16, %v5597_v34  ;;  %11610 = vmatpush3.msra.mxu0 %v9709_v18  ;;  %v5858_v38 = vadd.f32 %v18374_v50, %v5596_v35  ;;  %v6213_v57 = vsel %vm6149_vm8, %v6117_v5, %v6181_v29  ;;  %v18376_v5 = vld [vmem:[#allocation193_spill] sm:$0xff]  ;;  %v18380_v32 = vld [vmem:[#allocation88_spill] sm:$0xff] }
 0x49a   : > { %18371 = vst [vmem:[#allocation94_spill] sm:$0xff] %v15890_v10  ;;  %v6118_v9 = vadd.f32 %v5983_v46, %v5856_v39  ;;  %v8527_v56 = vpop.permute.xlu0 %8526  ;;  %v6212_v48 = vsel %vm6148_vm14, %v6116_v2, %v6180_v22  ;;  %11611 = vmatprep.subr.mxu0 %v9708_v19  ;;  %v6183_v34 = vmul.f32 %v6119_v51, %v18357_v15  ;;  %vm6151_vm15 = vcmp.ge.f32.partialorder %v6119_v51, 0.0  ;;  %v18377_v39 = vld [vmem:[#allocation205_spill] sm:$0xff]  ;;  %v15921_v22 = vpop.f32.mrf.mxu0 }
 0x49b   : > { %v15906_v18 = vsel %vm2743_vm13, %v15778_v61, %v8527_v56  ;;  %v11465_v4 = vpop.f32.mrf.mxu1  ;;  %11507 = vmatprep.mubr.msk.f32.mxu0 %vm2743_vm13, %v6212_v48  ;;  %11612 = vmatpush3.msra.mxu0 %v9708_v19  ;;  %v5341_v2 = vadd.f32 %v15729_v60, %v18376_v5  ;;  %v5340_v61 = vadd.f32 %v15729_v60, %v18377_v39  ;;  %v18382_v56 = vld [vmem:[#allocation136_spill] sm:$0xff] }
 0x49c   : > { %18375 = vst [vmem:[#allocation91_spill] sm:$0xff] %v15906_v18  ;;  %v6182_v23 = vmul.f32 %v6118_v9, %v18357_v15  ;;  %v6121_v45 = vadd.f32 %v11465_v4, %v5859_v53  ;;  %11508 = vmatmul.mubr.msk.f32.gmra.mxu0 %vm2743_vm13, %v6213_v57  ;;  %v8529_v35 = vpop.permute.xlu1 %8528  ;;  %vm6150_vm0 = vcmp.ge.f32.partialorder %v6118_v9, 0.0  ;;  %11717 = vmatprep.subr.mxu0 %v15896_v41  ;;  %v18381_v53 = vld [vmem:[#allocation19_spill] sm:$0xff] }
 0x49d   : > { %v15918_v59 = vsel %vm2743_vm13, %v15755_v63, %v8529_v35  ;;  %v5993_v29 = vpop.f32.mrf.mxu1  ;;  %v5861_v19 = vadd.f32 %v18379_v40, %v5599_v7  ;;  %v5601_v8 = vadd.f32 %v18380_v32, %v5339_v37  ;;  %v5860_v55 = vadd.f32 %v18381_v53, %v5598_v11  ;;  %v18383_v63 = vld [vmem:[#allocation138_spill] sm:$0xff]  ;;  %v18389_v40 = vld [vmem:[#allocation137_spill] sm:$0xff] }
 0x49e   : > { %18378 = vst [vmem:[#allocation114_spill] sm:$0xff] %v15918_v59  ;;  %v6120_v31 = vadd.f32 %v5993_v29, %v5858_v38  ;;  %v8531_v46 = vpop.permute.xlu0 %8530  ;;  %v6214_v16 = vsel %vm6150_vm0, %v6118_v9, %v6182_v23  ;;  %v5600_v48 = vadd.f32 %v18382_v56, %v5338_v47  ;;  %v6215_v50 = vsel %vm6151_vm15, %v6119_v51, %v6183_v34  ;;  %v18385_v47 = vld [vmem:[#allocation48_spill] sm:$0xff]  ;;  %v18386_v9 = vld [vmem:[#allocation22_spill] sm:$0xff]  ;;  %v15944_v29 = vpop.f32.mrf.mxu0 }
 0x49f   : > { %v6185_v57 = vmul.f32 %v6121_v45, %v18357_v15  ;;  %v15930_v4 = vsel %vm2743_vm13, %v18383_v63, %v8531_v46  ;;  %v11468_v7 = vpop.f32.mrf.mxu1  ;;  %11510 = vmatprep.mubr.msk.f32.mxu0 %vm2743_vm13, %v6214_v16  ;;  %vm6153_vm1 = vcmp.ge.f32.partialorder %v6121_v45, 0.0  ;;  %v5343_v51 = vadd.f32 %v15729_v60, %v18385_v47  ;;  %v18387_v23 = vld [vmem:[#allocation96_spill] sm:$0xff]  ;;  %v18390_v16 = vld [vmem:[#allocation126_spill] sm:$0xff] }
 0x4a0   : > { %18384 = vst [vmem:[#allocation98_spill] sm:$0xff] %v15930_v4  ;;  %v6184_v37 = vmul.f32 %v6120_v31, %v18357_v15  ;;  %v6123_v38 = vadd.f32 %v11468_v7, %v5861_v19  ;;  %11511 = vmatmul.mubr.msk.f32.gmra.mxu0 %vm2743_vm13, %v6215_v50  ;;  %v8533_v11 = vpop.permute.xlu1 %8532  ;;  %vm6152_vm11 = vcmp.ge.f32.partialorder %v6120_v31, 0.0  ;;  %v5342_v34 = vadd.f32 %v15729_v60, %v18386_v9  ;;  %v18391_v7 = vld [vmem:[#allocation139_spill] sm:$0xff] }
 0x4a1   : > { %v5603_v35 = vadd.f32 %v18387_v23, %v5341_v2  ;;  %v15942_v5 = vsel %vm2743_vm13, %v15781_v13, %v8533_v11  ;;  %v6003_v39 = vpop.f32.mrf.mxu1  ;;  %v5602_v19 = vadd.f32 %v18389_v40, %v5340_v61  ;;  %v5863_v53 = vadd.f32 %v18390_v16, %v5601_v8  ;;  %v18396_v23 = vld [vmem:[#allocation118_spill] sm:$0xff]  ;;  %v18488_v4 = vld [vmem:[#allocation79_spill] sm:$0xff] }
 0x4a2   : > { %18388 = vst [vmem:[#allocation111_spill] sm:$0xff] %v15942_v5  ;;  %v6122_v32 = vadd.f32 %v6003_v39, %v5860_v55  ;;  %v8535_v46 = vpop.permute.xlu0 %8534  ;;  %v6216_v56 = vsel %vm6152_vm11, %v6120_v31, %v6184_v37  ;;  %v6217_v50 = vsel %vm6153_vm1, %v6121_v45, %v6185_v57  ;;  %v6187_v63 = vmul.f32 %v6123_v38, %v18357_v15  ;;  %v18393_v45 = vld [vmem:[#allocation34_spill] sm:$0xff]  ;;  %v18394_v57 = vld [vmem:[#allocation44_spill] sm:$0xff] }
 0x4a3   : > { %v15952_v2 = vsel %vm2743_vm13, %v18391_v7, %v8535_v46  ;;  %v11471_v13 = vpop.f32.mrf.mxu1  ;;  %11513 = vmatprep.mubr.msk.f32.mxu0 %vm2743_vm13, %v6216_v56  ;;  %v5862_v11 = vadd.f32 %v15686_v17, %v5600_v48  ;;  %vm6155_vm3 = vcmp.ge.f32.partialorder %v6123_v38, 0.0  ;;  %v5345_v31 = vadd.f32 %v15729_v60, %v18393_v45  ;;  %v15967_v48 = vpop.f32.mrf.mxu0  ;;  %v18397_v56 = vld [vmem:[#allocation103_spill] sm:$0xff] }
 0x4a4   : > { %18392 = vst [vmem:[#allocation40_spill] sm:$0xff] %v15952_v2  ;;  %v6186_v61 = vmul.f32 %v6122_v32, %v18357_v15  ;;  %v6125_v55 = vadd.f32 %v11471_v13, %v5863_v53  ;;  %11514 = vmatmul.mubr.msk.f32.gmra.mxu0 %vm2743_vm13, %v6217_v50  ;;  %v8537_v8 = vpop.permute.xlu1 %8536  ;;  %vm6154_vm4 = vcmp.ge.f32.partialorder %v6122_v32, 0.0  ;;  %v5344_v37 = vadd.f32 %v15729_v60, %v18394_v57 }
 0x4a5   : > { %v15964_v47 = vsel %vm2743_vm13, %v15784_v24, %v8537_v8  ;;  %v6013_v9 = vpop.f32.mrf.mxu1  ;;  %v5865_v17 = vadd.f32 %v15715_v62, %v5603_v35  ;;  %v5605_v39 = vadd.f32 %v18396_v23, %v5343_v51  ;;  %v5864_v53 = vadd.f32 %v15746_v14, %v5602_v19  ;;  %v18398_v24 = vld [vmem:[#allocation141_spill] sm:$0xff]  ;;  %v18401_v19 = vld [vmem:[#allocation66_spill] sm:$0xff]  ;;  %v15990_v57 = vpop.f32.mrf.mxu0 }
 0x4a6   : > { %18395 = vst [vmem:[#allocation47_spill] sm:$0xff] %v15964_v47  ;;  %v6124_v40 = vadd.f32 %v6013_v9, %v5862_v11  ;;  %v8539_v46 = vpop.permute.xlu0 %8538  ;;  %v6218_v16 = vsel %vm6154_vm4, %v6122_v32, %v6186_v61  ;;  %v5604_v50 = vadd.f32 %v18397_v56, %v5342_v34  ;;  %v6219_v7 = vsel %vm6155_vm3, %v6123_v38, %v6187_v63  ;;  %v18400_v34 = vld [vmem:[#allocation53_spill] sm:$0xff]  ;;  %v18402_v63 = vld [vmem:[#allocation140_spill] sm:$0xff]  ;;  %v18404_v9 = vld [vmem:[#allocation122_spill] sm:$0xff] }
 0x4a7   : > { %v6189_v13 = vmul.f32 %v6125_v55, %v18357_v15  ;;  %v15976_v8 = vsel %vm2743_vm13, %v18398_v24, %v8539_v46  ;;  %v11474_v62 = vpop.f32.mrf.mxu1  ;;  %11516 = vmatprep.mubr.msk.f32.mxu0 %vm2743_vm13, %v6218_v16  ;;  %vm6157_vm5 = vcmp.ge.f32.partialorder %v6125_v55, 0.0  ;;  %v5347_v38 = vadd.f32 %v15729_v60, %v18400_v34 }
 0x4a8   : > { %18399 = vst [vmem:[#allocation59_spill] sm:$0xff] %v15976_v8  ;;  %v6188_v51 = vmul.f32 %v6124_v40, %v18357_v15  ;;  %v6127_v35 = vadd.f32 %v11474_v62, %v5865_v17  ;;  %11517 = vmatmul.mubr.msk.f32.gmra.mxu0 %vm2743_vm13, %v6219_v7  ;;  %v8541_v14 = vpop.permute.xlu1 %8540  ;;  %vm6156_vm7 = vcmp.ge.f32.partialorder %v6124_v40, 0.0  ;;  %v5346_v32 = vadd.f32 %v15729_v60, %v18401_v19  ;;  %v18405_v62 = vld [vmem:[#allocation142_spill] sm:$0xff] }
 0x4a9   : > { %v5607_v11 = vadd.f32 %v18402_v63, %v5345_v31  ;;  %v15988_v61 = vsel %vm2743_vm13, %v15791_v52, %v8541_v14  ;;  %v6023_v45 = vpop.f32.mrf.mxu1  ;;  %v5606_v17 = vadd.f32 %v18404_v9, %v5344_v37  ;;  %v5867_v16 = vadd.f32 %v15786_v33, %v5605_v39  ;;  %v18410_v19 = vld [vmem:[#allocation18_spill] sm:$0xff] }
 0x4aa   : > { %18403 = vst [vmem:[#allocation99_spill] sm:$0xff] %v15988_v61  ;;  %v6126_v23 = vadd.f32 %v6023_v45, %v5864_v53  ;;  %v8543_v46 = vpop.permute.xlu0 %8542  ;;  %v6220_v56 = vsel %vm6156_vm7, %v6124_v40, %v6188_v51  ;;  %v6221_v7 = vsel %vm6157_vm5, %v6125_v55, %v6189_v13  ;;  %v6191_v24 = vmul.f32 %v6127_v35, %v18357_v15  ;;  %v18407_v55 = vld [vmem:[#allocation78_spill] sm:$0xff]  ;;  %v18408_v40 = vld [vmem:[#allocation127_spill] sm:$0xff] }
 0x4ab   : > { %v15998_v31 = vsel %vm2743_vm13, %v18405_v62, %v8543_v46  ;;  %v11477_v52 = vpop.f32.mrf.mxu1  ;;  %11519 = vmatprep.mubr.msk.f32.mxu0 %vm2743_vm13, %v6220_v56  ;;  %v5866_v14 = vadd.f32 %v15817_v58, %v5604_v50  ;;  %vm6159_vm9 = vcmp.ge.f32.partialorder %v6127_v35, 0.0  ;;  %v5349_v39 = vadd.f32 %v15729_v60, %v18407_v55  ;;  %v16013_v50 = vpop.f32.mrf.mxu0  ;;  %v18411_v56 = vld [vmem:[#allocation125_spill] sm:$0xff] }
 0x4ac   : > { %18406 = vst [vmem:[#allocation101_spill] sm:$0xff] %v15998_v31  ;;  %v6190_v37 = vmul.f32 %v6126_v23, %v18357_v15  ;;  %v6129_v53 = vadd.f32 %v11477_v52, %v5867_v16  ;;  %11520 = vmatmul.mubr.msk.f32.gmra.mxu0 %vm2743_vm13, %v6221_v7  ;;  %v8545_v33 = vpop.permute.xlu1 %8544  ;;  %vm6158_vm10 = vcmp.ge.f32.partialorder %v6126_v23, 0.0  ;;  %v5348_v13 = vadd.f32 %v15729_v60, %v18408_v40  ;;  %v18485_v31 = vld [vmem:[#allocation202_spill] sm:$0xff] }
 0x4ad   : > { %v16010_v51 = vsel %vm2743_vm13, %v15794_v20, %v8545_v33  ;;  %v6033_v34 = vpop.f32.mrf.mxu1  ;;  %v5869_v58 = vadd.f32 %v15838_v1, %v5607_v11  ;;  %v5609_v63 = vadd.f32 %v18410_v19, %v5347_v38  ;;  %v5868_v16 = vadd.f32 %v15869_v36, %v5606_v17  ;;  %v18412_v20 = vld [vmem:[#allocation90_spill] sm:$0xff]  ;;  %v18415_v17 = vld [vmem:[#allocation56_spill] sm:$0xff]  ;;  %v16036_v40 = vpop.f32.mrf.mxu0 }
 0x4ae   : > { %18409 = vst [vmem:[#allocation179_spill] sm:$0xff] %v16010_v51  ;;  %v6128_v45 = vadd.f32 %v6033_v34, %v5866_v14  ;;  %v8547_v9 = vpop.permute.xlu0 %8546  ;;  %v6222_v46 = vsel %vm6158_vm10, %v6126_v23, %v6190_v37  ;;  %v5608_v7 = vadd.f32 %v18411_v56, %v5346_v32  ;;  %v6223_v62 = vsel %vm6159_vm9, %v6127_v35, %v6191_v24  ;;  %v18414_v32 = vld [vmem:[#allocation128_spill] sm:$0xff]  ;;  %v18416_v24 = vld [vmem:[#allocation119_spill] sm:$0xff] }
 0x4af   : > { %v6193_v52 = vmul.f32 %v6129_v53, %v18357_v15  ;;  %v16022_v33 = vsel %vm2743_vm13, %v18412_v20, %v8547_v9  ;;  %v11480_v1 = vpop.f32.mrf.mxu1  ;;  %11522 = vmatprep.mubr.msk.f32.mxu0 %vm2743_vm13, %v6222_v46  ;;  %vm6161_vm12 = vcmp.ge.f32.partialorder %v6129_v53, 0.0  ;;  %v5351_v35 = vadd.f32 %v15729_v60, %v18414_v32  ;;  %v18418_v34 = vld [vmem:[#allocation24_spill] sm:$0xff]  ;;  %v11874_v51 = vld [vmem:[%s12919_s16 + $0x10] sm:$0xff] }
 0x4b0   : > { %18413 = vst [vmem:[#allocation180_spill] sm:$0xff] %v16022_v33  ;;  %vm6160_vm6 = vcmp.ge.f32.partialorder %v6128_v45, 0.0  ;;  %v6192_v38 = vmul.f32 %v6128_v45, %v18357_v15  ;;  %v6131_v11 = vadd.f32 %v11480_v1, %v5869_v58  ;;  %11523 = vmatmul.mubr.msk.f32.gmra.mxu0 %vm2743_vm13, %v6223_v62  ;;  %v8549_v36 = vpop.permute.xlu1 %8548  ;;  %v5350_v23 = vadd.f32 %v15729_v60, %v18415_v17  ;;  %v18419_v1 = vld [vmem:[#allocation97_spill] sm:$0xff] }
 0x4b1   : > { %v5611_v14 = vadd.f32 %v18416_v24, %v5349_v39  ;;  %v16034_v37 = vsel %vm2743_vm13, %v15797_v42, %v8549_v36  ;;  %v6043_v55 = vpop.f32.mrf.mxu1  ;;  %v5610_v58 = vadd.f32 %v18418_v34, %v5348_v13  ;;  %v5871_v46 = vadd.f32 %v15898_v6, %v5609_v63  ;;  %v18425_v24 = vld [vmem:[#allocation134_spill] sm:$0xff] }
 0x4b2   : > { %18417 = vst [vmem:[#allocation182_spill] sm:$0xff] %v16034_v37  ;;  %v6130_v19 = vadd.f32 %v6043_v55, %v5868_v16  ;;  %v8551_v9 = vpop.permute.xlu0 %8550  ;;  %v6224_v56 = vsel %vm6160_vm6, %v6128_v45, %v6192_v38  ;;  %v6225_v62 = vsel %vm6161_vm12, %v6129_v53, %v6193_v52  ;;  %v6195_v20 = vmul.f32 %v6131_v11, %v18357_v15  ;;  %v18421_v53 = vld [vmem:[#allocation129_spill] sm:$0xff]  ;;  %v18422_v45 = vld [vmem:[#allocation62_spill] sm:$0xff]  ;;  %v18423_v38 = vld [vmem:[#allocation143_spill] sm:$0xff] }
 0x4b3   : > { %v16044_v39 = vsel %vm2743_vm13, %v18419_v1, %v8551_v9  ;;  %v11483_v42 = vpop.f32.mrf.mxu1  ;;  %11525 = vmatprep.mubr.msk.f32.mxu0 %vm2743_vm13, %v6224_v56  ;;  %v5870_v36 = vadd.f32 %v15921_v22, %v5608_v7  ;;  %vm6163_vm8 = vcmp.ge.f32.partialorder %v6131_v11, 0.0  ;;  %v5353_v63 = vadd.f32 %v15729_v60, %v18421_v53  ;;  %v5821_v7 = vpop.f32.mrf.mxu0  ;;  %v18426_v53 = vld [vmem:[#allocation105_spill] sm:$0xff] }
 0x4b4   : > { %18420 = vst [vmem:[#allocation106_spill] sm:$0xff] %v16044_v39  ;;  %vm6162_vm14 = vcmp.ge.f32.partialorder %v6130_v19, 0.0  ;;  %v6194_v13 = vmul.f32 %v6130_v19, %v18357_v15  ;;  %v6133_v16 = vadd.f32 %v11483_v42, %v5871_v46  ;;  %11526 = vmatmul.mubr.msk.f32.gmra.mxu0 %vm2743_vm13, %v6225_v62  ;;  %v8553_v6 = vpop.permute.xlu1 %8552  ;;  %v5352_v52 = vadd.f32 %v15729_v60, %v18422_v45 }
 0x4b5   : > { %v16056_v32 = vsel %vm2743_vm13, %v18423_v38, %v8553_v6  ;;  %v6053_v17 = vpop.f32.mrf.mxu1  ;;  %v5873_v22 = vadd.f32 %v15944_v29, %v5611_v14  ;;  %v5613_v55 = vadd.f32 %v18425_v24, %v5351_v35  ;;  %v5872_v56 = vadd.f32 %v15967_v48, %v5610_v58  ;;  %v18429_v14 = vld [vmem:[#allocation144_spill] sm:$0xff] }
 0x4b6   : > { %18424 = vst [vmem:[#allocation107_spill] sm:$0xff] %v16056_v32  ;;  %v6132_v34 = vadd.f32 %v6053_v17, %v5870_v36  ;;  %v8555_v9 = vpop.permute.xlu0 %8554  ;;  %v6226_v46 = vsel %vm6162_vm14, %v6130_v19, %v6194_v13  ;;  %v5612_v62 = vadd.f32 %v15678_v12, %v5350_v23  ;;  %v6227_v1 = vsel %vm6163_vm8, %v6131_v11, %v6195_v20  ;;  %v18428_v12 = vld [vmem:[#allocation130_spill] sm:$0xff]  ;;  %v11439_v20 = vpop.f32.mrf.mxu0  ;;  %v18431_v36 = vld [vmem:[#allocation32_spill] sm:$0xff] }
 0x4b7   : > { %v6197_v42 = vmul.f32 %v6133_v16, %v18357_v15  ;;  %v16066_v6 = vsel %vm2743_vm13, %v18426_v53, %v8555_v9  ;;  %v11486_v45 = vpop.f32.mrf.mxu1  ;;  %11528 = vmatprep.mubr.msk.f32.mxu0 %vm2743_vm13, %v6226_v46  ;;  %vm6165_vm15 = vcmp.ge.f32.partialorder %v6133_v16, 0.0  ;;  %v5355_v11 = vadd.f32 %v15729_v60, %v18428_v12  ;;  %v18438_v12 = vld [vmem:[#allocation61_spill] sm:$0xff] }
 0x4b8   : > { %18427 = vst [vmem:[#allocation183_spill] sm:$0xff] %v16066_v6  ;;  %vm6164_vm0 = vcmp.ge.f32.partialorder %v6132_v34, 0.0  ;;  %v6196_v29 = vmul.f32 %v6132_v34, %v18357_v15  ;;  %v6135_v35 = vadd.f32 %v11486_v45, %v5873_v22  ;;  %11529 = vmatmul.mubr.msk.f32.gmra.mxu0 %vm2743_vm13, %v6227_v1  ;;  %v8557_v48 = vpop.permute.xlu1 %8556  ;;  %v5615_v23 = vadd.f32 %v15688_v25, %v5353_v63  ;;  %v18432_v1 = vld [vmem:[#allocation146_spill] sm:$0xff]  ;;  %v18436_v45 = vld [vmem:[#allocation145_spill] sm:$0xff] }
 0x4b9   : > { %v16076_v58 = vsel %vm2743_vm13, %v18429_v14, %v8557_v48  ;;  %v6063_v19 = vpop.f32.mrf.mxu1  ;;  %v5614_v13 = vadd.f32 %v18431_v36, %v5352_v52  ;;  %v5875_v22 = vadd.f32 %v15990_v57, %v5613_v55  ;;  %v6229_v9 = vsel %vm6165_vm15, %v6133_v16, %v6197_v42  ;;  %v18434_v16 = vld [vmem:[#allocation68_spill] sm:$0xff] }
 0x4ba   : > { %18430 = vst [vmem:[#allocation185_spill] sm:$0xff] %v16076_v58  ;;  %v6134_v38 = vadd.f32 %v6063_v19, %v5872_v56  ;;  %v8559_v17 = vpop.permute.xlu0 %8558  ;;  %v6228_v24 = vsel %vm6164_vm0, %v6132_v34, %v6196_v29  ;;  %v6199_v46 = vmul.f32 %v6135_v35, %v18357_v15  ;;  %v5874_v53 = vadd.f32 %v16013_v50, %v5612_v62  ;;  %v18435_v34 = vld [vmem:[#allocation132_spill] sm:$0xff]  ;;  %v5831_v62 = vpop.f32.mrf.mxu0 }
 0x4bb   : > { %v16084_v25 = vsel %vm2743_vm13, %v18432_v1, %v8559_v17  ;;  %v11489_v63 = vpop.f32.mrf.mxu1  ;;  %11531 = vmatprep.mubr.msk.f32.mxu0 %vm2743_vm13, %v6228_v24  ;;  %vm6167_vm1 = vcmp.ge.f32.partialorder %v6135_v35, 0.0  ;;  %v5354_v55 = vadd.f32 %v15729_v60, %v18434_v16  ;;  %v5357_v42 = vadd.f32 %v15729_v60, %v18435_v34  ;;  %v18439_v24 = vld [vmem:[#allocation81_spill] sm:$0xff]  ;;  %v18440_v16 = vld [vmem:[#allocation147_spill] sm:$0xff]  ;;  %v11873_v58 = vld [vmem:[%s12919_s16 + $0x18] sm:$0xff] }
 0x4bc   : > { %18433 = vst [vmem:[#allocation188_spill] sm:$0xff] %v16084_v25  ;;  %vm6166_vm11 = vcmp.ge.f32.partialorder %v6134_v38, 0.0  ;;  %v6198_v52 = vmul.f32 %v6134_v38, %v18357_v15  ;;  %v6137_v56 = vadd.f32 %v11489_v63, %v5875_v22  ;;  %11532 = vmatmul.mubr.msk.f32.gmra.mxu0 %vm2743_vm13, %v6229_v9  ;;  %v8561_v57 = vpop.permute.xlu1 %8560  ;;  %v5877_v50 = vadd.f32 %v16036_v40, %v5615_v23  ;;  %v11442_v40 = vpop.f32.mrf.mxu0 }
 0x4bd   : > { %v16096_v29 = vsel %vm2743_vm13, %v18436_v45, %v8561_v57  ;;  %v6073_v48 = vpop.f32.mrf.mxu1  ;;  %v5617_v14 = vadd.f32 %v18438_v12, %v5355_v11  ;;  %v5876_v22 = vadd.f32 %v5821_v7, %v5614_v13  ;;  %v5616_v9 = vadd.f32 %v18439_v24, %v5354_v55  ;;  %v18442_v13 = vld [vmem:[#allocation74_spill] sm:$0xff] }
 0x4be   : > { %18437 = vst [vmem:[#allocation190_spill] sm:$0xff] %v16096_v29  ;;  %v6136_v19 = vadd.f32 %v6073_v48, %v5874_v53  ;;  %v8563_v36 = vpop.permute.xlu0 %8562  ;;  %v6230_v17 = vsel %vm6166_vm11, %v6134_v38, %v6198_v52  ;;  %v6231_v1 = vsel %vm6167_vm1, %v6135_v35, %v6199_v46  ;;  %v6201_v63 = vmul.f32 %v6137_v56, %v18357_v15  ;;  %v18443_v38 = vld [vmem:[#allocation123_spill] sm:$0xff]  ;;  %v18483_v29 = vld [vmem:[#allocation201_spill] sm:$0xff] }
 0x4bf   : > { %v16105_v57 = vsel %vm2743_vm13, %v18440_v16, %v8563_v36  ;;  %v11492_v34 = vpop.f32.mrf.mxu1  ;;  %11534 = vmatprep.mubr.msk.f32.mxu0 %vm2743_vm13, %v6230_v17  ;;  %vm6169_vm3 = vcmp.ge.f32.partialorder %v6137_v56, 0.0  ;;  %v5356_v35 = vadd.f32 %v15729_v60, %v18442_v13  ;;  %v5619_v52 = vadd.f32 %v15749_v3, %v5357_v42  ;;  %v5841_v60 = vpop.f32.mrf.mxu0 }
 0x4c0   : > { %18441 = vst [vmem:[#allocation108_spill] sm:$0xff] %v16105_v57  ;;  %vm6168_vm4 = vcmp.ge.f32.partialorder %v6136_v19, 0.0  ;;  %v6200_v11 = vmul.f32 %v6136_v19, %v18357_v15  ;;  %v6139_v23 = vadd.f32 %v11492_v34, %v5877_v50  ;;  %11535 = vmatmul.mubr.msk.f32.gmra.mxu0 %vm2743_vm13, %v6231_v1  ;;  %v8565_v7 = vpop.permute.xlu1 %8564  ;;  %v5879_v45 = vadd.f32 %v11439_v20, %v5617_v14 }
 0x4c1   : > { %v16114_v46 = vsel %vm2743_vm13, %v18443_v38, %v8565_v7  ;;  %v6083_v53 = vpop.f32.mrf.mxu1  ;;  %v5618_v12 = vadd.f32 %v15775_v43, %v5356_v35  ;;  %v6233_v36 = vsel %vm6169_vm3, %v6137_v56, %v6201_v63  ;;  %v5878_v24 = vadd.f32 %v5831_v62, %v5616_v9  ;;  %v18445_v38 = vld [vmem:[#allocation149_spill] sm:$0xff] }
 0x4c2   : > { %18444 = vst [vmem:[#allocation192_spill] sm:$0xff] %v16114_v46  ;;  %v6138_v55 = vadd.f32 %v6083_v53, %v5876_v22  ;;  %v6232_v48 = vsel %vm6168_vm4, %v6136_v19, %v6200_v11  ;;  %v6203_v50 = vmul.f32 %v6139_v23, %v18357_v15  ;;  %vm6171_vm5 = vcmp.ge.f32.partialorder %v6139_v23, 0.0  ;;  %v9782_v53 = vld [vmem:[%s17291_s5 + $0x1f0] sm:$0xff]  ;;  %v11872_v46 = vld [vmem:[%s12919_s16] sm:$0xff] }
 0x4c3   : > { %v11495_v17 = vpop.f32.mrf.mxu1  ;;  %11537 = vmatprep.mubr.msk.f32.mxu0 %vm2743_vm13, %v6232_v48  ;;  %v5881_v20 = vadd.f32 %v11442_v40, %v5619_v52  ;;  %v5880_v43 = vadd.f32 %v5841_v60, %v5618_v12  ;;  %v18446_v52 = vld [vmem:[#allocation6_spill] sm:$0xff]  ;;  %v9780_v48 = vld [vmem:[%s17291_s5 + $0x1e0] sm:$0xff]  ;;  %v18454_v60 = vld [vmem:[#allocation23_spill] sm:$0xff]  ;;  %v6664_v5 = vadd.s32 32, %v18488_v4 }
 0x4c4   : > { %vm6170_vm7 = vcmp.ge.f32.partialorder %v6138_v55, 0.0  ;;  %v6202_v1 = vmul.f32 %v6138_v55, %v18357_v15  ;;  %v6141_v16 = vadd.f32 %v11495_v17, %v5879_v45  ;;  %11538 = vmatmul.mubr.msk.f32.gmra.mxu0 %vm2743_vm13, %v6233_v36  ;;  %v6235_v56 = vsel %vm6171_vm5, %v6139_v23, %v6203_v50  ;;  %v9781_v45 = vld [vmem:[%s17291_s5 + $0x1e8] sm:$0xff]  ;;  %v18448_v12 = vld [vmem:[#allocation9_spill] sm:$0xff]  ;;  %v18451_v50 = vld [vmem:[#allocation15_spill] sm:$0xff] }
 0x4c5   : > { %v6093_v3 = vpop.f32.mrf.mxu1  ;;  %v18449_v36 = vld [vmem:[#allocation10_spill] sm:$0xff]  ;;  %v18452_v17 = vld [vmem:[#allocation20_spill] sm:$0xff] }
 0x4c6   : > { %v6140_v42 = vadd.f32 %v6093_v3, %v5878_v24  ;;  %v6234_v14 = vsel %vm6170_vm7, %v6138_v55, %v6202_v1  ;;  %v6205_v19 = vmul.f32 %v6141_v16, %v18357_v15  ;;  %vm6173_vm9 = vcmp.ge.f32.partialorder %v6141_v16, 0.0  ;;  %v18447_v55 = vld [vmem:[#allocation7_spill] sm:$0xff]  ;;  %v18453_v24 = vld [vmem:[#allocation12_spill] sm:$0xff]  ;;  %v18457_v3 = vld [vmem:[#allocation29_spill] sm:$0xff] }
 0x4c7   : > { %v11498_v22 = vpop.f32.mrf.mxu1  ;;  %11540 = vmatprep.mubr.msk.f32.mxu0 %vm2743_vm13, %v6234_v14  ;;  %v18455_v1 = vld [vmem:[#allocation27_spill] sm:$0xff]  ;;  %v18460_v14 = vld [vmem:[#allocation37_spill] sm:$0xff] }
 0x4c8   : > { %vm6172_vm10 = vcmp.ge.f32.partialorder %v6140_v42, 0.0  ;;  %v6204_v62 = vmul.f32 %v6140_v42, %v18357_v15  ;;  %v6143_v9 = vadd.f32 %v11498_v22, %v5881_v20  ;;  %11541 = vmatmul.mubr.msk.f32.gmra.mxu0 %vm2743_vm13, %v6235_v56  ;;  %v6237_v40 = vsel %vm6173_vm9, %v6141_v16, %v6205_v19  ;;  %v18456_v16 = vld [vmem:[#allocation13_spill] sm:$0xff]  ;;  %v18458_v20 = vld [vmem:[#allocation36_spill] sm:$0xff]  ;;  %v18462_v56 = vld [vmem:[#allocation30_spill] sm:$0xff] }
 0x4c9   : > { %v6103_v63 = vpop.f32.mrf.mxu1  ;;  %v18463_v19 = vld [vmem:[#allocation45_spill] sm:$0xff]  ;;  %v18464_v22 = vld [vmem:[#allocation46_spill] sm:$0xff] }
 0x4ca   : > { %v6142_v34 = vadd.f32 %v6103_v63, %v5880_v43  ;;  %v6236_v11 = vsel %vm6172_vm10, %v6140_v42, %v6204_v62  ;;  %v6207_v7 = vmul.f32 %v6143_v9, %v18357_v15  ;;  %vm6175_vm12 = vcmp.ge.f32.partialorder %v6143_v9, 0.0  ;;  %v18459_v42 = vld [vmem:[#allocation21_spill] sm:$0xff]  ;;  %v18461_v43 = vld [vmem:[#allocation43_spill] sm:$0xff] }
 0x4cb   : > { %11543 = vmatprep.mubr.msk.f32.mxu0 %vm2743_vm13, %v6236_v11  ;;  %v18465_v62 = vld [vmem:[#allocation35_spill] sm:$0xff]  ;;  %v18467_v63 = vld [vmem:[#allocation57_spill] sm:$0xff]  ;;  %v18469_v11 = vld [vmem:[#allocation58_spill] sm:$0xff] }
 0x4cc   : > { %vm6174_vm6 = vcmp.ge.f32.partialorder %v6142_v34, 0.0  ;;  %v6206_v23 = vmul.f32 %v6142_v34, %v18357_v15  ;;  %11544 = vmatmul.mubr.msk.f32.gmra.mxu0 %vm2743_vm13, %v6237_v40  ;;  %v6239_v35 = vsel %vm6175_vm12, %v6143_v9, %v6207_v7  ;;  %v18466_v9 = vld [vmem:[#allocation52_spill] sm:$0xff]  ;;  %v18470_v40 = vld [vmem:[#allocation65_spill] sm:$0xff]  ;;  %v18471_v7 = vld [vmem:[#allocation51_spill] sm:$0xff] }
 0x4ce   : > { %v6238_v13 = vsel %vm6174_vm6, %v6142_v34, %v6206_v23  ;;  %v18468_v34 = vld [vmem:[#allocation42_spill] sm:$0xff]  ;;  %v18472_v23 = vld [vmem:[#allocation67_spill] sm:$0xff] }
 0x4cf   : > { %11546 = vmatprep.mubr.msk.f32.mxu0 %vm2743_vm13, %v6238_v13  ;;  %v18473_v13 = vld [vmem:[#allocation73_spill] sm:$0xff] }
 0x4d0   : > { %11547 = vmatmul.mubr.msk.f32.gmra.mxu0 %vm2743_vm13, %v6239_v35  ;;  %v18474_v35 = vld [vmem:[#allocation60_spill] sm:$0xff] }
 0x4d1   : > { %11613 = vmatprep.mubr.msk.f32.mxu0 %vm1340_vm2, %v18445_v38  ;;  %v18475_v38 = vld [vmem:[#allocation75_spill] sm:$0xff] }
 0x4d4   : > { %11614 = vmatmul.mubr.msk.f32.vlgmr.msra.gmra.mxu0 %vm1340_vm2, %v18446_v52  ;;  %v16208_v52 = vpop.f32.mrf.mxu1 }
 0x4d5   : > { %11718 = vmatpush3.msra.mxu0 %v15896_v41  ;;  %11616 = vmatprep.mubr.msk.f32.mxu0 %vm1340_vm2, %v18447_v55  ;;  %v18450_v41 = vld [vmem:[#allocation8_spill] sm:$0xff] }
 0x4d6   : > { %11719 = vmatprep.subr.mxu0 %v9782_v53 }
 0x4d7   : > { %11720 = vmatpush3.msra.mxu0 %v9782_v53  ;;  %v18476_v53 = vld [vmem:[#allocation112_spill] sm:$0xff] }
 0x4d8   : > { %11617 = vmatmul.mubr.msk.f32.gmra.mxu0 %vm1340_vm2, %v18448_v12  ;;  %11721 = vmatprep.subr.mxu0 %v9781_v45 }
 0x4d9   : > { %11619 = vmatprep.mubr.msk.f32.mxu0 %vm1340_vm2, %v18449_v36  ;;  %11722 = vmatpush3.msra.mxu0 %v9781_v45  ;;  %v16214_v45 = vpop.f32.mrf.mxu1 }
 0x4da   : > { %11723 = vmatprep.subr.mxu0 %v9780_v48 }
 0x4db   : > { %11724 = vmatpush3.msra.mxu0 %v9780_v48  ;;  %v16220_v48 = vpop.f32.mrf.mxu1 }
 0x4dc   : > { %11620 = vmatmul.mubr.msk.f32.gmra.mxu0 %vm1340_vm2, %v18450_v41 }
 0x4dd   : > { %11622 = vmatprep.mubr.msk.f32.mxu0 %vm1340_vm2, %v18451_v50 }
 0x4e0   : > { %11623 = vmatmul.mubr.msk.f32.gmra.mxu0 %vm1340_vm2, %v18452_v17 }
 0x4e1   : > { %11625 = vmatprep.mubr.msk.f32.mxu0 %vm1340_vm2, %v18453_v24 }
 0x4e4   : > { %11626 = vmatmul.mubr.msk.f32.gmra.mxu0 %vm1340_vm2, %v18454_v60 }
 0x4e5   : > { %11628 = vmatprep.mubr.msk.f32.mxu0 %vm1340_vm2, %v18455_v1 }
 0x4e8   : > { %11629 = vmatmul.mubr.msk.f32.gmra.mxu0 %vm1340_vm2, %v18456_v16 }
 0x4e9   : > { %11631 = vmatprep.mubr.msk.f32.mxu0 %vm1340_vm2, %v18457_v3 }
 0x4ec   : > { %11632 = vmatmul.mubr.msk.f32.gmra.mxu0 %vm1340_vm2, %v18458_v20 }
 0x4ed   : > { %11634 = vmatprep.mubr.msk.f32.mxu0 %vm1340_vm2, %v18459_v42 }
 0x4f0   : > { %11635 = vmatmul.mubr.msk.f32.gmra.mxu0 %vm1340_vm2, %v18460_v14 }
 0x4f1   : > { %11637 = vmatprep.mubr.msk.f32.mxu0 %vm1340_vm2, %v18461_v43 }
 0x4f4   : > { %11638 = vmatmul.mubr.msk.f32.gmra.mxu0 %vm1340_vm2, %v18462_v56 }
 0x4f5   : > { %11640 = vmatprep.mubr.msk.f32.mxu0 %vm1340_vm2, %v18463_v19 }
 0x4f8   : > { %11641 = vmatmul.mubr.msk.f32.gmra.mxu0 %vm1340_vm2, %v18464_v22 }
 0x4f9   : > { %11643 = vmatprep.mubr.msk.f32.mxu0 %vm1340_vm2, %v18465_v62 }
 0x4fc   : > { %11644 = vmatmul.mubr.msk.f32.gmra.mxu0 %vm1340_vm2, %v18466_v9 }
 0x4fd   : > { %11646 = vmatprep.mubr.msk.f32.mxu0 %vm1340_vm2, %v18467_v63 }
 0x500   : > { %11647 = vmatmul.mubr.msk.f32.gmra.mxu0 %vm1340_vm2, %v18468_v34 }
 0x501   : > { %11649 = vmatprep.mubr.msk.f32.mxu0 %vm1340_vm2, %v18469_v11 }
 0x504   : > { %11650 = vmatmul.mubr.msk.f32.gmra.mxu0 %vm1340_vm2, %v18470_v40 }
 0x505   : > { %11652 = vmatprep.mubr.msk.f32.mxu0 %vm1340_vm2, %v18471_v7 }
 0x508   : > { %11653 = vmatmul.mubr.msk.f32.gmra.mxu0 %vm1340_vm2, %v18472_v23 }
 0x509   : > { %11655 = vmatprep.mubr.msk.f32.mxu0 %vm1340_vm2, %v18473_v13 }
 0x50c   : > { %11656 = vmatmul.mubr.msk.f32.gmra.mxu0 %vm1340_vm2, %v18474_v35 }
 0x50d   : > { %11658 = vmatprep.mubr.msk.f32.mxu0 %vm1340_vm2, %v18475_v38 }
 0x510   : > { %11659 = vmatmul.mubr.msk.f32.gmra.mxu0 %vm1340_vm2, %v18476_v53 }
 0x511   : > { %11725 = vmatprep.mubr.msk.f32.mxu0 %vm1340_vm2, %v18447_v55  ;;  %v16226_v55 = vpop.f32.mrf.mxu1 }
 0x514   : > { %11726 = vmatmul.mubr.msk.f32.vlgmr.msra.gmra.mxu0 %vm1340_vm2, %v18448_v12  ;;  %v16232_v12 = vpop.f32.mrf.mxu1 }
 0x515   : > { %11728 = vmatprep.mubr.msk.f32.mxu0 %vm1340_vm2, %v18449_v36 }
 0x516   : > { %v16238_v36 = vpop.f32.mrf.mxu1 }
 0x518   : > { %11729 = vmatmul.mubr.msk.f32.gmra.mxu0 %vm1340_vm2, %v18450_v41  ;;  %v16244_v41 = vpop.f32.mrf.mxu1 }
 0x519   : > { %11731 = vmatprep.mubr.msk.f32.mxu0 %vm1340_vm2, %v18451_v50 }
 0x51a   : > { %v16250_v50 = vpop.f32.mrf.mxu1 }
 0x51c   : > { %11732 = vmatmul.mubr.msk.f32.gmra.mxu0 %vm1340_vm2, %v18452_v17  ;;  %v16256_v17 = vpop.f32.mrf.mxu1 }
 0x51d   : > { %11734 = vmatprep.mubr.msk.f32.mxu0 %vm1340_vm2, %v18453_v24 }
 0x51e   : > { %v16262_v24 = vpop.f32.mrf.mxu1 }
 0x520   : > { %11735 = vmatmul.mubr.msk.f32.gmra.mxu0 %vm1340_vm2, %v18454_v60  ;;  %v16268_v60 = vpop.f32.mrf.mxu1 }
 0x521   : > { %11737 = vmatprep.mubr.msk.f32.mxu0 %vm1340_vm2, %v18455_v1 }
 0x522   : > { %v16274_v1 = vpop.f32.mrf.mxu1 }
 0x524   : > { %11738 = vmatmul.mubr.msk.f32.gmra.mxu0 %vm1340_vm2, %v18456_v16  ;;  %v16280_v16 = vpop.f32.mrf.mxu1 }
 0x525   : > { %11740 = vmatprep.mubr.msk.f32.mxu0 %vm1340_vm2, %v18457_v3 }
 0x526   : > { %v16286_v3 = vpop.f32.mrf.mxu1 }
 0x528   : > { %11741 = vmatmul.mubr.msk.f32.gmra.mxu0 %vm1340_vm2, %v18458_v20  ;;  %v16292_v20 = vpop.f32.mrf.mxu1 }
 0x529   : > { %11743 = vmatprep.mubr.msk.f32.mxu0 %vm1340_vm2, %v18459_v42  ;;  %v18477_v42 = vld [vmem:[#allocation110_spill] sm:$0xff] }
 0x52c   : > { %11744 = vmatmul.mubr.msk.f32.gmra.mxu0 %vm1340_vm2, %v18460_v14  ;;  %v16298_v14 = vpop.f32.mrf.mxu1 }
 0x52d   : > { %11746 = vmatprep.mubr.msk.f32.mxu0 %vm1340_vm2, %v18461_v43  ;;  %v18478_v43 = vld [vmem:[#allocation113_spill] sm:$0xff] }
 0x530   : > { %11747 = vmatmul.mubr.msk.f32.gmra.mxu0 %vm1340_vm2, %v18462_v56  ;;  %v6658_v56 = vadd.s32 32, %v18478_v43 }
 0x531   : > { %11749 = vmatprep.mubr.msk.f32.mxu0 %vm1340_vm2, %v18463_v19  ;;  %v16303_v19 = vpop.f32.mrf.mxu1 }
 0x534   : > { %11750 = vmatmul.mubr.msk.f32.gmra.mxu0 %vm1340_vm2, %v18464_v22  ;;  %v18479_v22 = vld [vmem:[#allocation124_spill] sm:$0xff] }
 0x535   : > { %11752 = vmatprep.mubr.msk.f32.mxu0 %vm1340_vm2, %v18465_v62  ;;  %v6657_v62 = vadd.s32 32, %v18479_v22 }
 0x537   : > { %vm6689_vm15 = vcmp.eq.s32.totalorder %v11872_v46, %v6657_v62  ;;  %v18486_v46 = vld [vmem:[#allocation54_spill] sm:$0xff] }
 0x538   : > { %11753 = vmatmul.mubr.msk.f32.gmra.mxu0 %vm1340_vm2, %v18466_v9  ;;  %v6661_v62 = vadd.s32 32, %v18486_v46 }
 0x539   : > { %11755 = vmatprep.mubr.msk.f32.mxu0 %vm1340_vm2, %v18467_v63  ;;  %v18480_v63 = vld [vmem:[#allocation116_spill] sm:$0xff] }
 0x53c   : > { %11756 = vmatmul.mubr.msk.f32.gmra.mxu0 %vm1340_vm2, %v18468_v34  ;;  %v6660_v34 = vadd.s32 32, %v18480_v63 }
 0x53d   : > { %11758 = vmatprep.mubr.msk.f32.mxu0 %vm1340_vm2, %v18469_v11  ;;  %v16310_v11 = vld [vmem:[%s17294_s8] ss:$0 sm:$0xff] }
 0x53e   : > { %vm6692_vm0 = vcmp.eq.s32.totalorder %v11873_v58, %v6660_v34  ;;  %v11876_v58 = vld [vmem:[%s12919_s16 + $0x20] sm:$0xff]  ;;  %v18490_v34 = vld [vmem:[#allocation55_spill] sm:$0xff] }
 0x53f   : > { %vm6693_vm7 = vcmp.eq.s32.totalorder %v11876_v58, %v6661_v62  ;;  %v11879_v58 = vld [vmem:[%s12919_s16 + $0x48] sm:$0xff] }
 0x540   : > { %11759 = vmatmul.mubr.msk.f32.gmra.mxu0 %vm1340_vm2, %v18470_v40 }
 0x541   : > { %11761 = vmatprep.mubr.msk.f32.mxu0 %vm1340_vm2, %v18471_v7  ;;  %v11871_v7 = vld [vmem:[%s12919_s16 + $0x8] sm:$0xff] }
 0x542   : > { %vm6690_vm8 = vcmp.eq.s32.totalorder %v11871_v7, %v6658_v56 }
 0x543   : > { %v6722_v6 = vsel %vm6690_vm8, %v18483_v29, 0.0 }
 0x544   : > { %11762 = vmatmul.mubr.msk.f32.gmra.mxu0 %vm1340_vm2, %v18472_v23 }
 0x545   : > { %11764 = vmatprep.mubr.msk.f32.mxu0 %vm1340_vm2, %v18473_v13  ;;  %v18481_v13 = vld [vmem:[#allocation49_spill] sm:$0xff] }
 0x548   : > { %11765 = vmatmul.mubr.msk.f32.gmra.mxu0 %vm1340_vm2, %v18474_v35  ;;  %v6659_v35 = vadd.s32 32, %v18481_v13 }
 0x549   : > { %11767 = vmatprep.mubr.msk.f32.mxu0 %vm1340_vm2, %v18475_v38  ;;  %v16315_v38 = vpop.f32.mrf.mxu1 }
 0x54a   : > { %vm6691_vm11 = vcmp.eq.s32.totalorder %v11874_v51, %v6659_v35  ;;  %v11877_v35 = vld [vmem:[%s12919_s16 + $0x38] sm:$0xff] }
 0x54b   : > { %v16328_v8 = vpop.f32.mrf.mxu1  ;;  %vm6696_vm10 = vcmp.eq.s32.totalorder %v11877_v35, %v6664_v5  ;;  %v11880_v5 = vld [vmem:[%s12919_s16 + $0x40] sm:$0xff]  ;;  %v18498_v35 = vld [vmem:[#allocation70_spill] sm:$0xff] }
 0x54c   : > { %11768 = vmatmul.mubr.msk.f32.gmra.mxu0 %vm1340_vm2, %v18476_v53  ;;  %v18482_v53 = vld [vmem:[#allocation187_spill] sm:$0xff] }
 0x54d   : > { %11770 = vmatprep.mubr.msk.f32.mxu0 %vm1340_vm2, %v18477_v42  ;;  %v16344_v27 = vpop.f32.mrf.mxu1 }
 0x550   : > { %11771 = vmatmul.mubr.msk.f32.gmra.mxu0 %vm1340_vm2, %v18477_v42 }
 0x554   : > { %v11503_v9 = vpop.f32.mrf.mxu0 }
 0x555   : > { %v6408_v40 = vadd.f32 %v16310_v11, %v11503_v9  ;;  %v18484_v9 = vld [vmem:[#allocation77_spill] sm:$0xff] }
 0x556   : > { %v6402_v23 = vpop.f32.mrf.mxu0  ;;  %v6662_v56 = vadd.s32 32, %v18484_v9 }
 0x557   : > { %vm6562_vm14 = vcmp.ge.f32.partialorder %v6408_v40, 0.0  ;;  %v6594_v42 = vmul.f32 %v6408_v40, %v18482_v53  ;;  %v6403_v57 = vadd.f32 %v16310_v11, %v6402_v23  ;;  %v6721_v23 = vsel %vm6689_vm15, %v18485_v31, 0.0 }
 0x558   : > { %v11506_v25 = vpop.f32.mrf.mxu0 }
 0x559   : > { %vm6561_vm1 = vcmp.ge.f32.partialorder %v6403_v57, 0.0  ;;  %v6593_v7 = vmul.f32 %v6403_v57, %v18482_v53  ;;  %v6418_v39 = vadd.f32 %v16310_v11, %v11506_v25  ;;  %v6626_v32 = vsel %vm6562_vm14, %v6408_v40, %v6594_v42  ;;  %v11875_v42 = vld [vmem:[%s12919_s16 + $0x28] sm:$0xff] }
 0x55a   : > { %v6412_v33 = vpop.f32.mrf.mxu0  ;;  %v6754_v37 = vadd.f32 %v6722_v6, %v6626_v32  ;;  %v18487_v6 = vld [vmem:[#allocation195_spill] sm:$0xff]  ;;  %vm6694_vm4 = vcmp.eq.s32.totalorder %v11875_v42, %v6662_v56  ;;  %v18494_v42 = vld [vmem:[#allocation69_spill] sm:$0xff] }
 0x55b   : > { %vm6564_vm3 = vcmp.ge.f32.partialorder %v6418_v39, 0.0  ;;  %v6596_v61 = vmul.f32 %v6418_v39, %v18482_v53  ;;  %v6413_v2 = vadd.f32 %v16310_v11, %v6412_v33  ;;  %v6625_v47 = vsel %vm6561_vm1, %v6403_v57, %v6593_v7  ;;  %v18489_v7 = vld [vmem:[#allocation197_spill] sm:$0xff]  ;;  %v11878_v56 = vld [vmem:[%s12919_s16 + $0x30] sm:$0xff] }
 0x55c   : > { %8636 = vrot.lane.b32.xlu1 %v6754_v37, %s11939_s18  ;;  %v11509_v25 = vpop.f32.mrf.mxu0  ;;  %v6753_v32 = vadd.f32 %v6721_v23, %v6625_v47  ;;  %v6724_v40 = vsel %vm6692_vm0, %v18487_v6, 0.0  ;;  %v6723_v47 = vsel %vm6691_vm11, %v18489_v7, 0.0  ;;  %v6663_v23 = vadd.s32 32, %v18490_v34 }
 0x55d   : > { %vm6563_vm5 = vcmp.ge.f32.partialorder %v6413_v2, 0.0  ;;  %v6595_v18 = vmul.f32 %v6413_v2, %v18482_v53  ;;  %v6428_v59 = vadd.f32 %v16310_v11, %v11509_v25  ;;  %v6628_v33 = vsel %vm6564_vm3, %v6418_v39, %v6596_v61 }
 0x55e   : > { %v6422_v57 = vpop.f32.mrf.mxu0  ;;  %8634 = vrot.lane.b32.xlu0 %v6753_v32, %s11939_s18  ;;  %v6756_v37 = vadd.f32 %v6724_v40, %v6628_v33  ;;  %v18491_v40 = vld [vmem:[#allocation203_spill] sm:$0xff]  ;;  %v18492_v33 = vld [vmem:[#allocation84_spill] sm:$0xff]  ;;  %vm6695_vm6 = vcmp.eq.s32.totalorder %v11878_v56, %v6663_v23 }
 0x55f   : > { %vm6566_vm9 = vcmp.ge.f32.partialorder %v6428_v59, 0.0  ;;  %v6598_v10 = vmul.f32 %v6428_v59, %v18482_v53  ;;  %v6423_v25 = vadd.f32 %v16310_v11, %v6422_v57  ;;  %v6627_v61 = vsel %vm6563_vm5, %v6413_v2, %v6595_v18  ;;  %v18493_v2 = vld [vmem:[#allocation204_spill] sm:$0xff] }
 0x560   : > { %8640 = vrot.lane.b32.xlu1 %v6756_v37, %s11939_s18  ;;  %v11512_v39 = vpop.f32.mrf.mxu0  ;;  %v6755_v32 = vadd.f32 %v6723_v47, %v6627_v61  ;;  %v6726_v51 = vsel %vm6694_vm4, %v18491_v40, 0.0  ;;  %v6666_v54 = vadd.s32 32, %v18492_v33  ;;  %v6725_v37 = vsel %vm6693_vm7, %v18493_v2, 0.0  ;;  %v16360_v61 = vpop.f32.mrf.mxu1  ;;  %v11881_v56 = vld [vmem:[%s12919_s16 + $0x58] sm:$0xff]  ;;  %v18514_v33 = vld [vmem:[#allocation39_spill] sm:$0xff]  ;;  %v18518_v40 = vld [vmem:[#allocation41_spill] sm:$0xff] }
 0x561   : > { %vm6565_vm12 = vcmp.ge.f32.partialorder %v6423_v25, 0.0  ;;  %v6597_v21 = vmul.f32 %v6423_v25, %v18482_v53  ;;  %v6438_v30 = vadd.f32 %v16310_v11, %v11512_v39  ;;  %v6630_v26 = vsel %vm6566_vm9, %v6428_v59, %v6598_v10 }
 0x562   : > { %v6432_v57 = vpop.f32.mrf.mxu0  ;;  %8638 = vrot.lane.b32.xlu0 %v6755_v32, %s11939_s18  ;;  %v6758_v18 = vadd.f32 %v6726_v51, %v6630_v26  ;;  %v6665_v47 = vadd.s32 32, %v18494_v42  ;;  %v18495_v32 = vld [vmem:[#allocation95_spill] sm:$0xff]  ;;  %vm6698_vm14 = vcmp.eq.s32.totalorder %v11879_v58, %v6666_v54  ;;  %v18496_v51 = vld [vmem:[#allocation16_spill] sm:$0xff] }
 0x563   : > { %vm6568_vm8 = vcmp.ge.f32.partialorder %v6438_v30, 0.0  ;;  %v6600_v28 = vmul.f32 %v6438_v30, %v18482_v53  ;;  %v6433_v39 = vadd.f32 %v16310_v11, %v6432_v57  ;;  %v6629_v10 = vsel %vm6565_vm12, %v6423_v25, %v6597_v21  ;;  %v18497_v25 = vld [vmem:[#allocation206_spill] sm:$0xff]  ;;  %v11882_v54 = vld [vmem:[%s12919_s16 + $0x50] sm:$0xff] }
 0x564   : > { %8644 = vrot.lane.b32.xlu1 %v6758_v18, %s11939_s18  ;;  %v11515_v59 = vpop.f32.mrf.mxu0  ;;  %v6757_v26 = vadd.f32 %v6725_v37, %v6629_v10  ;;  %v6728_v62 = vsel %vm6696_vm10, %v18495_v32, 0.0  ;;  %v6668_v44 = vadd.s32 32, %v18496_v51  ;;  %v6727_v18 = vsel %vm6695_vm6, %v18497_v25, 0.0  ;;  %v16376_v10 = vpop.f32.mrf.mxu1 }
 0x565   : > { %vm6567_vm15 = vcmp.ge.f32.partialorder %v6433_v39, 0.0  ;;  %v6599_v49 = vmul.f32 %v6433_v39, %v18482_v53  ;;  %v6448_v0 = vadd.f32 %v16310_v11, %v11515_v59  ;;  %v6632_v42 = vsel %vm6568_vm8, %v6438_v30, %v6600_v28 }
 0x566   : > { %v6442_v57 = vpop.f32.mrf.mxu0  ;;  %8642 = vrot.lane.b32.xlu0 %v6757_v26, %s11939_s18  ;;  %v6760_v21 = vadd.f32 %v6728_v62, %v6632_v42  ;;  %vm6697_vm0 = vcmp.eq.s32.totalorder %v11880_v5, %v6665_v47  ;;  %v6667_v37 = vadd.s32 32, %v18498_v35  ;;  %v18499_v26 = vld [vmem:[#allocation120_spill] sm:$0xff]  ;;  %vm6700_vm11 = vcmp.eq.s32.totalorder %v11881_v56, %v6668_v44  ;;  %v18500_v62 = vld [vmem:[#allocation17_spill] sm:$0xff]  ;;  %v16391_v58 = vpop.f32.mrf.mxu1 }
 0x567   : > { %vm6570_vm1 = vcmp.ge.f32.partialorder %v6448_v0, 0.0  ;;  %v6602_v51 = vmul.f32 %v6448_v0, %v18482_v53  ;;  %v6443_v59 = vadd.f32 %v16310_v11, %v6442_v57  ;;  %v6631_v28 = vsel %vm6567_vm15, %v6433_v39, %v6599_v49  ;;  %v18501_v57 = vld [vmem:[#allocation207_spill] sm:$0xff]  ;;  %v18503_v47 = vld [vmem:[#allocation28_spill] sm:$0xff] }
 0x568   : > { %8648 = vrot.lane.b32.xlu1 %v6760_v21, %s11939_s18  ;;  %v11518_v30 = vpop.f32.mrf.mxu0  ;;  %v6759_v42 = vadd.f32 %v6727_v18, %v6631_v28  ;;  %v6730_v23 = vsel %vm6698_vm14, %v18499_v26, 0.0  ;;  %v6670_v35 = vadd.s32 32, %v18500_v62  ;;  %v6729_v21 = vsel %vm6697_vm0, %v18501_v57, 0.0  ;;  %v16405_v44 = vpop.f32.mrf.mxu1 }
 0x569   : > { %vm6569_vm3 = vcmp.ge.f32.partialorder %v6443_v59, 0.0  ;;  %v6601_v25 = vmul.f32 %v6443_v59, %v18482_v53  ;;  %v6458_v32 = vadd.f32 %v16310_v11, %v11518_v30  ;;  %v6634_v2 = vsel %vm6570_vm1, %v6448_v0, %v6602_v51  ;;  %v18502_v30 = vld [vmem:[#allocation208_spill] sm:$0xff] }
 0x56a   : > { %v6452_v49 = vpop.f32.mrf.mxu0  ;;  %8646 = vrot.lane.b32.xlu0 %v6759_v42, %s11939_s18  ;;  %v6762_v39 = vadd.f32 %v6730_v23, %v6634_v2  ;;  %vm6699_vm4 = vcmp.eq.s32.totalorder %v11882_v54, %v6667_v37  ;;  %v6732_v2 = vsel %vm6700_vm11, %v18502_v30, 0.0  ;;  %v11883_v42 = vld [vmem:[%s12919_s16 + $0x68] sm:$0xff]  ;;  %v6672_v5 = vadd.s32 32, %v18503_v47  ;;  %v18511_v30 = vld [vmem:[#allocation33_spill] sm:$0xff] }
 0x56b   : > { %vm6572_vm5 = vcmp.ge.f32.partialorder %v6458_v32, 0.0  ;;  %v6604_v18 = vmul.f32 %v6458_v32, %v18482_v53  ;;  %v6453_v28 = vadd.f32 %v16310_v11, %v6452_v49  ;;  %v6633_v62 = vsel %vm6569_vm3, %v6443_v59, %v6601_v25  ;;  %v18504_v59 = vld [vmem:[#allocation11_spill] sm:$0xff] }
 0x56c   : > { %8652 = vrot.lane.b32.xlu1 %v6762_v39, %s11939_s18  ;;  %v11521_v0 = vpop.f32.mrf.mxu0  ;;  %v6761_v51 = vadd.f32 %v6729_v21, %v6633_v62  ;;  %vm6702_vm7 = vcmp.eq.s32.totalorder %v11883_v42, %v6670_v35  ;;  %v6731_v62 = vsel %vm6699_vm4, %v18504_v59, 0.0 }
 0x56d   : > { %vm6571_vm9 = vcmp.ge.f32.partialorder %v6453_v28, 0.0  ;;  %v6603_v23 = vmul.f32 %v6453_v28, %v18482_v53  ;;  %v6468_v57 = vadd.f32 %v16310_v11, %v11521_v0  ;;  %v6636_v26 = vsel %vm6572_vm5, %v6458_v32, %v6604_v18  ;;  %v18505_v32 = vld [vmem:[#allocation14_spill] sm:$0xff] }
 0x56e   : > { %v6462_v49 = vpop.f32.mrf.mxu0  ;;  %8650 = vrot.lane.b32.xlu0 %v6761_v51, %s11939_s18  ;;  %v6764_v25 = vadd.f32 %v6732_v2, %v6636_v26  ;;  %v6734_v18 = vsel %vm6702_vm7, %v18505_v32, 0.0  ;;  %v11884_v51 = vld [vmem:[%s12919_s16 + $0x78] sm:$0xff]  ;;  %v18506_v26 = vld [vmem:[#allocation31_spill] sm:$0xff]  ;;  %v18508_v32 = vld [vmem:[#allocation26_spill] sm:$0xff] }
 0x56f   : > { %vm6574_vm10 = vcmp.ge.f32.partialorder %v6468_v57, 0.0  ;;  %v6606_v56 = vmul.f32 %v6468_v57, %v18482_v53  ;;  %v6463_v39 = vadd.f32 %v16310_v11, %v6462_v49  ;;  %v6635_v21 = vsel %vm6571_vm9, %v6453_v28, %v6603_v23  ;;  %v16417_v23 = vpop.f32.mrf.mxu1 }
 0x570   : > { %8656 = vrot.lane.b32.xlu1 %v6764_v25, %s11939_s18  ;;  %v11524_v47 = vpop.f32.mrf.mxu0  ;;  %v6763_v0 = vadd.f32 %v6731_v62, %v6635_v21  ;;  %vm6704_vm12 = vcmp.eq.s32.totalorder %v11884_v51, %v6672_v5  ;;  %v6674_v37 = vadd.s32 32, %v18506_v26  ;;  %v18507_v21 = vld [vmem:[#allocation150_spill] sm:$0xff] }
 0x571   : > { %vm6573_vm6 = vcmp.ge.f32.partialorder %v6463_v39, 0.0  ;;  %v6605_v54 = vmul.f32 %v6463_v39, %v18482_v53  ;;  %v6478_v2 = vadd.f32 %v16310_v11, %v11524_v47  ;;  %v6638_v59 = vsel %vm6574_vm10, %v6468_v57, %v6606_v56  ;;  %v11885_v47 = vld [vmem:[%s12919_s16 + $0x88] sm:$0xff] }
 0x572   : > { %v6472_v49 = vpop.f32.mrf.mxu0  ;;  %8654 = vrot.lane.b32.xlu0 %v6763_v0, %s11939_s18  ;;  %v6766_v28 = vadd.f32 %v6734_v18, %v6638_v59  ;;  %v6736_v57 = vsel %vm6704_vm12, %v18508_v32, 0.0  ;;  %vm6706_vm14 = vcmp.eq.s32.totalorder %v11885_v47, %v6674_v37  ;;  %v18509_v56 = vld [vmem:[#allocation50_spill] sm:$0xff] }
 0x573   : > { %vm6576_vm8 = vcmp.ge.f32.partialorder %v6478_v2, 0.0  ;;  %v6608_v35 = vmul.f32 %v6478_v2, %v18482_v53  ;;  %v6473_v42 = vadd.f32 %v16310_v11, %v6472_v49  ;;  %v6637_v25 = vsel %vm6573_vm6, %v6463_v39, %v6605_v54 }
 0x574   : > { %8660 = vrot.lane.b32.xlu1 %v6766_v28, %s11939_s18  ;;  %v11527_v62 = vpop.f32.mrf.mxu0  ;;  %v6765_v26 = vadd.f32 %v18507_v21, %v6637_v25  ;;  %v6676_v59 = vadd.s32 32, %v18509_v56  ;;  %v16430_v28 = vpop.f32.mrf.mxu1  ;;  %v18510_v56 = vld [vmem:[#allocation151_spill] sm:$0xff] }
 0x575   : > { %vm6575_vm15 = vcmp.ge.f32.partialorder %v6473_v42, 0.0  ;;  %v6607_v0 = vmul.f32 %v6473_v42, %v18482_v53  ;;  %v6488_v18 = vadd.f32 %v16310_v11, %v11527_v62  ;;  %v6640_v49 = vsel %vm6576_vm8, %v6478_v2, %v6608_v35  ;;  %v11886_v35 = vld [vmem:[%s12919_s16 + $0x98] sm:$0xff] }
 0x576   : > { %v6482_v39 = vpop.f32.mrf.mxu0  ;;  %8658 = vrot.lane.b32.xlu0 %v6765_v26, %s11939_s18  ;;  %v6768_v54 = vadd.f32 %v6736_v57, %v6640_v49  ;;  %v6738_v2 = vsel %vm6706_vm14, %v18511_v30, 0.0  ;;  %vm6708_vm1 = vcmp.eq.s32.totalorder %v11886_v35, %v6676_v59  ;;  %v18512_v26 = vld [vmem:[#allocation71_spill] sm:$0xff] }
 0x577   : > { %vm6578_vm0 = vcmp.ge.f32.partialorder %v6488_v18, 0.0  ;;  %v6610_v5 = vmul.f32 %v6488_v18, %v18482_v53  ;;  %v6483_v51 = vadd.f32 %v16310_v11, %v6482_v39  ;;  %v6639_v25 = vsel %vm6575_vm15, %v6473_v42, %v6607_v0 }
 0x578   : > { %8664 = vrot.lane.b32.xlu1 %v6768_v54, %s11939_s18  ;;  %v11530_v21 = vpop.f32.mrf.mxu0  ;;  %v6767_v32 = vadd.f32 %v18510_v56, %v6639_v25  ;;  %v6678_v62 = vadd.s32 32, %v18512_v26  ;;  %v16443_v54 = vpop.f32.mrf.mxu1  ;;  %v18513_v26 = vld [vmem:[#allocation152_spill] sm:$0xff] }
 0x579   : > { %vm6577_vm11 = vcmp.ge.f32.partialorder %v6483_v51, 0.0  ;;  %v6609_v57 = vmul.f32 %v6483_v51, %v18482_v53  ;;  %v6498_v49 = vadd.f32 %v16310_v11, %v11530_v21  ;;  %v6642_v39 = vsel %vm6578_vm0, %v6488_v18, %v6610_v5  ;;  %v11887_v5 = vld [vmem:[%s12919_s16 + $0xa8] sm:$0xff] }
 0x57a   : > { %v6492_v42 = vpop.f32.mrf.mxu0  ;;  %8662 = vrot.lane.b32.xlu0 %v6767_v32, %s11939_s18  ;;  %v6770_v0 = vadd.f32 %v6738_v2, %v6642_v39  ;;  %v6740_v18 = vsel %vm6708_vm1, %v18514_v33, 0.0  ;;  %vm6710_vm4 = vcmp.eq.s32.totalorder %v11887_v5, %v6678_v62  ;;  %v18515_v32 = vld [vmem:[#allocation196_spill] sm:$0xff] }
 0x57b   : > { %vm6580_vm3 = vcmp.ge.f32.partialorder %v6498_v49, 0.0  ;;  %v6612_v37 = vmul.f32 %v6498_v49, %v18482_v53  ;;  %v6493_v47 = vadd.f32 %v16310_v11, %v6492_v42  ;;  %v6641_v56 = vsel %vm6577_vm11, %v6483_v51, %v6609_v57 }
 0x57c   : > { %8668 = vrot.lane.b32.xlu1 %v6770_v0, %s11939_s18  ;;  %v11533_v25 = vpop.f32.mrf.mxu0  ;;  %v6769_v30 = vadd.f32 %v18513_v26, %v6641_v56  ;;  %v6680_v21 = vadd.s32 32, %v18515_v32  ;;  %v16456_v0 = vpop.f32.mrf.mxu1  ;;  %v18517_v32 = vld [vmem:[#allocation153_spill] sm:$0xff] }
 0x57d   : > { %vm6579_vm5 = vcmp.ge.f32.partialorder %v6493_v47, 0.0  ;;  %v6611_v2 = vmul.f32 %v6493_v47, %v18482_v53  ;;  %v6508_v39 = vadd.f32 %v16310_v11, %v11533_v25  ;;  %v6644_v42 = vsel %vm6580_vm3, %v6498_v49, %v6612_v37  ;;  %18516 = vst [vmem:[#allocation194_spill] sm:$0xff] %v16456_v0  ;;  %v11888_v37 = vld [vmem:[%s12919_s16 + $0xb8] sm:$0xff] }
 0x57e   : > { %v6502_v51 = vpop.f32.mrf.mxu0  ;;  %8666 = vrot.lane.b32.xlu0 %v6769_v30, %s11939_s18  ;;  %v6772_v57 = vadd.f32 %v6740_v18, %v6644_v42  ;;  %v6742_v49 = vsel %vm6710_vm4, %v18518_v40, 0.0  ;;  %vm6712_vm9 = vcmp.eq.s32.totalorder %v11888_v37, %v6680_v21  ;;  %v18520_v40 = vld [vmem:[#allocation85_spill] sm:$0xff]  ;;  %v18522_v37 = vld [vmem:[#allocation155_spill] sm:$0xff] }
 0x57f   : > { %vm6582_vm7 = vcmp.ge.f32.partialorder %v6508_v39, 0.0  ;;  %v6614_v59 = vmul.f32 %v6508_v39, %v18482_v53  ;;  %v6503_v35 = vadd.f32 %v16310_v11, %v6502_v51  ;;  %v6643_v26 = vsel %vm6579_vm5, %v6493_v47, %v6611_v2  ;;  %v16468_v2 = vpop.f32.mrf.mxu1 }
 0x580   : > { %8672 = vrot.lane.b32.xlu1 %v6772_v57, %s11939_s18  ;;  %v11536_v56 = vpop.f32.mrf.mxu0  ;;  %v6771_v33 = vadd.f32 %v18517_v32, %v6643_v26  ;;  %v18519_v57 = vld [vmem:[#allocation154_spill] sm:$0xff] }
 0x581   : > { %vm6581_vm10 = vcmp.ge.f32.partialorder %v6503_v35, 0.0  ;;  %v6613_v30 = vmul.f32 %v6503_v35, %v18482_v53  ;;  %v6518_v25 = vadd.f32 %v16310_v11, %v11536_v56  ;;  %v6646_v18 = vsel %vm6582_vm7, %v6508_v39, %v6614_v59 }
 0x582   : > { %v6512_v42 = vpop.f32.mrf.mxu0  ;;  %8670 = vrot.lane.b32.xlu0 %v6771_v33, %s11939_s18  ;;  %v6774_v47 = vadd.f32 %v6742_v49, %v6646_v18  ;;  %v6744_v39 = vsel %vm6712_vm9, %v18520_v40, 0.0 }
 0x583   : > { %vm6584_vm12 = vcmp.ge.f32.partialorder %v6518_v25, 0.0  ;;  %v6616_v32 = vmul.f32 %v6518_v25, %v18482_v53  ;;  %v6513_v62 = vadd.f32 %v16310_v11, %v6512_v42  ;;  %v6645_v5 = vsel %vm6581_vm10, %v6503_v35, %v6613_v30  ;;  %v16479_v42 = vpop.f32.mrf.mxu1 }
 0x584   : > { %8676 = vrot.lane.b32.xlu1 %v6774_v47, %s11939_s18  ;;  %v11539_v51 = vpop.f32.mrf.mxu0  ;;  %v6773_v26 = vadd.f32 %v18519_v57, %v6645_v5  ;;  %18521 = vst [vmem:[#allocation76_spill] sm:$0xff] %v16479_v42 }
 0x585   : > { %vm6583_vm6 = vcmp.ge.f32.partialorder %v6513_v62, 0.0  ;;  %v6615_v33 = vmul.f32 %v6513_v62, %v18482_v53  ;;  %v6528_v59 = vadd.f32 %v16310_v11, %v11539_v51  ;;  %v6648_v56 = vsel %vm6584_vm12, %v6518_v25, %v6616_v32 }
 0x586   : > { %v6522_v49 = vpop.f32.mrf.mxu0  ;;  %8674 = vrot.lane.b32.xlu0 %v6773_v26, %s11939_s18  ;;  %v6776_v18 = vadd.f32 %v6744_v39, %v6648_v56  ;;  %v18523_v26 = vld [vmem:[#allocation156_spill] sm:$0xff]  ;;  %v16489_v56 = vpop.f32.mrf.mxu1 }
 0x587   : > { %vm6586_vm8 = vcmp.ge.f32.partialorder %v6528_v59, 0.0  ;;  %v6618_v35 = vmul.f32 %v6528_v59, %v18482_v53  ;;  %v6523_v30 = vadd.f32 %v16310_v11, %v6522_v49  ;;  %v6647_v47 = vsel %vm6583_vm6, %v6513_v62, %v6615_v33 }
 0x588   : > { %8680 = vrot.lane.b32.xlu1 %v6776_v18, %s11939_s18  ;;  %v11542_v21 = vpop.f32.mrf.mxu0  ;;  %v6775_v5 = vadd.f32 %v18522_v37, %v6647_v47  ;;  %v18524_v47 = vld [vmem:[#allocation157_spill] sm:$0xff]  ;;  %v16499_v40 = vpop.f32.mrf.mxu1 }
 0x589   : > { %vm6585_vm14 = vcmp.ge.f32.partialorder %v6523_v30, 0.0  ;;  %v6617_v25 = vmul.f32 %v6523_v30, %v18482_v53  ;;  %v6538_v32 = vadd.f32 %v16310_v11, %v11542_v21  ;;  %v6650_v51 = vsel %vm6586_vm8, %v6528_v59, %v6618_v35  ;;  %18526 = vst [vmem:[#allocation5_spill] sm:$0xff] %v16499_v40 }
 0x58a   : > { %v6532_v57 = vpop.f32.mrf.mxu0  ;;  %8678 = vrot.lane.b32.xlu0 %v6775_v5, %s11939_s18  ;;  %v6778_v39 = vadd.f32 %v18523_v26, %v6650_v51  ;;  %v18525_v51 = vld [vmem:[#allocation158_spill] sm:$0xff] }
 0x58b   : > { %vm6588_vm15 = vcmp.ge.f32.partialorder %v6538_v32, 0.0  ;;  %v6620_v62 = vmul.f32 %v6538_v32, %v18482_v53  ;;  %v6533_v33 = vadd.f32 %v16310_v11, %v6532_v57  ;;  %v6649_v49 = vsel %vm6585_vm14, %v6523_v30, %v6617_v25 }
 0x58c   : > { %8684 = vrot.lane.b32.xlu1 %v6778_v39, %s11939_s18  ;;  %v11545_v18 = vpop.f32.mrf.mxu0  ;;  %v6777_v37 = vadd.f32 %v18524_v47, %v6649_v49  ;;  %v18527_v49 = vld [vmem:[#allocation159_spill] sm:$0xff] }
 0x58d   : > { %vm6587_vm0 = vcmp.ge.f32.partialorder %v6533_v33, 0.0  ;;  %v6619_v59 = vmul.f32 %v6533_v33, %v18482_v53  ;;  %v6548_v35 = vadd.f32 %v16310_v11, %v11545_v18  ;;  %v6652_v21 = vsel %vm6588_vm15, %v6538_v32, %v6620_v62 }
 0x58e   : > { %v6542_v5 = vpop.f32.mrf.mxu0  ;;  %8682 = vrot.lane.b32.xlu0 %v6777_v37, %s11939_s18  ;;  %v6780_v26 = vadd.f32 %v18525_v51, %v6652_v21  ;;  %v16510_v37 = vld [vmem:[%s17292_s6] ss:$0 sm:$0xff]  ;;  %v16516_v51 = vpop.f32.mrf.mxu1 }
 0x58f   : > { %vm6590_vm1 = vcmp.ge.f32.partialorder %v6548_v35, 0.0  ;;  %v6622_v30 = vmul.f32 %v6548_v35, %v18482_v53  ;;  %v6543_v25 = vadd.f32 %v16310_v11, %v6542_v5  ;;  %v6651_v57 = vsel %vm6587_vm0, %v6533_v33, %v6619_v59  ;;  %v18528_v59 = vld [vmem:[#allocation160_spill] sm:$0xff] }
 0x590   : > { %8688 = vrot.lane.b32.xlu1 %v6780_v26, %s11939_s18  ;;  %v11548_v39 = vpop.f32.mrf.mxu0  ;;  %v6779_v47 = vadd.f32 %v18527_v49, %v6651_v57  ;;  %v7016_v21 = vadd.f32 %v16510_v37, %v16208_v52 }
 0x591   : > { %vm6589_vm11 = vcmp.ge.f32.partialorder %v6543_v25, 0.0  ;;  %v6621_v32 = vmul.f32 %v6543_v25, %v18482_v53  ;;  %v6558_v62 = vadd.f32 %v16310_v11, %v11548_v39  ;;  %v6654_v18 = vsel %vm6590_vm1, %v6548_v35, %v6622_v30  ;;  %v18529_v39 = vld [vmem:[#allocation161_spill] sm:$0xff] }
 0x592   : > { %v6552_v33 = vpop.f32.mrf.mxu0  ;;  %8686 = vrot.lane.b32.xlu0 %v6779_v47, %s11939_s18  ;;  %v6782_v5 = vadd.f32 %v18528_v59, %v6654_v18  ;;  %v18530_v59 = vld [vmem:[#allocation162_spill] sm:$0xff] }
 0x593   : > { %vm6592_vm3 = vcmp.ge.f32.partialorder %v6558_v62, 0.0  ;;  %v6624_v26 = vmul.f32 %v6558_v62, %v18482_v53  ;;  %v6553_v35 = vadd.f32 %v16310_v11, %v6552_v33  ;;  %v6653_v30 = vsel %vm6589_vm11, %v6543_v25, %v6621_v32  ;;  %v16531_v25 = vpop.f32.mrf.mxu1 }
 0x594   : > { %8692 = vrot.lane.b32.xlu1 %v6782_v5, %s11939_s18  ;;  %v11615_v57 = vpop.f32.mrf.mxu0  ;;  %v6781_v49 = vadd.f32 %v18529_v39, %v6653_v30  ;;  %v7018_v11 = vadd.f32 %v16510_v37, %v16220_v48  ;;  %v18531_v5 = vld [vmem:[#allocation163_spill] sm:$0xff] }
 0x595   : > { %vm6591_vm4 = vcmp.ge.f32.partialorder %v6553_v35, 0.0  ;;  %v6623_v52 = vmul.f32 %v6553_v35, %v18482_v53  ;;  %v16523_v34 = vadd.f32 %v11615_v57, %v7016_v21  ;;  %v6656_v47 = vsel %vm6592_vm3, %v6558_v62, %v6624_v26  ;;  %v16542_v57 = vpop.f32.mrf.mxu1 }
 0x596   : > { %v16525_v18 = vpop.f32.mrf.mxu0  ;;  %8690 = vrot.lane.b32.xlu0 %v6781_v49, %s11939_s18  ;;  %v6784_v7 = vadd.f32 %v18530_v59, %v6656_v47  ;;  %v7020_v26 = vadd.f32 %v16510_v37, %v16232_v12  ;;  %v7024_v12 = vadd.f32 %v16510_v37, %v16256_v17  ;;  %v7028_v17 = vadd.f32 %v16510_v37, %v16280_v16 }
 0x597   : > { %v6655_v32 = vsel %vm6591_vm4, %v6553_v35, %v6623_v52  ;;  %v16550_v49 = vpop.f32.mrf.mxu1  ;;  %v7032_v16 = vadd.f32 %v16510_v37, %v16303_v19  ;;  %v7036_v19 = vadd.f32 %v16510_v37, %v16360_v61  ;;  %v7040_v61 = vadd.f32 %v16510_v37, %v16417_v23 }
 0x598   : > { %8696 = vrot.lane.b32.xlu1 %v6784_v7, %s11939_s18  ;;  %v11618_v33 = vpop.f32.mrf.mxu0  ;;  %v6783_v30 = vadd.f32 %v18531_v5, %v6655_v32  ;;  %v7022_v7 = vadd.f32 %v16510_v37, %v16244_v41  ;;  %v7026_v41 = vadd.f32 %v16510_v37, %v16268_v60  ;;  %v7030_v60 = vadd.f32 %v16510_v37, %v16292_v20 }
 0x599   : > { %v16535_v21 = vadd.f32 %v11618_v33, %v7018_v11  ;;  %v16558_v11 = vpop.f32.mrf.mxu1  ;;  %v7034_v20 = vadd.f32 %v16510_v37, %v16328_v8  ;;  %v7038_v8 = vadd.f32 %v16510_v37, %v16391_v58  ;;  %v7042_v58 = vadd.f32 %v16510_v37, %v16443_v54 }
 0x59a   : > { %v16537_v62 = vpop.f32.mrf.mxu0  ;;  %8694 = vrot.lane.b32.xlu0 %v6783_v30, %s11939_s18  ;;  %v7044_v23 = vadd.f32 %v16510_v37, %v16468_v2  ;;  %v7015_v54 = vadd.f32 %v16510_v37, %v16214_v45  ;;  %v7017_v2 = vadd.f32 %v16510_v37, %v16226_v55  ;;  %v7540_v45 = vadd.f32 %v16516_v51, %v16523_v34 }
 0x59b   : > { %v16566_v30 = vpop.f32.mrf.mxu1 }
 0x59c   : > { %v11621_v48 = vpop.f32.mrf.mxu0 }
 0x59d   : > { %v16544_v39 = vadd.f32 %v11621_v48, %v7020_v26 }
 0x59e   : > { %v16546_v35 = vpop.f32.mrf.mxu0 }
 0x5a0   : > { %v11624_v52 = vpop.f32.mrf.mxu0 }
 0x5a1   : > { %v16552_v47 = vadd.f32 %v11624_v52, %v7022_v7  ;;  %v16574_v52 = vpop.f32.mrf.mxu1 }
 0x5a2   : > { %v16554_v59 = vpop.f32.mrf.mxu0 }
 0x5a3   : > { %v16582_v6 = vpop.f32.mrf.mxu1 }
 0x5a4   : > { %v11627_v32 = vpop.f32.mrf.mxu0 }
 0x5a5   : > { %v16560_v33 = vadd.f32 %v11627_v32, %v7024_v12  ;;  %v16590_v31 = vpop.f32.mrf.mxu1 }
 0x5a6   : > { %v16562_v5 = vpop.f32.mrf.mxu0 }
 0x5a7   : > { %v16598_v29 = vpop.f32.mrf.mxu1 }
 0x5a8   : > { %v11630_v26 = vpop.f32.mrf.mxu0 }
 0x5a9   : > { %v16568_v48 = vadd.f32 %v11630_v26, %v7026_v41  ;;  %v16606_v13 = vpop.f32.mrf.mxu1 }
 0x5aa   : > { %v16570_v7 = vpop.f32.mrf.mxu0 }
 0x5ab   : > { %v16614_v22 = vpop.f32.mrf.mxu1 }
 0x5ac   : > { %v11633_v4 = vpop.f32.mrf.mxu0 }
 0x5ad   : > { %v16576_v12 = vadd.f32 %v11633_v4, %v7028_v17  ;;  %v16622_v40 = vpop.f32.mrf.mxu1 }
 0x5ae   : > { %v16578_v32 = vpop.f32.mrf.mxu0 }
 0x5af   : > { %v16630_v0 = vpop.f32.mrf.mxu1 }
 0x5b0   : > { %v11636_v46 = vpop.f32.mrf.mxu0 }
 0x5b1   : > { %v16584_v41 = vadd.f32 %v11636_v46, %v7030_v60 }
 0x5b2   : > { %v16586_v26 = vpop.f32.mrf.mxu0 }
 0x5b4   : > { %v11639_v9 = vpop.f32.mrf.mxu0 }
 0x5b5   : > { %v16592_v4 = vadd.f32 %v11639_v9, %v7032_v16 }
 0x5b6   : > { %v16594_v17 = vpop.f32.mrf.mxu0 }
 0x5b8   : > { %v11642_v53 = vpop.f32.mrf.mxu0 }
 0x5b9   : > { %v16600_v46 = vadd.f32 %v11642_v53, %v7034_v20 }
 0x5ba   : > { %v16602_v60 = vpop.f32.mrf.mxu0 }
 0x5bc   : > { %v11645_v63 = vpop.f32.mrf.mxu0 }
 0x5bd   : > { %v16608_v9 = vadd.f32 %v11645_v63, %v7036_v19 }
 0x5be   : > { %v16610_v16 = vpop.f32.mrf.mxu0 }
 0x5bf   : > { %18532 = vst [vmem:[#allocation64_spill] sm:$0xff] %v16608_v9 }
 0x5c0   : > { %v11648_v43 = vpop.f32.mrf.mxu0 }
 0x5c1   : > { %v16616_v53 = vadd.f32 %v11648_v43, %v7038_v8 }
 0x5c2   : > { %v16618_v20 = vpop.f32.mrf.mxu0 }
 0x5c3   : > { %18533 = vst [vmem:[#allocation72_spill] sm:$0xff] %v16616_v53  ;;  %18534 = vst [vmem:[#allocation83_spill] sm:$0xff] %v16618_v20  ;;  %v16638_v53 = vpop.f32.mrf.mxu1 }
 0x5c4   : > { %v11651_v42 = vpop.f32.mrf.mxu0 }
 0x5c5   : > { %v16624_v63 = vadd.f32 %v11651_v42, %v7040_v61 }
 0x5c6   : > { %v16626_v19 = vpop.f32.mrf.mxu0 }
 0x5c7   : > { %18535 = vst [vmem:[#allocation104_spill] sm:$0xff] %v16624_v63  ;;  %18536 = vst [vmem:[#allocation178_spill] sm:$0xff] %v16626_v19  ;;  %v7046_v63 = vadd.f32 %v16510_v37, %v16489_v56 }
 0x5c8   : > { %v11654_v9 = vpop.f32.mrf.mxu0 }
 0x5c9   : > { %v16632_v43 = vadd.f32 %v11654_v9, %v7042_v58  ;;  %v16648_v9 = vpop.f32.mrf.mxu1 }
 0x5ca   : > { %v16634_v8 = vpop.f32.mrf.mxu0 }
 0x5cb   : > { %18537 = vst [vmem:[#allocation181_spill] sm:$0xff] %v16632_v43  ;;  %18538 = vst [vmem:[#allocation184_spill] sm:$0xff] %v16634_v8  ;;  %v7277_v43 = vadd.f32 %v16525_v18, %v7015_v54 }
 0x5cc   : > { %v11657_v20 = vpop.f32.mrf.mxu0 }
 0x5cd   : > { %v16640_v42 = vadd.f32 %v11657_v20, %v7044_v23  ;;  %v16657_v23 = vpop.f32.mrf.mxu1  ;;  %v7539_v18 = vadd.f32 %v16531_v25, %v7277_v43  ;;  %v7021_v25 = vadd.f32 %v16510_v37, %v16250_v50 }
 0x5ce   : > { %v16642_v61 = vpop.f32.mrf.mxu0 }
 0x5cf   : > { %18539 = vst [vmem:[#allocation198_spill] sm:$0xff] %v16640_v42  ;;  %18540 = vst [vmem:[#allocation186_spill] sm:$0xff] %v16642_v61  ;;  %v7279_v42 = vadd.f32 %v16537_v62, %v7017_v2  ;;  %v7019_v61 = vadd.f32 %v16510_v37, %v16238_v36  ;;  %v16665_v54 = vpop.f32.mrf.mxu1 }
 0x5d0   : > { %v11660_v58 = vpop.f32.mrf.mxu0 }
 0x5d1   : > { %v16651_v8 = vadd.f32 %v11660_v58, %v7046_v63  ;;  %v7281_v55 = vadd.f32 %v16546_v35, %v7019_v61  ;;  %v7541_v62 = vadd.f32 %v16550_v49, %v7279_v42  ;;  %v7023_v35 = vadd.f32 %v16510_v37, %v16262_v24  ;;  %v16677_v61 = vpop.f32.mrf.mxu1 }
 0x5d2   : > { %v16655_v20 = vpop.f32.mrf.mxu0  ;;  %v7283_v42 = vadd.f32 %v16554_v59, %v7021_v25 }
 0x5d3   : > { %18541 = vst [vmem:[#allocation109_spill] sm:$0xff] %v16651_v8  ;;  %v7542_v8 = vadd.f32 %v16542_v57, %v16535_v21  ;;  %v7544_v57 = vadd.f32 %v16558_v11, %v16544_v39  ;;  %v7543_v49 = vadd.f32 %v16566_v30, %v7281_v55  ;;  %v16687_v39 = vpop.f32.mrf.mxu1  ;;  %v7285_v11 = vadd.f32 %v16562_v5, %v7023_v35 }
 0x5d4   : > { %v11727_v56 = vpop.f32.mrf.mxu0  ;;  %v7546_v30 = vadd.f32 %v16574_v52, %v16552_v47  ;;  %v7025_v5 = vadd.f32 %v16510_v37, %v16274_v1  ;;  %v7027_v52 = vadd.f32 %v16510_v37, %v16286_v3 }
 0x5d5   : > { %v7802_v19 = vadd.f32 %v11727_v56, %v7540_v45 }
 0x5d6   : > { %v7642_v63 = vpop.f32.mrf.mxu0  ;;  %v7287_v35 = vadd.f32 %v16570_v7, %v7025_v5 }
 0x5d7   : > { %v7801_v58 = vadd.f32 %v7642_v63, %v7539_v18  ;;  %v7866_v34 = vmul.f32 %v7802_v19, %v18357_v15  ;;  %vm7834_vm5 = vcmp.ge.f32.partialorder %v7802_v19, 0.0 }
 0x5d8   : > { %v11730_v51 = vpop.f32.mrf.mxu0 }
 0x5d9   : > { %vm7833_vm7 = vcmp.ge.f32.partialorder %v7801_v58, 0.0  ;;  %v7865_v36 = vmul.f32 %v7801_v58, %v18357_v15  ;;  %v7804_v2 = vadd.f32 %v11730_v51, %v7542_v8  ;;  %v7898_v45 = vsel %vm7834_vm5, %v7802_v19, %v7866_v34 }
 0x5da   : > { %v7652_v43 = vpop.f32.mrf.mxu0  ;;  %v7545_v51 = vadd.f32 %v16582_v6, %v7283_v42  ;;  %v7548_v6 = vadd.f32 %v16590_v31, %v16560_v33 }
 0x5db   : > { %v7803_v21 = vadd.f32 %v7652_v43, %v7541_v62  ;;  %v7868_v8 = vmul.f32 %v7804_v2, %v18357_v15  ;;  %v7897_v18 = vsel %vm7833_vm7, %v7801_v58, %v7865_v36  ;;  %vm7836_vm9 = vcmp.ge.f32.partialorder %v7804_v2, 0.0 }
 0x5dc   : > { %v11733_v56 = vpop.f32.mrf.mxu0  ;;  %11775 = vmatprep.mubr.msk.f32.mxu1 %vm2743_vm13, %v7897_v18  ;;  %v7547_v43 = vadd.f32 %v16598_v29, %v7285_v11  ;;  %v7289_v29 = vadd.f32 %v16578_v32, %v7027_v52  ;;  %v7029_v32 = vadd.f32 %v16510_v37, %v16298_v14 }
 0x5dd   : > { %vm7835_vm10 = vcmp.ge.f32.partialorder %v7803_v21, 0.0  ;;  %v7867_v50 = vmul.f32 %v7803_v21, %v18357_v15  ;;  %v7806_v24 = vadd.f32 %v11733_v56, %v7544_v57  ;;  %11776 = vmatmul.mubr.msk.f32.vlgmr.msra.gmra.mxu1 %vm2743_vm13, %v7898_v45  ;;  %v7900_v19 = vsel %vm7836_vm9, %v7804_v2, %v7868_v8  ;;  %v16701_v2 = vpop.f32.mrf.mxu1 }
 0x5de   : > { %v7662_v63 = vpop.f32.mrf.mxu0  ;;  %v7550_v45 = vadd.f32 %v16606_v13, %v16568_v48  ;;  %v7031_v48 = vadd.f32 %v16510_v37, %v16315_v38 }
 0x5df   : > { %v7805_v59 = vadd.f32 %v7662_v63, %v7543_v49  ;;  %v7870_v55 = vmul.f32 %v7806_v24, %v18357_v15  ;;  %v7899_v34 = vsel %vm7835_vm10, %v7803_v21, %v7867_v50  ;;  %vm7838_vm12 = vcmp.ge.f32.partialorder %v7806_v24, 0.0  ;;  %v16712_v33 = vpop.f32.mrf.mxu1 }
 0x5e0   : > { %v11736_v58 = vpop.f32.mrf.mxu0  ;;  %11778 = vmatprep.mubr.msk.f32.mxu1 %vm2743_vm13, %v7899_v34 }
 0x5e1   : > { %vm7837_vm6 = vcmp.ge.f32.partialorder %v7805_v59, 0.0  ;;  %v7869_v62 = vmul.f32 %v7805_v59, %v18357_v15  ;;  %v7808_v36 = vadd.f32 %v11736_v58, %v7546_v30  ;;  %11779 = vmatmul.mubr.msk.f32.gmra.mxu1 %vm2743_vm13, %v7900_v19  ;;  %v7902_v21 = vsel %vm7838_vm12, %v7806_v24, %v7870_v55 }
 0x5e2   : > { %v7672_v47 = vpop.f32.mrf.mxu0  ;;  %v7549_v24 = vadd.f32 %v16614_v22, %v7287_v35  ;;  %v7552_v22 = vadd.f32 %v16622_v40, %v16576_v12  ;;  %v7551_v19 = vadd.f32 %v16630_v0, %v7289_v29  ;;  %v7291_v55 = vadd.f32 %v16586_v26, %v7029_v32 }
 0x5e3   : > { %v7807_v25 = vadd.f32 %v7672_v47, %v7545_v51  ;;  %v7872_v57 = vmul.f32 %v7808_v36, %v18357_v15  ;;  %v7901_v49 = vsel %vm7837_vm6, %v7805_v59, %v7869_v62  ;;  %vm7840_vm8 = vcmp.ge.f32.partialorder %v7808_v36, 0.0  ;;  %v16726_v59 = vpop.f32.mrf.mxu1 }
 0x5e4   : > { %v11739_v1 = vpop.f32.mrf.mxu0  ;;  %11781 = vmatprep.mubr.msk.f32.mxu1 %vm2743_vm13, %v7901_v49  ;;  %v7293_v0 = vadd.f32 %v16594_v17, %v7031_v48  ;;  %v7033_v17 = vadd.f32 %v16510_v37, %v16344_v27 }
 0x5e5   : > { %vm7839_vm14 = vcmp.ge.f32.partialorder %v7807_v25, 0.0  ;;  %v7871_v3 = vmul.f32 %v7807_v25, %v18357_v15  ;;  %v7810_v42 = vadd.f32 %v11739_v1, %v7548_v6  ;;  %11782 = vmatmul.mubr.msk.f32.gmra.mxu1 %vm2743_vm13, %v7902_v21  ;;  %v7904_v8 = vsel %vm7840_vm8, %v7808_v36, %v7872_v57  ;;  %v16737_v12 = vpop.f32.mrf.mxu1 }
 0x5e6   : > { %v7682_v31 = vpop.f32.mrf.mxu0  ;;  %v7554_v36 = vadd.f32 %v16638_v53, %v16584_v41  ;;  %v7553_v6 = vadd.f32 %v16648_v9, %v7291_v55  ;;  %v7035_v53 = vadd.f32 %v16510_v37, %v16376_v10  ;;  %v7556_v9 = vadd.f32 %v16657_v23, %v16592_v4 }
 0x5e7   : > { %v7809_v7 = vadd.f32 %v7682_v31, %v7547_v43  ;;  %v7874_v56 = vmul.f32 %v7810_v42, %v18357_v15  ;;  %v7903_v50 = vsel %vm7839_vm14, %v7807_v25, %v7871_v3  ;;  %vm7842_vm15 = vcmp.ge.f32.partialorder %v7810_v42, 0.0  ;;  %v16751_v21 = vpop.f32.mrf.mxu1 }
 0x5e8   : > { %v11742_v18 = vpop.f32.mrf.mxu0  ;;  %11784 = vmatprep.mubr.msk.f32.mxu1 %vm2743_vm13, %v7903_v50  ;;  %v7555_v1 = vadd.f32 %v16665_v54, %v7293_v0  ;;  %v7295_v49 = vadd.f32 %v16602_v60, %v7033_v17  ;;  %v7297_v54 = vadd.f32 %v16610_v16, %v7035_v53  ;;  %v7037_v16 = vadd.f32 %v16510_v37, %v16405_v44 }
 0x5e9   : > { %vm7841_vm0 = vcmp.ge.f32.partialorder %v7809_v7, 0.0  ;;  %v7873_v63 = vmul.f32 %v7809_v7, %v18357_v15  ;;  %v7812_v11 = vadd.f32 %v11742_v18, %v7550_v45  ;;  %11785 = vmatmul.mubr.msk.f32.gmra.mxu1 %vm2743_vm13, %v7904_v8  ;;  %v7906_v58 = vsel %vm7842_vm15, %v7810_v42, %v7874_v56  ;;  %v7500_v23 = vpop.f32.mrf.mxu1 }
 0x5ea   : > { %v7692_v13 = vpop.f32.mrf.mxu0  ;;  %v7557_v50 = vadd.f32 %v16687_v39, %v7295_v49  ;;  %v7559_v48 = vadd.f32 %v16712_v33, %v7297_v54  ;;  %v18544_v33 = vld [vmem:[#allocation178_spill] sm:$0xff] }
 0x5eb   : > { %v7811_v30 = vadd.f32 %v7692_v13, %v7549_v24  ;;  %v7876_v34 = vmul.f32 %v7812_v11, %v18357_v15  ;;  %v7905_v51 = vsel %vm7841_vm0, %v7809_v7, %v7873_v63  ;;  %vm7844_vm1 = vcmp.ge.f32.partialorder %v7812_v11, 0.0  ;;  %v18542_v13 = vld [vmem:[#allocation64_spill] sm:$0xff] }
 0x5ec   : > { %v11745_v14 = vpop.f32.mrf.mxu0  ;;  %11787 = vmatprep.mubr.msk.f32.mxu1 %vm2743_vm13, %v7905_v51  ;;  %v7558_v7 = vadd.f32 %v16677_v61, %v16600_v46  ;;  %v7039_v61 = vadd.f32 %v16510_v37, %v16430_v28  ;;  %v7560_v39 = vadd.f32 %v16701_v2, %v18542_v13 }
 0x5ed   : > { %vm7843_vm11 = vcmp.ge.f32.partialorder %v7811_v30, 0.0  ;;  %v7875_v38 = vmul.f32 %v7811_v30, %v18357_v15  ;;  %v7814_v62 = vadd.f32 %v11745_v14, %v7552_v22  ;;  %11788 = vmatmul.mubr.msk.f32.gmra.mxu1 %vm2743_vm13, %v7906_v58  ;;  %v7908_v5 = vsel %vm7844_vm1, %v7812_v11, %v7876_v34  ;;  %v11710_v11 = vpop.f32.mrf.mxu1 }
 0x5ee   : > { %v7702_v40 = vpop.f32.mrf.mxu0  ;;  %v7301_v51 = vadd.f32 %v18544_v33, %v7039_v61  ;;  %v18552_v61 = vld [vmem:[#allocation5_spill] sm:$0xff] }
 0x5ef   : > { %v7813_v26 = vadd.f32 %v7702_v40, %v7551_v19  ;;  %v7878_v47 = vmul.f32 %v7814_v62, %v18357_v15  ;;  %v7907_v25 = vsel %vm7843_vm11, %v7811_v30, %v7875_v38  ;;  %vm7846_vm3 = vcmp.ge.f32.partialorder %v7814_v62, 0.0  ;;  %v18543_v30 = vld [vmem:[#allocation83_spill] sm:$0xff]  ;;  %v7510_v14 = vpop.f32.mrf.mxu1 }
 0x5f0   : > { %v11748_v52 = vpop.f32.mrf.mxu0  ;;  %11790 = vmatprep.mubr.msk.f32.mxu1 %vm2743_vm13, %v7907_v25  ;;  %v7299_v22 = vadd.f32 %v18543_v30, %v7037_v16 }
 0x5f1   : > { %vm7845_vm4 = vcmp.ge.f32.partialorder %v7813_v26, 0.0  ;;  %v7877_v43 = vmul.f32 %v7813_v26, %v18357_v15  ;;  %v7816_v35 = vadd.f32 %v11748_v52, %v7554_v36  ;;  %11791 = vmatmul.mubr.msk.f32.gmra.mxu1 %vm2743_vm13, %v7908_v5  ;;  %v7910_v3 = vsel %vm7846_vm3, %v7814_v62, %v7878_v47  ;;  %v18545_v62 = vld [vmem:[#allocation72_spill] sm:$0xff] }
 0x5f2   : > { %v7712_v41 = vpop.f32.mrf.mxu0  ;;  %v7562_v40 = vadd.f32 %v16726_v59, %v18545_v62  ;;  %v7561_v47 = vadd.f32 %v16737_v12, %v7299_v22 }
 0x5f3   : > { %v7815_v57 = vadd.f32 %v7712_v41, %v7553_v6  ;;  %v7880_v42 = vmul.f32 %v7816_v35, %v18357_v15  ;;  %v7909_v31 = vsel %vm7845_vm4, %v7813_v26, %v7877_v43  ;;  %vm7848_vm5 = vcmp.ge.f32.partialorder %v7816_v35, 0.0  ;;  %v18546_v6 = vld [vmem:[#allocation194_spill] sm:$0xff]  ;;  %v11713_v41 = vpop.f32.mrf.mxu1 }
 0x5f4   : > { %v11751_v27 = vpop.f32.mrf.mxu0  ;;  %11793 = vmatprep.mubr.msk.f32.mxu1 %vm2743_vm13, %v7909_v31  ;;  %v7041_v43 = vadd.f32 %v16510_v37, %v18546_v6 }
 0x5f5   : > { %vm7847_vm7 = vcmp.ge.f32.partialorder %v7815_v57, 0.0  ;;  %v7879_v10 = vmul.f32 %v7815_v57, %v18357_v15  ;;  %v7818_v29 = vadd.f32 %v11751_v27, %v7556_v9  ;;  %11794 = vmatmul.mubr.msk.f32.gmra.mxu1 %vm2743_vm13, %v7910_v3  ;;  %v7912_v45 = vsel %vm7848_vm5, %v7816_v35, %v7880_v42  ;;  %v18547_v35 = vld [vmem:[#allocation76_spill] sm:$0xff] }
 0x5f6   : > { %v7722_v4 = vpop.f32.mrf.mxu0  ;;  %v7043_v17 = vadd.f32 %v16510_v37, %v18547_v35  ;;  %v7563_v9 = vadd.f32 %v7500_v23, %v7301_v51  ;;  %v18550_v23 = vld [vmem:[#allocation186_spill] sm:$0xff] }
 0x5f7   : > { %v7817_v60 = vadd.f32 %v7722_v4, %v7555_v1  ;;  %v7882_v8 = vmul.f32 %v7818_v29, %v18357_v15  ;;  %v7911_v18 = vsel %vm7847_vm7, %v7815_v57, %v7879_v10  ;;  %vm7850_vm9 = vcmp.ge.f32.partialorder %v7818_v29, 0.0  ;;  %v18548_v57 = vld [vmem:[#allocation104_spill] sm:$0xff] }
 0x5f8   : > { %v11754_v56 = vpop.f32.mrf.mxu0  ;;  %11796 = vmatprep.mubr.msk.f32.mxu1 %vm2743_vm13, %v7911_v18  ;;  %v7564_v12 = vadd.f32 %v16751_v21, %v18548_v57  ;;  %v18549_v1 = vld [vmem:[#allocation184_spill] sm:$0xff]  ;;  %v7520_v21 = vpop.f32.mrf.mxu1  ;;  %v7305_v54 = vadd.f32 %v18550_v23, %v7043_v17  ;;  %v18555_v17 = vld [vmem:[#allocation113_spill] sm:$0xff] }
 0x5f9   : > { %vm7849_vm10 = vcmp.ge.f32.partialorder %v7817_v60, 0.0  ;;  %v7881_v24 = vmul.f32 %v7817_v60, %v18357_v15  ;;  %v7820_v63 = vadd.f32 %v11754_v56, %v7558_v7  ;;  %11797 = vmatmul.mubr.msk.f32.gmra.mxu1 %vm2743_vm13, %v7912_v45  ;;  %v7914_v19 = vsel %vm7850_vm9, %v7818_v29, %v7882_v8  ;;  %v18551_v7 = vld [vmem:[#allocation181_spill] sm:$0xff] }
 0x5fa   : > { %v7732_v46 = vpop.f32.mrf.mxu0  ;;  %v7303_v49 = vadd.f32 %v18549_v1, %v7041_v43  ;;  %v7566_v45 = vadd.f32 %v11710_v11, %v18551_v7  ;;  %v7567_v30 = vadd.f32 %v7520_v21, %v7305_v54  ;;  %v11892_v21 = vld [vmem:[%s12919_s16] sm:$0xff]  ;;  %v11893_v7 = vld [vmem:[%s12919_s16 + $0x18] sm:$0xff] }
 0x5fb   : > { %v7819_v32 = vadd.f32 %v7732_v46, %v7557_v50  ;;  %v7884_v55 = vmul.f32 %v7820_v63, %v18357_v15  ;;  %v7913_v44 = vsel %vm7849_vm10, %v7817_v60, %v7881_v24  ;;  %vm7852_vm12 = vcmp.ge.f32.partialorder %v7820_v63, 0.0  ;;  %v18560_v54 = vld [vmem:[#allocation201_spill] sm:$0xff] }
 0x5fc   : > { %v11757_v58 = vpop.f32.mrf.mxu0  ;;  %11799 = vmatprep.mubr.msk.f32.mxu1 %vm2743_vm13, %v7913_v44  ;;  %v7565_v24 = vadd.f32 %v7510_v14, %v7303_v49  ;;  %v18554_v14 = vld [vmem:[#allocation109_spill] sm:$0xff] }
 0x5fd   : > { %vm7851_vm6 = vcmp.ge.f32.partialorder %v7819_v32, 0.0  ;;  %v7883_v34 = vmul.f32 %v7819_v32, %v18357_v15  ;;  %v7822_v28 = vadd.f32 %v11757_v58, %v7560_v39  ;;  %11800 = vmatmul.mubr.msk.f32.gmra.mxu1 %vm2743_vm13, %v7914_v19  ;;  %v7916_v0 = vsel %vm7852_vm12, %v7820_v63, %v7884_v55  ;;  %v11716_v63 = vpop.f32.mrf.mxu1  ;;  %v18553_v39 = vld [vmem:[#allocation198_spill] sm:$0xff] }
 0x5fe   : > { %v7742_v2 = vpop.f32.mrf.mxu0  ;;  %v7570_v33 = vadd.f32 %v11716_v63, %v18554_v14 }
 0x5ff   : > { %v7821_v38 = vadd.f32 %v7742_v2, %v7559_v48  ;;  %v7886_v26 = vmul.f32 %v7822_v28, %v18357_v15  ;;  %v7915_v5 = vsel %vm7851_vm6, %v7819_v32, %v7883_v34  ;;  %vm7854_vm8 = vcmp.ge.f32.partialorder %v7822_v28, 0.0  ;;  %v7530_v34 = vpop.f32.mrf.mxu1 }
 0x600   : > { %v11760_v36 = vpop.f32.mrf.mxu0  ;;  %11802 = vmatprep.mubr.msk.f32.mxu1 %vm2743_vm13, %v7915_v5  ;;  %v7045_v32 = vadd.f32 %v16510_v37, %v18552_v61  ;;  %v7568_v48 = vadd.f32 %v11713_v41, %v18553_v39  ;;  %v8347_v41 = vadd.s32 33, %v18555_v17  ;;  %v11894_v61 = vld [vmem:[%s12919_s16 + $0x10] sm:$0xff] }
 0x601   : > { %vm7853_vm14 = vcmp.ge.f32.partialorder %v7821_v38, 0.0  ;;  %v7885_v52 = vmul.f32 %v7821_v38, %v18357_v15  ;;  %v7824_v25 = vadd.f32 %v11760_v36, %v7562_v40  ;;  %11803 = vmatmul.mubr.msk.f32.gmra.mxu1 %vm2743_vm13, %v7916_v0  ;;  %v7918_v3 = vsel %vm7854_vm8, %v7822_v28, %v7886_v26 }
 0x602   : > { %v7752_v59 = vpop.f32.mrf.mxu0  ;;  %v7307_v22 = vadd.f32 %v16655_v20, %v7045_v32  ;;  %v18563_v32 = vld [vmem:[#allocation54_spill] sm:$0xff] }
 0x603   : > { %v7823_v53 = vadd.f32 %v7752_v59, %v7561_v47  ;;  %v7888_v42 = vmul.f32 %v7824_v25, %v18357_v15  ;;  %v7917_v31 = vsel %vm7853_vm14, %v7821_v38, %v7885_v52  ;;  %vm7856_vm15 = vcmp.ge.f32.partialorder %v7824_v25, 0.0 }
 0x604   : > { %v11763_v27 = vpop.f32.mrf.mxu0  ;;  %11805 = vmatprep.mubr.msk.f32.mxu1 %vm2743_vm13, %v7917_v31  ;;  %v7569_v38 = vadd.f32 %v7530_v34, %v7307_v22 }
 0x605   : > { %vm7855_vm0 = vcmp.ge.f32.partialorder %v7823_v53, 0.0  ;;  %v7887_v10 = vmul.f32 %v7823_v53, %v18357_v15  ;;  %v7826_v29 = vadd.f32 %v11763_v27, %v7564_v12  ;;  %11806 = vmatmul.mubr.msk.f32.gmra.mxu1 %vm2743_vm13, %v7918_v3  ;;  %v7920_v8 = vsel %vm7856_vm15, %v7824_v25, %v7888_v42  ;;  %v11891_v3 = vld [vmem:[%s12919_s16 + $0x8] sm:$0xff]  ;;  %v18558_v27 = vld [vmem:[#allocation49_spill] sm:$0xff] }
 0x606   : > { %v7762_v4 = vpop.f32.mrf.mxu0  ;;  %vm8379_vm12 = vcmp.eq.s32.totalorder %v11891_v3, %v8347_v41  ;;  %v8348_v31 = vadd.s32 33, %v18558_v27 }
 0x607   : > { %v7825_v60 = vadd.f32 %v7762_v4, %v7563_v9  ;;  %v7890_v56 = vmul.f32 %v7826_v29, %v18357_v15  ;;  %v7919_v50 = vsel %vm7855_vm0, %v7823_v53, %v7887_v10  ;;  %vm7858_vm1 = vcmp.ge.f32.partialorder %v7826_v29, 0.0  ;;  %v18556_v53 = vld [vmem:[#allocation124_spill] sm:$0xff]  ;;  %v18559_v10 = vld [vmem:[#allocation187_spill] sm:$0xff] }
 0x608   : > { %v11766_v18 = vpop.f32.mrf.mxu0  ;;  %11808 = vmatprep.mubr.msk.f32.mxu1 %vm2743_vm13, %v7919_v50  ;;  %v8346_v57 = vadd.s32 33, %v18556_v53  ;;  %v18557_v9 = vld [vmem:[#allocation116_spill] sm:$0xff]  ;;  %vm8380_vm0 = vcmp.eq.s32.totalorder %v11894_v61, %v8348_v31 }
 0x609   : > { %vm7857_vm11 = vcmp.ge.f32.partialorder %v7825_v60, 0.0  ;;  %v7889_v16 = vmul.f32 %v7825_v60, %v18357_v15  ;;  %v7828_v46 = vadd.f32 %v11766_v18, %v7566_v45  ;;  %11809 = vmatmul.mubr.msk.f32.gmra.mxu1 %vm2743_vm13, %v7920_v8  ;;  %v7922_v19 = vsel %vm7858_vm1, %v7826_v29, %v7890_v56  ;;  %v18561_v45 = vld [vmem:[#allocation77_spill] sm:$0xff] }
 0x60a   : > { %v7772_v11 = vpop.f32.mrf.mxu0  ;;  %v8349_v1 = vadd.s32 33, %v18557_v9  ;;  %vm8378_vm8 = vcmp.eq.s32.totalorder %v11892_v21, %v8346_v57  ;;  %v8351_v8 = vadd.s32 33, %v18561_v45  ;;  %v18572_v21 = vld [vmem:[#allocation95_spill] sm:$0xff] }
 0x60b   : > { %v7827_v13 = vadd.f32 %v7772_v11, %v7565_v24  ;;  %v7892_v55 = vmul.f32 %v7828_v46, %v18357_v15  ;;  %v7921_v44 = vsel %vm7857_vm11, %v7825_v60, %v7889_v16  ;;  %vm7860_vm3 = vcmp.ge.f32.partialorder %v7828_v46, 0.0  ;;  %v18562_v16 = vld [vmem:[#allocation202_spill] sm:$0xff] }
 0x60c   : > { %v11769_v58 = vpop.f32.mrf.mxu0  ;;  %11811 = vmatprep.mubr.msk.f32.mxu1 %vm2743_vm13, %v7921_v44  ;;  %v8411_v60 = vsel %vm8379_vm12, %v18560_v54, 0.0  ;;  %vm8381_vm14 = vcmp.eq.s32.totalorder %v11893_v7, %v8349_v1  ;;  %v8350_v11 = vadd.s32 33, %v18563_v32  ;;  %v18565_v44 = vld [vmem:[#allocation79_spill] sm:$0xff]  ;;  %v11899_v54 = vld [vmem:[%s12919_s16 + $0x48] sm:$0xff] }
 0x60d   : > { %vm7859_vm4 = vcmp.ge.f32.partialorder %v7827_v13, 0.0  ;;  %v7891_v28 = vmul.f32 %v7827_v13, %v18357_v15  ;;  %v7830_v37 = vadd.f32 %v11769_v58, %v7568_v48  ;;  %11812 = vmatmul.mubr.msk.f32.gmra.mxu1 %vm2743_vm13, %v7922_v19  ;;  %v7924_v62 = vsel %vm7860_vm3, %v7828_v46, %v7892_v55  ;;  %v18564_v19 = vld [vmem:[#allocation195_spill] sm:$0xff]  ;;  %v11895_v58 = vld [vmem:[%s12919_s16 + $0x28] sm:$0xff] }
 0x60e   : > { %v7782_v2 = vpop.f32.mrf.mxu0  ;;  %v8410_v46 = vsel %vm8378_vm8, %v18562_v16, 0.0  ;;  %v8413_v55 = vsel %vm8381_vm14, %v18564_v19, 0.0  ;;  %vm8383_vm11 = vcmp.eq.s32.totalorder %v11895_v58, %v8351_v8  ;;  %v8353_v34 = vadd.s32 33, %v18565_v44  ;;  %v11898_v1 = vld [vmem:[%s12919_s16 + $0x30] sm:$0xff]  ;;  %v11900_v16 = vld [vmem:[%s12919_s16 + $0x40] sm:$0xff]  ;;  %v11901_v19 = vld [vmem:[%s12919_s16 + $0x58] sm:$0xff] }
 0x60f   : > { %v7829_v51 = vadd.f32 %v7782_v2, %v7567_v30  ;;  %v7923_v20 = vsel %vm7859_vm4, %v7827_v13, %v7891_v28  ;;  %v7894_v0 = vmul.f32 %v7830_v37, %v18357_v15  ;;  %vm7862_vm7 = vcmp.ge.f32.partialorder %v7830_v37, 0.0 }
 0x610   : > { %v11772_v40 = vpop.f32.mrf.mxu0  ;;  %11814 = vmatprep.mubr.msk.f32.mxu1 %vm2743_vm13, %v7923_v20 }
 0x611   : > { %vm7861_vm5 = vcmp.ge.f32.partialorder %v7829_v51, 0.0  ;;  %v7893_v26 = vmul.f32 %v7829_v51, %v18357_v15  ;;  %v7832_v36 = vadd.f32 %v11772_v40, %v7570_v33  ;;  %11815 = vmatmul.mubr.msk.f32.gmra.mxu1 %vm2743_vm13, %v7924_v62  ;;  %v7926_v25 = vsel %vm7862_vm7, %v7830_v37, %v7894_v0  ;;  %v18567_v62 = vld [vmem:[#allocation55_spill] sm:$0xff] }
 0x612   : > { %v7792_v5 = vpop.f32.mrf.mxu0  ;;  %v8352_v40 = vadd.s32 33, %v18567_v62 }
 0x613   : > { %v7831_v47 = vadd.f32 %v7792_v5, %v7569_v38  ;;  %v7925_v52 = vsel %vm7861_vm5, %v7829_v51, %v7893_v26  ;;  %v7896_v6 = vmul.f32 %v7832_v36, %v18357_v15  ;;  %vm7864_vm10 = vcmp.ge.f32.partialorder %v7832_v36, 0.0  ;;  %v18566_v51 = vld [vmem:[#allocation197_spill] sm:$0xff] }
 0x614   : > { %11817 = vmatprep.mubr.msk.f32.mxu1 %vm2743_vm13, %v7925_v52  ;;  %v8412_v20 = vsel %vm8380_vm0, %v18566_v51, 0.0  ;;  %v11896_v38 = vld [vmem:[%s12919_s16 + $0x20] sm:$0xff]  ;;  %v18568_v52 = vld [vmem:[#allocation203_spill] sm:$0xff] }
 0x615   : > { %vm7863_vm9 = vcmp.ge.f32.partialorder %v7831_v47, 0.0  ;;  %v7895_v43 = vmul.f32 %v7831_v47, %v18357_v15  ;;  %11818 = vmatmul.mubr.msk.f32.gmra.mxu1 %vm2743_vm13, %v7926_v25  ;;  %v7928_v35 = vsel %vm7864_vm10, %v7832_v36, %v7896_v6  ;;  %v16834_v15 = vld [vmem:[%s17294_s8] ss:$0 sm:$0xff]  ;;  %vm8382_vm4 = vcmp.eq.s32.totalorder %v11896_v38, %v8350_v11  ;;  %v11897_v6 = vld [vmem:[%s12919_s16 + $0x38] sm:$0xff]  ;;  %v11902_v51 = vld [vmem:[%s12919_s16 + $0x50] sm:$0xff] }
 0x616   : > { %v8415_v25 = vsel %vm8383_vm11, %v18568_v52, 0.0  ;;  %vm8385_vm7 = vcmp.eq.s32.totalorder %v11897_v6, %v8353_v34  ;;  %vm8384_vm10 = vcmp.eq.s32.totalorder %v11898_v1, %v8352_v40  ;;  %v16907_v40 = vpop.permute.xlu1 %8568  ;;  %v18580_v52 = vld [vmem:[#allocation28_spill] sm:$0xff] }
 0x617   : > { %v7927_v59 = vsel %vm7863_vm9, %v7831_v47, %v7895_v43  ;;  %v18569_v43 = vld [vmem:[#allocation84_spill] sm:$0xff] }
 0x618   : > { %11820 = vmatprep.mubr.msk.f32.mxu1 %vm2743_vm13, %v7927_v59  ;;  %v8355_v59 = vadd.s32 33, %v18569_v43 }
 0x619   : > { %11821 = vmatmul.mubr.msk.f32.gmra.mxu1 %vm2743_vm13, %v7928_v35 }
 0x69d   : > { %v11777_v12 = vpop.f32.mrf.mxu1 }
 0x69e   : > { %v8097_v49 = vadd.f32 %v16834_v15, %v11777_v12  ;;  %v18570_v12 = vld [vmem:[#allocation204_spill] sm:$0xff] }
 0x69f   : > { %v8091_v42 = vpop.f32.mrf.mxu1  ;;  %v8414_v9 = vsel %vm8382_vm4, %v18570_v12, 0.0 }
 0x6a0   : > { %vm8251_vm6 = vcmp.ge.f32.partialorder %v8097_v49, 0.0  ;;  %v8283_v29 = vmul.f32 %v8097_v49, %v18559_v10  ;;  %v8092_v4 = vadd.f32 %v16834_v15, %v8091_v42 }
 0x6a1   : > { %v11780_v23 = vpop.f32.mrf.mxu1 }
 0x6a2   : > { %vm8250_vm15 = vcmp.ge.f32.partialorder %v8092_v4, 0.0  ;;  %v8282_v56 = vmul.f32 %v8092_v4, %v18559_v10  ;;  %v8107_v18 = vadd.f32 %v16834_v15, %v11780_v23  ;;  %v8315_v50 = vsel %vm8251_vm6, %v8097_v49, %v8283_v29  ;;  %v18571_v49 = vld [vmem:[#allocation69_spill] sm:$0xff] }
 0x6a3   : > { %v8101_v24 = vpop.f32.mrf.mxu1  ;;  %v8443_v63 = vadd.f32 %v8411_v60, %v8315_v50  ;;  %v8354_v3 = vadd.s32 33, %v18571_v49  ;;  %v8417_v23 = vsel %vm8385_vm7, %v18572_v21, 0.0  ;;  %vm8387_vm6 = vcmp.eq.s32.totalorder %v11899_v54, %v8355_v59  ;;  %v18573_v60 = vld [vmem:[#allocation16_spill] sm:$0xff]  ;;  %v16923_v49 = vpop.permute.xlu1 %8636 }
 0x6a4   : > { %vm8253_vm1 = vcmp.ge.f32.partialorder %v8107_v18, 0.0  ;;  %v8285_v13 = vmul.f32 %v8107_v18, %v18559_v10  ;;  %v8102_v39 = vadd.f32 %v16834_v15, %v8101_v24  ;;  %v8314_v48 = vsel %vm8250_vm15, %v8092_v4, %v8282_v56  ;;  %v18574_v24 = vld [vmem:[#allocation206_spill] sm:$0xff] }
 0x6a5   : > { %8764 = vrot.lane.b32.xlu1 %v8443_v63, %s11940_s24  ;;  %v11783_v30 = vpop.f32.mrf.mxu1  ;;  %v8442_v22 = vadd.f32 %v8410_v46, %v8314_v48  ;;  %v8357_v7 = vadd.s32 33, %v18573_v60  ;;  %v8416_v63 = vsel %vm8384_vm10, %v18574_v24, 0.0  ;;  %vm8386_vm14 = vcmp.eq.s32.totalorder %v11900_v16, %v8354_v3  ;;  %v18575_v46 = vld [vmem:[#allocation70_spill] sm:$0xff] }
 0x6a6   : > { %vm8252_vm3 = vcmp.ge.f32.partialorder %v8102_v39, 0.0  ;;  %v8284_v28 = vmul.f32 %v8102_v39, %v18559_v10  ;;  %v8117_v37 = vadd.f32 %v16834_v15, %v11783_v30  ;;  %v8317_v2 = vsel %vm8253_vm1, %v8107_v18, %v8285_v13  ;;  %v18576_v30 = vld [vmem:[#allocation120_spill] sm:$0xff] }
 0x6a7   : > { %v8111_v14 = vpop.f32.mrf.mxu1  ;;  %8762 = vrot.lane.b32.xlu0 %v8442_v22, %s11940_s24  ;;  %v8445_v33 = vadd.f32 %v8413_v55, %v8317_v2  ;;  %v8356_v61 = vadd.s32 33, %v18575_v46  ;;  %v8419_v22 = vsel %vm8387_vm6, %v18576_v30, 0.0  ;;  %vm8389_vm0 = vcmp.eq.s32.totalorder %v11901_v19, %v8357_v7  ;;  %v18577_v55 = vld [vmem:[#allocation17_spill] sm:$0xff]  ;;  %v18585_v46 = vld [vmem:[#allocation26_spill] sm:$0xff] }
 0x6a8   : > { %vm8255_vm5 = vcmp.ge.f32.partialorder %v8117_v37, 0.0  ;;  %v8287_v0 = vmul.f32 %v8117_v37, %v18559_v10  ;;  %v8112_v26 = vadd.f32 %v16834_v15, %v8111_v14  ;;  %v8316_v36 = vsel %vm8252_vm3, %v8102_v39, %v8284_v28  ;;  %v18578_v14 = vld [vmem:[#allocation207_spill] sm:$0xff] }
 0x6a9   : > { %8768 = vrot.lane.b32.xlu1 %v8445_v33, %s11940_s24  ;;  %v11786_v5 = vpop.f32.mrf.mxu1  ;;  %v8444_v47 = vadd.f32 %v8412_v20, %v8316_v36  ;;  %v8359_v58 = vadd.s32 33, %v18577_v55  ;;  %v8418_v33 = vsel %vm8386_vm14, %v18578_v14, 0.0  ;;  %vm8388_vm11 = vcmp.eq.s32.totalorder %v11902_v51, %v8356_v61  ;;  %v18579_v36 = vld [vmem:[#allocation208_spill] sm:$0xff] }
 0x6aa   : > { %vm8254_vm9 = vcmp.ge.f32.partialorder %v8112_v26, 0.0  ;;  %v8286_v35 = vmul.f32 %v8112_v26, %v18559_v10  ;;  %v8127_v17 = vadd.f32 %v16834_v15, %v11786_v5  ;;  %v8319_v41 = vsel %vm8255_vm5, %v8117_v37, %v8287_v0 }
 0x6ab   : > { %v8121_v53 = vpop.f32.mrf.mxu1  ;;  %8766 = vrot.lane.b32.xlu0 %v8444_v47, %s11940_s24  ;;  %v8447_v57 = vadd.f32 %v8415_v25, %v8319_v41  ;;  %v8421_v5 = vsel %vm8389_vm0, %v18579_v36, 0.0  ;;  %v11903_v47 = vld [vmem:[%s12919_s16 + $0x68] sm:$0xff]  ;;  %v8361_v25 = vadd.s32 33, %v18580_v52 }
 0x6ac   : > { %vm8257_vm12 = vcmp.ge.f32.partialorder %v8127_v17, 0.0  ;;  %v8289_v42 = vmul.f32 %v8127_v17, %v18559_v10  ;;  %v8122_v27 = vadd.f32 %v16834_v15, %v8121_v53  ;;  %v8318_v31 = vsel %vm8254_vm9, %v8112_v26, %v8286_v35  ;;  %v16916_v35 = vpop.permute.xlu0 %8566  ;;  %v18581_v53 = vld [vmem:[#allocation11_spill] sm:$0xff] }
 0x6ad   : > { %8772 = vrot.lane.b32.xlu1 %v8447_v57, %s11940_s24  ;;  %v11789_v29 = vpop.f32.mrf.mxu1  ;;  %v8446_v4 = vadd.f32 %v8414_v9, %v8318_v31  ;;  %vm8391_vm4 = vcmp.eq.s32.totalorder %v11903_v47, %v8359_v58  ;;  %v8420_v57 = vsel %vm8388_vm11, %v18581_v53, 0.0  ;;  %v18591_v53 = vld [vmem:[#allocation39_spill] sm:$0xff] }
 0x6ae   : > { %vm8256_vm8 = vcmp.ge.f32.partialorder %v8122_v27, 0.0  ;;  %v8288_v45 = vmul.f32 %v8122_v27, %v18559_v10  ;;  %v8137_v8 = vadd.f32 %v16834_v15, %v11789_v29  ;;  %v8321_v56 = vsel %vm8257_vm12, %v8127_v17, %v8289_v42  ;;  %v11904_v29 = vld [vmem:[%s12919_s16 + $0x78] sm:$0xff] }
 0x6af   : > { %v8131_v18 = vpop.f32.mrf.mxu1  ;;  %8770 = vrot.lane.b32.xlu0 %v8446_v4, %s11940_s24  ;;  %v8449_v50 = vadd.f32 %v8417_v23, %v8321_v56  ;;  %vm8393_vm9 = vcmp.eq.s32.totalorder %v11904_v29, %v8361_v25  ;;  %v18583_v4 = vld [vmem:[#allocation31_spill] sm:$0xff] }
 0x6b0   : > { %vm8259_vm15 = vcmp.ge.f32.partialorder %v8137_v8, 0.0  ;;  %v8291_v32 = vmul.f32 %v8137_v8, %v18559_v10  ;;  %v8132_v11 = vadd.f32 %v16834_v15, %v8131_v18  ;;  %v8320_v13 = vsel %vm8256_vm8, %v8122_v27, %v8288_v45  ;;  %v18582_v27 = vld [vmem:[#allocation14_spill] sm:$0xff]  ;;  %v16932_v7 = vpop.permute.xlu0 %8634 }
 0x6b1   : > { %8776 = vrot.lane.b32.xlu1 %v8449_v50, %s11940_s24  ;;  %v11792_v39 = vpop.f32.mrf.mxu1  ;;  %v8448_v48 = vadd.f32 %v8416_v63, %v8320_v13  ;;  %v8423_v31 = vsel %vm8391_vm4, %v18582_v27, 0.0  ;;  %v8363_v21 = vadd.s32 33, %v18583_v4  ;;  %v18584_v63 = vld [vmem:[#allocation164_spill] sm:$0xff]  ;;  %v8425_v61 = vsel %vm8393_vm9, %v18585_v46, 0.0 }
 0x6b2   : > { %vm8258_vm1 = vcmp.ge.f32.partialorder %v8132_v11, 0.0  ;;  %v8290_v44 = vmul.f32 %v8132_v11, %v18559_v10  ;;  %v8147_v34 = vadd.f32 %v16834_v15, %v11792_v39  ;;  %v8323_v28 = vsel %vm8259_vm15, %v8137_v8, %v8291_v32  ;;  %v11905_v32 = vld [vmem:[%s12919_s16 + $0x88] sm:$0xff] }
 0x6b3   : > { %v8141_v37 = vpop.f32.mrf.mxu1  ;;  %8774 = vrot.lane.b32.xlu0 %v8448_v48, %s11940_s24  ;;  %v8451_v2 = vadd.f32 %v8419_v22, %v8323_v28  ;;  %vm8395_vm6 = vcmp.eq.s32.totalorder %v11905_v32, %v8363_v21  ;;  %v16945_v22 = vpop.permute.xlu1 %8640 }
 0x6b4   : > { %vm8261_vm3 = vcmp.ge.f32.partialorder %v8147_v34, 0.0  ;;  %v8293_v20 = vmul.f32 %v8147_v34, %v18559_v10  ;;  %v8142_v38 = vadd.f32 %v16834_v15, %v8141_v37  ;;  %v8322_v62 = vsel %vm8258_vm1, %v8132_v11, %v8290_v44  ;;  %v18586_v11 = vld [vmem:[#allocation50_spill] sm:$0xff]  ;;  %v16950_v28 = vpop.permute.xlu0 %8638 }
 0x6b5   : > { %8780 = vrot.lane.b32.xlu1 %v8451_v2, %s11940_s24  ;;  %v11795_v0 = vpop.f32.mrf.mxu1  ;;  %v8450_v26 = vadd.f32 %v8418_v33, %v8322_v62  ;;  %v8365_v13 = vadd.s32 33, %v18586_v11  ;;  %v18587_v2 = vld [vmem:[#allocation165_spill] sm:$0xff] }
 0x6b6   : > { %vm8260_vm5 = vcmp.ge.f32.partialorder %v8142_v38, 0.0  ;;  %v8292_v6 = vmul.f32 %v8142_v38, %v18559_v10  ;;  %v8157_v43 = vadd.f32 %v16834_v15, %v11795_v0  ;;  %v8325_v59 = vsel %vm8261_vm3, %v8147_v34, %v8293_v20  ;;  %v18588_v33 = vld [vmem:[#allocation33_spill] sm:$0xff]  ;;  %v11906_v20 = vld [vmem:[%s12919_s16 + $0x98] sm:$0xff] }
 0x6b7   : > { %v8151_v17 = vpop.f32.mrf.mxu1  ;;  %8778 = vrot.lane.b32.xlu0 %v8450_v26, %s11940_s24  ;;  %v8453_v41 = vadd.f32 %v8421_v5, %v8325_v59  ;;  %v8427_v51 = vsel %vm8395_vm6, %v18588_v33, 0.0  ;;  %vm8397_vm15 = vcmp.eq.s32.totalorder %v11906_v20, %v8365_v13 }
 0x6b8   : > { %vm8263_vm7 = vcmp.ge.f32.partialorder %v8157_v43, 0.0  ;;  %v8295_v12 = vmul.f32 %v8157_v43, %v18559_v10  ;;  %v8152_v9 = vadd.f32 %v16834_v15, %v8151_v17  ;;  %v8324_v1 = vsel %vm8260_vm5, %v8142_v38, %v8292_v6  ;;  %v18589_v38 = vld [vmem:[#allocation71_spill] sm:$0xff]  ;;  %v18590_v17 = vld [vmem:[#allocation166_spill] sm:$0xff] }
 0x6b9   : > { %8784 = vrot.lane.b32.xlu1 %v8453_v41, %s11940_s24  ;;  %v11798_v3 = vpop.f32.mrf.mxu1  ;;  %v8452_v42 = vadd.f32 %v8420_v57, %v8324_v1  ;;  %v8367_v62 = vadd.s32 33, %v18589_v38  ;;  %v8429_v57 = vsel %vm8397_vm15, %v18591_v53, 0.0 }
 0x6ba   : > { %vm8262_vm10 = vcmp.ge.f32.partialorder %v8152_v9, 0.0  ;;  %v8294_v23 = vmul.f32 %v8152_v9, %v18559_v10  ;;  %v8167_v54 = vadd.f32 %v16834_v15, %v11798_v3  ;;  %v8327_v60 = vsel %vm8263_vm7, %v8157_v43, %v8295_v12  ;;  %v16963_v43 = vpop.permute.xlu1 %8644  ;;  %v11907_v12 = vld [vmem:[%s12919_s16 + $0xa8] sm:$0xff] }
 0x6bb   : > { %v8161_v45 = vpop.f32.mrf.mxu1  ;;  %8782 = vrot.lane.b32.xlu0 %v8452_v42, %s11940_s24  ;;  %v8455_v8 = vadd.f32 %v8423_v31, %v8327_v60  ;;  %vm8399_vm11 = vcmp.eq.s32.totalorder %v11907_v12, %v8367_v62  ;;  %v16973_v31 = vpop.permute.xlu0 %8642 }
 0x6bc   : > { %vm8265_vm12 = vcmp.ge.f32.partialorder %v8167_v54, 0.0  ;;  %v8297_v56 = vmul.f32 %v8167_v54, %v18559_v10  ;;  %v8162_v18 = vadd.f32 %v16834_v15, %v8161_v45  ;;  %v8326_v50 = vsel %vm8262_vm10, %v8152_v9, %v8294_v23  ;;  %v18592_v9 = vld [vmem:[#allocation196_spill] sm:$0xff]  ;;  %v18593_v45 = vld [vmem:[#allocation167_spill] sm:$0xff] }
 0x6bd   : > { %8788 = vrot.lane.b32.xlu1 %v8455_v8, %s11940_s24  ;;  %v11801_v24 = vpop.f32.mrf.mxu1  ;;  %v8454_v16 = vadd.f32 %v18584_v63, %v8326_v50  ;;  %v8369_v1 = vadd.s32 33, %v18592_v9  ;;  %v11908_v50 = vld [vmem:[%s12919_s16 + $0xb8] sm:$0xff]  ;;  %v18599_v9 = vld [vmem:[#allocation171_spill] sm:$0xff] }
 0x6be   : > { %vm8264_vm8 = vcmp.ge.f32.partialorder %v8162_v18, 0.0  ;;  %v8296_v39 = vmul.f32 %v8162_v18, %v18559_v10  ;;  %v8177_v48 = vadd.f32 %v16834_v15, %v11801_v24  ;;  %v8329_v30 = vsel %vm8265_vm12, %v8167_v54, %v8297_v56  ;;  %v18594_v56 = vld [vmem:[#allocation41_spill] sm:$0xff]  ;;  %v16985_v46 = vpop.permute.xlu1 %8648 }
 0x6bf   : > { %v8171_v19 = vpop.f32.mrf.mxu1  ;;  %8786 = vrot.lane.b32.xlu0 %v8454_v16, %s11940_s24  ;;  %v8457_v55 = vadd.f32 %v8425_v61, %v8329_v30  ;;  %vm8401_vm5 = vcmp.eq.s32.totalorder %v11908_v50, %v8369_v1 }
 0x6c0   : > { %vm8267_vm14 = vcmp.ge.f32.partialorder %v8177_v48, 0.0  ;;  %v8299_v58 = vmul.f32 %v8177_v48, %v18559_v10  ;;  %v8172_v44 = vadd.f32 %v16834_v15, %v8171_v19  ;;  %v8328_v34 = vsel %vm8264_vm8, %v8162_v18, %v8296_v39  ;;  %v18595_v19 = vld [vmem:[#allocation168_spill] sm:$0xff] }
 0x6c1   : > { %8792 = vrot.lane.b32.xlu1 %v8457_v55, %s11940_s24  ;;  %v11804_v37 = vpop.f32.mrf.mxu1  ;;  %v8456_v14 = vadd.f32 %v18587_v2, %v8328_v34  ;;  %v8431_v18 = vsel %vm8399_vm11, %v18594_v56, 0.0 }
 0x6c2   : > { %vm8266_vm0 = vcmp.ge.f32.partialorder %v8172_v44, 0.0  ;;  %v8298_v0 = vmul.f32 %v8172_v44, %v18559_v10  ;;  %v8187_v26 = vadd.f32 %v16834_v15, %v11804_v37  ;;  %v8331_v36 = vsel %vm8267_vm14, %v8177_v48, %v8299_v58  ;;  %v16990_v48 = vpop.permute.xlu0 %8646  ;;  %v18596_v58 = vld [vmem:[#allocation85_spill] sm:$0xff]  ;;  %v17001_v62 = vpop.permute.xlu1 %8652 }
 0x6c3   : > { %v8181_v5 = vpop.f32.mrf.mxu1  ;;  %8790 = vrot.lane.b32.xlu0 %v8456_v14, %s11940_s24  ;;  %v8459_v47 = vadd.f32 %v8427_v51, %v8331_v36 }
 0x6c4   : > { %vm8269_vm1 = vcmp.ge.f32.partialorder %v8187_v26, 0.0  ;;  %v8301_v52 = vmul.f32 %v8187_v26, %v18559_v10  ;;  %v8182_v25 = vadd.f32 %v16834_v15, %v8181_v5  ;;  %v8330_v6 = vsel %vm8266_vm0, %v8172_v44, %v8298_v0 }
 0x6c5   : > { %8796 = vrot.lane.b32.xlu1 %v8459_v47, %s11940_s24  ;;  %v11807_v59 = vpop.f32.mrf.mxu1  ;;  %v8458_v41 = vadd.f32 %v18590_v17, %v8330_v6  ;;  %v8433_v44 = vsel %vm8401_vm5, %v18596_v58, 0.0 }
 0x6c6   : > { %vm8268_vm3 = vcmp.ge.f32.partialorder %v8182_v25, 0.0  ;;  %v8300_v3 = vmul.f32 %v8182_v25, %v18559_v10  ;;  %v8197_v42 = vadd.f32 %v16834_v15, %v11807_v59  ;;  %v8333_v27 = vsel %vm8269_vm1, %v8187_v26, %v8301_v52  ;;  %v18597_v26 = vld [vmem:[#allocation169_spill] sm:$0xff]  ;;  %v18598_v59 = vld [vmem:[#allocation170_spill] sm:$0xff] }
 0x6c7   : > { %v8191_v29 = vpop.f32.mrf.mxu1  ;;  %8794 = vrot.lane.b32.xlu0 %v8458_v41, %s11940_s24  ;;  %v8461_v4 = vadd.f32 %v8429_v57, %v8333_v27 }
 0x6c8   : > { %vm8271_vm4 = vcmp.ge.f32.partialorder %v8197_v42, 0.0  ;;  %v8303_v21 = vmul.f32 %v8197_v42, %v18559_v10  ;;  %v8192_v23 = vadd.f32 %v16834_v15, %v8191_v29  ;;  %v8332_v54 = vsel %vm8268_vm3, %v8182_v25, %v8300_v3  ;;  %v17007_v25 = vpop.permute.xlu0 %8650  ;;  %v17017_v29 = vpop.permute.xlu1 %8656 }
 0x6c9   : > { %8800 = vrot.lane.b32.xlu1 %v8461_v4, %s11940_s24  ;;  %v11810_v60 = vpop.f32.mrf.mxu1  ;;  %v8460_v8 = vadd.f32 %v18593_v45, %v8332_v54  ;;  %vm8890_vm3 = vcmask 130048  }
 0x6ca   : > { %vm8270_vm7 = vcmp.ge.f32.partialorder %v8192_v23, 0.0  ;;  %v8302_v24 = vmul.f32 %v8192_v23, %v18559_v10  ;;  %v8207_v63 = vadd.f32 %v16834_v15, %v11810_v60  ;;  %v8335_v16 = vsel %vm8271_vm4, %v8197_v42, %v8303_v21  ;;  %v18600_v21 = vld [vmem:[#allocation172_spill] sm:$0xff] }
 0x6cb   : > { %v8201_v61 = vpop.f32.mrf.mxu1  ;;  %8798 = vrot.lane.b32.xlu0 %v8460_v8, %s11940_s24  ;;  %v8463_v32 = vadd.f32 %v8431_v18, %v8335_v16  ;;  %v18601_v18 = vld [vmem:[#allocation173_spill] sm:$0xff]  ;;  %vm8923_vm4 = vcmask 195584  }
 0x6cc   : > { %vm8273_vm9 = vcmp.ge.f32.partialorder %v8207_v63, 0.0  ;;  %v8305_v11 = vmul.f32 %v8207_v63, %v18559_v10  ;;  %v8202_v13 = vadd.f32 %v16834_v15, %v8201_v61  ;;  %v8334_v39 = vsel %vm8270_vm7, %v8192_v23, %v8302_v24  ;;  %v17023_v8 = vpop.permute.xlu0 %8654 }
 0x6cd   : > { %8804 = vrot.lane.b32.xlu1 %v8463_v32, %s11940_s24  ;;  %v11813_v30 = vpop.f32.mrf.mxu1  ;;  %v8462_v55 = vadd.f32 %v18595_v19, %v8334_v39  ;;  %v18602_v32 = vld [vmem:[#allocation174_spill] sm:$0xff]  ;;  %v17033_v19 = vpop.permute.xlu1 %8660 }
 0x6ce   : > { %vm8272_vm10 = vcmp.ge.f32.partialorder %v8202_v13, 0.0  ;;  %v8304_v34 = vmul.f32 %v8202_v13, %v18559_v10  ;;  %v8217_v37 = vadd.f32 %v16834_v15, %v11813_v30  ;;  %v8337_v2 = vsel %vm8273_vm9, %v8207_v63, %v8305_v11 }
 0x6cf   : > { %v8211_v14 = vpop.f32.mrf.mxu1  ;;  %8802 = vrot.lane.b32.xlu0 %v8462_v55, %s11940_s24  ;;  %v8465_v33 = vadd.f32 %v8433_v44, %v8337_v2  ;;  %v18603_v55 = vld [vmem:[#allocation175_spill] sm:$0xff]  ;;  %v18604_v2 = vld [vmem:[#allocation176_spill] sm:$0xff] }
 0x6d0   : > { %vm8275_vm12 = vcmp.ge.f32.partialorder %v8217_v37, 0.0  ;;  %v8307_v51 = vmul.f32 %v8217_v37, %v18559_v10  ;;  %v8212_v20 = vadd.f32 %v16834_v15, %v8211_v14  ;;  %v8336_v38 = vsel %vm8272_vm10, %v8202_v13, %v8304_v34 }
 0x6d1   : > { %8808 = vrot.lane.b32.xlu1 %v8465_v33, %s11940_s24  ;;  %v11816_v0 = vpop.f32.mrf.mxu1  ;;  %v8464_v36 = vadd.f32 %v18597_v26, %v8336_v38 }
 0x6d2   : > { %vm8274_vm6 = vcmp.ge.f32.partialorder %v8212_v20, 0.0  ;;  %v8306_v5 = vmul.f32 %v8212_v20, %v18559_v10  ;;  %v8227_v47 = vadd.f32 %v16834_v15, %v11816_v0  ;;  %v8339_v52 = vsel %vm8275_vm12, %v8217_v37, %v8307_v51  ;;  %v17038_v37 = vpop.permute.xlu0 %8658 }
 0x6d3   : > { %v8221_v6 = vpop.f32.mrf.mxu1  ;;  %8806 = vrot.lane.b32.xlu0 %v8464_v36, %s11940_s24  ;;  %v8467_v17 = vadd.f32 %v18598_v59, %v8339_v52 }
 0x6d4   : > { %vm8277_vm8 = vcmp.ge.f32.partialorder %v8227_v47, 0.0  ;;  %v8309_v41 = vmul.f32 %v8227_v47, %v18559_v10  ;;  %v8222_v53 = vadd.f32 %v16834_v15, %v8221_v6  ;;  %v8338_v57 = vsel %vm8274_vm6, %v8212_v20, %v8306_v5  ;;  %v17044_v20 = vpop.permute.xlu1 %8664 }
 0x6d5   : > { %8812 = vrot.lane.b32.xlu1 %v8467_v17, %s11940_s24  ;;  %v11819_v12 = vpop.f32.mrf.mxu1  ;;  %v8466_v1 = vadd.f32 %v18599_v9, %v8338_v57 }
 0x6d6   : > { %vm8276_vm14 = vcmp.ge.f32.partialorder %v8222_v53, 0.0  ;;  %v8308_v3 = vmul.f32 %v8222_v53, %v18559_v10  ;;  %v8237_v42 = vadd.f32 %v16834_v15, %v11819_v12  ;;  %v8341_v27 = vsel %vm8277_vm8, %v8227_v47, %v8309_v41  ;;  %v17047_v38 = vpop.permute.xlu0 %8662 }
 0x6d7   : > { %v8231_v4 = vpop.f32.mrf.mxu1  ;;  %8810 = vrot.lane.b32.xlu0 %v8466_v1, %s11940_s24  ;;  %v8469_v23 = vadd.f32 %v18600_v21, %v8341_v27  ;;  %v18607_v21 = vld [vmem:[#allocation89_spill] sm:$0xff] }
 0x6d8   : > { %vm8279_vm15 = vcmp.ge.f32.partialorder %v8237_v42, 0.0  ;;  %v8311_v54 = vmul.f32 %v8237_v42, %v18559_v10  ;;  %v8232_v60 = vadd.f32 %v16834_v15, %v8231_v4  ;;  %v8340_v45 = vsel %vm8276_vm14, %v8222_v53, %v8308_v3  ;;  %v17049_v0 = vpop.permute.xlu1 %8668  ;;  %v18606_v3 = vld [vmem:[#allocation87_spill] sm:$0xff] }
 0x6d9   : > { %8816 = vrot.lane.b32.xlu1 %v8469_v23, %s11940_s24  ;;  %v11822_v56 = vpop.f32.mrf.mxu1  ;;  %v8468_v50 = vadd.f32 %v18601_v18, %v8340_v45  ;;  %v8891_v23 = vsel %vm8890_vm3, %v18607_v21, %v16932_v7  ;;  %v18608_v45 = vld [vmem:[#allocation86_spill] sm:$0xff] }
 0x6da   : > { %vm8278_vm0 = vcmp.ge.f32.partialorder %v8232_v60, 0.0  ;;  %v8310_v24 = vmul.f32 %v8232_v60, %v18559_v10  ;;  %v8247_v63 = vadd.f32 %v16834_v15, %v11822_v56  ;;  %v8343_v16 = vsel %vm8279_vm15, %v8237_v42, %v8311_v54 }
 0x6db   : > { %v8241_v61 = vpop.f32.mrf.mxu1  ;;  %8814 = vrot.lane.b32.xlu0 %v8468_v50, %s11940_s24  ;;  %v8471_v11 = vadd.f32 %v18602_v32, %v8343_v16  ;;  %v8892_v42 = vsel %vm8890_vm3, %v18606_v3, %v16923_v49  ;;  %v8894_v56 = vsel %vm8890_vm3, %v18608_v45, %v16945_v22  ;;  %v18609_v50 = vld [vmem:[#allocation93_spill] sm:$0xff]  ;;  %v18618_v45 = vld [vmem:[#allocation111_spill] sm:$0xff] }
 0x6dc   : > { %vm8281_vm1 = vcmp.ge.f32.partialorder %v8247_v63, 0.0  ;;  %v8313_v13 = vmul.f32 %v8247_v63, %v18559_v10  ;;  %v8242_v39 = vadd.f32 %v16834_v15, %v8241_v61  ;;  %v8342_v30 = vsel %vm8278_vm0, %v8232_v60, %v8310_v24  ;;  %v18605_v15 = vld [vmem:[#allocation177_spill] sm:$0xff]  ;;  %v17053_v26 = vpop.permute.xlu1 %8672 }
 0x6dd   : > { %8820 = vrot.lane.b32.xlu1 %v8471_v11, %s11940_s24  ;;  %v8470_v58 = vadd.f32 %v18603_v55, %v8342_v30  ;;  %v8893_v7 = vsel %vm8890_vm3, %v18609_v50, %v16950_v28  ;;  %v18610_v16 = vld [vmem:[#allocation25_spill] sm:$0xff]  ;;  %v18611_v11 = vld [vmem:[#allocation63_spill] sm:$0xff]  ;;  %v18612_v30 = vld [vmem:[#allocation82_spill] sm:$0xff] }
 0x6de   : > { %vm8280_vm11 = vcmp.ge.f32.partialorder %v8242_v39, 0.0  ;;  %v8312_v44 = vmul.f32 %v8242_v39, %v18559_v10  ;;  %v8345_v34 = vsel %vm8281_vm1, %v8247_v63, %v8313_v13  ;;  %v17051_v10 = vpop.permute.xlu0 %8666  ;;  %v8896_v22 = vsel %vm8890_vm3, %v18610_v16, %v16963_v43 }
 0x6df   : > { %8818 = vrot.lane.b32.xlu0 %v8470_v58, %s11940_s24  ;;  %v8473_v14 = vadd.f32 %v18604_v2, %v8345_v34  ;;  %v8895_v28 = vsel %vm8890_vm3, %v18611_v11, %v16973_v31  ;;  %v8898_v43 = vsel %vm8890_vm3, %v18612_v30, %v16985_v46  ;;  %v18622_v11 = vld [vmem:[#allocation99_spill] sm:$0xff] }
 0x6e0   : > { %v8344_v33 = vsel %vm8280_vm11, %v8242_v39, %v8312_v44  ;;  %v17057_v5 = vpop.permute.xlu1 %8676  ;;  %v18613_v44 = vld [vmem:[#allocation38_spill] sm:$0xff] }
 0x6e1   : > { %8824 = vrot.lane.b32.xlu1 %v8473_v14, %s11940_s24  ;;  %v8472_v51 = vadd.f32 %v18605_v15, %v8344_v33  ;;  %v8897_v31 = vsel %vm8890_vm3, %v18613_v44, %v16990_v48  ;;  %v18614_v14 = vld [vmem:[#allocation94_spill] sm:$0xff] }
 0x6e2   : > { %v17055_v36 = vpop.permute.xlu0 %8670  ;;  %v8900_v46 = vsel %vm8890_vm3, %v18614_v14, %v17001_v62  ;;  %v18626_v14 = vld [vmem:[#allocation182_spill] sm:$0xff] }
 0x6e3   : > { %8822 = vrot.lane.b32.xlu0 %v8472_v51, %s11940_s24  ;;  %v18615_v51 = vld [vmem:[#allocation102_spill] sm:$0xff] }
 0x6e4   : > { %v17061_v52 = vpop.permute.xlu1 %8680  ;;  %v8899_v48 = vsel %vm8890_vm3, %v18615_v51, %v17007_v25 }
 0x6e6   : > { %v17059_v47 = vpop.permute.xlu0 %8674 }
 0x6e8   : > { %v17065_v59 = vpop.permute.xlu1 %8684 }
 0x6ea   : > { %v17063_v6 = vpop.permute.xlu0 %8678 }
 0x6ec   : > { %v17069_v41 = vpop.permute.xlu1 %8688 }
 0x6ee   : > { %v17067_v17 = vpop.permute.xlu0 %8682 }
 0x6f0   : > { %v17073_v57 = vpop.permute.xlu1 %8692 }
 0x6f2   : > { %v17071_v53 = vpop.permute.xlu0 %8686 }
 0x6f4   : > { %v17077_v9 = vpop.permute.xlu1 %8696 }
 0x6f6   : > { %v17075_v12 = vpop.permute.xlu0 %8690 }
 0x6fa   : > { %v17079_v1 = vpop.permute.xlu0 %8694 }
 0x717   : > { %v8765_v27 = vpop.permute.xlu1 %8764 }
 0x718   : > { %v8925_v4 = vsel %vm8923_vm4, %v8892_v42, %v8765_v27  ;;  %v18616_v27 = vld [vmem:[#allocation114_spill] sm:$0xff] }
 0x719   : > { %8957 = vst.msk [vmem:[%s17085_s26 + $0x8] sm:$0xff] %vm1340_vm2, %v8925_v4  ;;  %v8763_v54 = vpop.permute.xlu0 %8762  ;;  %v8902_v62 = vsel %vm8890_vm3, %v18616_v27, %v17017_v29  ;;  %v8904_v29 = vsel %vm8890_vm3, %v18618_v45, %v17033_v19 }
 0x71a   : > { %v8924_v60 = vsel %vm8923_vm4, %v8891_v23, %v8763_v54  ;;  %v18617_v23 = vld [vmem:[#allocation91_spill] sm:$0xff] }
 0x71b   : > { %8956 = vst.msk [vmem:[%s17085_s26] sm:$0xff] %vm1340_vm2, %v8924_v60  ;;  %v8769_v49 = vpop.permute.xlu1 %8768  ;;  %v8901_v25 = vsel %vm8890_vm3, %v18617_v23, %v17023_v8  ;;  %v18630_v23 = vld [vmem:[#allocation185_spill] sm:$0xff] }
 0x71c   : > { %v8927_v18 = vsel %vm8923_vm4, %v8894_v56, %v8769_v49 }
 0x71d   : > { %8959 = vst.msk [vmem:[%s17085_s26 + $0x18] sm:$0xff] %vm1340_vm2, %v8927_v18  ;;  %v8767_v24 = vpop.permute.xlu0 %8766  ;;  %v18619_v18 = vld [vmem:[#allocation98_spill] sm:$0xff] }
 0x71e   : > { %v8926_v63 = vsel %vm8923_vm4, %v8893_v7, %v8767_v24  ;;  %v8903_v8 = vsel %vm8890_vm3, %v18619_v18, %v17038_v37  ;;  %v18620_v24 = vld [vmem:[#allocation47_spill] sm:$0xff] }
 0x71f   : > { %8958 = vst.msk [vmem:[%s17085_s26 + $0x10] sm:$0xff] %vm1340_vm2, %v8926_v63  ;;  %v8773_v61 = vpop.permute.xlu1 %8772  ;;  %v8906_v19 = vsel %vm8890_vm3, %v18620_v24, %v17044_v20  ;;  %v8908_v20 = vsel %vm8890_vm3, %v18622_v11, %v17049_v0  ;;  %v18634_v24 = vld [vmem:[#allocation192_spill] sm:$0xff] }
 0x720   : > { %v8929_v32 = vsel %vm8923_vm4, %v8896_v22, %v8773_v61  ;;  %v18621_v22 = vld [vmem:[#allocation40_spill] sm:$0xff] }
 0x721   : > { %8961 = vst.msk [vmem:[%s17085_s26 + $0x28] sm:$0xff] %vm1340_vm2, %v8929_v32  ;;  %v8771_v13 = vpop.permute.xlu0 %8770  ;;  %v8905_v37 = vsel %vm8890_vm3, %v18621_v22, %v17047_v38 }
 0x722   : > { %v8928_v39 = vsel %vm8923_vm4, %v8895_v28, %v8771_v13 }
 0x723   : > { %8960 = vst.msk [vmem:[%s17085_s26 + $0x20] sm:$0xff] %vm1340_vm2, %v8928_v39  ;;  %v8777_v55 = vpop.permute.xlu1 %8776  ;;  %v18623_v39 = vld [vmem:[#allocation59_spill] sm:$0xff] }
 0x724   : > { %v8931_v58 = vsel %vm8923_vm4, %v8898_v43, %v8777_v55  ;;  %v8907_v38 = vsel %vm8890_vm3, %v18623_v39, %v17051_v10  ;;  %v18624_v55 = vld [vmem:[#allocation179_spill] sm:$0xff] }
 0x725   : > { %8963 = vst.msk [vmem:[%s17085_s26 + $0x38] sm:$0xff] %vm1340_vm2, %v8931_v58  ;;  %v8775_v34 = vpop.permute.xlu0 %8774  ;;  %v8910_v0 = vsel %vm8890_vm3, %v18624_v55, %v17053_v26  ;;  %v8912_v26 = vsel %vm8890_vm3, %v18626_v14, %v17057_v5 }
 0x726   : > { %v8930_v2 = vsel %vm8923_vm4, %v8897_v31, %v8775_v34  ;;  %v18625_v31 = vld [vmem:[#allocation101_spill] sm:$0xff] }
 0x727   : > { %8962 = vst.msk [vmem:[%s17085_s26 + $0x30] sm:$0xff] %vm1340_vm2, %v8930_v2  ;;  %v8781_v33 = vpop.permute.xlu1 %8780  ;;  %v8909_v10 = vsel %vm8890_vm3, %v18625_v31, %v17055_v36 }
 0x728   : > { %v8933_v15 = vsel %vm8923_vm4, %v8900_v46, %v8781_v33 }
 0x729   : > { %8965 = vst.msk [vmem:[%s17085_s26 + $0x48] sm:$0xff] %vm1340_vm2, %v8933_v15  ;;  %v8779_v3 = vpop.permute.xlu0 %8778  ;;  %v18627_v15 = vld [vmem:[#allocation180_spill] sm:$0xff] }
 0x72a   : > { %v8932_v42 = vsel %vm8923_vm4, %v8899_v48, %v8779_v3  ;;  %v8911_v36 = vsel %vm8890_vm3, %v18627_v15, %v17059_v47  ;;  %v18628_v3 = vld [vmem:[#allocation107_spill] sm:$0xff] }
 0x72b   : > { %8964 = vst.msk [vmem:[%s17085_s26 + $0x40] sm:$0xff] %vm1340_vm2, %v8932_v42  ;;  %v8785_v4 = vpop.permute.xlu1 %8784  ;;  %v8914_v5 = vsel %vm8890_vm3, %v18628_v3, %v17061_v52  ;;  %v8916_v52 = vsel %vm8890_vm3, %v18630_v23, %v17065_v59 }
 0x72c   : > { %v8935_v21 = vsel %vm8923_vm4, %v8902_v62, %v8785_v4  ;;  %v18629_v62 = vld [vmem:[#allocation106_spill] sm:$0xff] }
 0x72d   : > { %8967 = vst.msk [vmem:[%s17085_s26 + $0x58] sm:$0xff] %vm1340_vm2, %v8935_v21  ;;  %v8783_v54 = vpop.permute.xlu0 %8782  ;;  %v8913_v47 = vsel %vm8890_vm3, %v18629_v62, %v17063_v6 }
 0x72e   : > { %v8934_v60 = vsel %vm8923_vm4, %v8901_v25, %v8783_v54 }
 0x72f   : > { %8966 = vst.msk [vmem:[%s17085_s26 + $0x50] sm:$0xff] %vm1340_vm2, %v8934_v60  ;;  %v8789_v56 = vpop.permute.xlu1 %8788  ;;  %v18631_v60 = vld [vmem:[#allocation183_spill] sm:$0xff] }
 0x730   : > { %v8937_v49 = vsel %vm8923_vm4, %v8904_v29, %v8789_v56  ;;  %v8915_v6 = vsel %vm8890_vm3, %v18631_v60, %v17067_v17  ;;  %v18632_v56 = vld [vmem:[#allocation190_spill] sm:$0xff] }
 0x731   : > { %8969 = vst.msk [vmem:[%s17085_s26 + $0x68] sm:$0xff] %vm1340_vm2, %v8937_v49  ;;  %v8787_v50 = vpop.permute.xlu0 %8786  ;;  %v8918_v59 = vsel %vm8890_vm3, %v18632_v56, %v17069_v41  ;;  %v8920_v41 = vsel %vm8890_vm3, %v18634_v24, %v17073_v57 }
 0x732   : > { %v8936_v7 = vsel %vm8923_vm4, %v8903_v8, %v8787_v50  ;;  %v18633_v8 = vld [vmem:[#allocation188_spill] sm:$0xff] }
 0x733   : > { %8968 = vst.msk [vmem:[%s17085_s26 + $0x60] sm:$0xff] %vm1340_vm2, %v8936_v7  ;;  %v8793_v63 = vpop.permute.xlu1 %8792  ;;  %v8917_v17 = vsel %vm8890_vm3, %v18633_v8, %v17071_v53 }
 0x734   : > { %v8939_v16 = vsel %vm8923_vm4, %v8906_v19, %v8793_v63 }
 0x735   : > { %8971 = vst.msk [vmem:[%s17085_s26 + $0x78] sm:$0xff] %vm1340_vm2, %v8939_v16  ;;  %v8791_v61 = vpop.permute.xlu0 %8790  ;;  %v18635_v16 = vld [vmem:[#allocation108_spill] sm:$0xff] }
 0x736   : > { %v8938_v32 = vsel %vm8923_vm4, %v8905_v37, %v8791_v61  ;;  %v8919_v53 = vsel %vm8890_vm3, %v18635_v16, %v17075_v12  ;;  %v18636_v37 = vld [vmem:[#allocation131_spill] sm:$0xff] }
 0x737   : > { %8970 = vst.msk [vmem:[%s17085_s26 + $0x70] sm:$0xff] %vm1340_vm2, %v8938_v32  ;;  %v8797_v28 = vpop.permute.xlu1 %8796  ;;  %v8889_v61 = vsel %vm2743_vm13, %v18636_v37, %v16907_v40 }
 0x738   : > { %v8941_v13 = vsel %vm8923_vm4, %v8908_v20, %v8797_v28  ;;  %v8922_v57 = vsel %vm8890_vm3, %v8889_v61, %v17077_v9  ;;  %v18637_v20 = vld [vmem:[#allocation148_spill] sm:$0xff] }
 0x739   : > { %8973 = vst.msk [vmem:[%s17085_s26 + $0x88] sm:$0xff] %vm1340_vm2, %v8941_v13  ;;  %v8795_v30 = vpop.permute.xlu0 %8794  ;;  %v8888_v28 = vsel %vm2743_vm13, %v18637_v20, %v16916_v35 }
 0x73a   : > { %v8940_v43 = vsel %vm8923_vm4, %v8907_v38, %v8795_v30  ;;  %v8921_v13 = vsel %vm8890_vm3, %v8888_v28, %v17079_v1 }
 0x73b   : > { %8972 = vst.msk [vmem:[%s17085_s26 + $0x80] sm:$0xff] %vm1340_vm2, %v8940_v43  ;;  %v8801_v58 = vpop.permute.xlu1 %8800 }
 0x73c   : > { %v8943_v44 = vsel %vm8923_vm4, %v8910_v0, %v8801_v58 }
 0x73d   : > { %8975 = vst.msk [vmem:[%s17085_s26 + $0x98] sm:$0xff] %vm1340_vm2, %v8943_v44  ;;  %v8799_v34 = vpop.permute.xlu0 %8798 }
 0x73e   : > { %v8942_v2 = vsel %vm8923_vm4, %v8909_v10, %v8799_v34 }
 0x73f   : > { %8974 = vst.msk [vmem:[%s17085_s26 + $0x90] sm:$0xff] %vm1340_vm2, %v8942_v2  ;;  %v8805_v46 = vpop.permute.xlu1 %8804 }
 0x740   : > { %v8945_v33 = vsel %vm8923_vm4, %v8912_v26, %v8805_v46 }
 0x741   : > { %8977 = vst.msk [vmem:[%s17085_s26 + $0xa8] sm:$0xff] %vm1340_vm2, %v8945_v33  ;;  %v8803_v51 = vpop.permute.xlu0 %8802 }
 0x742   : > { %v8944_v48 = vsel %vm8923_vm4, %v8911_v36, %v8803_v51 }
 0x743   : > { %8976 = vst.msk [vmem:[%s17085_s26 + $0xa0] sm:$0xff] %vm1340_vm2, %v8944_v48  ;;  %v8809_v42 = vpop.permute.xlu1 %8808 }
 0x744   : > { %v8947_v27 = vsel %vm8923_vm4, %v8914_v5, %v8809_v42 }
 0x745   : > { %8979 = vst.msk [vmem:[%s17085_s26 + $0xb8] sm:$0xff] %vm1340_vm2, %v8947_v27  ;;  %v8807_v4 = vpop.permute.xlu0 %8806 }
 0x746   : > { %v8946_v21 = vsel %vm8923_vm4, %v8913_v47, %v8807_v4 }
 0x747   : > { %8978 = vst.msk [vmem:[%s17085_s26 + $0xb0] sm:$0xff] %vm1340_vm2, %v8946_v21  ;;  %v8813_v25 = vpop.permute.xlu1 %8812 }
 0x748   : > { %v8949_v54 = vsel %vm8923_vm4, %v8916_v52, %v8813_v25 }
 0x749   : > { %8981 = vst.msk [vmem:[%s17085_s26 + $0xc8] sm:$0xff] %vm1340_vm2, %v8949_v54  ;;  %v8811_v45 = vpop.permute.xlu0 %8810 }
 0x74a   : > { %v8948_v29 = vsel %vm8923_vm4, %v8915_v6, %v8811_v45 }
 0x74b   : > { %8980 = vst.msk [vmem:[%s17085_s26 + $0xc0] sm:$0xff] %vm1340_vm2, %v8948_v29  ;;  %v8817_v49 = vpop.permute.xlu1 %8816 }
 0x74c   : > { %v8951_v18 = vsel %vm8923_vm4, %v8918_v59, %v8817_v49 }
 0x74d   : > { %8983 = vst.msk [vmem:[%s17085_s26 + $0xd8] sm:$0xff] %vm1340_vm2, %v8951_v18  ;;  %v8815_v50 = vpop.permute.xlu0 %8814 }
 0x74e   : > { %v8950_v7 = vsel %vm8923_vm4, %v8917_v17, %v8815_v50 }
 0x74f   : > { %8982 = vst.msk [vmem:[%s17085_s26 + $0xd0] sm:$0xff] %vm1340_vm2, %v8950_v7  ;;  %v8821_v19 = vpop.permute.xlu1 %8820 }
 0x750   : > { %v8953_v63 = vsel %vm8923_vm4, %v8920_v41, %v8821_v19 }
 0x751   : > { %8985 = vst.msk [vmem:[%s17085_s26 + $0xe8] sm:$0xff] %vm1340_vm2, %v8953_v63  ;;  %v8819_v22 = vpop.permute.xlu0 %8818 }
 0x752   : > { %v8952_v32 = vsel %vm8923_vm4, %v8919_v53, %v8819_v22 }
 0x753   : > { %8984 = vst.msk [vmem:[%s17085_s26 + $0xe0] sm:$0xff] %vm1340_vm2, %v8952_v32  ;;  %v8825_v11 = vpop.permute.xlu1 %8824 }
 0x754   : > { %v8955_v12 = vsel %vm8923_vm4, %v8922_v57, %v8825_v11 }
 0x755   : > { %8987 = vst.msk [vmem:[%s17085_s26 + $0xf8] sm:$0xff] %vm1340_vm2, %v8955_v12  ;;  %v8823_v40 = vpop.permute.xlu0 %8822 }
 0x756   : > { %v8954_v39 = vsel %vm8923_vm4, %v8921_v13, %v8823_v40 }
 0x757   : > { %8986 = vst.msk [vmem:[%s17085_s26 + $0xf0] sm:$0xff] %vm1340_vm2, %v8954_v39 }
 0x758 PF: > { %s22_s17 = sadd.s32 1, %s11934_s17  }
 0x759   : > { %p19_p1 = scmp.ge.s32.totalorder %s22_s17, 4  }
 0x75b   :  { %21 = sbr.rel (!%p19_p1) target bundleno = 1 (0x1), region = 117 }
 0x760   :  { %9009 = vsyncpa [#allocation3], 1 }
 0x761   :  { %9011 = vsyncpa [#allocation3 + $0x1], 1 }

</bundles_post_ra>
